<compile_context>
chip_gen: v6e
topology: v6e:2x2x1
jax: 0.10.0
libtpu: 0.0.40
codegen_flags: <defaults>
</compile_context>

<pallas_src>
import math

import jax
import jax.numpy as jnp
from jax import lax
from jax.experimental import pallas as pl
from jax.experimental.pallas import tpu as pltpu  # noqa: F401

jax.config.update("jax_default_matmul_precision", "highest")

# --------------------------- Config ---------------------------
D_MODEL = 32
N_HEADS = 4
D_FFN = 64
N_LAYERS = 2
D_K = D_MODEL // N_HEADS
LN_EPS = 1e-5
NEG_INF = -1.0e9
MAX_LEN = 2000

# Matmul operand dtype. Kept float32 so the strict 1e-2 check against the f32
# reference holds exactly; on v6e/v7x set to jnp.bfloat16 for ~2x MXU throughput
# (accumulation stays f32 via preferred_element_type; LayerNorm / softmax /
# residuals stay f32 regardless, which is also what v5e's VPU/EUP require).
MATMUL_DTYPE = jnp.float32


# --------------------------- Pallas kernel: full decoder stack ---------------------------
def _make_decoder_stack_kernel(n_layers):
    D, F, H, DK = D_MODEL, D_FFN, N_HEADS, D_K

    def mm(a, b):
        return jnp.dot(a.astype(MATMUL_DTYPE), b.astype(MATMUL_DTYPE),
                       preferred_element_type=jnp.float32)

    def kernel(x_ref, enc_ref, q_meta_ref, k_meta_ref, ek_meta_ref,
               w_attn_ref, b_attn_ref, ln_ref, wf1_ref, wf2_ref, bf_ref,
               out_ref):
        x = x_ref[...]          # (B*S, D)   decoder activations, batch folded into rows
        enc = enc_ref[...]      # (B*Se, D)  encoder output, batch folded into rows

        # ---- attention masks built in-kernel from O(S)-sized metadata ----
        q_meta = q_meta_ref[...]            # (B*S, 2): [batch_id, position]
        k_meta = k_meta_ref[...]            # (3, B*S): [batch_id; position; is_pad]
        ek_meta = ek_meta_ref[...]          # (2, B*Se): [batch_id; is_pad]
        qb, qp = q_meta[:, 0:1], q_meta[:, 1:2]                          # (B*S, 1)
        kb, kp, kpad = k_meta[0:1, :], k_meta[1:2, :], k_meta[2:3, :]    # (1, B*S)
        ekb, ekpad = ek_meta[0:1, :], ek_meta[1:2, :]                    # (1, B*Se)
        # True = may attend. Because the batch is folded into rows, cross-batch
        # pairs are masked here too (they receive exactly-zero softmax weight).
        self_ok = (qb == kb) & (kp <= qp) & (kpad < 0.5)                 # (B*S, B*S)
        cross_ok = (qb == ekb) & (ekpad < 0.5)                           # (B*S, B*Se)

        # per-head lane index (head h owns lanes [h*DK, (h+1)*DK))
        lane = lax.broadcasted_iota(jnp.int32, (1, D), 1)

        # ---- packed parameters (stacked over layers) ----
        w_attn = w_attn_ref[...]            # (L, 2, D, 4D)  [Wq|Wk|Wv|Wo]
        b_attn = b_attn_ref[...]            # (L, 2, 1, 4D)  [bq|bk|bv|bo]
        ln_p = ln_ref[...]                  # (L, 6, 1, D)
        wf1 = wf1_ref[...]                  # (L, D, F)
        wf2 = wf2_ref[...]                  # (L, F, D)
        bf = bf_ref[...]                    # (L, 1, F+D)

        def layer_norm(v, g, b):
            mu = jnp.mean(v, axis=-1, keepdims=True)
            c = v - mu
            var = jnp.mean(c * c, axis=-1, keepdims=True)
            return c * lax.rsqrt(var + LN_EPS) * g + b

        scale = 1.0 / math.sqrt(DK)

        def attention(Q, K, V, ok):
            # Head lane-masking trick: (Q*sel_h) @ K^T == Q_h @ K_h^T because the
            # zeroed lanes contribute exactly 0 to the contraction, so every
            # matmul stays full-width (no unaligned 8-lane slices, no relayouts).
            Kt = K.T                                        # (D, rows_k), hoisted out of head loop
            z = jnp.zeros((Q.shape[0], D), jnp.float32)
            for h in range(H):
                sel = (lane >= h * DK) & (lane < (h + 1) * DK)    # (1, D)
                s = mm(jnp.where(sel, Q, 0.0), Kt) * scale        # == Q_h @ K_h^T
                s = jnp.where(ok, s, NEG_INF)
                s = s - jnp.max(s, axis=-1, keepdims=True)
                e = jnp.exp(s)
                a = e * pl.reciprocal(jnp.sum(e, axis=-1, keepdims=True), approx=True)
                z = z + mm(a, jnp.where(sel, V, 0.0))             # A_h @ V_h into head-h lanes
            return z

        # ---- the whole decoder stack in one kernel invocation ----
        for l in range(n_layers):
            g1, be1 = ln_p[l, 0], ln_p[l, 1]
            g2, be2 = ln_p[l, 2], ln_p[l, 3]
            g3, be3 = ln_p[l, 4], ln_p[l, 5]
            w_sa, b_sa = w_attn[l, 0], b_attn[l, 0]
            w_ca, b_ca = w_attn[l, 1], b_attn[l, 1]

            # self-attention: fused QKV projection, single output projection
            xn = layer_norm(x, g1, be1)
            qkv = mm(xn, w_sa[:, :3 * D]) + b_sa[:, :3 * D]                 # (B*S, 3D)
            z = attention(qkv[:, 0:D], qkv[:, D:2 * D], qkv[:, 2 * D:3 * D], self_ok)
            x = x + mm(z, w_sa[:, 3 * D:]) + b_sa[:, 3 * D:]

            # cross-attention: Q from decoder, fused K|V projection of encoder output
            xn = layer_norm(x, g2, be2)
            q = mm(xn, w_ca[:, 0:D]) + b_ca[:, 0:D]
            kv = mm(enc, w_ca[:, D:3 * D]) + b_ca[:, D:3 * D]               # (B*Se, 2D)
            z = attention(q, kv[:, 0:D], kv[:, D:2 * D], cross_ok)
            x = x + mm(z, w_ca[:, 3 * D:]) + b_ca[:, 3 * D:]

            # position-wise FFN
            xn = layer_norm(x, g3, be3)
            hdn = jnp.maximum(mm(xn, wf1[l]) + bf[l][:, :F], 0.0)
            x = x + mm(hdn, wf2[l]) + bf[l][:, F:]

        out_ref[...] = x

    return kernel


# --------------------------- parameter packing & JAX glue ---------------------------
def make_positional_encoding(max_len, d_model):
    pos = jnp.arange(max_len, dtype=jnp.float32)[:, None]
    div = jnp.exp(jnp.arange(0, d_model, 2, dtype=jnp.float32) * (-math.log(10000.0) / d_model))
    pe = jnp.zeros((max_len, d_model), jnp.float32)
    pe = pe.at[:, 0::2].set(jnp.sin(pos * div))
    pe = pe.at[:, 1::2].set(jnp.cos(pos * div))
    return pe


def pack_layer_params(layers):
    """Pack the 26 per-layer tensors into 6 stacked slabs (kernel inputs 30 -> 11)."""
    w_attn, b_attn, ln_p, wf1s, wf2s, bfs = [], [], [], [], [], []
    for p in layers:
        (ln1g, ln1b, ln2g, ln2b, ln3g, ln3b,
         wq1, bq1, wk1, bk1, wv1, bv1, wo1, bo1,
         wq2, bq2, wk2, bk2, wv2, bv2, wo2, bo2,
         wf1, bf1, wf2, bf2) = p
        w_attn.append(jnp.stack([jnp.concatenate([wq1, wk1, wv1, wo1], axis=1),
                                 jnp.concatenate([wq2, wk2, wv2, wo2], axis=1)]))
        b_attn.append(jnp.stack([jnp.concatenate([bq1, bk1, bv1, bo1], axis=1),
                                 jnp.concatenate([bq2, bk2, bv2, bo2], axis=1)]))
        ln_p.append(jnp.stack([ln1g, ln1b, ln2g, ln2b, ln3g, ln3b]))
        wf1s.append(wf1)
        wf2s.append(wf2)
        bfs.append(jnp.concatenate([bf1, bf2], axis=1))
    return (jnp.stack(w_attn),   # (L, 2, D, 4D)
            jnp.stack(b_attn),   # (L, 2, 1, 4D)
            jnp.stack(ln_p),     # (L, 6, 1, D)
            jnp.stack(wf1s),     # (L, D, F)
            jnp.stack(wf2s),     # (L, F, D)
            jnp.stack(bfs))      # (L, 1, F+D)


@jax.jit
def decoder_forward_pallas(dec_in, enc_in, enc_out, params):
    B, S = dec_in.shape
    Se = enc_in.shape[1]
    D = D_MODEL
    n_layers = len(params["layers"])

    # embedding + positional encoding (thin JAX glue; gather has no clean tiny-shape Pallas win)
    x = jnp.take(params["emb"], dec_in, axis=0) * math.sqrt(D)
    pe = make_positional_encoding(MAX_LEN, D)
    x = (x + pe[:S, :]).astype(jnp.float32)

    # fold batch into rows: dense sublane dim, one kernel invocation for everything
    x2 = x.reshape(B * S, D)
    enc2 = enc_out.reshape(B * Se, D).astype(jnp.float32)

    # O(S)-sized mask metadata; the O(S^2) masks themselves are built in-kernel
    d_batch = jnp.repeat(jnp.arange(B, dtype=jnp.float32), S)
    d_pos = jnp.tile(jnp.arange(S, dtype=jnp.float32), B)
    d_pad = (dec_in == 0).astype(jnp.float32).reshape(B * S)
    e_batch = jnp.repeat(jnp.arange(B, dtype=jnp.float32), Se)
    e_pad = (enc_in == 0).astype(jnp.float32).reshape(B * Se)
    q_meta = jnp.stack([d_batch, d_pos], axis=1)          # (B*S, 2)
    k_meta = jnp.stack([d_batch, d_pos, d_pad], axis=0)   # (3, B*S)
    ek_meta = jnp.stack([e_batch, e_pad], axis=0)         # (2, B*Se)

    packed = pack_layer_params(params["layers"])

    kernel = _make_decoder_stack_kernel(n_layers)
    out2 = pl.pallas_call(
        kernel,
        out_shape=jax.ShapeDtypeStruct((B * S, D), jnp.float32),
    )(x2, enc2, q_meta, k_meta, ek_meta, *packed)
    return out2.reshape(B, S, D)


# --------------------------- pure-JAX reference (matches torch semantics) ---------------------------
def padding_mask_j(seq_q, seq_k):
    mask = (seq_k == 0)[:, None, :]
    return jnp.broadcast_to(mask, (seq_k.shape[0], seq_q.shape[1], seq_k.shape[1]))


def future_att_mask_j(seq):
    B, S = seq.shape
    return jnp.broadcast_to(jnp.triu(jnp.ones((S, S), jnp.float32), k=1), (B, S, S))


def build_masks(dec_in, enc_in):
    dec_pad = padding_mask_j(dec_in, dec_in).astype(jnp.float32)
    fut = future_att_mask_j(dec_in)
    self_mask = ((dec_pad + fut) > 0).astype(jnp.float32)
    cross_mask = padding_mask_j(dec_in, enc_in).astype(jnp.float32)
    return self_mask, cross_mask


def decoder_layer_ref(x, enc_out, self_mask, cross_mask, p):
    (ln1g, ln1b, ln2g, ln2b, ln3g, ln3b,
     wq1, bq1, wk1, bk1, wv1, bv1, wo1, bo1,
     wq2, bq2, wk2, bk2, wv2, bv2, wo2, bo2,
     wf1, bf1, wf2, bf2) = p

    def ln(v, g, b):
        mu = v.mean(-1, keepdims=True)
        var = ((v - mu) ** 2).mean(-1, keepdims=True)
        return (v - mu) / jnp.sqrt(var + LN_EPS) * g + b

    def mha(q_in, kv_in, mask, wq, bq, wk, bk, wv, bv, wo, bo):
        B, Sq, _ = q_in.shape
        Sk = kv_in.shape[1]
        Q = (q_in @ wq + bq).reshape(B, Sq, N_HEADS, D_K).transpose(0, 2, 1, 3)
        K = (kv_in @ wk + bk).reshape(B, Sk, N_HEADS, D_K).transpose(0, 2, 1, 3)
        V = (kv_in @ wv + bv).reshape(B, Sk, N_HEADS, D_K).transpose(0, 2, 1, 3)
        s = jnp.einsum("bhqd,bhkd->bhqk", Q, K) / math.sqrt(D_K)
        s = jnp.where(mask[:, None] > 0, NEG_INF, s)
        a = jax.nn.softmax(s, axis=-1)
        z = jnp.einsum("bhqk,bhkd->bhqd", a, V).transpose(0, 2, 1, 3).reshape(B, Sq, D_MODEL)
        return z @ wo + bo

    xn = ln(x, ln1g, ln1b)
    x1 = x + mha(xn, xn, self_mask, wq1, bq1, wk1, bk1, wv1, bv1, wo1, bo1)
    x1n = ln(x1, ln2g, ln2b)
    x2 = x1 + mha(x1n, enc_out, cross_mask, wq2, bq2, wk2, bk2, wv2, bv2, wo2, bo2)
    x2n = ln(x2, ln3g, ln3b)
    f = jnp.maximum(x2n @ wf1 + bf1, 0.0) @ wf2 + bf2
    return x2 + f


def decoder_forward_ref(dec_in, enc_in, enc_out, params):
    x = jnp.take(params["emb"], dec_in, axis=0) * math.sqrt(D_MODEL)
    pe = make_positional_encoding(MAX_LEN, D_MODEL)
    x = x + pe[: x.shape[1], :]
    self_mask, cross_mask = build_masks(dec_in, enc_in)
    for p in params["layers"]:
        x = decoder_layer_ref(x, enc_out, self_mask, cross_mask, p)
    return x


# --------------------------- deterministic parameter init ---------------------------
def init_layer_params(key):
    ks = jax.random.split(key, 10)

    def lin(k, din, dout):
        kw, kb = jax.random.split(k)
        w = jax.random.normal(kw, (din, dout), jnp.float32) / math.sqrt(din)
        b = jax.random.normal(kb, (1, dout), jnp.float32) * 0.01
        return w, b

    ones = jnp.ones((1, D_MODEL), jnp.float32)
    zeros = jnp.zeros((1, D_MODEL), jnp.float32)
    wq1, bq1 = lin(ks[0], D_MODEL, D_MODEL)
    wk1, bk1 = lin(ks[1], D_MODEL, D_MODEL)
    wv1, bv1 = lin(ks[2], D_MODEL, D_MODEL)
    wo1, bo1 = lin(ks[3], D_MODEL, D_MODEL)
    wq2, bq2 = lin(ks[4], D_MODEL, D_MODEL)
    wk2, bk2 = lin(ks[5], D_MODEL, D_MODEL)
    wv2, bv2 = lin(ks[6], D_MODEL, D_MODEL)
    wo2, bo2 = lin(ks[7], D_MODEL, D_MODEL)
    wf1, bf1 = lin(ks[8], D_MODEL, D_FFN)
    wf2, bf2 = lin(ks[9], D_FFN, D_MODEL)
    return [ones, zeros, ones, zeros, ones, zeros,
            wq1, bq1, wk1, bk1, wv1, bv1, wo1, bo1,
            wq2, bq2, wk2, bk2, wv2, bv2, wo2, bo2,
            wf1, bf1, wf2, bf2]


def init_params(key, vocab_size):
    keys = jax.random.split(key, 1 + N_LAYERS)
    emb = jax.random.normal(keys[0], (vocab_size, D_MODEL), jnp.float32) * 0.1
    layers = [init_layer_params(keys[1 + i]) for i in range(N_LAYERS)]
    return {"emb": emb, "layers": layers}


# --------------------------- main ---------------------------
if __name__ == "__main__":
    import numpy as np

    B, S_DEC, S_ENC, VOCAB = 2, 8, 10, 17
    key = jax.random.PRNGKey(0)
    k_par, k_dec, k_enc, k_eo = jax.random.split(key, 4)

    dec_in = jax.random.randint(k_dec, (B, S_DEC), 1, VOCAB)
    dec_in = dec_in.at[:, -1].set(0)          # a pad token in the decoder input
    enc_in = jax.random.randint(k_enc, (B, S_ENC), 1, VOCAB)
    enc_in = enc_in.at[:, -2:].set(0)         # pad tokens in the encoder input
    enc_out = jax.random.normal(k_eo, (B, S_ENC, D_MODEL), jnp.float32)

    params = init_params(k_par, VOCAB)

    out = decoder_forward_pallas(dec_in, enc_in, enc_out, params)
    out = jax.block_until_ready(out)

    ref = decoder_forward_ref(dec_in, enc_in, enc_out, params)
    ref = jax.block_until_ready(ref)

    assert out.shape == (B, S_DEC, D_MODEL)
    np.testing.assert_allclose(np.asarray(out), np.asarray(ref), atol=1e-2, rtol=1e-2)
    print("KERNEL_OK")
</pallas_src>

<mosaic_0001>
module attributes {stable_mosaic.version = 11 : i64} {
  func.func @kernel(%arg0: memref<16x32xf32, #tpu.memory_space<vmem>>, %arg1: memref<20x32xf32, #tpu.memory_space<vmem>>, %arg2: memref<16x2xf32, #tpu.memory_space<vmem>>, %arg3: memref<3x16xf32, #tpu.memory_space<vmem>>, %arg4: memref<2x20xf32, #tpu.memory_space<vmem>>, %arg5: memref<2x2x32x128xf32, #tpu.memory_space<vmem>>, %arg6: memref<2x2x1x128xf32, #tpu.memory_space<vmem>>, %arg7: memref<2x6x1x32xf32, #tpu.memory_space<vmem>>, %arg8: memref<2x32x64xf32, #tpu.memory_space<vmem>>, %arg9: memref<2x64x32xf32, #tpu.memory_space<vmem>>, %arg10: memref<2x1x96xf32, #tpu.memory_space<vmem>>, %arg11: memref<16x32xf32, #tpu.memory_space<vmem>>) attributes {dimension_semantics = [], scalar_prefetch = 0 : i64, scratch_operands = 0 : i64, tpu.core_type = #tpu.core_type<tc>} {
    %c0 = arith.constant 0 : index
    %c0_0 = arith.constant 0 : index
    %0 = vector.load %arg0[%c0, %c0_0] : memref<16x32xf32, #tpu.memory_space<vmem>>, vector<16x32xf32>
    %c0_1 = arith.constant 0 : index
    %c0_2 = arith.constant 0 : index
    %1 = vector.load %arg1[%c0_1, %c0_2] : memref<20x32xf32, #tpu.memory_space<vmem>>, vector<20x32xf32>
    %c0_3 = arith.constant 0 : index
    %c0_4 = arith.constant 0 : index
    %2 = vector.load %arg2[%c0_3, %c0_4] : memref<16x2xf32, #tpu.memory_space<vmem>>, vector<16x2xf32>
    %c0_5 = arith.constant 0 : index
    %c0_6 = arith.constant 0 : index
    %3 = vector.load %arg3[%c0_5, %c0_6] : memref<3x16xf32, #tpu.memory_space<vmem>>, vector<3x16xf32>
    %c0_7 = arith.constant 0 : index
    %c0_8 = arith.constant 0 : index
    %4 = vector.load %arg4[%c0_7, %c0_8] : memref<2x20xf32, #tpu.memory_space<vmem>>, vector<2x20xf32>
    %5 = vector.extract_strided_slice %2 {offsets = [0, 0], sizes = [16, 1], strides = [1, 1]} : vector<16x2xf32> to vector<16x1xf32>
    %6 = vector.extract_strided_slice %2 {offsets = [0, 1], sizes = [16, 1], strides = [1, 1]} : vector<16x2xf32> to vector<16x1xf32>
    %7 = vector.extract_strided_slice %3 {offsets = [0, 0], sizes = [1, 16], strides = [1, 1]} : vector<3x16xf32> to vector<1x16xf32>
    %8 = vector.extract_strided_slice %3 {offsets = [1, 0], sizes = [1, 16], strides = [1, 1]} : vector<3x16xf32> to vector<1x16xf32>
    %9 = vector.extract_strided_slice %3 {offsets = [2, 0], sizes = [1, 16], strides = [1, 1]} : vector<3x16xf32> to vector<1x16xf32>
    %10 = vector.extract_strided_slice %4 {offsets = [0, 0], sizes = [1, 20], strides = [1, 1]} : vector<2x20xf32> to vector<1x20xf32>
    %11 = vector.extract_strided_slice %4 {offsets = [1, 0], sizes = [1, 20], strides = [1, 1]} : vector<2x20xf32> to vector<1x20xf32>
    %12 = vector.broadcast %5 : vector<16x1xf32> to vector<16x16xf32>
    %13 = vector.broadcast %7 : vector<1x16xf32> to vector<16x16xf32>
    %14 = arith.cmpf oeq, %12, %13 : vector<16x16xf32>
    %15 = vector.broadcast %8 : vector<1x16xf32> to vector<16x16xf32>
    %16 = vector.broadcast %6 : vector<16x1xf32> to vector<16x16xf32>
    %17 = arith.cmpf ole, %15, %16 : vector<16x16xf32>
    %18 = arith.andi %14, %17 : vector<16x16xi1>
    %cst = arith.constant 5.000000e-01 : f32
    %19 = vector.broadcast %cst : f32 to vector<1x16xf32>
    %20 = arith.cmpf olt, %9, %19 : vector<1x16xf32>
    %21 = vector.broadcast %20 : vector<1x16xi1> to vector<16x16xi1>
    %22 = arith.andi %18, %21 : vector<16x16xi1>
    %23 = vector.broadcast %5 : vector<16x1xf32> to vector<16x20xf32>
    %24 = vector.broadcast %10 : vector<1x20xf32> to vector<16x20xf32>
    %25 = arith.cmpf oeq, %23, %24 : vector<16x20xf32>
    %cst_9 = arith.constant 5.000000e-01 : f32
    %26 = vector.broadcast %cst_9 : f32 to vector<1x20xf32>
    %27 = arith.cmpf olt, %11, %26 : vector<1x20xf32>
    %28 = vector.broadcast %27 : vector<1x20xi1> to vector<16x20xi1>
    %29 = arith.andi %25, %28 : vector<16x20xi1>
    %30 = tpu.iota {dimensions = array<i32: 1>} : vector<1x32xi32>
    %c0_10 = arith.constant 0 : index
    %c0_11 = arith.constant 0 : index
    %c0_12 = arith.constant 0 : index
    %c0_13 = arith.constant 0 : index
    %31 = vector.load %arg5[%c0_10, %c0_11, %c0_12, %c0_13] : memref<2x2x32x128xf32, #tpu.memory_space<vmem>>, vector<2x2x32x128xf32>
    %c0_14 = arith.constant 0 : index
    %c0_15 = arith.constant 0 : index
    %c0_16 = arith.constant 0 : index
    %c0_17 = arith.constant 0 : index
    %32 = vector.load %arg6[%c0_14, %c0_15, %c0_16, %c0_17] : memref<2x2x1x128xf32, #tpu.memory_space<vmem>>, vector<2x2x1x128xf32>
    %c0_18 = arith.constant 0 : index
    %c0_19 = arith.constant 0 : index
    %c0_20 = arith.constant 0 : index
    %c0_21 = arith.constant 0 : index
    %33 = vector.load %arg7[%c0_18, %c0_19, %c0_20, %c0_21] : memref<2x6x1x32xf32, #tpu.memory_space<vmem>>, vector<2x6x1x32xf32>
    %c0_22 = arith.constant 0 : index
    %c0_23 = arith.constant 0 : index
    %c0_24 = arith.constant 0 : index
    %34 = vector.load %arg8[%c0_22, %c0_23, %c0_24] : memref<2x32x64xf32, #tpu.memory_space<vmem>>, vector<2x32x64xf32>
    %c0_25 = arith.constant 0 : index
    %c0_26 = arith.constant 0 : index
    %c0_27 = arith.constant 0 : index
    %35 = vector.load %arg9[%c0_25, %c0_26, %c0_27] : memref<2x64x32xf32, #tpu.memory_space<vmem>>, vector<2x64x32xf32>
    %c0_28 = arith.constant 0 : index
    %c0_29 = arith.constant 0 : index
    %c0_30 = arith.constant 0 : index
    %36 = vector.load %arg10[%c0_28, %c0_29, %c0_30] : memref<2x1x96xf32, #tpu.memory_space<vmem>>, vector<2x1x96xf32>
    %37 = vector.extract_strided_slice %33 {offsets = [0, 0, 0, 0], sizes = [1, 1, 1, 32], strides = [1, 1, 1, 1]} : vector<2x6x1x32xf32> to vector<1x1x1x32xf32>
    %38 = vector.shape_cast %37 : vector<1x1x1x32xf32> to vector<1x32xf32>
    %39 = vector.extract_strided_slice %33 {offsets = [0, 1, 0, 0], sizes = [1, 1, 1, 32], strides = [1, 1, 1, 1]} : vector<2x6x1x32xf32> to vector<1x1x1x32xf32>
    %40 = vector.shape_cast %39 : vector<1x1x1x32xf32> to vector<1x32xf32>
    %41 = vector.extract_strided_slice %33 {offsets = [0, 2, 0, 0], sizes = [1, 1, 1, 32], strides = [1, 1, 1, 1]} : vector<2x6x1x32xf32> to vector<1x1x1x32xf32>
    %42 = vector.shape_cast %41 : vector<1x1x1x32xf32> to vector<1x32xf32>
    %43 = vector.extract_strided_slice %33 {offsets = [0, 3, 0, 0], sizes = [1, 1, 1, 32], strides = [1, 1, 1, 1]} : vector<2x6x1x32xf32> to vector<1x1x1x32xf32>
    %44 = vector.shape_cast %43 : vector<1x1x1x32xf32> to vector<1x32xf32>
    %45 = vector.extract_strided_slice %33 {offsets = [0, 4, 0, 0], sizes = [1, 1, 1, 32], strides = [1, 1, 1, 1]} : vector<2x6x1x32xf32> to vector<1x1x1x32xf32>
    %46 = vector.shape_cast %45 : vector<1x1x1x32xf32> to vector<1x32xf32>
    %47 = vector.extract_strided_slice %33 {offsets = [0, 5, 0, 0], sizes = [1, 1, 1, 32], strides = [1, 1, 1, 1]} : vector<2x6x1x32xf32> to vector<1x1x1x32xf32>
    %48 = vector.shape_cast %47 : vector<1x1x1x32xf32> to vector<1x32xf32>
    %49 = vector.extract_strided_slice %31 {offsets = [0, 0, 0, 0], sizes = [1, 1, 32, 128], strides = [1, 1, 1, 1]} : vector<2x2x32x128xf32> to vector<1x1x32x128xf32>
    %50 = vector.shape_cast %49 : vector<1x1x32x128xf32> to vector<32x128xf32>
    %51 = vector.extract_strided_slice %32 {offsets = [0, 0, 0, 0], sizes = [1, 1, 1, 128], strides = [1, 1, 1, 1]} : vector<2x2x1x128xf32> to vector<1x1x1x128xf32>
    %52 = vector.shape_cast %51 : vector<1x1x1x128xf32> to vector<1x128xf32>
    %53 = vector.extract_strided_slice %31 {offsets = [0, 1, 0, 0], sizes = [1, 1, 32, 128], strides = [1, 1, 1, 1]} : vector<2x2x32x128xf32> to vector<1x1x32x128xf32>
    %54 = vector.shape_cast %53 : vector<1x1x32x128xf32> to vector<32x128xf32>
    %55 = vector.extract_strided_slice %32 {offsets = [0, 1, 0, 0], sizes = [1, 1, 1, 128], strides = [1, 1, 1, 1]} : vector<2x2x1x128xf32> to vector<1x1x1x128xf32>
    %56 = vector.shape_cast %55 : vector<1x1x1x128xf32> to vector<1x128xf32>
    %cst_31 = arith.constant dense<0.000000e+00> : vector<16xf32>
    %57 = vector.multi_reduction <add>, %0, %cst_31 [1] : vector<16x32xf32> to vector<16xf32>
    %58 = vector.shape_cast %57 : vector<16xf32> to vector<16x1xf32>
    %cst_32 = arith.constant 3.200000e+01 : f32
    %59 = vector.broadcast %cst_32 : f32 to vector<16x1xf32>
    %60 = arith.divf %58, %59 : vector<16x1xf32>
    %61 = vector.broadcast %60 : vector<16x1xf32> to vector<16x32xf32>
    %62 = arith.subf %0, %61 : vector<16x32xf32>
    %63 = arith.mulf %62, %62 : vector<16x32xf32>
    %cst_33 = arith.constant dense<0.000000e+00> : vector<16xf32>
    %64 = vector.multi_reduction <add>, %63, %cst_33 [1] : vector<16x32xf32> to vector<16xf32>
    %65 = vector.shape_cast %64 : vector<16xf32> to vector<16x1xf32>
    %cst_34 = arith.constant 3.200000e+01 : f32
    %66 = vector.broadcast %cst_34 : f32 to vector<16x1xf32>
    %67 = arith.divf %65, %66 : vector<16x1xf32>
    %cst_35 = arith.constant 9.99999974E-6 : f32
    %68 = vector.broadcast %cst_35 : f32 to vector<16x1xf32>
    %69 = arith.addf %67, %68 : vector<16x1xf32>
    %70 = math.rsqrt %69 : vector<16x1xf32>
    %71 = vector.broadcast %70 : vector<16x1xf32> to vector<16x32xf32>
    %72 = arith.mulf %62, %71 : vector<16x32xf32>
    %73 = vector.broadcast %38 : vector<1x32xf32> to vector<16x32xf32>
    %74 = arith.mulf %72, %73 : vector<16x32xf32>
    %75 = vector.broadcast %40 : vector<1x32xf32> to vector<16x32xf32>
    %76 = arith.addf %74, %75 : vector<16x32xf32>
    %77 = vector.extract_strided_slice %50 {offsets = [0, 0], sizes = [32, 96], strides = [1, 1]} : vector<32x128xf32> to vector<32x96xf32>
    %cst_36 = arith.constant dense<0.000000e+00> : vector<16x96xf32>
    %78 = tpu.matmul %76, %77, %cst_36 {dimension_numbers = #tpu.dot_dimension_numbers<[1], [0], [0], [1], [0, 0, 1, 1], [], []>, precision = #tpu.contract_precision<fp32>} : vector<16x32xf32>, vector<32x96xf32>, vector<16x96xf32> -> vector<16x96xf32>
    %79 = vector.extract_strided_slice %52 {offsets = [0, 0], sizes = [1, 96], strides = [1, 1]} : vector<1x128xf32> to vector<1x96xf32>
    %80 = vector.broadcast %79 : vector<1x96xf32> to vector<16x96xf32>
    %81 = arith.addf %78, %80 : vector<16x96xf32>
    %82 = vector.extract_strided_slice %81 {offsets = [0, 0], sizes = [16, 32], strides = [1, 1]} : vector<16x96xf32> to vector<16x32xf32>
    %83 = vector.extract_strided_slice %81 {offsets = [0, 32], sizes = [16, 32], strides = [1, 1]} : vector<16x96xf32> to vector<16x32xf32>
    %84 = vector.extract_strided_slice %81 {offsets = [0, 64], sizes = [16, 32], strides = [1, 1]} : vector<16x96xf32> to vector<16x32xf32>
    %85 = tpu.transpose %83, [1, 0] : vector<16x32xf32> -> vector<32x16xf32>
    %cst_37 = arith.constant 0.000000e+00 : f32
    %86 = vector.broadcast %cst_37 : f32 to vector<16x32xf32>
    %c0_i32 = arith.constant 0 : i32
    %87 = vector.broadcast %c0_i32 : i32 to vector<1x32xi32>
    %88 = arith.cmpi sge, %30, %87 : vector<1x32xi32>
    %c8_i32 = arith.constant 8 : i32
    %89 = vector.broadcast %c8_i32 : i32 to vector<1x32xi32>
    %90 = arith.cmpi slt, %30, %89 : vector<1x32xi32>
    %91 = arith.andi %88, %90 : vector<1x32xi1>
    %cst_38 = arith.constant 0.000000e+00 : f32
    %92 = vector.shape_cast %91 : vector<1x32xi1> to vector<1x32xi1>
    %93 = vector.broadcast %92 : vector<1x32xi1> to vector<16x32xi1>
    %94 = vector.broadcast %cst_38 : f32 to vector<16x32xf32>
    %95 = arith.select %93, %82, %94 : vector<16x32xi1>, vector<16x32xf32>
    %cst_39 = arith.constant dense<0.000000e+00> : vector<16x16xf32>
    %96 = tpu.matmul %95, %85, %cst_39 {dimension_numbers = #tpu.dot_dimension_numbers<[1], [0], [0], [1], [0, 0, 1, 1], [], []>, precision = #tpu.contract_precision<fp32>} : vector<16x32xf32>, vector<32x16xf32>, vector<16x16xf32> -> vector<16x16xf32>
    %cst_40 = arith.constant 0.353553385 : f32
    %97 = vector.broadcast %cst_40 : f32 to vector<16x16xf32>
    %98 = arith.mulf %96, %97 : vector<16x16xf32>
    %cst_41 = arith.constant -1.000000e+09 : f32
    %99 = vector.broadcast %cst_41 : f32 to vector<16x16xf32>
    %100 = arith.select %22, %98, %99 : vector<16x16xi1>, vector<16x16xf32>
    %cst_42 = arith.constant dense<0xFF800000> : vector<16xf32>
    %101 = vector.multi_reduction <maximumf>, %100, %cst_42 [1] : vector<16x16xf32> to vector<16xf32>
    %102 = vector.shape_cast %101 : vector<16xf32> to vector<16x1xf32>
    %103 = vector.broadcast %102 : vector<16x1xf32> to vector<16x16xf32>
    %104 = arith.subf %100, %103 : vector<16x16xf32>
    %105 = math.exp %104 : vector<16x16xf32>
    %cst_43 = arith.constant dense<0.000000e+00> : vector<16xf32>
    %106 = vector.multi_reduction <add>, %105, %cst_43 [1] : vector<16x16xf32> to vector<16xf32>
    %107 = vector.shape_cast %106 : vector<16xf32> to vector<16x1xf32>
    %108 = tpu.reciprocal %107 {approx = true} : vector<16x1xf32> -> vector<16x1xf32>
    %109 = vector.broadcast %108 : vector<16x1xf32> to vector<16x16xf32>
    %110 = arith.mulf %105, %109 : vector<16x16xf32>
    %cst_44 = arith.constant 0.000000e+00 : f32
    %111 = vector.shape_cast %91 : vector<1x32xi1> to vector<1x32xi1>
    %112 = vector.broadcast %111 : vector<1x32xi1> to vector<16x32xi1>
    %113 = vector.broadcast %cst_44 : f32 to vector<16x32xf32>
    %114 = arith.select %112, %84, %113 : vector<16x32xi1>, vector<16x32xf32>
    %cst_45 = arith.constant dense<0.000000e+00> : vector<16x32xf32>
    %115 = tpu.matmul %110, %114, %cst_45 {dimension_numbers = #tpu.dot_dimension_numbers<[1], [0], [0], [1], [0, 0, 1, 1], [], []>, precision = #tpu.contract_precision<fp32>} : vector<16x16xf32>, vector<16x32xf32>, vector<16x32xf32> -> vector<16x32xf32>
    %116 = arith.addf %86, %115 : vector<16x32xf32>
    %c8_i32_46 = arith.constant 8 : i32
    %117 = vector.broadcast %c8_i32_46 : i32 to vector<1x32xi32>
    %118 = arith.cmpi sge, %30, %117 : vector<1x32xi32>
    %c16_i32 = arith.constant 16 : i32
    %119 = vector.broadcast %c16_i32 : i32 to vector<1x32xi32>
    %120 = arith.cmpi slt, %30, %119 : vector<1x32xi32>
    %121 = arith.andi %118, %120 : vector<1x32xi1>
    %cst_47 = arith.constant 0.000000e+00 : f32
    %122 = vector.shape_cast %121 : vector<1x32xi1> to vector<1x32xi1>
    %123 = vector.broadcast %122 : vector<1x32xi1> to vector<16x32xi1>
    %124 = vector.broadcast %cst_47 : f32 to vector<16x32xf32>
    %125 = arith.select %123, %82, %124 : vector<16x32xi1>, vector<16x32xf32>
    %cst_48 = arith.constant dense<0.000000e+00> : vector<16x16xf32>
    %126 = tpu.matmul %125, %85, %cst_48 {dimension_numbers = #tpu.dot_dimension_numbers<[1], [0], [0], [1], [0, 0, 1, 1], [], []>, precision = #tpu.contract_precision<fp32>} : vector<16x32xf32>, vector<32x16xf32>, vector<16x16xf32> -> vector<16x16xf32>
    %cst_49 = arith.constant 0.353553385 : f32
    %127 = vector.broadcast %cst_49 : f32 to vector<16x16xf32>
    %128 = arith.mulf %126, %127 : vector<16x16xf32>
    %cst_50 = arith.constant -1.000000e+09 : f32
    %129 = vector.broadcast %cst_50 : f32 to vector<16x16xf32>
    %130 = arith.select %22, %128, %129 : vector<16x16xi1>, vector<16x16xf32>
    %cst_51 = arith.constant dense<0xFF800000> : vector<16xf32>
    %131 = vector.multi_reduction <maximumf>, %130, %cst_51 [1] : vector<16x16xf32> to vector<16xf32>
    %132 = vector.shape_cast %131 : vector<16xf32> to vector<16x1xf32>
    %133 = vector.broadcast %132 : vector<16x1xf32> to vector<16x16xf32>
    %134 = arith.subf %130, %133 : vector<16x16xf32>
    %135 = math.exp %134 : vector<16x16xf32>
    %cst_52 = arith.constant dense<0.000000e+00> : vector<16xf32>
    %136 = vector.multi_reduction <add>, %135, %cst_52 [1] : vector<16x16xf32> to vector<16xf32>
    %137 = vector.shape_cast %136 : vector<16xf32> to vector<16x1xf32>
    %138 = tpu.reciprocal %137 {approx = true} : vector<16x1xf32> -> vector<16x1xf32>
    %139 = vector.broadcast %138 : vector<16x1xf32> to vector<16x16xf32>
    %140 = arith.mulf %135, %139 : vector<16x16xf32>
    %cst_53 = arith.constant 0.000000e+00 : f32
    %141 = vector.shape_cast %121 : vector<1x32xi1> to vector<1x32xi1>
    %142 = vector.broadcast %141 : vector<1x32xi1> to vector<16x32xi1>
    %143 = vector.broadcast %cst_53 : f32 to vector<16x32xf32>
    %144 = arith.select %142, %84, %143 : vector<16x32xi1>, vector<16x32xf32>
    %cst_54 = arith.constant dense<0.000000e+00> : vector<16x32xf32>
    %145 = tpu.matmul %140, %144, %cst_54 {dimension_numbers = #tpu.dot_dimension_numbers<[1], [0], [0], [1], [0, 0, 1, 1], [], []>, precision = #tpu.contract_precision<fp32>} : vector<16x16xf32>, vector<16x32xf32>, vector<16x32xf32> -> vector<16x32xf32>
    %146 = arith.addf %116, %145 : vector<16x32xf32>
    %c16_i32_55 = arith.constant 16 : i32
    %147 = vector.broadcast %c16_i32_55 : i32 to vector<1x32xi32>
    %148 = arith.cmpi sge, %30, %147 : vector<1x32xi32>
    %c24_i32 = arith.constant 24 : i32
    %149 = vector.broadcast %c24_i32 : i32 to vector<1x32xi32>
    %150 = arith.cmpi slt, %30, %149 : vector<1x32xi32>
    %151 = arith.andi %148, %150 : vector<1x32xi1>
    %cst_56 = arith.constant 0.000000e+00 : f32
    %152 = vector.shape_cast %151 : vector<1x32xi1> to vector<1x32xi1>
    %153 = vector.broadcast %152 : vector<1x32xi1> to vector<16x32xi1>
    %154 = vector.broadcast %cst_56 : f32 to vector<16x32xf32>
    %155 = arith.select %153, %82, %154 : vector<16x32xi1>, vector<16x32xf32>
    %cst_57 = arith.constant dense<0.000000e+00> : vector<16x16xf32>
    %156 = tpu.matmul %155, %85, %cst_57 {dimension_numbers = #tpu.dot_dimension_numbers<[1], [0], [0], [1], [0, 0, 1, 1], [], []>, precision = #tpu.contract_precision<fp32>} : vector<16x32xf32>, vector<32x16xf32>, vector<16x16xf32> -> vector<16x16xf32>
    %cst_58 = arith.constant 0.353553385 : f32
    %157 = vector.broadcast %cst_58 : f32 to vector<16x16xf32>
    %158 = arith.mulf %156, %157 : vector<16x16xf32>
    %cst_59 = arith.constant -1.000000e+09 : f32
    %159 = vector.broadcast %cst_59 : f32 to vector<16x16xf32>
    %160 = arith.select %22, %158, %159 : vector<16x16xi1>, vector<16x16xf32>
    %cst_60 = arith.constant dense<0xFF800000> : vector<16xf32>
    %161 = vector.multi_reduction <maximumf>, %160, %cst_60 [1] : vector<16x16xf32> to vector<16xf32>
    %162 = vector.shape_cast %161 : vector<16xf32> to vector<16x1xf32>
    %163 = vector.broadcast %162 : vector<16x1xf32> to vector<16x16xf32>
    %164 = arith.subf %160, %163 : vector<16x16xf32>
    %165 = math.exp %164 : vector<16x16xf32>
    %cst_61 = arith.constant dense<0.000000e+00> : vector<16xf32>
    %166 = vector.multi_reduction <add>, %165, %cst_61 [1] : vector<16x16xf32> to vector<16xf32>
    %167 = vector.shape_cast %166 : vector<16xf32> to vector<16x1xf32>
    %168 = tpu.reciprocal %167 {approx = true} : vector<16x1xf32> -> vector<16x1xf32>
    %169 = vector.broadcast %168 : vector<16x1xf32> to vector<16x16xf32>
    %170 = arith.mulf %165, %169 : vector<16x16xf32>
    %cst_62 = arith.constant 0.000000e+00 : f32
    %171 = vector.shape_cast %151 : vector<1x32xi1> to vector<1x32xi1>
    %172 = vector.broadcast %171 : vector<1x32xi1> to vector<16x32xi1>
    %173 = vector.broadcast %cst_62 : f32 to vector<16x32xf32>
    %174 = arith.select %172, %84, %173 : vector<16x32xi1>, vector<16x32xf32>
    %cst_63 = arith.constant dense<0.000000e+00> : vector<16x32xf32>
    %175 = tpu.matmul %170, %174, %cst_63 {dimension_numbers = #tpu.dot_dimension_numbers<[1], [0], [0], [1], [0, 0, 1, 1], [], []>, precision = #tpu.contract_precision<fp32>} : vector<16x16xf32>, vector<16x32xf32>, vector<16x32xf32> -> vector<16x32xf32>
    %176 = arith.addf %146, %175 : vector<16x32xf32>
    %c24_i32_64 = arith.constant 24 : i32
    %177 = vector.broadcast %c24_i32_64 : i32 to vector<1x32xi32>
    %178 = arith.cmpi sge, %30, %177 : vector<1x32xi32>
    %c32_i32 = arith.constant 32 : i32
    %179 = vector.broadcast %c32_i32 : i32 to vector<1x32xi32>
    %180 = arith.cmpi slt, %30, %179 : vector<1x32xi32>
    %181 = arith.andi %178, %180 : vector<1x32xi1>
    %cst_65 = arith.constant 0.000000e+00 : f32
    %182 = vector.shape_cast %181 : vector<1x32xi1> to vector<1x32xi1>
    %183 = vector.broadcast %182 : vector<1x32xi1> to vector<16x32xi1>
    %184 = vector.broadcast %cst_65 : f32 to vector<16x32xf32>
    %185 = arith.select %183, %82, %184 : vector<16x32xi1>, vector<16x32xf32>
    %cst_66 = arith.constant dense<0.000000e+00> : vector<16x16xf32>
    %186 = tpu.matmul %185, %85, %cst_66 {dimension_numbers = #tpu.dot_dimension_numbers<[1], [0], [0], [1], [0, 0, 1, 1], [], []>, precision = #tpu.contract_precision<fp32>} : vector<16x32xf32>, vector<32x16xf32>, vector<16x16xf32> -> vector<16x16xf32>
    %cst_67 = arith.constant 0.353553385 : f32
    %187 = vector.broadcast %cst_67 : f32 to vector<16x16xf32>
    %188 = arith.mulf %186, %187 : vector<16x16xf32>
    %cst_68 = arith.constant -1.000000e+09 : f32
    %189 = vector.broadcast %cst_68 : f32 to vector<16x16xf32>
    %190 = arith.select %22, %188, %189 : vector<16x16xi1>, vector<16x16xf32>
    %cst_69 = arith.constant dense<0xFF800000> : vector<16xf32>
    %191 = vector.multi_reduction <maximumf>, %190, %cst_69 [1] : vector<16x16xf32> to vector<16xf32>
    %192 = vector.shape_cast %191 : vector<16xf32> to vector<16x1xf32>
    %193 = vector.broadcast %192 : vector<16x1xf32> to vector<16x16xf32>
    %194 = arith.subf %190, %193 : vector<16x16xf32>
    %195 = math.exp %194 : vector<16x16xf32>
    %cst_70 = arith.constant dense<0.000000e+00> : vector<16xf32>
    %196 = vector.multi_reduction <add>, %195, %cst_70 [1] : vector<16x16xf32> to vector<16xf32>
    %197 = vector.shape_cast %196 : vector<16xf32> to vector<16x1xf32>
    %198 = tpu.reciprocal %197 {approx = true} : vector<16x1xf32> -> vector<16x1xf32>
    %199 = vector.broadcast %198 : vector<16x1xf32> to vector<16x16xf32>
    %200 = arith.mulf %195, %199 : vector<16x16xf32>
    %cst_71 = arith.constant 0.000000e+00 : f32
    %201 = vector.shape_cast %181 : vector<1x32xi1> to vector<1x32xi1>
    %202 = vector.broadcast %201 : vector<1x32xi1> to vector<16x32xi1>
    %203 = vector.broadcast %cst_71 : f32 to vector<16x32xf32>
    %204 = arith.select %202, %84, %203 : vector<16x32xi1>, vector<16x32xf32>
    %cst_72 = arith.constant dense<0.000000e+00> : vector<16x32xf32>
    %205 = tpu.matmul %200, %204, %cst_72 {dimension_numbers = #tpu.dot_dimension_numbers<[1], [0], [0], [1], [0, 0, 1, 1], [], []>, precision = #tpu.contract_precision<fp32>} : vector<16x16xf32>, vector<16x32xf32>, vector<16x32xf32> -> vector<16x32xf32>
    %206 = arith.addf %176, %205 : vector<16x32xf32>
    %207 = vector.extract_strided_slice %50 {offsets = [0, 96], sizes = [32, 32], strides = [1, 1]} : vector<32x128xf32> to vector<32x32xf32>
    %cst_73 = arith.constant dense<0.000000e+00> : vector<16x32xf32>
    %208 = tpu.matmul %206, %207, %cst_73 {dimension_numbers = #tpu.dot_dimension_numbers<[1], [0], [0], [1], [0, 0, 1, 1], [], []>, precision = #tpu.contract_precision<fp32>} : vector<16x32xf32>, vector<32x32xf32>, vector<16x32xf32> -> vector<16x32xf32>
    %209 = arith.addf %0, %208 : vector<16x32xf32>
    %210 = vector.extract_strided_slice %52 {offsets = [0, 96], sizes = [1, 32], strides = [1, 1]} : vector<1x128xf32> to vector<1x32xf32>
    %211 = vector.broadcast %210 : vector<1x32xf32> to vector<16x32xf32>
    %212 = arith.addf %209, %211 : vector<16x32xf32>
    %cst_74 = arith.constant dense<0.000000e+00> : vector<16xf32>
    %213 = vector.multi_reduction <add>, %212, %cst_74 [1] : vector<16x32xf32> to vector<16xf32>
    %214 = vector.shape_cast %213 : vector<16xf32> to vector<16x1xf32>
    %cst_75 = arith.constant 3.200000e+01 : f32
    %215 = vector.broadcast %cst_75 : f32 to vector<16x1xf32>
    %216 = arith.divf %214, %215 : vector<16x1xf32>
    %217 = vector.broadcast %216 : vector<16x1xf32> to vector<16x32xf32>
    %218 = arith.subf %212, %217 : vector<16x32xf32>
    %219 = arith.mulf %218, %218 : vector<16x32xf32>
    %cst_76 = arith.constant dense<0.000000e+00> : vector<16xf32>
    %220 = vector.multi_reduction <add>, %219, %cst_76 [1] : vector<16x32xf32> to vector<16xf32>
    %221 = vector.shape_cast %220 : vector<16xf32> to vector<16x1xf32>
    %cst_77 = arith.constant 3.200000e+01 : f32
    %222 = vector.broadcast %cst_77 : f32 to vector<16x1xf32>
    %223 = arith.divf %221, %222 : vector<16x1xf32>
    %cst_78 = arith.constant 9.99999974E-6 : f32
    %224 = vector.broadcast %cst_78 : f32 to vector<16x1xf32>
    %225 = arith.addf %223, %224 : vector<16x1xf32>
    %226 = math.rsqrt %225 : vector<16x1xf32>
    %227 = vector.broadcast %226 : vector<16x1xf32> to vector<16x32xf32>
    %228 = arith.mulf %218, %227 : vector<16x32xf32>
    %229 = vector.broadcast %42 : vector<1x32xf32> to vector<16x32xf32>
    %230 = arith.mulf %228, %229 : vector<16x32xf32>
    %231 = vector.broadcast %44 : vector<1x32xf32> to vector<16x32xf32>
    %232 = arith.addf %230, %231 : vector<16x32xf32>
    %233 = vector.extract_strided_slice %54 {offsets = [0, 0], sizes = [32, 32], strides = [1, 1]} : vector<32x128xf32> to vector<32x32xf32>
    %cst_79 = arith.constant dense<0.000000e+00> : vector<16x32xf32>
    %234 = tpu.matmul %232, %233, %cst_79 {dimension_numbers = #tpu.dot_dimension_numbers<[1], [0], [0], [1], [0, 0, 1, 1], [], []>, precision = #tpu.contract_precision<fp32>} : vector<16x32xf32>, vector<32x32xf32>, vector<16x32xf32> -> vector<16x32xf32>
    %235 = vector.extract_strided_slice %56 {offsets = [0, 0], sizes = [1, 32], strides = [1, 1]} : vector<1x128xf32> to vector<1x32xf32>
    %236 = vector.broadcast %235 : vector<1x32xf32> to vector<16x32xf32>
    %237 = arith.addf %234, %236 : vector<16x32xf32>
    %238 = vector.extract_strided_slice %54 {offsets = [0, 32], sizes = [32, 64], strides = [1, 1]} : vector<32x128xf32> to vector<32x64xf32>
    %cst_80 = arith.constant dense<0.000000e+00> : vector<20x64xf32>
    %239 = tpu.matmul %1, %238, %cst_80 {dimension_numbers = #tpu.dot_dimension_numbers<[1], [0], [0], [1], [0, 0, 1, 1], [], []>, precision = #tpu.contract_precision<fp32>} : vector<20x32xf32>, vector<32x64xf32>, vector<20x64xf32> -> vector<20x64xf32>
    %240 = vector.extract_strided_slice %56 {offsets = [0, 32], sizes = [1, 64], strides = [1, 1]} : vector<1x128xf32> to vector<1x64xf32>
    %241 = vector.broadcast %240 : vector<1x64xf32> to vector<20x64xf32>
    %242 = arith.addf %239, %241 : vector<20x64xf32>
    %243 = vector.extract_strided_slice %242 {offsets = [0, 0], sizes = [20, 32], strides = [1, 1]} : vector<20x64xf32> to vector<20x32xf32>
    %244 = vector.extract_strided_slice %242 {offsets = [0, 32], sizes = [20, 32], strides = [1, 1]} : vector<20x64xf32> to vector<20x32xf32>
    %245 = tpu.transpose %243, [1, 0] : vector<20x32xf32> -> vector<32x20xf32>
    %cst_81 = arith.constant 0.000000e+00 : f32
    %246 = vector.broadcast %cst_81 : f32 to vector<16x32xf32>
    %c0_i32_82 = arith.constant 0 : i32
    %247 = vector.broadcast %c0_i32_82 : i32 to vector<1x32xi32>
    %248 = arith.cmpi sge, %30, %247 : vector<1x32xi32>
    %c8_i32_83 = arith.constant 8 : i32
    %249 = vector.broadcast %c8_i32_83 : i32 to vector<1x32xi32>
    %250 = arith.cmpi slt, %30, %249 : vector<1x32xi32>
    %251 = arith.andi %248, %250 : vector<1x32xi1>
    %cst_84 = arith.constant 0.000000e+00 : f32
    %252 = vector.shape_cast %251 : vector<1x32xi1> to vector<1x32xi1>
    %253 = vector.broadcast %252 : vector<1x32xi1> to vector<16x32xi1>
    %254 = vector.broadcast %cst_84 : f32 to vector<16x32xf32>
    %255 = arith.select %253, %237, %254 : vector<16x32xi1>, vector<16x32xf32>
    %cst_85 = arith.constant dense<0.000000e+00> : vector<16x20xf32>
    %256 = tpu.matmul %255, %245, %cst_85 {dimension_numbers = #tpu.dot_dimension_numbers<[1], [0], [0], [1], [0, 0, 1, 1], [], []>, precision = #tpu.contract_precision<fp32>} : vector<16x32xf32>, vector<32x20xf32>, vector<16x20xf32> -> vector<16x20xf32>
    %cst_86 = arith.constant 0.353553385 : f32
    %257 = vector.broadcast %cst_86 : f32 to vector<16x20xf32>
    %258 = arith.mulf %256, %257 : vector<16x20xf32>
    %cst_87 = arith.constant -1.000000e+09 : f32
    %259 = vector.broadcast %cst_87 : f32 to vector<16x20xf32>
    %260 = arith.select %29, %258, %259 : vector<16x20xi1>, vector<16x20xf32>
    %cst_88 = arith.constant dense<0xFF800000> : vector<16xf32>
    %261 = vector.multi_reduction <maximumf>, %260, %cst_88 [1] : vector<16x20xf32> to vector<16xf32>
    %262 = vector.shape_cast %261 : vector<16xf32> to vector<16x1xf32>
    %263 = vector.broadcast %262 : vector<16x1xf32> to vector<16x20xf32>
    %264 = arith.subf %260, %263 : vector<16x20xf32>
    %265 = math.exp %264 : vector<16x20xf32>
    %cst_89 = arith.constant dense<0.000000e+00> : vector<16xf32>
    %266 = vector.multi_reduction <add>, %265, %cst_89 [1] : vector<16x20xf32> to vector<16xf32>
    %267 = vector.shape_cast %266 : vector<16xf32> to vector<16x1xf32>
    %268 = tpu.reciprocal %267 {approx = true} : vector<16x1xf32> -> vector<16x1xf32>
    %269 = vector.broadcast %268 : vector<16x1xf32> to vector<16x20xf32>
    %270 = arith.mulf %265, %269 : vector<16x20xf32>
    %cst_90 = arith.constant 0.000000e+00 : f32
    %271 = vector.shape_cast %251 : vector<1x32xi1> to vector<1x32xi1>
    %272 = vector.broadcast %271 : vector<1x32xi1> to vector<20x32xi1>
    %273 = vector.broadcast %cst_90 : f32 to vector<20x32xf32>
    %274 = arith.select %272, %244, %273 : vector<20x32xi1>, vector<20x32xf32>
    %cst_91 = arith.constant dense<0.000000e+00> : vector<16x32xf32>
    %275 = tpu.matmul %270, %274, %cst_91 {dimension_numbers = #tpu.dot_dimension_numbers<[1], [0], [0], [1], [0, 0, 1, 1], [], []>, precision = #tpu.contract_precision<fp32>} : vector<16x20xf32>, vector<20x32xf32>, vector<16x32xf32> -> vector<16x32xf32>
    %276 = arith.addf %246, %275 : vector<16x32xf32>
    %c8_i32_92 = arith.constant 8 : i32
    %277 = vector.broadcast %c8_i32_92 : i32 to vector<1x32xi32>
    %278 = arith.cmpi sge, %30, %277 : vector<1x32xi32>
    %c16_i32_93 = arith.constant 16 : i32
    %279 = vector.broadcast %c16_i32_93 : i32 to vector<1x32xi32>
    %280 = arith.cmpi slt, %30, %279 : vector<1x32xi32>
    %281 = arith.andi %278, %280 : vector<1x32xi1>
    %cst_94 = arith.constant 0.000000e+00 : f32
    %282 = vector.shape_cast %281 : vector<1x32xi1> to vector<1x32xi1>
    %283 = vector.broadcast %282 : vector<1x32xi1> to vector<16x32xi1>
    %284 = vector.broadcast %cst_94 : f32 to vector<16x32xf32>
    %285 = arith.select %283, %237, %284 : vector<16x32xi1>, vector<16x32xf32>
    %cst_95 = arith.constant dense<0.000000e+00> : vector<16x20xf32>
    %286 = tpu.matmul %285, %245, %cst_95 {dimension_numbers = #tpu.dot_dimension_numbers<[1], [0], [0], [1], [0, 0, 1, 1], [], []>, precision = #tpu.contract_precision<fp32>} : vector<16x32xf32>, vector<32x20xf32>, vector<16x20xf32> -> vector<16x20xf32>
    %cst_96 = arith.constant 0.353553385 : f32
    %287 = vector.broadcast %cst_96 : f32 to vector<16x20xf32>
    %288 = arith.mulf %286, %287 : vector<16x20xf32>
    %cst_97 = arith.constant -1.000000e+09 : f32
    %289 = vector.broadcast %cst_97 : f32 to vector<16x20xf32>
    %290 = arith.select %29, %288, %289 : vector<16x20xi1>, vector<16x20xf32>
    %cst_98 = arith.constant dense<0xFF800000> : vector<16xf32>
    %291 = vector.multi_reduction <maximumf>, %290, %cst_98 [1] : vector<16x20xf32> to vector<16xf32>
    %292 = vector.shape_cast %291 : vector<16xf32> to vector<16x1xf32>
    %293 = vector.broadcast %292 : vector<16x1xf32> to vector<16x20xf32>
    %294 = arith.subf %290, %293 : vector<16x20xf32>
    %295 = math.exp %294 : vector<16x20xf32>
    %cst_99 = arith.constant dense<0.000000e+00> : vector<16xf32>
    %296 = vector.multi_reduction <add>, %295, %cst_99 [1] : vector<16x20xf32> to vector<16xf32>
    %297 = vector.shape_cast %296 : vector<16xf32> to vector<16x1xf32>
    %298 = tpu.reciprocal %297 {approx = true} : vector<16x1xf32> -> vector<16x1xf32>
    %299 = vector.broadcast %298 : vector<16x1xf32> to vector<16x20xf32>
    %300 = arith.mulf %295, %299 : vector<16x20xf32>
    %cst_100 = arith.constant 0.000000e+00 : f32
    %301 = vector.shape_cast %281 : vector<1x32xi1> to vector<1x32xi1>
    %302 = vector.broadcast %301 : vector<1x32xi1> to vector<20x32xi1>
    %303 = vector.broadcast %cst_100 : f32 to vector<20x32xf32>
    %304 = arith.select %302, %244, %303 : vector<20x32xi1>, vector<20x32xf32>
    %cst_101 = arith.constant dense<0.000000e+00> : vector<16x32xf32>
    %305 = tpu.matmul %300, %304, %cst_101 {dimension_numbers = #tpu.dot_dimension_numbers<[1], [0], [0], [1], [0, 0, 1, 1], [], []>, precision = #tpu.contract_precision<fp32>} : vector<16x20xf32>, vector<20x32xf32>, vector<16x32xf32> -> vector<16x32xf32>
    %306 = arith.addf %276, %305 : vector<16x32xf32>
    %c16_i32_102 = arith.constant 16 : i32
    %307 = vector.broadcast %c16_i32_102 : i32 to vector<1x32xi32>
    %308 = arith.cmpi sge, %30, %307 : vector<1x32xi32>
    %c24_i32_103 = arith.constant 24 : i32
    %309 = vector.broadcast %c24_i32_103 : i32 to vector<1x32xi32>
    %310 = arith.cmpi slt, %30, %309 : vector<1x32xi32>
    %311 = arith.andi %308, %310 : vector<1x32xi1>
    %cst_104 = arith.constant 0.000000e+00 : f32
    %312 = vector.shape_cast %311 : vector<1x32xi1> to vector<1x32xi1>
    %313 = vector.broadcast %312 : vector<1x32xi1> to vector<16x32xi1>
    %314 = vector.broadcast %cst_104 : f32 to vector<16x32xf32>
    %315 = arith.select %313, %237, %314 : vector<16x32xi1>, vector<16x32xf32>
    %cst_105 = arith.constant dense<0.000000e+00> : vector<16x20xf32>
    %316 = tpu.matmul %315, %245, %cst_105 {dimension_numbers = #tpu.dot_dimension_numbers<[1], [0], [0], [1], [0, 0, 1, 1], [], []>, precision = #tpu.contract_precision<fp32>} : vector<16x32xf32>, vector<32x20xf32>, vector<16x20xf32> -> vector<16x20xf32>
    %cst_106 = arith.constant 0.353553385 : f32
    %317 = vector.broadcast %cst_106 : f32 to vector<16x20xf32>
    %318 = arith.mulf %316, %317 : vector<16x20xf32>
    %cst_107 = arith.constant -1.000000e+09 : f32
    %319 = vector.broadcast %cst_107 : f32 to vector<16x20xf32>
    %320 = arith.select %29, %318, %319 : vector<16x20xi1>, vector<16x20xf32>
    %cst_108 = arith.constant dense<0xFF800000> : vector<16xf32>
    %321 = vector.multi_reduction <maximumf>, %320, %cst_108 [1] : vector<16x20xf32> to vector<16xf32>
    %322 = vector.shape_cast %321 : vector<16xf32> to vector<16x1xf32>
    %323 = vector.broadcast %322 : vector<16x1xf32> to vector<16x20xf32>
    %324 = arith.subf %320, %323 : vector<16x20xf32>
    %325 = math.exp %324 : vector<16x20xf32>
    %cst_109 = arith.constant dense<0.000000e+00> : vector<16xf32>
    %326 = vector.multi_reduction <add>, %325, %cst_109 [1] : vector<16x20xf32> to vector<16xf32>
    %327 = vector.shape_cast %326 : vector<16xf32> to vector<16x1xf32>
    %328 = tpu.reciprocal %327 {approx = true} : vector<16x1xf32> -> vector<16x1xf32>
    %329 = vector.broadcast %328 : vector<16x1xf32> to vector<16x20xf32>
    %330 = arith.mulf %325, %329 : vector<16x20xf32>
    %cst_110 = arith.constant 0.000000e+00 : f32
    %331 = vector.shape_cast %311 : vector<1x32xi1> to vector<1x32xi1>
    %332 = vector.broadcast %331 : vector<1x32xi1> to vector<20x32xi1>
    %333 = vector.broadcast %cst_110 : f32 to vector<20x32xf32>
    %334 = arith.select %332, %244, %333 : vector<20x32xi1>, vector<20x32xf32>
    %cst_111 = arith.constant dense<0.000000e+00> : vector<16x32xf32>
    %335 = tpu.matmul %330, %334, %cst_111 {dimension_numbers = #tpu.dot_dimension_numbers<[1], [0], [0], [1], [0, 0, 1, 1], [], []>, precision = #tpu.contract_precision<fp32>} : vector<16x20xf32>, vector<20x32xf32>, vector<16x32xf32> -> vector<16x32xf32>
    %336 = arith.addf %306, %335 : vector<16x32xf32>
    %c24_i32_112 = arith.constant 24 : i32
    %337 = vector.broadcast %c24_i32_112 : i32 to vector<1x32xi32>
    %338 = arith.cmpi sge, %30, %337 : vector<1x32xi32>
    %c32_i32_113 = arith.constant 32 : i32
    %339 = vector.broadcast %c32_i32_113 : i32 to vector<1x32xi32>
    %340 = arith.cmpi slt, %30, %339 : vector<1x32xi32>
    %341 = arith.andi %338, %340 : vector<1x32xi1>
    %cst_114 = arith.constant 0.000000e+00 : f32
    %342 = vector.shape_cast %341 : vector<1x32xi1> to vector<1x32xi1>
    %343 = vector.broadcast %342 : vector<1x32xi1> to vector<16x32xi1>
    %344 = vector.broadcast %cst_114 : f32 to vector<16x32xf32>
    %345 = arith.select %343, %237, %344 : vector<16x32xi1>, vector<16x32xf32>
    %cst_115 = arith.constant dense<0.000000e+00> : vector<16x20xf32>
    %346 = tpu.matmul %345, %245, %cst_115 {dimension_numbers = #tpu.dot_dimension_numbers<[1], [0], [0], [1], [0, 0, 1, 1], [], []>, precision = #tpu.contract_precision<fp32>} : vector<16x32xf32>, vector<32x20xf32>, vector<16x20xf32> -> vector<16x20xf32>
    %cst_116 = arith.constant 0.353553385 : f32
    %347 = vector.broadcast %cst_116 : f32 to vector<16x20xf32>
    %348 = arith.mulf %346, %347 : vector<16x20xf32>
    %cst_117 = arith.constant -1.000000e+09 : f32
    %349 = vector.broadcast %cst_117 : f32 to vector<16x20xf32>
    %350 = arith.select %29, %348, %349 : vector<16x20xi1>, vector<16x20xf32>
    %cst_118 = arith.constant dense<0xFF800000> : vector<16xf32>
    %351 = vector.multi_reduction <maximumf>, %350, %cst_118 [1] : vector<16x20xf32> to vector<16xf32>
    %352 = vector.shape_cast %351 : vector<16xf32> to vector<16x1xf32>
    %353 = vector.broadcast %352 : vector<16x1xf32> to vector<16x20xf32>
    %354 = arith.subf %350, %353 : vector<16x20xf32>
    %355 = math.exp %354 : vector<16x20xf32>
    %cst_119 = arith.constant dense<0.000000e+00> : vector<16xf32>
    %356 = vector.multi_reduction <add>, %355, %cst_119 [1] : vector<16x20xf32> to vector<16xf32>
    %357 = vector.shape_cast %356 : vector<16xf32> to vector<16x1xf32>
    %358 = tpu.reciprocal %357 {approx = true} : vector<16x1xf32> -> vector<16x1xf32>
    %359 = vector.broadcast %358 : vector<16x1xf32> to vector<16x20xf32>
    %360 = arith.mulf %355, %359 : vector<16x20xf32>
    %cst_120 = arith.constant 0.000000e+00 : f32
    %361 = vector.shape_cast %341 : vector<1x32xi1> to vector<1x32xi1>
    %362 = vector.broadcast %361 : vector<1x32xi1> to vector<20x32xi1>
    %363 = vector.broadcast %cst_120 : f32 to vector<20x32xf32>
    %364 = arith.select %362, %244, %363 : vector<20x32xi1>, vector<20x32xf32>
    %cst_121 = arith.constant dense<0.000000e+00> : vector<16x32xf32>
    %365 = tpu.matmul %360, %364, %cst_121 {dimension_numbers = #tpu.dot_dimension_numbers<[1], [0], [0], [1], [0, 0, 1, 1], [], []>, precision = #tpu.contract_precision<fp32>} : vector<16x20xf32>, vector<20x32xf32>, vector<16x32xf32> -> vector<16x32xf32>
    %366 = arith.addf %336, %365 : vector<16x32xf32>
    %367 = vector.extract_strided_slice %54 {offsets = [0, 96], sizes = [32, 32], strides = [1, 1]} : vector<32x128xf32> to vector<32x32xf32>
    %cst_122 = arith.constant dense<0.000000e+00> : vector<16x32xf32>
    %368 = tpu.matmul %366, %367, %cst_122 {dimension_numbers = #tpu.dot_dimension_numbers<[1], [0], [0], [1], [0, 0, 1, 1], [], []>, precision = #tpu.contract_precision<fp32>} : vector<16x32xf32>, vector<32x32xf32>, vector<16x32xf32> -> vector<16x32xf32>
    %369 = arith.addf %212, %368 : vector<16x32xf32>
    %370 = vector.extract_strided_slice %56 {offsets = [0, 96], sizes = [1, 32], strides = [1, 1]} : vector<1x128xf32> to vector<1x32xf32>
    %371 = vector.broadcast %370 : vector<1x32xf32> to vector<16x32xf32>
    %372 = arith.addf %369, %371 : vector<16x32xf32>
    %cst_123 = arith.constant dense<0.000000e+00> : vector<16xf32>
    %373 = vector.multi_reduction <add>, %372, %cst_123 [1] : vector<16x32xf32> to vector<16xf32>
    %374 = vector.shape_cast %373 : vector<16xf32> to vector<16x1xf32>
    %cst_124 = arith.constant 3.200000e+01 : f32
    %375 = vector.broadcast %cst_124 : f32 to vector<16x1xf32>
    %376 = arith.divf %374, %375 : vector<16x1xf32>
    %377 = vector.broadcast %376 : vector<16x1xf32> to vector<16x32xf32>
    %378 = arith.subf %372, %377 : vector<16x32xf32>
    %379 = arith.mulf %378, %378 : vector<16x32xf32>
    %cst_125 = arith.constant dense<0.000000e+00> : vector<16xf32>
    %380 = vector.multi_reduction <add>, %379, %cst_125 [1] : vector<16x32xf32> to vector<16xf32>
    %381 = vector.shape_cast %380 : vector<16xf32> to vector<16x1xf32>
    %cst_126 = arith.constant 3.200000e+01 : f32
    %382 = vector.broadcast %cst_126 : f32 to vector<16x1xf32>
    %383 = arith.divf %381, %382 : vector<16x1xf32>
    %cst_127 = arith.constant 9.99999974E-6 : f32
    %384 = vector.broadcast %cst_127 : f32 to vector<16x1xf32>
    %385 = arith.addf %383, %384 : vector<16x1xf32>
    %386 = math.rsqrt %385 : vector<16x1xf32>
    %387 = vector.broadcast %386 : vector<16x1xf32> to vector<16x32xf32>
    %388 = arith.mulf %378, %387 : vector<16x32xf32>
    %389 = vector.broadcast %46 : vector<1x32xf32> to vector<16x32xf32>
    %390 = arith.mulf %388, %389 : vector<16x32xf32>
    %391 = vector.broadcast %48 : vector<1x32xf32> to vector<16x32xf32>
    %392 = arith.addf %390, %391 : vector<16x32xf32>
    %393 = vector.extract_strided_slice %34 {offsets = [0, 0, 0], sizes = [1, 32, 64], strides = [1, 1, 1]} : vector<2x32x64xf32> to vector<1x32x64xf32>
    %394 = vector.shape_cast %393 : vector<1x32x64xf32> to vector<32x64xf32>
    %cst_128 = arith.constant dense<0.000000e+00> : vector<16x64xf32>
    %395 = tpu.matmul %392, %394, %cst_128 {dimension_numbers = #tpu.dot_dimension_numbers<[1], [0], [0], [1], [0, 0, 1, 1], [], []>, precision = #tpu.contract_precision<fp32>} : vector<16x32xf32>, vector<32x64xf32>, vector<16x64xf32> -> vector<16x64xf32>
    %396 = vector.extract_strided_slice %36 {offsets = [0, 0, 0], sizes = [1, 1, 96], strides = [1, 1, 1]} : vector<2x1x96xf32> to vector<1x1x96xf32>
    %397 = vector.shape_cast %396 : vector<1x1x96xf32> to vector<1x96xf32>
    %398 = vector.extract_strided_slice %397 {offsets = [0, 0], sizes = [1, 64], strides = [1, 1]} : vector<1x96xf32> to vector<1x64xf32>
    %399 = vector.broadcast %398 : vector<1x64xf32> to vector<16x64xf32>
    %400 = arith.addf %395, %399 : vector<16x64xf32>
    %cst_129 = arith.constant 0.000000e+00 : f32
    %401 = vector.broadcast %cst_129 : f32 to vector<16x64xf32>
    %402 = arith.maximumf %400, %401 : vector<16x64xf32>
    %403 = vector.extract_strided_slice %35 {offsets = [0, 0, 0], sizes = [1, 64, 32], strides = [1, 1, 1]} : vector<2x64x32xf32> to vector<1x64x32xf32>
    %404 = vector.shape_cast %403 : vector<1x64x32xf32> to vector<64x32xf32>
    %cst_130 = arith.constant dense<0.000000e+00> : vector<16x32xf32>
    %405 = tpu.matmul %402, %404, %cst_130 {dimension_numbers = #tpu.dot_dimension_numbers<[1], [0], [0], [1], [0, 0, 1, 1], [], []>, precision = #tpu.contract_precision<fp32>} : vector<16x64xf32>, vector<64x32xf32>, vector<16x32xf32> -> vector<16x32xf32>
    %406 = arith.addf %372, %405 : vector<16x32xf32>
    %407 = vector.extract_strided_slice %36 {offsets = [0, 0, 0], sizes = [1, 1, 96], strides = [1, 1, 1]} : vector<2x1x96xf32> to vector<1x1x96xf32>
    %408 = vector.shape_cast %407 : vector<1x1x96xf32> to vector<1x96xf32>
    %409 = vector.extract_strided_slice %408 {offsets = [0, 64], sizes = [1, 32], strides = [1, 1]} : vector<1x96xf32> to vector<1x32xf32>
    %410 = vector.broadcast %409 : vector<1x32xf32> to vector<16x32xf32>
    %411 = arith.addf %406, %410 : vector<16x32xf32>
    %412 = vector.extract_strided_slice %33 {offsets = [1, 0, 0, 0], sizes = [1, 1, 1, 32], strides = [1, 1, 1, 1]} : vector<2x6x1x32xf32> to vector<1x1x1x32xf32>
    %413 = vector.shape_cast %412 : vector<1x1x1x32xf32> to vector<1x32xf32>
    %414 = vector.extract_strided_slice %33 {offsets = [1, 1, 0, 0], sizes = [1, 1, 1, 32], strides = [1, 1, 1, 1]} : vector<2x6x1x32xf32> to vector<1x1x1x32xf32>
    %415 = vector.shape_cast %414 : vector<1x1x1x32xf32> to vector<1x32xf32>
    %416 = vector.extract_strided_slice %33 {offsets = [1, 2, 0, 0], sizes = [1, 1, 1, 32], strides = [1, 1, 1, 1]} : vector<2x6x1x32xf32> to vector<1x1x1x32xf32>
    %417 = vector.shape_cast %416 : vector<1x1x1x32xf32> to vector<1x32xf32>
    %418 = vector.extract_strided_slice %33 {offsets = [1, 3, 0, 0], sizes = [1, 1, 1, 32], strides = [1, 1, 1, 1]} : vector<2x6x1x32xf32> to vector<1x1x1x32xf32>
    %419 = vector.shape_cast %418 : vector<1x1x1x32xf32> to vector<1x32xf32>
    %420 = vector.extract_strided_slice %33 {offsets = [1, 4, 0, 0], sizes = [1, 1, 1, 32], strides = [1, 1, 1, 1]} : vector<2x6x1x32xf32> to vector<1x1x1x32xf32>
    %421 = vector.shape_cast %420 : vector<1x1x1x32xf32> to vector<1x32xf32>
    %422 = vector.extract_strided_slice %33 {offsets = [1, 5, 0, 0], sizes = [1, 1, 1, 32], strides = [1, 1, 1, 1]} : vector<2x6x1x32xf32> to vector<1x1x1x32xf32>
    %423 = vector.shape_cast %422 : vector<1x1x1x32xf32> to vector<1x32xf32>
    %424 = vector.extract_strided_slice %31 {offsets = [1, 0, 0, 0], sizes = [1, 1, 32, 128], strides = [1, 1, 1, 1]} : vector<2x2x32x128xf32> to vector<1x1x32x128xf32>
    %425 = vector.shape_cast %424 : vector<1x1x32x128xf32> to vector<32x128xf32>
    %426 = vector.extract_strided_slice %32 {offsets = [1, 0, 0, 0], sizes = [1, 1, 1, 128], strides = [1, 1, 1, 1]} : vector<2x2x1x128xf32> to vector<1x1x1x128xf32>
    %427 = vector.shape_cast %426 : vector<1x1x1x128xf32> to vector<1x128xf32>
    %428 = vector.extract_strided_slice %31 {offsets = [1, 1, 0, 0], sizes = [1, 1, 32, 128], strides = [1, 1, 1, 1]} : vector<2x2x32x128xf32> to vector<1x1x32x128xf32>
    %429 = vector.shape_cast %428 : vector<1x1x32x128xf32> to vector<32x128xf32>
    %430 = vector.extract_strided_slice %32 {offsets = [1, 1, 0, 0], sizes = [1, 1, 1, 128], strides = [1, 1, 1, 1]} : vector<2x2x1x128xf32> to vector<1x1x1x128xf32>
    %431 = vector.shape_cast %430 : vector<1x1x1x128xf32> to vector<1x128xf32>
    %cst_131 = arith.constant dense<0.000000e+00> : vector<16xf32>
    %432 = vector.multi_reduction <add>, %411, %cst_131 [1] : vector<16x32xf32> to vector<16xf32>
    %433 = vector.shape_cast %432 : vector<16xf32> to vector<16x1xf32>
    %cst_132 = arith.constant 3.200000e+01 : f32
    %434 = vector.broadcast %cst_132 : f32 to vector<16x1xf32>
    %435 = arith.divf %433, %434 : vector<16x1xf32>
    %436 = vector.broadcast %435 : vector<16x1xf32> to vector<16x32xf32>
    %437 = arith.subf %411, %436 : vector<16x32xf32>
    %438 = arith.mulf %437, %437 : vector<16x32xf32>
    %cst_133 = arith.constant dense<0.000000e+00> : vector<16xf32>
    %439 = vector.multi_reduction <add>, %438, %cst_133 [1] : vector<16x32xf32> to vector<16xf32>
    %440 = vector.shape_cast %439 : vector<16xf32> to vector<16x1xf32>
    %cst_134 = arith.constant 3.200000e+01 : f32
    %441 = vector.broadcast %cst_134 : f32 to vector<16x1xf32>
    %442 = arith.divf %440, %441 : vector<16x1xf32>
    %cst_135 = arith.constant 9.99999974E-6 : f32
    %443 = vector.broadcast %cst_135 : f32 to vector<16x1xf32>
    %444 = arith.addf %442, %443 : vector<16x1xf32>
    %445 = math.rsqrt %444 : vector<16x1xf32>
    %446 = vector.broadcast %445 : vector<16x1xf32> to vector<16x32xf32>
    %447 = arith.mulf %437, %446 : vector<16x32xf32>
    %448 = vector.broadcast %413 : vector<1x32xf32> to vector<16x32xf32>
    %449 = arith.mulf %447, %448 : vector<16x32xf32>
    %450 = vector.broadcast %415 : vector<1x32xf32> to vector<16x32xf32>
    %451 = arith.addf %449, %450 : vector<16x32xf32>
    %452 = vector.extract_strided_slice %425 {offsets = [0, 0], sizes = [32, 96], strides = [1, 1]} : vector<32x128xf32> to vector<32x96xf32>
    %cst_136 = arith.constant dense<0.000000e+00> : vector<16x96xf32>
    %453 = tpu.matmul %451, %452, %cst_136 {dimension_numbers = #tpu.dot_dimension_numbers<[1], [0], [0], [1], [0, 0, 1, 1], [], []>, precision = #tpu.contract_precision<fp32>} : vector<16x32xf32>, vector<32x96xf32>, vector<16x96xf32> -> vector<16x96xf32>
    %454 = vector.extract_strided_slice %427 {offsets = [0, 0], sizes = [1, 96], strides = [1, 1]} : vector<1x128xf32> to vector<1x96xf32>
    %455 = vector.broadcast %454 : vector<1x96xf32> to vector<16x96xf32>
    %456 = arith.addf %453, %455 : vector<16x96xf32>
    %457 = vector.extract_strided_slice %456 {offsets = [0, 0], sizes = [16, 32], strides = [1, 1]} : vector<16x96xf32> to vector<16x32xf32>
    %458 = vector.extract_strided_slice %456 {offsets = [0, 32], sizes = [16, 32], strides = [1, 1]} : vector<16x96xf32> to vector<16x32xf32>
    %459 = vector.extract_strided_slice %456 {offsets = [0, 64], sizes = [16, 32], strides = [1, 1]} : vector<16x96xf32> to vector<16x32xf32>
    %460 = tpu.transpose %458, [1, 0] : vector<16x32xf32> -> vector<32x16xf32>
    %cst_137 = arith.constant 0.000000e+00 : f32
    %461 = vector.broadcast %cst_137 : f32 to vector<16x32xf32>
    %c0_i32_138 = arith.constant 0 : i32
    %462 = vector.broadcast %c0_i32_138 : i32 to vector<1x32xi32>
    %463 = arith.cmpi sge, %30, %462 : vector<1x32xi32>
    %c8_i32_139 = arith.constant 8 : i32
    %464 = vector.broadcast %c8_i32_139 : i32 to vector<1x32xi32>
    %465 = arith.cmpi slt, %30, %464 : vector<1x32xi32>
    %466 = arith.andi %463, %465 : vector<1x32xi1>
    %cst_140 = arith.constant 0.000000e+00 : f32
    %467 = vector.shape_cast %466 : vector<1x32xi1> to vector<1x32xi1>
    %468 = vector.broadcast %467 : vector<1x32xi1> to vector<16x32xi1>
    %469 = vector.broadcast %cst_140 : f32 to vector<16x32xf32>
    %470 = arith.select %468, %457, %469 : vector<16x32xi1>, vector<16x32xf32>
    %cst_141 = arith.constant dense<0.000000e+00> : vector<16x16xf32>
    %471 = tpu.matmul %470, %460, %cst_141 {dimension_numbers = #tpu.dot_dimension_numbers<[1], [0], [0], [1], [0, 0, 1, 1], [], []>, precision = #tpu.contract_precision<fp32>} : vector<16x32xf32>, vector<32x16xf32>, vector<16x16xf32> -> vector<16x16xf32>
    %cst_142 = arith.constant 0.353553385 : f32
    %472 = vector.broadcast %cst_142 : f32 to vector<16x16xf32>
    %473 = arith.mulf %471, %472 : vector<16x16xf32>
    %cst_143 = arith.constant -1.000000e+09 : f32
    %474 = vector.broadcast %cst_143 : f32 to vector<16x16xf32>
    %475 = arith.select %22, %473, %474 : vector<16x16xi1>, vector<16x16xf32>
    %cst_144 = arith.constant dense<0xFF800000> : vector<16xf32>
    %476 = vector.multi_reduction <maximumf>, %475, %cst_144 [1] : vector<16x16xf32> to vector<16xf32>
    %477 = vector.shape_cast %476 : vector<16xf32> to vector<16x1xf32>
    %478 = vector.broadcast %477 : vector<16x1xf32> to vector<16x16xf32>
    %479 = arith.subf %475, %478 : vector<16x16xf32>
    %480 = math.exp %479 : vector<16x16xf32>
    %cst_145 = arith.constant dense<0.000000e+00> : vector<16xf32>
    %481 = vector.multi_reduction <add>, %480, %cst_145 [1] : vector<16x16xf32> to vector<16xf32>
    %482 = vector.shape_cast %481 : vector<16xf32> to vector<16x1xf32>
    %483 = tpu.reciprocal %482 {approx = true} : vector<16x1xf32> -> vector<16x1xf32>
    %484 = vector.broadcast %483 : vector<16x1xf32> to vector<16x16xf32>
    %485 = arith.mulf %480, %484 : vector<16x16xf32>
    %cst_146 = arith.constant 0.000000e+00 : f32
    %486 = vector.shape_cast %466 : vector<1x32xi1> to vector<1x32xi1>
    %487 = vector.broadcast %486 : vector<1x32xi1> to vector<16x32xi1>
    %488 = vector.broadcast %cst_146 : f32 to vector<16x32xf32>
    %489 = arith.select %487, %459, %488 : vector<16x32xi1>, vector<16x32xf32>
    %cst_147 = arith.constant dense<0.000000e+00> : vector<16x32xf32>
    %490 = tpu.matmul %485, %489, %cst_147 {dimension_numbers = #tpu.dot_dimension_numbers<[1], [0], [0], [1], [0, 0, 1, 1], [], []>, precision = #tpu.contract_precision<fp32>} : vector<16x16xf32>, vector<16x32xf32>, vector<16x32xf32> -> vector<16x32xf32>
    %491 = arith.addf %461, %490 : vector<16x32xf32>
    %c8_i32_148 = arith.constant 8 : i32
    %492 = vector.broadcast %c8_i32_148 : i32 to vector<1x32xi32>
    %493 = arith.cmpi sge, %30, %492 : vector<1x32xi32>
    %c16_i32_149 = arith.constant 16 : i32
    %494 = vector.broadcast %c16_i32_149 : i32 to vector<1x32xi32>
    %495 = arith.cmpi slt, %30, %494 : vector<1x32xi32>
    %496 = arith.andi %493, %495 : vector<1x32xi1>
    %cst_150 = arith.constant 0.000000e+00 : f32
    %497 = vector.shape_cast %496 : vector<1x32xi1> to vector<1x32xi1>
    %498 = vector.broadcast %497 : vector<1x32xi1> to vector<16x32xi1>
    %499 = vector.broadcast %cst_150 : f32 to vector<16x32xf32>
    %500 = arith.select %498, %457, %499 : vector<16x32xi1>, vector<16x32xf32>
    %cst_151 = arith.constant dense<0.000000e+00> : vector<16x16xf32>
    %501 = tpu.matmul %500, %460, %cst_151 {dimension_numbers = #tpu.dot_dimension_numbers<[1], [0], [0], [1], [0, 0, 1, 1], [], []>, precision = #tpu.contract_precision<fp32>} : vector<16x32xf32>, vector<32x16xf32>, vector<16x16xf32> -> vector<16x16xf32>
    %cst_152 = arith.constant 0.353553385 : f32
    %502 = vector.broadcast %cst_152 : f32 to vector<16x16xf32>
    %503 = arith.mulf %501, %502 : vector<16x16xf32>
    %cst_153 = arith.constant -1.000000e+09 : f32
    %504 = vector.broadcast %cst_153 : f32 to vector<16x16xf32>
    %505 = arith.select %22, %503, %504 : vector<16x16xi1>, vector<16x16xf32>
    %cst_154 = arith.constant dense<0xFF800000> : vector<16xf32>
    %506 = vector.multi_reduction <maximumf>, %505, %cst_154 [1] : vector<16x16xf32> to vector<16xf32>
    %507 = vector.shape_cast %506 : vector<16xf32> to vector<16x1xf32>
    %508 = vector.broadcast %507 : vector<16x1xf32> to vector<16x16xf32>
    %509 = arith.subf %505, %508 : vector<16x16xf32>
    %510 = math.exp %509 : vector<16x16xf32>
    %cst_155 = arith.constant dense<0.000000e+00> : vector<16xf32>
    %511 = vector.multi_reduction <add>, %510, %cst_155 [1] : vector<16x16xf32> to vector<16xf32>
    %512 = vector.shape_cast %511 : vector<16xf32> to vector<16x1xf32>
    %513 = tpu.reciprocal %512 {approx = true} : vector<16x1xf32> -> vector<16x1xf32>
    %514 = vector.broadcast %513 : vector<16x1xf32> to vector<16x16xf32>
    %515 = arith.mulf %510, %514 : vector<16x16xf32>
    %cst_156 = arith.constant 0.000000e+00 : f32
    %516 = vector.shape_cast %496 : vector<1x32xi1> to vector<1x32xi1>
    %517 = vector.broadcast %516 : vector<1x32xi1> to vector<16x32xi1>
    %518 = vector.broadcast %cst_156 : f32 to vector<16x32xf32>
    %519 = arith.select %517, %459, %518 : vector<16x32xi1>, vector<16x32xf32>
    %cst_157 = arith.constant dense<0.000000e+00> : vector<16x32xf32>
    %520 = tpu.matmul %515, %519, %cst_157 {dimension_numbers = #tpu.dot_dimension_numbers<[1], [0], [0], [1], [0, 0, 1, 1], [], []>, precision = #tpu.contract_precision<fp32>} : vector<16x16xf32>, vector<16x32xf32>, vector<16x32xf32> -> vector<16x32xf32>
    %521 = arith.addf %491, %520 : vector<16x32xf32>
    %c16_i32_158 = arith.constant 16 : i32
    %522 = vector.broadcast %c16_i32_158 : i32 to vector<1x32xi32>
    %523 = arith.cmpi sge, %30, %522 : vector<1x32xi32>
    %c24_i32_159 = arith.constant 24 : i32
    %524 = vector.broadcast %c24_i32_159 : i32 to vector<1x32xi32>
    %525 = arith.cmpi slt, %30, %524 : vector<1x32xi32>
    %526 = arith.andi %523, %525 : vector<1x32xi1>
    %cst_160 = arith.constant 0.000000e+00 : f32
    %527 = vector.shape_cast %526 : vector<1x32xi1> to vector<1x32xi1>
    %528 = vector.broadcast %527 : vector<1x32xi1> to vector<16x32xi1>
    %529 = vector.broadcast %cst_160 : f32 to vector<16x32xf32>
    %530 = arith.select %528, %457, %529 : vector<16x32xi1>, vector<16x32xf32>
    %cst_161 = arith.constant dense<0.000000e+00> : vector<16x16xf32>
    %531 = tpu.matmul %530, %460, %cst_161 {dimension_numbers = #tpu.dot_dimension_numbers<[1], [0], [0], [1], [0, 0, 1, 1], [], []>, precision = #tpu.contract_precision<fp32>} : vector<16x32xf32>, vector<32x16xf32>, vector<16x16xf32> -> vector<16x16xf32>
    %cst_162 = arith.constant 0.353553385 : f32
    %532 = vector.broadcast %cst_162 : f32 to vector<16x16xf32>
    %533 = arith.mulf %531, %532 : vector<16x16xf32>
    %cst_163 = arith.constant -1.000000e+09 : f32
    %534 = vector.broadcast %cst_163 : f32 to vector<16x16xf32>
    %535 = arith.select %22, %533, %534 : vector<16x16xi1>, vector<16x16xf32>
    %cst_164 = arith.constant dense<0xFF800000> : vector<16xf32>
    %536 = vector.multi_reduction <maximumf>, %535, %cst_164 [1] : vector<16x16xf32> to vector<16xf32>
    %537 = vector.shape_cast %536 : vector<16xf32> to vector<16x1xf32>
    %538 = vector.broadcast %537 : vector<16x1xf32> to vector<16x16xf32>
    %539 = arith.subf %535, %538 : vector<16x16xf32>
    %540 = math.exp %539 : vector<16x16xf32>
    %cst_165 = arith.constant dense<0.000000e+00> : vector<16xf32>
    %541 = vector.multi_reduction <add>, %540, %cst_165 [1] : vector<16x16xf32> to vector<16xf32>
    %542 = vector.shape_cast %541 : vector<16xf32> to vector<16x1xf32>
    %543 = tpu.reciprocal %542 {approx = true} : vector<16x1xf32> -> vector<16x1xf32>
    %544 = vector.broadcast %543 : vector<16x1xf32> to vector<16x16xf32>
    %545 = arith.mulf %540, %544 : vector<16x16xf32>
    %cst_166 = arith.constant 0.000000e+00 : f32
    %546 = vector.shape_cast %526 : vector<1x32xi1> to vector<1x32xi1>
    %547 = vector.broadcast %546 : vector<1x32xi1> to vector<16x32xi1>
    %548 = vector.broadcast %cst_166 : f32 to vector<16x32xf32>
    %549 = arith.select %547, %459, %548 : vector<16x32xi1>, vector<16x32xf32>
    %cst_167 = arith.constant dense<0.000000e+00> : vector<16x32xf32>
    %550 = tpu.matmul %545, %549, %cst_167 {dimension_numbers = #tpu.dot_dimension_numbers<[1], [0], [0], [1], [0, 0, 1, 1], [], []>, precision = #tpu.contract_precision<fp32>} : vector<16x16xf32>, vector<16x32xf32>, vector<16x32xf32> -> vector<16x32xf32>
    %551 = arith.addf %521, %550 : vector<16x32xf32>
    %c24_i32_168 = arith.constant 24 : i32
    %552 = vector.broadcast %c24_i32_168 : i32 to vector<1x32xi32>
    %553 = arith.cmpi sge, %30, %552 : vector<1x32xi32>
    %c32_i32_169 = arith.constant 32 : i32
    %554 = vector.broadcast %c32_i32_169 : i32 to vector<1x32xi32>
    %555 = arith.cmpi slt, %30, %554 : vector<1x32xi32>
    %556 = arith.andi %553, %555 : vector<1x32xi1>
    %cst_170 = arith.constant 0.000000e+00 : f32
    %557 = vector.shape_cast %556 : vector<1x32xi1> to vector<1x32xi1>
    %558 = vector.broadcast %557 : vector<1x32xi1> to vector<16x32xi1>
    %559 = vector.broadcast %cst_170 : f32 to vector<16x32xf32>
    %560 = arith.select %558, %457, %559 : vector<16x32xi1>, vector<16x32xf32>
    %cst_171 = arith.constant dense<0.000000e+00> : vector<16x16xf32>
    %561 = tpu.matmul %560, %460, %cst_171 {dimension_numbers = #tpu.dot_dimension_numbers<[1], [0], [0], [1], [0, 0, 1, 1], [], []>, precision = #tpu.contract_precision<fp32>} : vector<16x32xf32>, vector<32x16xf32>, vector<16x16xf32> -> vector<16x16xf32>
    %cst_172 = arith.constant 0.353553385 : f32
    %562 = vector.broadcast %cst_172 : f32 to vector<16x16xf32>
    %563 = arith.mulf %561, %562 : vector<16x16xf32>
    %cst_173 = arith.constant -1.000000e+09 : f32
    %564 = vector.broadcast %cst_173 : f32 to vector<16x16xf32>
    %565 = arith.select %22, %563, %564 : vector<16x16xi1>, vector<16x16xf32>
    %cst_174 = arith.constant dense<0xFF800000> : vector<16xf32>
    %566 = vector.multi_reduction <maximumf>, %565, %cst_174 [1] : vector<16x16xf32> to vector<16xf32>
    %567 = vector.shape_cast %566 : vector<16xf32> to vector<16x1xf32>
    %568 = vector.broadcast %567 : vector<16x1xf32> to vector<16x16xf32>
    %569 = arith.subf %565, %568 : vector<16x16xf32>
    %570 = math.exp %569 : vector<16x16xf32>
    %cst_175 = arith.constant dense<0.000000e+00> : vector<16xf32>
    %571 = vector.multi_reduction <add>, %570, %cst_175 [1] : vector<16x16xf32> to vector<16xf32>
    %572 = vector.shape_cast %571 : vector<16xf32> to vector<16x1xf32>
    %573 = tpu.reciprocal %572 {approx = true} : vector<16x1xf32> -> vector<16x1xf32>
    %574 = vector.broadcast %573 : vector<16x1xf32> to vector<16x16xf32>
    %575 = arith.mulf %570, %574 : vector<16x16xf32>
    %cst_176 = arith.constant 0.000000e+00 : f32
    %576 = vector.shape_cast %556 : vector<1x32xi1> to vector<1x32xi1>
    %577 = vector.broadcast %576 : vector<1x32xi1> to vector<16x32xi1>
    %578 = vector.broadcast %cst_176 : f32 to vector<16x32xf32>
    %579 = arith.select %577, %459, %578 : vector<16x32xi1>, vector<16x32xf32>
    %cst_177 = arith.constant dense<0.000000e+00> : vector<16x32xf32>
    %580 = tpu.matmul %575, %579, %cst_177 {dimension_numbers = #tpu.dot_dimension_numbers<[1], [0], [0], [1], [0, 0, 1, 1], [], []>, precision = #tpu.contract_precision<fp32>} : vector<16x16xf32>, vector<16x32xf32>, vector<16x32xf32> -> vector<16x32xf32>
    %581 = arith.addf %551, %580 : vector<16x32xf32>
    %582 = vector.extract_strided_slice %425 {offsets = [0, 96], sizes = [32, 32], strides = [1, 1]} : vector<32x128xf32> to vector<32x32xf32>
    %cst_178 = arith.constant dense<0.000000e+00> : vector<16x32xf32>
    %583 = tpu.matmul %581, %582, %cst_178 {dimension_numbers = #tpu.dot_dimension_numbers<[1], [0], [0], [1], [0, 0, 1, 1], [], []>, precision = #tpu.contract_precision<fp32>} : vector<16x32xf32>, vector<32x32xf32>, vector<16x32xf32> -> vector<16x32xf32>
    %584 = arith.addf %411, %583 : vector<16x32xf32>
    %585 = vector.extract_strided_slice %427 {offsets = [0, 96], sizes = [1, 32], strides = [1, 1]} : vector<1x128xf32> to vector<1x32xf32>
    %586 = vector.broadcast %585 : vector<1x32xf32> to vector<16x32xf32>
    %587 = arith.addf %584, %586 : vector<16x32xf32>
    %cst_179 = arith.constant dense<0.000000e+00> : vector<16xf32>
    %588 = vector.multi_reduction <add>, %587, %cst_179 [1] : vector<16x32xf32> to vector<16xf32>
    %589 = vector.shape_cast %588 : vector<16xf32> to vector<16x1xf32>
    %cst_180 = arith.constant 3.200000e+01 : f32
    %590 = vector.broadcast %cst_180 : f32 to vector<16x1xf32>
    %591 = arith.divf %589, %590 : vector<16x1xf32>
    %592 = vector.broadcast %591 : vector<16x1xf32> to vector<16x32xf32>
    %593 = arith.subf %587, %592 : vector<16x32xf32>
    %594 = arith.mulf %593, %593 : vector<16x32xf32>
    %cst_181 = arith.constant dense<0.000000e+00> : vector<16xf32>
    %595 = vector.multi_reduction <add>, %594, %cst_181 [1] : vector<16x32xf32> to vector<16xf32>
    %596 = vector.shape_cast %595 : vector<16xf32> to vector<16x1xf32>
    %cst_182 = arith.constant 3.200000e+01 : f32
    %597 = vector.broadcast %cst_182 : f32 to vector<16x1xf32>
    %598 = arith.divf %596, %597 : vector<16x1xf32>
    %cst_183 = arith.constant 9.99999974E-6 : f32
    %599 = vector.broadcast %cst_183 : f32 to vector<16x1xf32>
    %600 = arith.addf %598, %599 : vector<16x1xf32>
    %601 = math.rsqrt %600 : vector<16x1xf32>
    %602 = vector.broadcast %601 : vector<16x1xf32> to vector<16x32xf32>
    %603 = arith.mulf %593, %602 : vector<16x32xf32>
    %604 = vector.broadcast %417 : vector<1x32xf32> to vector<16x32xf32>
    %605 = arith.mulf %603, %604 : vector<16x32xf32>
    %606 = vector.broadcast %419 : vector<1x32xf32> to vector<16x32xf32>
    %607 = arith.addf %605, %606 : vector<16x32xf32>
    %608 = vector.extract_strided_slice %429 {offsets = [0, 0], sizes = [32, 32], strides = [1, 1]} : vector<32x128xf32> to vector<32x32xf32>
    %cst_184 = arith.constant dense<0.000000e+00> : vector<16x32xf32>
    %609 = tpu.matmul %607, %608, %cst_184 {dimension_numbers = #tpu.dot_dimension_numbers<[1], [0], [0], [1], [0, 0, 1, 1], [], []>, precision = #tpu.contract_precision<fp32>} : vector<16x32xf32>, vector<32x32xf32>, vector<16x32xf32> -> vector<16x32xf32>
    %610 = vector.extract_strided_slice %431 {offsets = [0, 0], sizes = [1, 32], strides = [1, 1]} : vector<1x128xf32> to vector<1x32xf32>
    %611 = vector.broadcast %610 : vector<1x32xf32> to vector<16x32xf32>
    %612 = arith.addf %609, %611 : vector<16x32xf32>
    %613 = vector.extract_strided_slice %429 {offsets = [0, 32], sizes = [32, 64], strides = [1, 1]} : vector<32x128xf32> to vector<32x64xf32>
    %cst_185 = arith.constant dense<0.000000e+00> : vector<20x64xf32>
    %614 = tpu.matmul %1, %613, %cst_185 {dimension_numbers = #tpu.dot_dimension_numbers<[1], [0], [0], [1], [0, 0, 1, 1], [], []>, precision = #tpu.contract_precision<fp32>} : vector<20x32xf32>, vector<32x64xf32>, vector<20x64xf32> -> vector<20x64xf32>
    %615 = vector.extract_strided_slice %431 {offsets = [0, 32], sizes = [1, 64], strides = [1, 1]} : vector<1x128xf32> to vector<1x64xf32>
    %616 = vector.broadcast %615 : vector<1x64xf32> to vector<20x64xf32>
    %617 = arith.addf %614, %616 : vector<20x64xf32>
    %618 = vector.extract_strided_slice %617 {offsets = [0, 0], sizes = [20, 32], strides = [1, 1]} : vector<20x64xf32> to vector<20x32xf32>
    %619 = vector.extract_strided_slice %617 {offsets = [0, 32], sizes = [20, 32], strides = [1, 1]} : vector<20x64xf32> to vector<20x32xf32>
    %620 = tpu.transpose %618, [1, 0] : vector<20x32xf32> -> vector<32x20xf32>
    %cst_186 = arith.constant 0.000000e+00 : f32
    %621 = vector.broadcast %cst_186 : f32 to vector<16x32xf32>
    %c0_i32_187 = arith.constant 0 : i32
    %622 = vector.broadcast %c0_i32_187 : i32 to vector<1x32xi32>
    %623 = arith.cmpi sge, %30, %622 : vector<1x32xi32>
    %c8_i32_188 = arith.constant 8 : i32
    %624 = vector.broadcast %c8_i32_188 : i32 to vector<1x32xi32>
    %625 = arith.cmpi slt, %30, %624 : vector<1x32xi32>
    %626 = arith.andi %623, %625 : vector<1x32xi1>
    %cst_189 = arith.constant 0.000000e+00 : f32
    %627 = vector.shape_cast %626 : vector<1x32xi1> to vector<1x32xi1>
    %628 = vector.broadcast %627 : vector<1x32xi1> to vector<16x32xi1>
    %629 = vector.broadcast %cst_189 : f32 to vector<16x32xf32>
    %630 = arith.select %628, %612, %629 : vector<16x32xi1>, vector<16x32xf32>
    %cst_190 = arith.constant dense<0.000000e+00> : vector<16x20xf32>
    %631 = tpu.matmul %630, %620, %cst_190 {dimension_numbers = #tpu.dot_dimension_numbers<[1], [0], [0], [1], [0, 0, 1, 1], [], []>, precision = #tpu.contract_precision<fp32>} : vector<16x32xf32>, vector<32x20xf32>, vector<16x20xf32> -> vector<16x20xf32>
    %cst_191 = arith.constant 0.353553385 : f32
    %632 = vector.broadcast %cst_191 : f32 to vector<16x20xf32>
    %633 = arith.mulf %631, %632 : vector<16x20xf32>
    %cst_192 = arith.constant -1.000000e+09 : f32
    %634 = vector.broadcast %cst_192 : f32 to vector<16x20xf32>
    %635 = arith.select %29, %633, %634 : vector<16x20xi1>, vector<16x20xf32>
    %cst_193 = arith.constant dense<0xFF800000> : vector<16xf32>
    %636 = vector.multi_reduction <maximumf>, %635, %cst_193 [1] : vector<16x20xf32> to vector<16xf32>
    %637 = vector.shape_cast %636 : vector<16xf32> to vector<16x1xf32>
    %638 = vector.broadcast %637 : vector<16x1xf32> to vector<16x20xf32>
    %639 = arith.subf %635, %638 : vector<16x20xf32>
    %640 = math.exp %639 : vector<16x20xf32>
    %cst_194 = arith.constant dense<0.000000e+00> : vector<16xf32>
    %641 = vector.multi_reduction <add>, %640, %cst_194 [1] : vector<16x20xf32> to vector<16xf32>
    %642 = vector.shape_cast %641 : vector<16xf32> to vector<16x1xf32>
    %643 = tpu.reciprocal %642 {approx = true} : vector<16x1xf32> -> vector<16x1xf32>
    %644 = vector.broadcast %643 : vector<16x1xf32> to vector<16x20xf32>
    %645 = arith.mulf %640, %644 : vector<16x20xf32>
    %cst_195 = arith.constant 0.000000e+00 : f32
    %646 = vector.shape_cast %626 : vector<1x32xi1> to vector<1x32xi1>
    %647 = vector.broadcast %646 : vector<1x32xi1> to vector<20x32xi1>
    %648 = vector.broadcast %cst_195 : f32 to vector<20x32xf32>
    %649 = arith.select %647, %619, %648 : vector<20x32xi1>, vector<20x32xf32>
    %cst_196 = arith.constant dense<0.000000e+00> : vector<16x32xf32>
    %650 = tpu.matmul %645, %649, %cst_196 {dimension_numbers = #tpu.dot_dimension_numbers<[1], [0], [0], [1], [0, 0, 1, 1], [], []>, precision = #tpu.contract_precision<fp32>} : vector<16x20xf32>, vector<20x32xf32>, vector<16x32xf32> -> vector<16x32xf32>
    %651 = arith.addf %621, %650 : vector<16x32xf32>
    %c8_i32_197 = arith.constant 8 : i32
    %652 = vector.broadcast %c8_i32_197 : i32 to vector<1x32xi32>
    %653 = arith.cmpi sge, %30, %652 : vector<1x32xi32>
    %c16_i32_198 = arith.constant 16 : i32
    %654 = vector.broadcast %c16_i32_198 : i32 to vector<1x32xi32>
    %655 = arith.cmpi slt, %30, %654 : vector<1x32xi32>
    %656 = arith.andi %653, %655 : vector<1x32xi1>
    %cst_199 = arith.constant 0.000000e+00 : f32
    %657 = vector.shape_cast %656 : vector<1x32xi1> to vector<1x32xi1>
    %658 = vector.broadcast %657 : vector<1x32xi1> to vector<16x32xi1>
    %659 = vector.broadcast %cst_199 : f32 to vector<16x32xf32>
    %660 = arith.select %658, %612, %659 : vector<16x32xi1>, vector<16x32xf32>
    %cst_200 = arith.constant dense<0.000000e+00> : vector<16x20xf32>
    %661 = tpu.matmul %660, %620, %cst_200 {dimension_numbers = #tpu.dot_dimension_numbers<[1], [0], [0], [1], [0, 0, 1, 1], [], []>, precision = #tpu.contract_precision<fp32>} : vector<16x32xf32>, vector<32x20xf32>, vector<16x20xf32> -> vector<16x20xf32>
    %cst_201 = arith.constant 0.353553385 : f32
    %662 = vector.broadcast %cst_201 : f32 to vector<16x20xf32>
    %663 = arith.mulf %661, %662 : vector<16x20xf32>
    %cst_202 = arith.constant -1.000000e+09 : f32
    %664 = vector.broadcast %cst_202 : f32 to vector<16x20xf32>
    %665 = arith.select %29, %663, %664 : vector<16x20xi1>, vector<16x20xf32>
    %cst_203 = arith.constant dense<0xFF800000> : vector<16xf32>
    %666 = vector.multi_reduction <maximumf>, %665, %cst_203 [1] : vector<16x20xf32> to vector<16xf32>
    %667 = vector.shape_cast %666 : vector<16xf32> to vector<16x1xf32>
    %668 = vector.broadcast %667 : vector<16x1xf32> to vector<16x20xf32>
    %669 = arith.subf %665, %668 : vector<16x20xf32>
    %670 = math.exp %669 : vector<16x20xf32>
    %cst_204 = arith.constant dense<0.000000e+00> : vector<16xf32>
    %671 = vector.multi_reduction <add>, %670, %cst_204 [1] : vector<16x20xf32> to vector<16xf32>
    %672 = vector.shape_cast %671 : vector<16xf32> to vector<16x1xf32>
    %673 = tpu.reciprocal %672 {approx = true} : vector<16x1xf32> -> vector<16x1xf32>
    %674 = vector.broadcast %673 : vector<16x1xf32> to vector<16x20xf32>
    %675 = arith.mulf %670, %674 : vector<16x20xf32>
    %cst_205 = arith.constant 0.000000e+00 : f32
    %676 = vector.shape_cast %656 : vector<1x32xi1> to vector<1x32xi1>
    %677 = vector.broadcast %676 : vector<1x32xi1> to vector<20x32xi1>
    %678 = vector.broadcast %cst_205 : f32 to vector<20x32xf32>
    %679 = arith.select %677, %619, %678 : vector<20x32xi1>, vector<20x32xf32>
    %cst_206 = arith.constant dense<0.000000e+00> : vector<16x32xf32>
    %680 = tpu.matmul %675, %679, %cst_206 {dimension_numbers = #tpu.dot_dimension_numbers<[1], [0], [0], [1], [0, 0, 1, 1], [], []>, precision = #tpu.contract_precision<fp32>} : vector<16x20xf32>, vector<20x32xf32>, vector<16x32xf32> -> vector<16x32xf32>
    %681 = arith.addf %651, %680 : vector<16x32xf32>
    %c16_i32_207 = arith.constant 16 : i32
    %682 = vector.broadcast %c16_i32_207 : i32 to vector<1x32xi32>
    %683 = arith.cmpi sge, %30, %682 : vector<1x32xi32>
    %c24_i32_208 = arith.constant 24 : i32
    %684 = vector.broadcast %c24_i32_208 : i32 to vector<1x32xi32>
    %685 = arith.cmpi slt, %30, %684 : vector<1x32xi32>
    %686 = arith.andi %683, %685 : vector<1x32xi1>
    %cst_209 = arith.constant 0.000000e+00 : f32
    %687 = vector.shape_cast %686 : vector<1x32xi1> to vector<1x32xi1>
    %688 = vector.broadcast %687 : vector<1x32xi1> to vector<16x32xi1>
    %689 = vector.broadcast %cst_209 : f32 to vector<16x32xf32>
    %690 = arith.select %688, %612, %689 : vector<16x32xi1>, vector<16x32xf32>
    %cst_210 = arith.constant dense<0.000000e+00> : vector<16x20xf32>
    %691 = tpu.matmul %690, %620, %cst_210 {dimension_numbers = #tpu.dot_dimension_numbers<[1], [0], [0], [1], [0, 0, 1, 1], [], []>, precision = #tpu.contract_precision<fp32>} : vector<16x32xf32>, vector<32x20xf32>, vector<16x20xf32> -> vector<16x20xf32>
    %cst_211 = arith.constant 0.353553385 : f32
    %692 = vector.broadcast %cst_211 : f32 to vector<16x20xf32>
    %693 = arith.mulf %691, %692 : vector<16x20xf32>
    %cst_212 = arith.constant -1.000000e+09 : f32
    %694 = vector.broadcast %cst_212 : f32 to vector<16x20xf32>
    %695 = arith.select %29, %693, %694 : vector<16x20xi1>, vector<16x20xf32>
    %cst_213 = arith.constant dense<0xFF800000> : vector<16xf32>
    %696 = vector.multi_reduction <maximumf>, %695, %cst_213 [1] : vector<16x20xf32> to vector<16xf32>
    %697 = vector.shape_cast %696 : vector<16xf32> to vector<16x1xf32>
    %698 = vector.broadcast %697 : vector<16x1xf32> to vector<16x20xf32>
    %699 = arith.subf %695, %698 : vector<16x20xf32>
    %700 = math.exp %699 : vector<16x20xf32>
    %cst_214 = arith.constant dense<0.000000e+00> : vector<16xf32>
    %701 = vector.multi_reduction <add>, %700, %cst_214 [1] : vector<16x20xf32> to vector<16xf32>
    %702 = vector.shape_cast %701 : vector<16xf32> to vector<16x1xf32>
    %703 = tpu.reciprocal %702 {approx = true} : vector<16x1xf32> -> vector<16x1xf32>
    %704 = vector.broadcast %703 : vector<16x1xf32> to vector<16x20xf32>
    %705 = arith.mulf %700, %704 : vector<16x20xf32>
    %cst_215 = arith.constant 0.000000e+00 : f32
    %706 = vector.shape_cast %686 : vector<1x32xi1> to vector<1x32xi1>
    %707 = vector.broadcast %706 : vector<1x32xi1> to vector<20x32xi1>
    %708 = vector.broadcast %cst_215 : f32 to vector<20x32xf32>
    %709 = arith.select %707, %619, %708 : vector<20x32xi1>, vector<20x32xf32>
    %cst_216 = arith.constant dense<0.000000e+00> : vector<16x32xf32>
    %710 = tpu.matmul %705, %709, %cst_216 {dimension_numbers = #tpu.dot_dimension_numbers<[1], [0], [0], [1], [0, 0, 1, 1], [], []>, precision = #tpu.contract_precision<fp32>} : vector<16x20xf32>, vector<20x32xf32>, vector<16x32xf32> -> vector<16x32xf32>
    %711 = arith.addf %681, %710 : vector<16x32xf32>
    %c24_i32_217 = arith.constant 24 : i32
    %712 = vector.broadcast %c24_i32_217 : i32 to vector<1x32xi32>
    %713 = arith.cmpi sge, %30, %712 : vector<1x32xi32>
    %c32_i32_218 = arith.constant 32 : i32
    %714 = vector.broadcast %c32_i32_218 : i32 to vector<1x32xi32>
    %715 = arith.cmpi slt, %30, %714 : vector<1x32xi32>
    %716 = arith.andi %713, %715 : vector<1x32xi1>
    %cst_219 = arith.constant 0.000000e+00 : f32
    %717 = vector.shape_cast %716 : vector<1x32xi1> to vector<1x32xi1>
    %718 = vector.broadcast %717 : vector<1x32xi1> to vector<16x32xi1>
    %719 = vector.broadcast %cst_219 : f32 to vector<16x32xf32>
    %720 = arith.select %718, %612, %719 : vector<16x32xi1>, vector<16x32xf32>
    %cst_220 = arith.constant dense<0.000000e+00> : vector<16x20xf32>
    %721 = tpu.matmul %720, %620, %cst_220 {dimension_numbers = #tpu.dot_dimension_numbers<[1], [0], [0], [1], [0, 0, 1, 1], [], []>, precision = #tpu.contract_precision<fp32>} : vector<16x32xf32>, vector<32x20xf32>, vector<16x20xf32> -> vector<16x20xf32>
    %cst_221 = arith.constant 0.353553385 : f32
    %722 = vector.broadcast %cst_221 : f32 to vector<16x20xf32>
    %723 = arith.mulf %721, %722 : vector<16x20xf32>
    %cst_222 = arith.constant -1.000000e+09 : f32
    %724 = vector.broadcast %cst_222 : f32 to vector<16x20xf32>
    %725 = arith.select %29, %723, %724 : vector<16x20xi1>, vector<16x20xf32>
    %cst_223 = arith.constant dense<0xFF800000> : vector<16xf32>
    %726 = vector.multi_reduction <maximumf>, %725, %cst_223 [1] : vector<16x20xf32> to vector<16xf32>
    %727 = vector.shape_cast %726 : vector<16xf32> to vector<16x1xf32>
    %728 = vector.broadcast %727 : vector<16x1xf32> to vector<16x20xf32>
    %729 = arith.subf %725, %728 : vector<16x20xf32>
    %730 = math.exp %729 : vector<16x20xf32>
    %cst_224 = arith.constant dense<0.000000e+00> : vector<16xf32>
    %731 = vector.multi_reduction <add>, %730, %cst_224 [1] : vector<16x20xf32> to vector<16xf32>
    %732 = vector.shape_cast %731 : vector<16xf32> to vector<16x1xf32>
    %733 = tpu.reciprocal %732 {approx = true} : vector<16x1xf32> -> vector<16x1xf32>
    %734 = vector.broadcast %733 : vector<16x1xf32> to vector<16x20xf32>
    %735 = arith.mulf %730, %734 : vector<16x20xf32>
    %cst_225 = arith.constant 0.000000e+00 : f32
    %736 = vector.shape_cast %716 : vector<1x32xi1> to vector<1x32xi1>
    %737 = vector.broadcast %736 : vector<1x32xi1> to vector<20x32xi1>
    %738 = vector.broadcast %cst_225 : f32 to vector<20x32xf32>
    %739 = arith.select %737, %619, %738 : vector<20x32xi1>, vector<20x32xf32>
    %cst_226 = arith.constant dense<0.000000e+00> : vector<16x32xf32>
    %740 = tpu.matmul %735, %739, %cst_226 {dimension_numbers = #tpu.dot_dimension_numbers<[1], [0], [0], [1], [0, 0, 1, 1], [], []>, precision = #tpu.contract_precision<fp32>} : vector<16x20xf32>, vector<20x32xf32>, vector<16x32xf32> -> vector<16x32xf32>
    %741 = arith.addf %711, %740 : vector<16x32xf32>
    %742 = vector.extract_strided_slice %429 {offsets = [0, 96], sizes = [32, 32], strides = [1, 1]} : vector<32x128xf32> to vector<32x32xf32>
    %cst_227 = arith.constant dense<0.000000e+00> : vector<16x32xf32>
    %743 = tpu.matmul %741, %742, %cst_227 {dimension_numbers = #tpu.dot_dimension_numbers<[1], [0], [0], [1], [0, 0, 1, 1], [], []>, precision = #tpu.contract_precision<fp32>} : vector<16x32xf32>, vector<32x32xf32>, vector<16x32xf32> -> vector<16x32xf32>
    %744 = arith.addf %587, %743 : vector<16x32xf32>
    %745 = vector.extract_strided_slice %431 {offsets = [0, 96], sizes = [1, 32], strides = [1, 1]} : vector<1x128xf32> to vector<1x32xf32>
    %746 = vector.broadcast %745 : vector<1x32xf32> to vector<16x32xf32>
    %747 = arith.addf %744, %746 : vector<16x32xf32>
    %cst_228 = arith.constant dense<0.000000e+00> : vector<16xf32>
    %748 = vector.multi_reduction <add>, %747, %cst_228 [1] : vector<16x32xf32> to vector<16xf32>
    %749 = vector.shape_cast %748 : vector<16xf32> to vector<16x1xf32>
    %cst_229 = arith.constant 3.200000e+01 : f32
    %750 = vector.broadcast %cst_229 : f32 to vector<16x1xf32>
    %751 = arith.divf %749, %750 : vector<16x1xf32>
    %752 = vector.broadcast %751 : vector<16x1xf32> to vector<16x32xf32>
    %753 = arith.subf %747, %752 : vector<16x32xf32>
    %754 = arith.mulf %753, %753 : vector<16x32xf32>
    %cst_230 = arith.constant dense<0.000000e+00> : vector<16xf32>
    %755 = vector.multi_reduction <add>, %754, %cst_230 [1] : vector<16x32xf32> to vector<16xf32>
    %756 = vector.shape_cast %755 : vector<16xf32> to vector<16x1xf32>
    %cst_231 = arith.constant 3.200000e+01 : f32
    %757 = vector.broadcast %cst_231 : f32 to vector<16x1xf32>
    %758 = arith.divf %756, %757 : vector<16x1xf32>
    %cst_232 = arith.constant 9.99999974E-6 : f32
    %759 = vector.broadcast %cst_232 : f32 to vector<16x1xf32>
    %760 = arith.addf %758, %759 : vector<16x1xf32>
    %761 = math.rsqrt %760 : vector<16x1xf32>
    %762 = vector.broadcast %761 : vector<16x1xf32> to vector<16x32xf32>
    %763 = arith.mulf %753, %762 : vector<16x32xf32>
    %764 = vector.broadcast %421 : vector<1x32xf32> to vector<16x32xf32>
    %765 = arith.mulf %763, %764 : vector<16x32xf32>
    %766 = vector.broadcast %423 : vector<1x32xf32> to vector<16x32xf32>
    %767 = arith.addf %765, %766 : vector<16x32xf32>
    %768 = vector.extract_strided_slice %34 {offsets = [1, 0, 0], sizes = [1, 32, 64], strides = [1, 1, 1]} : vector<2x32x64xf32> to vector<1x32x64xf32>
    %769 = vector.shape_cast %768 : vector<1x32x64xf32> to vector<32x64xf32>
    %cst_233 = arith.constant dense<0.000000e+00> : vector<16x64xf32>
    %770 = tpu.matmul %767, %769, %cst_233 {dimension_numbers = #tpu.dot_dimension_numbers<[1], [0], [0], [1], [0, 0, 1, 1], [], []>, precision = #tpu.contract_precision<fp32>} : vector<16x32xf32>, vector<32x64xf32>, vector<16x64xf32> -> vector<16x64xf32>
    %771 = vector.extract_strided_slice %36 {offsets = [1, 0, 0], sizes = [1, 1, 96], strides = [1, 1, 1]} : vector<2x1x96xf32> to vector<1x1x96xf32>
    %772 = vector.shape_cast %771 : vector<1x1x96xf32> to vector<1x96xf32>
    %773 = vector.extract_strided_slice %772 {offsets = [0, 0], sizes = [1, 64], strides = [1, 1]} : vector<1x96xf32> to vector<1x64xf32>
    %774 = vector.broadcast %773 : vector<1x64xf32> to vector<16x64xf32>
    %775 = arith.addf %770, %774 : vector<16x64xf32>
    %cst_234 = arith.constant 0.000000e+00 : f32
    %776 = vector.broadcast %cst_234 : f32 to vector<16x64xf32>
    %777 = arith.maximumf %775, %776 : vector<16x64xf32>
    %778 = vector.extract_strided_slice %35 {offsets = [1, 0, 0], sizes = [1, 64, 32], strides = [1, 1, 1]} : vector<2x64x32xf32> to vector<1x64x32xf32>
    %779 = vector.shape_cast %778 : vector<1x64x32xf32> to vector<64x32xf32>
    %cst_235 = arith.constant dense<0.000000e+00> : vector<16x32xf32>
    %780 = tpu.matmul %777, %779, %cst_235 {dimension_numbers = #tpu.dot_dimension_numbers<[1], [0], [0], [1], [0, 0, 1, 1], [], []>, precision = #tpu.contract_precision<fp32>} : vector<16x64xf32>, vector<64x32xf32>, vector<16x32xf32> -> vector<16x32xf32>
    %781 = arith.addf %747, %780 : vector<16x32xf32>
    %782 = vector.extract_strided_slice %36 {offsets = [1, 0, 0], sizes = [1, 1, 96], strides = [1, 1, 1]} : vector<2x1x96xf32> to vector<1x1x96xf32>
    %783 = vector.shape_cast %782 : vector<1x1x96xf32> to vector<1x96xf32>
    %784 = vector.extract_strided_slice %783 {offsets = [0, 64], sizes = [1, 32], strides = [1, 1]} : vector<1x96xf32> to vector<1x32xf32>
    %785 = vector.broadcast %784 : vector<1x32xf32> to vector<16x32xf32>
    %786 = arith.addf %781, %785 : vector<16x32xf32>
    %c0_236 = arith.constant 0 : index
    %c0_237 = arith.constant 0 : index
    %787 = vector.load %arg11[%c0_236, %c0_237] : memref<16x32xf32, #tpu.memory_space<vmem>>, vector<16x32xf32>
    tpu.vector_store %arg11[%c0_236, %c0_237], %786 {strides = array<i32>} : memref<16x32xf32, #tpu.memory_space<vmem>>, vector<16x32xf32>,
    return
  }
}

</mosaic_0001>

<bundles_post_ra>
// kernel: tile.10
= control target key start
LH: loop header
LB: loop body
LE: loop exit
PB: predicated region body
PF: predicated region fallthrough
CT: control target
= control target key end

     0   :  { %vm8_vm0 = vcmask 64512   ;;  %vm14_vm1 = vcmask 130112   ;;  %s42_s0 = inlined_call_operand.vmem [shape: f32[2,8], index: 0, kind: input, shape index: {}]   ;;  %s43_s1 = inlined_call_operand.vmem [shape: f32[16,1], index: 1, kind: output, shape index: {}]  }
   0x1   :  { %v5_v0 = vld [vmem:[%s42_s0] sm:$0x3]  ;;  %s25_s0 = smov 8  }
   0x2   :  { %6 = vst [vmem:[#allocation1] sm:$0x3] %v5_v0 }
   0x9   :  { %v11_v1 = vld [vmem:[#allocation1 + $0x1] sm:$0x1]   ;;  %v7_v2 = vld [vmem:[#allocation1] sm:$0x1]  }
   0xa   :  { %12 = vrot.lane.b32.xlu0 %v11_v1, %s25_s0  ;;  %9 = vst.msk [vmem:[#allocation0] sm:$0x1] %vm8_vm0, %v7_v2  }
  0x7c   :  { %v13_v3 = vpop.permute.xlu0 %12  }
  0x7d   :  { %15 = vst.msk [vmem:[#allocation0] sm:$0x1] %vm14_vm1, %v13_v3  }
  0x84   :  { %v20_v4 = vld [vmem:[#allocation0] sm:$0x1] }
  0x85   :  { %23 = vst [vmem:[%s43_s1] sm:$0x1] %v20_v4 }

// kernel: decoder_forward_pallas.1
= control target key start
LH: loop header
LB: loop body
LE: loop exit
PB: predicated region body
PF: predicated region fallthrough
CT: control target
= control target key end

     0   :  { %vm164_vm0 = vcmask 261120   ;;  %s34060_s0 = inlined_call_operand.vmem [shape: f32[16,32], index: 0, kind: input, shape index: {}]   ;;  %s34061_s1 = inlined_call_operand.vmem [shape: f32[20,32], index: 1, kind: input, shape index: {}]   ;;  %s34062_s2 = inlined_call_operand.vmem [shape: f32[16,2], index: 2, kind: input, shape index: {}]   ;;  %s34063_s3 = inlined_call_operand.vmem [shape: f32[3,16], index: 3, kind: input, shape index: {}]   ;;  %s34064_s4 = inlined_call_operand.vmem [shape: f32[2,20], index: 4, kind: input, shape index: {}]   ;;  %s34065_s5 = inlined_call_operand.vmem [shape: f32[2,2,32,128], index: 5, kind: input, shape index: {}]   ;;  %s34066_s6 = inlined_call_operand.vmem [shape: f32[2,2,1,128], index: 6, kind: input, shape index: {}]   ;;  %s34067_s7 = inlined_call_operand.vmem [shape: f32[2,6,1,32], index: 7, kind: input, shape index: {}]   ;;  %s34068_s8 = inlined_call_operand.vmem [shape: f32[2,32,64], index: 8, kind: input, shape index: {}]   ;;  %s34069_s9 = inlined_call_operand.vmem [shape: f32[2,64,32], index: 9, kind: input, shape index: {}]   ;;  %s34070_s10 = inlined_call_operand.vmem [shape: f32[2,1,96], index: 10, kind: input, shape index: {}]   ;;  %s34071_s11 = inlined_call_operand.hbm [shape: f32[16,32], index: 11, kind: output, shape index: {}]  }
   0x1   :  { %v39_v0 = vld [vmem:[%s34060_s0] sm:$0xff]  ;;  %v40_v1 = vld [vmem:[%s34060_s0 + $0x8] sm:$0xff] }
   0x2   :  { %16 = vsyncpa [#allocation3], 0  ;;  %v165_v2 = vsel %vm164_vm0, %v39_v0, 0.0  ;;  %v168_v3 = vsel %vm164_vm0, %v40_v1, 0.0  ;;  %v109_v14 = vld [vmem:[%s34065_s5 + $0x18] sm:$0xff]  ;;  %v108_v15 = vld [vmem:[%s34065_s5 + $0x10] sm:$0xff] }
   0x3   :  { %166 = vadd.xlane.f32.xlu0 %v165_v2  ;;  %v107_v16 = vld [vmem:[%s34065_s5 + $0x8] sm:$0xff]  ;;  %v29736_v17 = vand.u32 4294901760, %v109_v14  ;;  %v29738_v18 = vand.u32 4294901760, %v108_v15  ;;  %v106_v31 = vld [vmem:[%s34065_s5] sm:$0xff]  ;;  %s29643_s16 = smov 96   ;;  %s29647_s25 = smov 32  }
   0x4   :  { %v29740_v19 = vand.u32 4294901760, %v107_v16  ;;  %v29775_v32 = vand.u32 4294901760, %v106_v31  ;;  %v25359_v45 = vld [vmem:[%s34067_s7] ss:$0 sm:$0xff]  ;;  %v25360_v47 = vld [vmem:[%s34067_s7 + $0x1] ss:$0 sm:$0xff] }
   0x5   :  { %v29743_v20 = vsub.f32 %v109_v14, %v29736_v17  ;;  %v29746_v21 = vsub.f32 %v108_v15, %v29738_v18  ;;  %26805 = vmatprep.subr.mxu0 %v29736_v17 }
   0x6   :  { %v29749_v22 = vsub.f32 %v107_v16, %v29740_v19  ;;  %26806 = vmatpush3.msra.mxu0 %v29736_v17  ;;  %v29778_v34 = vsub.f32 %v106_v31, %v29775_v32 }
   0x7   :  { %169 = vadd.xlane.f32.xlu0 %v168_v3  ;;  %v29754_v23 = vand.u32 4294901760, %v29743_v20  ;;  %v29757_v24 = vand.u32 4294901760, %v29746_v21  ;;  %26807 = vmatprep.subr.mxu0 %v29738_v18  ;;  %v25361_v3 = vld [vmem:[%s34066_s6] ss:$0 sm:$0xff] }
   0x8   :  { %v29760_v25 = vand.u32 4294901760, %v29749_v22  ;;  %26808 = vmatpush3.msra.mxu0 %v29738_v18  ;;  %v29783_v35 = vand.u32 4294901760, %v29778_v34 }
   0x9   :  { %v337_v26 = vsub.f32 %v29743_v20, %v29754_v23  ;;  %v344_v27 = vsub.f32 %v29746_v21, %v29757_v24  ;;  %26809 = vmatprep.subr.mxu0 %v29740_v19 }
   0xa   :  { %v351_v28 = vsub.f32 %v29749_v22, %v29760_v25  ;;  %26810 = vmatpush3.msra.mxu0 %v29740_v19  ;;  %v358_v36 = vsub.f32 %v29778_v34, %v29783_v35 }
   0xb   :  { %v338_v29 = vand.u32 4294901760, %v337_v26  ;;  %v345_v30 = vand.u32 4294901760, %v344_v27  ;;  %26811 = vmatprep.subr.mxu0 %v29775_v32 }
   0xc   :  { %v352_v33 = vand.u32 4294901760, %v351_v28  ;;  %26812 = vmatpush3.msra.mxu0 %v29775_v32  ;;  %v359_v37 = vand.u32 4294901760, %v358_v36  ;;  %v44_v36 = vld [vmem:[%s34062_s2] sm:$0xff] }
   0xd   :  { %26816 = vmatprep.subr.mxu1 %v338_v29  ;;  %26827 = vmatprep.subr.mxu0 %v29743_v20 }
   0xe   :  { %26817 = vmatpush3.msra.mxu1 %v338_v29 }
   0xf   :  { %26818 = vmatprep.subr.mxu1 %v345_v30 }
  0x10   :  { %26819 = vmatpush3.msra.mxu1 %v345_v30 }
  0x11   :  { %26820 = vmatprep.subr.mxu1 %v352_v33 }
  0x12   :  { %26821 = vmatpush3.msra.mxu1 %v352_v33 }
  0x13   :  { %26822 = vmatprep.subr.mxu1 %v359_v37 }
  0x14   :  { %26823 = vmatpush3.msra.mxu1 %v359_v37  ;;  %v45_v37 = vld [vmem:[%s34062_s2 + $0x8] sm:$0xff] }
  0x15   :  { %26838 = vmatprep.subr.mxu1 %v29736_v17 }
  0x8c   :  { %v167_v4 = vpop.xlane.xlu0 %166 }
  0x8d   :  { %v172_v5 = vmul.f32 0.03125, %v167_v4 }
  0x8f   :  { %v174_v6 = vsub.f32 %v39_v0, %v172_v5 }
  0x90   :  { %v170_v7 = vpop.xlane.xlu0 %169 }
  0x91   :  { %v173_v8 = vmul.f32 0.03125, %v170_v7  ;;  %v176_v9 = vmul.f32 %v174_v6, %v174_v6 }
  0x93   :  { %v29721_v10 = vsub.f32 %v40_v1, %v173_v8  ;;  %v178_v11 = vsel %vm164_vm0, %v176_v9, 0.0 }
  0x94   :  { %179 = vadd.xlane.f32.xlu1 %v178_v11 }
  0x95   :  { %v177_v12 = vmul.f32 %v29721_v10, %v29721_v10 }
  0x97   :  { %v181_v13 = vsel %vm164_vm0, %v177_v12, 0.0 }
  0x98   :  { %182 = vadd.xlane.f32.xlu1 %v181_v13 }
 0x11d   :  { %v180_v38 = vpop.xlane.xlu1 %179 }
 0x11e   :  { %v184_v39 = vmul.f32 0.03125, %v180_v38  ;;  %v29644_v38 = vmov 0  }
 0x11f   :  { %29443 = vset.pattern.permute.xlu1 %v29644_v38  ;;  %29445 = vset.pattern.permute.xlu0 %v29644_v38 }
 0x120   :  { %v186_v40 = vadd.f32 1e-05, %v184_v39  ;;  %v29645_v39 = vmov 1  }
 0x121   :  { %v183_v41 = vpop.xlane.xlu1 %182 }
 0x122   :  { %29447 = vrsqrt.f32 %v186_v40  ;;  %v185_v42 = vmul.f32 0.03125, %v183_v41 }
 0x124   :  { %v187_v43 = vadd.f32 1e-05, %v185_v42 }
 0x126   :  { %29449 = vrsqrt.f32 %v187_v43 }
 0x12f   :  { %v29448_v44 = vpop.eup %29447 }
 0x130   :  { %v190_v46 = vmul.f32 %v29448_v44, %v174_v6 }
 0x132   :  { %v198_v48 = vmul.f32 %v25359_v45, %v190_v46 }
 0x133   :  { %v29450_v49 = vpop.eup %29449 }
 0x134   :  { %v206_v50 = vadd.f32 %v25360_v47, %v198_v48  ;;  %v191_v51 = vmul.f32 %v29450_v49, %v29721_v10 }
 0x136   :  { %v215_v52 = vsel %vm164_vm0, %v206_v50, 0  ;;  %v199_v53 = vmul.f32 %v25359_v45, %v191_v51 }
 0x137   :  { %v289_v54 = vand.u32 4294901760, %v215_v52 }
 0x138   :  { %v207_v55 = vadd.f32 %v25360_v47, %v199_v53 }
 0x139   :  { %26824 = vmatprep.mubr.f32.mxu1 %v289_v54  ;;  %v290_v56 = vsub.f32 %v215_v52, %v289_v54 }
 0x13a   :  { %v218_v57 = vsel %vm164_vm0, %v207_v55, 0  ;;  %v34102_v55 = vmov 0 }
 0x13b   :  { %v299_v58 = vand.u32 4294901760, %v218_v57  ;;  %v291_v59 = vand.u32 4294901760, %v290_v56 }
 0x13d   :  { %v300_v60 = vsub.f32 %v218_v57, %v299_v58  ;;  %26825 = vmatmul.mubr.f32.vlgmr.msra.gmra.mxu1 %v299_v58  ;;  %v292_v61 = vsub.f32 %v290_v56, %v291_v59 }
 0x13e   :  { %26839 = vmatpush3.msra.mxu1 %v29736_v17  ;;  %26846 = vmatprep.mubr.f32.mxu1 %v291_v59 }
 0x13f   :  { %26840 = vmatprep.subr.mxu1 %v29738_v18  ;;  %v293_v62 = vand.u32 4294901760, %v292_v61  ;;  %v301_v63 = vand.u32 4294901760, %v300_v60 }
 0x140   :  { %26841 = vmatpush3.msra.mxu1 %v29738_v18 }
 0x141   :  { %26842 = vmatprep.subr.mxu1 %v29740_v19  ;;  %26813 = vmatprep.mubr.f32.mxu0 %v293_v62  ;;  %v302_v0 = vsub.f32 %v300_v60, %v301_v63 }
 0x142   :  { %26843 = vmatpush3.msra.mxu1 %v29740_v19 }
 0x143   :  { %26844 = vmatprep.subr.mxu1 %v29775_v32  ;;  %v303_v1 = vand.u32 4294901760, %v302_v0 }
 0x144   :  { %26845 = vmatpush3.msra.mxu1 %v29775_v32 }
 0x145   :  { %26847 = vmatmul.mubr.f32.vlgmr.msra.gmra.mxu1 %v301_v63  ;;  %26860 = vmatprep.subr.mxu1 %v29736_v17 }
 0x146   :  { %26814 = vmatmul.mubr.f32.vlgmr.msra.gmra.mxu0 %v303_v1  ;;  %26861 = vmatpush3.msra.mxu1 %v29736_v17  ;;  %v58_v17 = vlaneseq }
 0x147   :  { %26828 = vmatpush3.msra.mxu0 %v29743_v20  ;;  %26868 = vmatprep.mubr.f32.mxu1 %v289_v54 }
 0x148   :  { %26829 = vmatprep.subr.mxu0 %v29746_v21  ;;  %26835 = vmatprep.mubr.f32.mxu0 %v290_v56 }
 0x149   :  { %26862 = vmatprep.subr.mxu1 %v29738_v18  ;;  %26830 = vmatpush3.msra.mxu0 %v29746_v21 }
 0x14a   :  { %26863 = vmatpush3.msra.mxu1 %v29738_v18  ;;  %26831 = vmatprep.subr.mxu0 %v29749_v22 }
 0x14b   :  { %26864 = vmatprep.subr.mxu1 %v29740_v19  ;;  %26832 = vmatpush3.msra.mxu0 %v29749_v22 }
 0x14c   :  { %26865 = vmatpush3.msra.mxu1 %v29740_v19  ;;  %26833 = vmatprep.subr.mxu0 %v29778_v34 }
 0x14d   :  { %26866 = vmatprep.subr.mxu1 %v29775_v32  ;;  %26834 = vmatpush3.msra.mxu0 %v29778_v34 }
 0x14e   :  { %26867 = vmatpush3.msra.mxu1 %v29775_v32  ;;  %26836 = vmatmul.mubr.f32.vlgmr.msra.gmra.mxu0 %v300_v60 }
 0x14f   :  { %26849 = vmatprep.subr.mxu0 %v29754_v23  ;;  %26869 = vmatmul.mubr.f32.vlgmr.msra.gmra.mxu1 %v299_v58 }
 0x150   :  { %26850 = vmatpush3.msra.mxu0 %v29754_v23  ;;  %26857 = vmatprep.mubr.f32.mxu0 %v289_v54 }
 0x151   :  { %26851 = vmatprep.subr.mxu0 %v29757_v24 }
 0x152   :  { %26852 = vmatpush3.msra.mxu0 %v29757_v24  ;;  %v29832_v24 = vand.u32 127, %v58_v17 }
 0x153   :  { %26853 = vmatprep.subr.mxu0 %v29760_v25 }
 0x154   :  { %26854 = vmatpush3.msra.mxu0 %v29760_v25  ;;  %34101 = vst [vmem:[#allocation5_spill] sm:$0xff] %v29832_v24  ;;  %vm749_vm1 = vcmp.lt.s32.totalorder %v29832_v24, 8  ;;  %vm1308_vm2 = vcmp.ge.s32.totalorder %v29832_v24, 8  ;;  %vm1309_vm3 = vcmp.lt.s32.totalorder %v29832_v24, 16 }
 0x155   :  { %26855 = vmatprep.subr.mxu0 %v29783_v35  ;;  %vm29892_vm4 = vmand %vm1308_vm2, %vm1309_vm3 }
 0x156   :  { %26856 = vmatpush3.msra.mxu0 %v29783_v35  ;;  %v34103_v55 = vsel %vm29892_vm4, 4294967295, %v34102_v55 }
 0x157   :  { %26858 = vmatmul.mubr.f32.vlgmr.msra.gmra.mxu0 %v299_v58  ;;  %34104 = vst [vmem:[#allocation6_spill] sm:$0xff] %v34103_v55 }
 0x1fd   :  { %v26826_v4 = vpop.f32.mrf.mxu1 }
 0x1ff   :  { %v396_v9 = vpop.f32.mrf.mxu1 }
 0x205   :  { %v26848_v11 = vpop.f32.mrf.mxu1 }
 0x206   :  { %v26815_v2 = vpop.f32.mrf.mxu0 }
 0x207   :  { %v306_v6 = vadd.f32 %v26815_v2, %v25361_v3  ;;  %v566_v16 = vpop.f32.mrf.mxu1 }
 0x208   :  { %v295_v5 = vpop.f32.mrf.mxu0 }
 0x209   :  { %v296_v7 = vadd.f32 %v25361_v3, %v295_v5  ;;  %v403_v10 = vadd.f32 %v26826_v4, %v306_v6 }
 0x20b   :  { %v397_v14 = vadd.f32 %v396_v9, %v296_v7 }
 0x20e   :  { %v26837_v8 = vpop.f32.mrf.mxu0 }
 0x20f   :  { %v490_v13 = vadd.f32 %v26837_v8, %v403_v10  ;;  %v26870_v19 = vpop.f32.mrf.mxu1 }
 0x210   :  { %v482_v12 = vpop.f32.mrf.mxu0 }
 0x211   :  { %v483_v15 = vadd.f32 %v482_v12, %v397_v14  ;;  %v575_v18 = vadd.f32 %v26848_v11, %v490_v13  ;;  %v738_v27 = vpop.f32.mrf.mxu1  ;;  %v47_v12 = vld [vmem:[%s34064_s4] sm:$0x3]  ;;  %v59_v13 = vshrl.u32 %v58_v17, 7 }
 0x212   :  { %vm95_vm5 = vcmp.lt.f32.partialorder %v47_v12, 0.5 }
 0x213   :  { %v567_v22 = vadd.f32 %v566_v16, %v483_v15  ;;  %v60_v14 = vsub.s32 0, %v59_v13  ;;  %v66_v15 = vsub.s32 1, %v59_v13  ;;  %v96_v16 = vsel %vm95_vm5, 1, %v29644_v38 }
 0x217   :  { %v26859_v20 = vpop.f32.mrf.mxu0 }
 0x218   :  { %v664_v21 = vadd.f32 %v26859_v20, %v575_v18  ;;  %v92_v18 = vrot.slane %v47_v12, %v60_v14 }
 0x219   :  { %v657_v23 = vpop.f32.mrf.mxu0 }
 0x21a   :  { %v29834_v25 = vadd.f32 %v26870_v19, %v664_v21  ;;  %v658_v26 = vadd.f32 %v657_v23, %v567_v22  ;;  %v100_v19 = vrot.slane %v96_v16, %v66_v15  ;;  %v29616_v21 = vld [vmem:[%s34065_s5 + $0x78] sm:$0xff] }
 0x21c   :  { %v29836_v28 = vadd.f32 %v738_v27, %v658_v26  ;;  %759 = vrot.lane.b32.xlu0 %v29834_v25, %s29643_s16  ;;  %v754_v40 = vsel %vm749_vm1, %v29834_v25, 0.0  ;;  %v1314_v1 = vsel %vm29892_vm4, %v29834_v25, 0.0  ;;  %vm101_vm6 = vcmp.eq.s32.totalorder %v100_v19, 1 }
 0x21d   :  { %v765_v41 = vsel %vm164_vm0, %v754_v40, 0  ;;  %v1319_v2 = vsel %vm164_vm0, %v1314_v1, 0 }
 0x21e   :  { %757 = vrot.lane.b32.xlu1 %v29836_v28, %s29643_s16  ;;  %v753_v29 = vsel %vm749_vm1, %v29836_v28, 0.0  ;;  %v29869_v42 = vand.u32 4294901760, %v765_v41  ;;  %v1313_v56 = vsel %vm29892_vm4, %v29836_v28, 0.0  ;;  %v1398_v4 = vand.u32 4294901760, %v1319_v2 }
 0x21f   :  { %v762_v30 = vsel %vm164_vm0, %v753_v29, 0  ;;  %v1316_v62 = vsel %vm164_vm0, %v1313_v56, 0 }
 0x220   :  { %v29847_v31 = vand.u32 4294901760, %v762_v30  ;;  %55 = vperm.xlu0 %29445, %v45_v37   ;;  %v849_v43 = vsub.f32 %v765_v41, %v29869_v42  ;;  %v29916_v0 = vand.u32 4294901760, %v1316_v62  ;;  %v1399_v6 = vsub.f32 %v1319_v2, %v1398_v4 }
 0x222   :  { %26882 = vmatprep.mubr.f32.mxu1 %v29847_v31  ;;  %v29851_v32 = vsub.f32 %v762_v30, %v29847_v31  ;;  %50 = vperm.xlu1 %29443, %v44_v36   ;;  %v850_v48 = vand.u32 4294901760, %v849_v43  ;;  %v1389_v3 = vsub.f32 %v1316_v62, %v29916_v0  ;;  %v1400_v8 = vand.u32 4294901760, %v1399_v6 }
 0x224   :  { %v840_v33 = vand.u32 4294901760, %v29851_v32  ;;  %29446 = vset.pattern.permute.xlu0 %v29645_v39  ;;  %v851_v54 = vsub.f32 %v849_v43, %v850_v48  ;;  %v1390_v5 = vand.u32 4294901760, %v1389_v3  ;;  %v1401_v10 = vsub.f32 %v1399_v6, %v1400_v8 }
 0x226   :  { %v841_v34 = vsub.f32 %v29851_v32, %v840_v33  ;;  %29444 = vset.pattern.permute.xlu1 %v29645_v39  ;;  %v852_v59 = vand.u32 4294901760, %v851_v54  ;;  %v1391_v7 = vsub.f32 %v1389_v3, %v1390_v5  ;;  %v1402_v11 = vand.u32 4294901760, %v1401_v10 }
 0x227   :  { %69 = vperm.xlu1 %29444, %v44_v36  }
 0x228   :  { %v842_v35 = vand.u32 4294901760, %v841_v34  ;;  %v1392_v9 = vand.u32 4294901760, %v1391_v7 }
 0x22a   :  { %26875 = vmatprep.mubr.f32.mxu0 %v842_v35 }
 0x22b   :  { %73 = vperm.xlu1 %29444, %v45_v37  }
 0x28e   :  { %v760_v44 = vpop.permute.xlu0 %759 }
 0x28f   :  { %v769_v45 = vsel %vm164_vm0, %v760_v44, 0 }
 0x290   :  { %v29873_v46 = vand.u32 4294901760, %v769_v45  ;;  %v758_v47 = vpop.permute.xlu1 %757 }
 0x291   :  { %v767_v49 = vsel %vm164_vm0, %v758_v47, 0 }
 0x292   :  { %v29879_v50 = vsub.f32 %v769_v45, %v29873_v46  ;;  %v29881_v51 = vand.u32 4294901760, %v767_v49  ;;  %26871 = vmatprep.subr.mxu0 %v29873_v46 }
 0x293   :  { %26872 = vmatpush3.xpose.msra.mxu0 %v29873_v46 }
 0x294   :  { %v29886_v52 = vand.u32 4294901760, %v29879_v50  ;;  %v29889_v53 = vsub.f32 %v767_v49, %v29881_v51  ;;  %26873 = vmatprep.subr.mxu0 %v29881_v51 }
 0x296   :  { %v29900_v57 = vand.u32 4294901760, %v29889_v53  ;;  %v890_v58 = vsub.f32 %v29879_v50, %v29886_v52 }
 0x297   :  { %26874 = vmatpush3.xpose.msra.mxu0 %v29881_v51 }
 0x298   :  { %26885 = vmatprep.subr.mxu0 %v29879_v50  ;;  %v29906_v60 = vand.u32 4294901760, %v890_v58  ;;  %v897_v61 = vsub.f32 %v29889_v53, %v29900_v57  ;;  %v84_v58 = vsub.s32 2, %v59_v13 }
 0x29a   :  { %26876 = vmatmul.mubr.f32.vlgmr.msra.gmra.mxu0 %v852_v59  ;;  %26878 = vmatprep.subr.mxu1 %v29906_v60  ;;  %v29912_v63 = vand.u32 4294901760, %v897_v61 }
 0x29b   :  { %26879 = vmatpush3.xpose.msra.mxu1 %v29906_v60  ;;  %26886 = vmatpush3.xpose.msra.mxu0 %v29879_v50  ;;  %v56_v22 = vpop.permute.xlu0 %55 }
 0x29c   :  { %26889 = vmatprep.mubr.f32.mxu0 %v29851_v32  ;;  %26880 = vmatprep.subr.mxu1 %v29912_v63  ;;  %vm94_vm9 = vcmp.eq.f32.partialorder %v56_v22, %v92_v18 }
 0x29d   :  { %26887 = vmatprep.subr.mxu0 %v29889_v53  ;;  %v51_v20 = vpop.permute.xlu1 %50  ;;  %vm29983_vm10 = vmand %vm94_vm9, %vm101_vm6  ;;  %vm1277_vm9 = vcmask 130048  }
 0x29e   :  { %vm93_vm7 = vcmp.eq.f32.partialorder %v51_v20, %v92_v18 }
 0x29f   :  { %26881 = vmatpush3.xpose.msra.mxu1 %v29912_v63  ;;  %26888 = vmatpush3.xpose.msra.mxu0 %v29889_v53  ;;  %vm29979_vm8 = vmand %vm93_vm7, %vm101_vm6 }
 0x2a0   :  { %26892 = vmatprep.subr.mxu1 %v29873_v46  ;;  %26899 = vmatprep.subr.mxu0 %v29886_v52 }
 0x2a2   :  { %26883 = vmatmul.mubr.f32.vlgmr.msra.gmra.mxu1 %v29869_v42  ;;  %26890 = vmatmul.mubr.f32.vlgmr.msra.gmra.mxu0 %v849_v43  ;;  %v70_v45 = vpop.permute.xlu1 %69 }
 0x2a3   :  { %26893 = vmatpush3.xpose.msra.mxu1 %v29873_v46  ;;  %26896 = vmatprep.mubr.f32.mxu1 %v840_v33 }
 0x2a4   :  { %26900 = vmatpush3.xpose.msra.mxu0 %v29886_v52  ;;  %26903 = vmatprep.mubr.f32.mxu0 %v29847_v31 }
 0x2a5   :  { %26894 = vmatprep.subr.mxu1 %v29881_v51  ;;  %26901 = vmatprep.subr.mxu0 %v29900_v57 }
 0x2a7   :  { %26895 = vmatpush3.xpose.msra.mxu1 %v29881_v51 }
 0x2a8   :  { %26902 = vmatpush3.xpose.msra.mxu0 %v29900_v57  ;;  %26906 = vmatprep.subr.mxu1 %v29873_v46 }
 0x2a9   :  { %26913 = vmatprep.subr.mxu0 %v29873_v46 }
 0x2aa   :  { %26897 = vmatmul.mubr.f32.vlgmr.msra.gmra.mxu1 %v850_v48 }
 0x2ab   :  { %26904 = vmatmul.mubr.f32.vlgmr.msra.gmra.mxu0 %v29869_v42  ;;  %26907 = vmatpush3.xpose.msra.mxu1 %v29873_v46 }
 0x2ac   :  { %26910 = vmatprep.mubr.f32.mxu1 %v29847_v31  ;;  %26914 = vmatpush3.xpose.msra.mxu0 %v29873_v46 }
 0x2ad   :  { %26917 = vmatprep.mubr.f32.mxu0 %v1392_v9  ;;  %26908 = vmatprep.subr.mxu1 %v29881_v51 }
 0x2ae   :  { %26915 = vmatprep.subr.mxu0 %v29881_v51 }
 0x2af   :  { %26909 = vmatpush3.xpose.msra.mxu1 %v29881_v51 }
 0x2b0   :  { %26916 = vmatpush3.xpose.msra.mxu0 %v29881_v51  ;;  %26920 = vmatprep.subr.mxu1 %v29906_v60 }
 0x2b1   :  { %26927 = vmatprep.subr.mxu0 %v29879_v50 }
 0x2b2   :  { %26911 = vmatmul.mubr.f32.vlgmr.msra.gmra.mxu1 %v29869_v42  ;;  %v46_v42 = vld [vmem:[%s34063_s3] sm:$0x7]  ;;  %s29646_s3 = smov 64  }
 0x2b3   :  { %26918 = vmatmul.mubr.f32.vlgmr.msra.gmra.mxu0 %v1402_v11  ;;  %26921 = vmatpush3.xpose.msra.mxu1 %v29906_v60  ;;  %vm80_vm11 = vcmp.lt.f32.partialorder %v46_v42, 0.5  ;;  %v61_v1 = vrot.slane %v46_v42, %v60_v14  ;;  %v67_v2 = vrot.slane %v46_v42, %v66_v15 }
 0x2b4   :  { %26924 = vmatprep.mubr.f32.mxu1 %v29916_v0  ;;  %26928 = vmatpush3.xpose.msra.mxu0 %v29879_v50  ;;  %v81_v62 = vsel %vm80_vm11, 1, %v29644_v38  ;;  %vm2867_vm11 = vcmp.ge.s32.totalorder %v29832_v24, 16 }
 0x2b5   :  { %26931 = vmatprep.mubr.f32.mxu0 %v1389_v3  ;;  %26922 = vmatprep.subr.mxu1 %v29912_v63  ;;  %vm62_vm12 = vcmp.eq.f32.partialorder %v51_v20, %v61_v1  ;;  %v85_v9 = vrot.slane %v81_v62, %v84_v58  ;;  %vm76_vm13 = vcmp.le.f32.partialorder %v67_v2, %v70_v45  ;;  %v34109_v20 = vmov 0 }
 0x2b6   :  { %26929 = vmatprep.subr.mxu0 %v29889_v53  ;;  %vm63_vm14 = vcmp.eq.f32.partialorder %v56_v22, %v61_v1  ;;  %vm78_vm2 = vmand %vm62_vm12, %vm76_vm13  ;;  %vm2868_vm12 = vcmp.lt.s32.totalorder %v29832_v24, 24 }
 0x2b7   :  { %26923 = vmatpush3.xpose.msra.mxu1 %v29912_v63  ;;  %vm86_vm3 = vcmp.eq.s32.totalorder %v85_v9, 1  ;;  %vm30113_vm13 = vmand %vm2867_vm11, %vm2868_vm12  ;;  %vm7840_vm11 = vcmask 1043456   ;;  %vm12176_vm12 = vcmask 523264  }
 0x2b8   :  { %26930 = vmatpush3.xpose.msra.mxu0 %v29889_v53  ;;  %26934 = vmatprep.subr.mxu1 %v29873_v46  ;;  %vm29991_vm6 = vmand %vm78_vm2, %vm86_vm3 }
 0x2b9   :  { %26941 = vmatprep.subr.mxu0 %v29886_v52  ;;  %v34110_v20 = vsel %vm29991_vm6, 4294967295, %v34109_v20 }
 0x2ba   :  { %26925 = vmatmul.mubr.f32.vlgmr.msra.gmra.mxu1 %v1398_v4  ;;  %34111 = vst [vmem:[#allocation7_spill] sm:$0xff] %v34110_v20 }
 0x2bb   :  { %26932 = vmatmul.mubr.f32.vlgmr.msra.gmra.mxu0 %v1399_v6  ;;  %26935 = vmatpush3.xpose.msra.mxu1 %v29873_v46  ;;  %v74_v6 = vpop.permute.xlu1 %73 }
 0x2bc   :  { %26938 = vmatprep.mubr.f32.mxu1 %v1390_v5  ;;  %26942 = vmatpush3.xpose.msra.mxu0 %v29886_v52  ;;  %vm77_vm15 = vcmp.le.f32.partialorder %v67_v2, %v74_v6 }
 0x2bd   :  { %26945 = vmatprep.mubr.f32.mxu0 %v29916_v0  ;;  %26936 = vmatprep.subr.mxu1 %v29881_v51  ;;  %vm79_vm5 = vmand %vm63_vm14, %vm77_vm15  ;;  %vm3920_vm14 = vcmp.ge.s32.totalorder %v29832_v24, 24  ;;  %vm3921_vm15 = vcmp.lt.s32.totalorder %v29832_v24, 32 }
 0x2be   :  { %26943 = vmatprep.subr.mxu0 %v29900_v57  ;;  %vm29995_vm7 = vmand %vm79_vm5, %vm86_vm3  ;;  %vm29649_vm3 = vmmov 0   ;;  %vm7247_vm5 = vcmask 162816  }
 0x2bf   :  { %26937 = vmatpush3.xpose.msra.mxu1 %v29881_v51  ;;  %vm30261_vm2 = vmand %vm3920_vm14, %vm3921_vm15 }
 0x2c0   :  { %26944 = vmatpush3.xpose.msra.mxu0 %v29900_v57  ;;  %26948 = vmatprep.subr.mxu1 %v29873_v46 }
 0x2c2   :  { %26939 = vmatmul.mubr.f32.vlgmr.msra.gmra.mxu1 %v1400_v8 }
 0x2c3   :  { %26946 = vmatmul.mubr.f32.vlgmr.msra.gmra.mxu0 %v1398_v4  ;;  %26949 = vmatpush3.xpose.msra.mxu1 %v29873_v46 }
 0x2c4   :  { %26952 = vmatprep.mubr.f32.mxu1 %v29916_v0  ;;  %26950 = vmatprep.subr.mxu1 %v29881_v51 }
 0x2c7   :  { %26951 = vmatpush3.xpose.msra.mxu1 %v29881_v51 }
 0x2ca   :  { %26953 = vmatmul.mubr.f32.vlgmr.msra.gmra.mxu1 %v1398_v4 }
 0x35a   :  { %v26877_v17 = vpop.f32.mrf.mxu0 }
 0x35c   :  { %v844_v27 = vpop.f32.mrf.mxu0 }
 0x362   :  { %v26884_v26 = vpop.f32.mrf.mxu1  ;;  %v26891_v30 = vpop.f32.mrf.mxu0 }
 0x363   :  { %v942_v49 = vadd.f32 %v26884_v26, %v26877_v17 }
 0x364   :  { %v935_v29 = vpop.f32.mrf.mxu1  ;;  %v1017_v32 = vpop.f32.mrf.mxu0 }
 0x365   :  { %v936_v41 = vadd.f32 %v935_v29, %v844_v27  ;;  %v1025_v5 = vadd.f32 %v26891_v30, %v942_v49 }
 0x367   :  { %v1018_v54 = vadd.f32 %v1017_v32, %v936_v41 }
 0x36a   :  { %v26898_v31 = vpop.f32.mrf.mxu1 }
 0x36b   :  { %v26905_v34 = vpop.f32.mrf.mxu0  ;;  %v1108_v11 = vadd.f32 %v26898_v31, %v1025_v5  ;;  %v34112_v31 = vmov 0 }
 0x36c   :  { %v1099_v33 = vpop.f32.mrf.mxu1  ;;  %v34113_v31 = vsel %vm29995_vm7, 4294967295, %v34112_v31 }
 0x36d   :  { %v1184_v36 = vpop.f32.mrf.mxu0  ;;  %v1100_v61 = vadd.f32 %v1099_v33, %v1018_v54  ;;  %v1191_v18 = vadd.f32 %v26905_v34, %v1108_v11  ;;  %34114 = vst [vmem:[#allocation8_spill] sm:$0xff] %v34113_v31 }
 0x36f   :  { %v1185_v12 = vadd.f32 %v1184_v36, %v1100_v61 }
 0x372   :  { %v26912_v35 = vpop.f32.mrf.mxu1 }
 0x373   :  { %v26919_v39 = vpop.f32.mrf.mxu0  ;;  %v1270_v27 = vadd.f32 %v26912_v35, %v1191_v18 }
 0x374   :  { %v1263_v37 = vpop.f32.mrf.mxu1 }
 0x375   :  { %v1394_v43 = vpop.f32.mrf.mxu0  ;;  %v1264_v16 = vadd.f32 %v1263_v37, %v1185_v12  ;;  %v1274_v36 = vmul.f32 0.35355338, %v1270_v27 }
 0x377   :  { %v1273_v29 = vmul.f32 0.35355338, %v1264_v16  ;;  %v1276_v41 = vsel %vm29995_vm7, %v1274_v36, -1e+09 }
 0x378   :  { %v1281_v42 = vsel %vm1277_vm9, %v1276_v41, -inf }
 0x379   :  { %v1275_v35 = vsel %vm29991_vm6, %v1273_v29, -1e+09 }
 0x37a   :  { %v26926_v40 = vpop.f32.mrf.mxu1 }
 0x37b   :  { %v1492_v47 = vadd.f32 %v26926_v40, %v26919_v39  ;;  %v26933_v48 = vpop.f32.mrf.mxu0  ;;  %v1278_v40 = vsel %vm1277_vm9, %v1275_v35, -inf }
 0x37c   :  { %v1485_v44 = vpop.f32.mrf.mxu1 }
 0x37d   :  { %v1486_v56 = vadd.f32 %v1485_v44, %v1394_v43  ;;  %v1575_v0 = vadd.f32 %v26933_v48, %v1492_v47  ;;  %v1567_v3 = vpop.f32.mrf.mxu0 }
 0x37f   :  { %v1568_v7 = vadd.f32 %v1567_v3, %v1486_v56 }
 0x382   :  { %v26940_v59 = vpop.f32.mrf.mxu1 }
 0x383   :  { %v1658_v8 = vadd.f32 %v26940_v59, %v1575_v0  ;;  %v26947_v10 = vpop.f32.mrf.mxu0 }
 0x384   :  { %v1649_v4 = vpop.f32.mrf.mxu1 }
 0x385   :  { %v1650_v13 = vadd.f32 %v1649_v4, %v1568_v7  ;;  %v1741_v38 = vadd.f32 %v26947_v10, %v1658_v8  ;;  %v1734_v14 = vpop.f32.mrf.mxu0 }
 0x387   :  { %v1735_v19 = vadd.f32 %v1734_v14, %v1650_v13 }
 0x38a   :  { %v26954_v15 = vpop.f32.mrf.mxu1 }
 0x38b   :  { %v1820_v17 = vadd.f32 %v26954_v15, %v1741_v38 }
 0x38c   :  { %v1813_v26 = vpop.f32.mrf.mxu1 }
 0x38d   :  { %v1824_v30 = vmul.f32 0.35355338, %v1820_v17  ;;  %v1814_v22 = vadd.f32 %v1813_v26, %v1735_v19 }
 0x38f   :  { %v1823_v32 = vmul.f32 0.35355338, %v1814_v22  ;;  %v1826_v33 = vsel %vm29995_vm7, %v1824_v30, -1e+09 }
 0x390   :  { %v1830_v34 = vsel %vm1277_vm9, %v1826_v33, -inf }
 0x391   :  { %1831 = vmax.xlane.f32.xlu0 %v1830_v34  ;;  %v1825_v37 = vsel %vm29991_vm6, %v1823_v32, -1e+09 }
 0x392   :  { %v1827_v39 = vsel %vm1277_vm9, %v1825_v37, -inf }
 0x393   :  { %1828 = vmax.xlane.f32.xlu1 %v1827_v39 }
 0x395   :  { %1279 = vmax.xlane.f32.xlu0 %v1278_v40 }
 0x399   :  { %1282 = vmax.xlane.f32.xlu0 %v1281_v42 }
 0x41a   :  { %v1832_v43 = vpop.xlane.xlu0 %1831 }
 0x41b   :  { %v1834_v49 = vsub.f32 %v1826_v33, %v1832_v43 }
 0x41c   :  { %v1829_v44 = vpop.xlane.xlu1 %1828 }
 0x41d   :  { %v1833_v45 = vsub.f32 %v1825_v37, %v1829_v44  ;;  %v1837_v61 = vmul.f32 1.442695, %v1834_v49 }
 0x41e   :  { %v1280_v47 = vpop.xlane.xlu0 %1279 }
 0x41f   :  { %v1284_v48 = vsub.f32 %v1275_v35, %v1280_v47  ;;  %v1835_v54 = vmul.f32 1.442695, %v1833_v45 }
 0x421   :  { %v1286_v56 = vmul.f32 1.442695, %v1284_v48 }
 0x422   :  { %v1283_v58 = vpop.xlane.xlu0 %1282 }
 0x423   :  { %29451 = vpow2.f32 %v1286_v56  ;;  %v1285_v59 = vsub.f32 %v1276_v41, %v1283_v58 }
 0x424   :  { %29453 = vpow2.f32 %v1835_v54 }
 0x425   :  { %v1288_v62 = vmul.f32 1.442695, %v1285_v59 }
 0x427   :  { %29455 = vpow2.f32 %v1288_v62 }
 0x428   :  { %29457 = vpow2.f32 %v1837_v61 }
 0x430   :  { %v30011_v0 = vpop.eup %29451 }
 0x431   :  { %v1290_v1 = vsel %vm1277_vm9, %v30011_v0, 0.0  ;;  %v29454_v2 = vpop.eup %29453 }
 0x432   :  { %1291 = vadd.xlane.f32.xlu1 %v1290_v1  ;;  %v1839_v4 = vsel %vm1277_vm9, %v29454_v2, 0.0 }
 0x434   :  { %v30015_v3 = vpop.eup %29455 }
 0x435   :  { %v1293_v5 = vsel %vm1277_vm9, %v30015_v3, 0.0  ;;  %v29458_v6 = vpop.eup %29457 }
 0x436   :  { %1840 = vadd.xlane.f32.xlu1 %v1839_v4  ;;  %1294 = vadd.xlane.f32.xlu0 %v1293_v5  ;;  %v1842_v7 = vsel %vm1277_vm9, %v29458_v6, 0.0 }
 0x43a   :  { %1843 = vadd.xlane.f32.xlu0 %v1842_v7 }
 0x447   :  { %1302 = vrot.lane.b32.xlu1 %v29834_v25, %s29646_s3 }
 0x450   :  { %1300 = vrot.lane.b32.xlu0 %v29836_v28, %s29646_s3 }
 0x4bb   :  { %v1292_v8 = vpop.xlane.xlu1 %1291 }
 0x4bf   :  { %v1841_v9 = vpop.xlane.xlu1 %1840  ;;  %v1295_v10 = vpop.xlane.xlu0 %1294 }
 0x4c0   :  { %29459 = vrcp.f32 %v1841_v9 }
 0x4c3   :  { %v30025_v11 = vpop.permute.xlu1 %1302  ;;  %v1844_v12 = vpop.xlane.xlu0 %1843 }
 0x4c4   :  { %v1850_v13 = vsel %vm29892_vm4, %v30025_v11, 0.0  ;;  %29461 = vrcp.f32 %v1844_v12  ;;  %v1307_v26 = vsel %vm749_vm1, %v30025_v11, 0.0 }
 0x4c5   :  { %v30030_v16 = vand.u32 4294901760, %v1850_v13  ;;  %29463 = vrcp.f32 %v1292_v8  ;;  %v30056_v33 = vand.u32 4294901760, %v1307_v26 }
 0x4c6   :  { %29465 = vrcp.f32 %v1295_v10 }
 0x4c7   :  { %26955 = vmatprep.subr.mxu0 %v30030_v16  ;;  %v30033_v38 = vpop.permute.xlu0 %1300  ;;  %v30036_v14 = vsub.f32 %v1850_v13, %v30030_v16  ;;  %v30069_v42 = vsub.f32 %v1307_v26, %v30056_v33 }
 0x4c8   :  { %v1849_v15 = vsel %vm29892_vm4, %v30033_v38, 0.0  ;;  %26956 = vmatpush3.msra.mxu0 %v30030_v16  ;;  %v1306_v34 = vsel %vm749_vm1, %v30033_v38, 0.0 }
 0x4c9   :  { %v1889_v18 = vand.u32 4294901760, %v1849_v15  ;;  %v30043_v19 = vand.u32 4294901760, %v30036_v14  ;;  %v30066_v40 = vand.u32 4294901760, %v1306_v34  ;;  %v30081_v59 = vand.u32 4294901760, %v30069_v42 }
 0x4cb   :  { %v30045_v17 = vsub.f32 %v1849_v15, %v1889_v18  ;;  %26957 = vmatprep.subr.mxu0 %v1889_v18  ;;  %v1976_v27 = vsub.f32 %v30036_v14, %v30043_v19  ;;  %v30075_v48 = vsub.f32 %v1306_v34, %v30066_v40  ;;  %v2873_v34 = vsel %vm30113_vm13, %v29834_v25, 0.0 }
 0x4cc   :  { %26958 = vmatpush3.msra.mxu0 %v1889_v18 }
 0x4cd   :  { %v29460_v29 = vpop.eup %29459  ;;  %26969 = vmatprep.subr.mxu0 %v30036_v14  ;;  %v30054_v30 = vand.u32 4294901760, %v30045_v17  ;;  %v1977_v22 = vand.u32 4294901760, %v1976_v27  ;;  %v2872_v27 = vsel %vm30113_vm13, %v29836_v28, 0.0 }
 0x4ce   :  { %v1847_v32 = vmul.f32 %v29460_v29, %v29454_v2  ;;  %v30088_v2 = vand.u32 4294901760, %v30075_v48 }
 0x4cf   :  { %v1983_v36 = vsub.f32 %v30045_v17, %v30054_v30  ;;  %26962 = vmatprep.subr.mxu1 %v1977_v22 }
 0x4d0   :  { %v1852_v37 = vsel %vm1277_vm9, %v1847_v32, 0  ;;  %26963 = vmatpush3.msra.mxu1 %v1977_v22  ;;  %v2875_v22 = vsel %vm164_vm0, %v2872_v27, 0 }
 0x4d1   :  { %v1984_v35 = vand.u32 4294901760, %v1983_v36  ;;  %v30064_v39 = vand.u32 4294901760, %v1852_v37  ;;  %v29462_v41 = vpop.eup %29461  ;;  %v30134_v32 = vand.u32 4294901760, %v2875_v22 }
 0x4d2   :  { %v29464_v44 = vpop.eup %29463  ;;  %v1848_v45 = vmul.f32 %v29462_v41, %v29458_v6  ;;  %v2484_v6 = vsub.f32 %v30069_v42, %v30081_v59 }
 0x4d3   :  { %26964 = vmatprep.subr.mxu1 %v1984_v35  ;;  %26966 = vmatprep.mubr.f32.mxu1 %v30064_v39  ;;  %v1925_v43 = vsub.f32 %v1852_v37, %v30064_v39  ;;  %v29466_v54 = vpop.eup %29465  ;;  %v1298_v61 = vmul.f32 %v29464_v44, %v30011_v0  ;;  %v3408_v44 = vsel %vm30113_vm13, %v30033_v38, 0.0 }
 0x4d4   :  { %26965 = vmatpush3.msra.mxu1 %v1984_v35  ;;  %v1855_v49 = vsel %vm1277_vm9, %v1848_v45, 0  ;;  %v1299_v4 = vmul.f32 %v29466_v54, %v30015_v3  ;;  %v2491_v3 = vsub.f32 %v30075_v48, %v30088_v2  ;;  %v2485_v10 = vand.u32 4294901760, %v2484_v6 }
 0x4d5   :  { %26976 = vmatprep.subr.mxu1 %v30030_v16  ;;  %v1926_v47 = vand.u32 4294901760, %v1925_v43  ;;  %v30078_v56 = vand.u32 4294901760, %v1855_v49  ;;  %v2360_v0 = vsel %vm1277_vm9, %v1298_v61, 0  ;;  %v2948_v35 = vsub.f32 %v2875_v22, %v30134_v32 }
 0x4d6   :  { %v30099_v8 = vand.u32 4294901760, %v2360_v0  ;;  %v2363_v9 = vsel %vm1277_vm9, %v1299_v4, 0 }
 0x4d7   :  { %v1927_v58 = vsub.f32 %v1925_v43, %v1926_v47  ;;  %v1935_v62 = vsub.f32 %v1855_v49, %v30078_v56  ;;  %26967 = vmatmul.mubr.f32.vlgmr.msra.gmra.mxu1 %v30078_v56  ;;  %v30102_v13 = vand.u32 4294901760, %v2363_v9 }
 0x4d8   :  { %26977 = vmatpush3.msra.mxu1 %v30030_v16  ;;  %26980 = vmatprep.mubr.f32.mxu1 %v1926_v47  ;;  %v2433_v15 = vsub.f32 %v2360_v0, %v30099_v8 }
 0x4d9   :  { %v1928_v1 = vand.u32 4294901760, %v1927_v58  ;;  %26978 = vmatprep.subr.mxu1 %v1889_v18  ;;  %v1936_v5 = vand.u32 4294901760, %v1935_v62 }
 0x4da   :  { %26979 = vmatpush3.msra.mxu1 %v1889_v18  ;;  %v2434_v26 = vand.u32 4294901760, %v2433_v15 }
 0x4db   :  { %26959 = vmatprep.mubr.f32.mxu0 %v1928_v1  ;;  %26990 = vmatprep.subr.mxu1 %v30030_v16  ;;  %v1937_v7 = vsub.f32 %v1935_v62, %v1936_v5 }
 0x4dc   :  { %26981 = vmatmul.mubr.f32.vlgmr.msra.gmra.mxu1 %v1936_v5  ;;  %v2435_v29 = vsub.f32 %v2433_v15, %v2434_v26 }
 0x4dd   :  { %26991 = vmatpush3.msra.mxu1 %v30030_v16  ;;  %26994 = vmatprep.mubr.f32.mxu1 %v30064_v39  ;;  %v1938_v12 = vand.u32 4294901760, %v1937_v7  ;;  %v2492_v16 = vand.u32 4294901760, %v2491_v3 }
 0x4de   :  { %26992 = vmatprep.subr.mxu1 %v1889_v18  ;;  %v2436_v36 = vand.u32 4294901760, %v2435_v29 }
 0x4df   :  { %26993 = vmatpush3.msra.mxu1 %v1889_v18  ;;  %26960 = vmatmul.mubr.f32.vlgmr.msra.gmra.mxu0 %v1938_v12  ;;  %v34115_v18 = vmov 0 }
 0x4e0   :  { %27004 = vmatprep.subr.mxu1 %v2485_v10  ;;  %26970 = vmatpush3.msra.mxu0 %v30036_v14  ;;  %v2443_v14 = vsub.f32 %v2363_v9, %v30102_v13  ;;  %v34116_v18 = vsel %vm30113_vm13, 4294967295, %v34115_v18 }
 0x4e1   :  { %26995 = vmatmul.mubr.f32.vlgmr.msra.gmra.mxu1 %v30078_v56  ;;  %26971 = vmatprep.subr.mxu0 %v30045_v17  ;;  %34117 = vst [vmem:[#allocation9_spill] sm:$0xff] %v34116_v18 }
 0x4e2   :  { %27005 = vmatpush3.msra.mxu1 %v2485_v10  ;;  %26973 = vmatprep.mubr.f32.mxu0 %v1925_v43 }
 0x4e3   :  { %27006 = vmatprep.subr.mxu1 %v2492_v16  ;;  %27008 = vmatprep.mubr.f32.mxu1 %v30099_v8 }
 0x4e4   :  { %26972 = vmatpush3.msra.mxu0 %v30045_v17  ;;  %27007 = vmatpush3.msra.mxu1 %v2492_v16  ;;  %v2444_v17 = vand.u32 4294901760, %v2443_v14 }
 0x4e5   :  { %26983 = vmatprep.subr.mxu0 %v30043_v19  ;;  %27018 = vmatprep.subr.mxu1 %v30056_v33 }
 0x4e6   :  { %26974 = vmatmul.mubr.f32.vlgmr.msra.gmra.mxu0 %v1935_v62  ;;  %27009 = vmatmul.mubr.f32.vlgmr.msra.gmra.mxu1 %v30102_v13 }
 0x4e7   :  { %26984 = vmatpush3.msra.mxu0 %v30043_v19  ;;  %27019 = vmatpush3.msra.mxu1 %v30056_v33  ;;  %v2445_v19 = vsub.f32 %v2443_v14, %v2444_v17 }
 0x4e8   :  { %26985 = vmatprep.subr.mxu0 %v30054_v30  ;;  %26987 = vmatprep.mubr.f32.mxu0 %v30064_v39  ;;  %v3409_v39 = vsel %vm30113_vm13, %v30025_v11, 0.0 }
 0x4e9   :  { %27020 = vmatprep.subr.mxu1 %v30066_v40  ;;  %27022 = vmatprep.mubr.f32.mxu1 %v2434_v26  ;;  %v2446_v37 = vand.u32 4294901760, %v2445_v19 }
 0x4ea   :  { %26986 = vmatpush3.msra.mxu0 %v30054_v30  ;;  %27021 = vmatpush3.msra.mxu1 %v30066_v40  ;;  %v2878_v30 = vsel %vm164_vm0, %v2873_v34, 0 }
 0x4eb   :  { %26997 = vmatprep.subr.mxu0 %v30056_v33  ;;  %27032 = vmatprep.subr.mxu1 %v30056_v33 }
 0x4ec   :  { %26988 = vmatmul.mubr.f32.vlgmr.msra.gmra.mxu0 %v30078_v56  ;;  %27023 = vmatmul.mubr.f32.vlgmr.msra.gmra.mxu1 %v2444_v17 }
 0x4ed   :  { %26998 = vmatpush3.msra.mxu0 %v30056_v33  ;;  %27033 = vmatpush3.msra.mxu1 %v30056_v33  ;;  %v30150_v33 = vand.u32 4294901760, %v2878_v30 }
 0x4ee   :  { %26999 = vmatprep.subr.mxu0 %v30066_v40  ;;  %27001 = vmatprep.mubr.f32.mxu0 %v2436_v36 }
 0x4ef   :  { %27034 = vmatprep.subr.mxu1 %v30066_v40  ;;  %27036 = vmatprep.mubr.f32.mxu1 %v30099_v8  ;;  %v2958_v41 = vsub.f32 %v2878_v30, %v30150_v33 }
 0x4f0   :  { %27000 = vmatpush3.msra.mxu0 %v30066_v40  ;;  %27035 = vmatpush3.msra.mxu1 %v30066_v40  ;;  %v2949_v40 = vand.u32 4294901760, %v2948_v35 }
 0x4f1   :  { %27011 = vmatprep.subr.mxu0 %v30069_v42  ;;  %27046 = vmatprep.subr.mxu1 %v29906_v60  ;;  %v2959_v45 = vand.u32 4294901760, %v2958_v41 }
 0x4f2   :  { %27002 = vmatmul.mubr.f32.vlgmr.msra.gmra.mxu0 %v2446_v37  ;;  %27037 = vmatmul.mubr.f32.vlgmr.msra.gmra.mxu1 %v30102_v13  ;;  %v2950_v43 = vsub.f32 %v2948_v35, %v2949_v40 }
 0x4f3   :  { %27012 = vmatpush3.msra.mxu0 %v30069_v42  ;;  %27047 = vmatpush3.xpose.msra.mxu1 %v29906_v60  ;;  %v30163_v42 = vand.u32 4294901760, %v3409_v39  ;;  %v2960_v54 = vsub.f32 %v2958_v41, %v2959_v45 }
 0x4f4   :  { %27013 = vmatprep.subr.mxu0 %v30075_v48  ;;  %27015 = vmatprep.mubr.f32.mxu0 %v2433_v15  ;;  %v2951_v49 = vand.u32 4294901760, %v2950_v43 }
 0x4f5   :  { %27048 = vmatprep.subr.mxu1 %v29912_v63  ;;  %27050 = vmatprep.mubr.f32.mxu1 %v30134_v32  ;;  %v30176_v47 = vsub.f32 %v3409_v39, %v30163_v42 }
 0x4f6   :  { %27014 = vmatpush3.msra.mxu0 %v30075_v48  ;;  %v30180_v48 = vand.u32 4294901760, %v3408_v44 }
 0x4f7   :  { %27025 = vmatprep.subr.mxu0 %v30081_v59  ;;  %27016 = vmatmul.mubr.f32.vlgmr.msra.gmra.mxu0 %v2443_v14  ;;  %v30188_v56 = vand.u32 4294901760, %v30176_v47 }
 0x4f8   :  { %27026 = vmatpush3.msra.mxu0 %v30081_v59  ;;  %27049 = vmatpush3.xpose.msra.mxu1 %v29912_v63  ;;  %v30191_v58 = vsub.f32 %v3408_v44, %v30180_v48  ;;  %v2961_v59 = vand.u32 4294901760, %v2960_v54 }
 0x4f9   :  { %27027 = vmatprep.subr.mxu0 %v30088_v2  ;;  %27029 = vmatprep.mubr.f32.mxu0 %v30099_v8  ;;  %v3535_v61 = vsub.f32 %v30176_v47, %v30188_v56 }
 0x4fa   :  { %27060 = vmatprep.subr.mxu1 %v29873_v46  ;;  %27028 = vmatpush3.msra.mxu0 %v30088_v2  ;;  %v30201_v62 = vand.u32 4294901760, %v30191_v58 }
 0x4fb   :  { %27039 = vmatprep.subr.mxu0 %v29873_v46  ;;  %27051 = vmatmul.mubr.f32.vlgmr.msra.gmra.mxu1 %v30150_v33  ;;  %v3536_v1 = vand.u32 4294901760, %v3535_v61 }
 0x4fc   :  { %27030 = vmatmul.mubr.f32.vlgmr.msra.gmra.mxu0 %v30102_v13  ;;  %27061 = vmatpush3.xpose.msra.mxu1 %v29873_v46  ;;  %v3542_v2 = vsub.f32 %v30191_v58, %v30201_v62 }
 0x4fd   :  { %27040 = vmatpush3.xpose.msra.mxu0 %v29873_v46  ;;  %27064 = vmatprep.mubr.f32.mxu1 %v2949_v40 }
 0x4fe   :  { %27041 = vmatprep.subr.mxu0 %v29881_v51  ;;  %27043 = vmatprep.mubr.f32.mxu0 %v2951_v49  ;;  %v3543_v4 = vand.u32 4294901760, %v3542_v2 }
 0x4ff   :  { %27062 = vmatprep.subr.mxu1 %v29881_v51 }
 0x500   :  { %27063 = vmatpush3.xpose.msra.mxu1 %v29881_v51 }
 0x501   :  { %27042 = vmatpush3.xpose.msra.mxu0 %v29881_v51  ;;  %27074 = vmatprep.subr.mxu1 %v29873_v46 }
 0x502   :  { %27053 = vmatprep.subr.mxu0 %v29879_v50 }
 0x503   :  { %27065 = vmatmul.mubr.f32.vlgmr.msra.gmra.mxu1 %v2959_v45 }
 0x504   :  { %27044 = vmatmul.mubr.f32.vlgmr.msra.gmra.mxu0 %v2961_v59  ;;  %27075 = vmatpush3.xpose.msra.mxu1 %v29873_v46 }
 0x505   :  { %27054 = vmatpush3.xpose.msra.mxu0 %v29879_v50  ;;  %27057 = vmatprep.mubr.f32.mxu0 %v2948_v35 }
 0x506   :  { %27078 = vmatprep.mubr.f32.mxu1 %v30134_v32  ;;  %27055 = vmatprep.subr.mxu0 %v29889_v53 }
 0x507   :  { %27076 = vmatprep.subr.mxu1 %v29881_v51 }
 0x508   :  { %27077 = vmatpush3.xpose.msra.mxu1 %v29881_v51 }
 0x509   :  { %27056 = vmatpush3.xpose.msra.mxu0 %v29889_v53  ;;  %27088 = vmatprep.subr.mxu1 %v3536_v1 }
 0x50a   :  { %27067 = vmatprep.subr.mxu0 %v29886_v52 }
 0x50b   :  { %27079 = vmatmul.mubr.f32.vlgmr.msra.gmra.mxu1 %v30150_v33 }
 0x50c   :  { %27058 = vmatmul.mubr.f32.vlgmr.msra.gmra.mxu0 %v2958_v41  ;;  %27089 = vmatpush3.msra.mxu1 %v3536_v1 }
 0x50d   :  { %27068 = vmatpush3.xpose.msra.mxu0 %v29886_v52  ;;  %27071 = vmatprep.mubr.f32.mxu0 %v30134_v32 }
 0x50e   :  { %27069 = vmatprep.subr.mxu0 %v29900_v57  ;;  %27090 = vmatprep.subr.mxu1 %v3543_v4 }
 0x50f   :  { %27091 = vmatpush3.msra.mxu1 %v3543_v4 }
 0x510   :  { %27102 = vmatprep.subr.mxu1 %v30163_v42 }
 0x511   :  { %27070 = vmatpush3.xpose.msra.mxu0 %v29900_v57 }
 0x512   :  { %27081 = vmatprep.subr.mxu0 %v30163_v42 }
 0x514   :  { %27072 = vmatmul.mubr.f32.vlgmr.msra.gmra.mxu0 %v30150_v33 }
 0x515   :  { %27082 = vmatpush3.msra.mxu0 %v30163_v42 }
 0x516   :  { %27083 = vmatprep.subr.mxu0 %v30180_v48 }
 0x517   :  { %27084 = vmatpush3.msra.mxu0 %v30180_v48 }
 0x518   :  { %27095 = vmatprep.subr.mxu0 %v30176_v47 }
 0x597   :  { %v26968_v5 = vpop.f32.mrf.mxu1 }
 0x599   :  { %v30224_v6 = vpop.f32.mrf.mxu1 }
 0x59c   :  { %v26982_v0 = vpop.f32.mrf.mxu1 }
 0x59e   :  { %v30226_v8 = vpop.f32.mrf.mxu1 }
 0x59f   :  { %v26961_v7 = vpop.f32.mrf.mxu0 }
 0x5a0   :  { %v2028_v3 = vadd.f32 %v26968_v5, %v26961_v7 }
 0x5a1   :  { %v30228_v9 = vpop.f32.mrf.mxu0  ;;  %v26996_v10 = vpop.f32.mrf.mxu1 }
 0x5a3   :  { %v30232_v14 = vpop.f32.mrf.mxu1 }
 0x5a6   :  { %v26975_v12 = vpop.f32.mrf.mxu0  ;;  %v27010_v17 = vpop.f32.mrf.mxu1 }
 0x5a7   :  { %v2111_v13 = vadd.f32 %v26975_v12, %v2028_v3 }
 0x5a8   :  { %v30230_v16 = vpop.f32.mrf.mxu0  ;;  %v30236_v19 = vpop.f32.mrf.mxu1 }
 0x5a9   :  { %v2194_v15 = vadd.f32 %v26982_v0, %v2111_v13 }
 0x5ac   :  { %v26989_v26 = vpop.f32.mrf.mxu0  ;;  %v27024_v37 = vpop.f32.mrf.mxu1 }
 0x5ad   :  { %v2277_v27 = vadd.f32 %v26989_v26, %v2194_v15 }
 0x5ae   :  { %v30234_v29 = vpop.f32.mrf.mxu0  ;;  %v30242_v40 = vpop.f32.mrf.mxu1 }
 0x5af   :  { %v2356_v22 = vadd.f32 %v26996_v10, %v2277_v27 }
 0x5b2   :  { %v27003_v32 = vpop.f32.mrf.mxu0  ;;  %v27038_v45 = vpop.f32.mrf.mxu1 }
 0x5b3   :  { %v2449_v34 = vadd.f32 %v27003_v32, %v2356_v22 }
 0x5b4   :  { %v30238_v36 = vpop.f32.mrf.mxu0  ;;  %v30248_v59 = vpop.f32.mrf.mxu1 }
 0x5b5   :  { %v2536_v30 = vadd.f32 %v27010_v17, %v2449_v34 }
 0x5b7   :  { %v27017_v35 = vpop.f32.mrf.mxu0 }
 0x5b8   :  { %v2619_v33 = vadd.f32 %v27017_v35, %v2536_v30 }
 0x5b9   :  { %v30240_v39 = vpop.f32.mrf.mxu0 }
 0x5ba   :  { %v2702_v41 = vadd.f32 %v27024_v37, %v2619_v33 }
 0x5bb   :  { %v27052_v1 = vpop.f32.mrf.mxu1 }
 0x5bc   :  { %v27031_v43 = vpop.f32.mrf.mxu0 }
 0x5bd   :  { %v2785_v44 = vadd.f32 %v27031_v43, %v2702_v41  ;;  %v3044_v4 = vpop.f32.mrf.mxu1 }
 0x5be   :  { %v30246_v54 = vpop.f32.mrf.mxu0 }
 0x5bf   :  { %v30244_v49 = vadd.f32 %v27038_v45, %v2785_v44 }
 0x5c3   :  { %v27066_v7 = vpop.f32.mrf.mxu1 }
 0x5c4   :  { %v27045_v61 = vpop.f32.mrf.mxu0 }
 0x5c5   :  { %v3051_v0 = vadd.f32 %v27052_v1, %v27045_v61  ;;  %v3208_v15 = vpop.f32.mrf.mxu1 }
 0x5c6   :  { %v2953_v2 = vpop.f32.mrf.mxu0 }
 0x5c7   :  { %v3045_v10 = vadd.f32 %v3044_v4, %v2953_v2 }
 0x5cb   :  { %v27080_v27 = vpop.f32.mrf.mxu1 }
 0x5cc   :  { %v27059_v5 = vpop.f32.mrf.mxu0 }
 0x5cd   :  { %v3134_v12 = vadd.f32 %v27059_v5, %v3051_v0  ;;  %v3372_v35 = vpop.f32.mrf.mxu1 }
 0x5ce   :  { %v3126_v3 = vpop.f32.mrf.mxu0 }
 0x5cf   :  { %v3127_v13 = vadd.f32 %v3126_v3, %v3045_v10  ;;  %v3217_v26 = vadd.f32 %v27066_v7, %v3134_v12 }
 0x5d1   :  { %v3209_v32 = vadd.f32 %v3208_v15, %v3127_v13 }
 0x5d4   :  { %v27073_v17 = vpop.f32.mrf.mxu0 }
 0x5d5   :  { %v3300_v22 = vadd.f32 %v27073_v17, %v3217_v26 }
 0x5d6   :  { %v3293_v34 = vpop.f32.mrf.mxu0 }
 0x5d7   :  { %v3379_v30 = vadd.f32 %v27080_v27, %v3300_v22  ;;  %v3294_v37 = vadd.f32 %v3293_v34, %v3209_v32 }
 0x5d9   :  { %v3383_v33 = vmul.f32 0.35355338, %v3379_v30  ;;  %v3373_v41 = vadd.f32 %v3372_v35, %v3294_v37 }
 0x5db   :  { %v3385_v43 = vsel %vm29995_vm7, %v3383_v33, -1e+09  ;;  %v3382_v44 = vmul.f32 0.35355338, %v3373_v41  ;;  %v3925_v41 = vsel %vm30261_vm2, %v29836_v28, 0.0  ;;  %v3926_v28 = vsel %vm30261_vm2, %v29834_v25, 0.0 }
 0x5dc   :  { %v3389_v45 = vsel %vm1277_vm9, %v3385_v43, -inf }
 0x5dd   :  { %3390 = vmax.xlane.f32.xlu0 %v3389_v45  ;;  %v3384_v61 = vsel %vm29991_vm6, %v3382_v44, -1e+09 }
 0x5de   :  { %v3386_v1 = vsel %vm1277_vm9, %v3384_v61, -inf }
 0x5df   :  { %3387 = vmax.xlane.f32.xlu1 %v3386_v1  ;;  %v3928_v1 = vsel %vm164_vm0, %v3925_v41, 0 }
 0x666   :  { %v3391_v2 = vpop.xlane.xlu0 %3390 }
 0x667   :  { %v3393_v4 = vsub.f32 %v3385_v43, %v3391_v2 }
 0x668   :  { %v3388_v5 = vpop.xlane.xlu1 %3387 }
 0x669   :  { %v3396_v0 = vmul.f32 1.442695, %v3393_v4  ;;  %v3392_v7 = vsub.f32 %v3384_v61, %v3388_v5  ;;  %v30272_v5 = vand.u32 4294901760, %v3928_v1 }
 0x66b   :  { %29467 = vpow2.f32 %v3396_v0  ;;  %v3394_v3 = vmul.f32 1.442695, %v3392_v7 }
 0x66d   :  { %29469 = vpow2.f32 %v3394_v3  ;;  %v3931_v3 = vsel %vm164_vm0, %v3926_v28, 0 }
 0x66e   :  { %v30285_v25 = vand.u32 4294901760, %v3931_v3 }
 0x678   :  { %v29468_v10 = vpop.eup %29467 }
 0x679   :  { %v3401_v12 = vsel %vm1277_vm9, %v29468_v10, 0.0 }
 0x67a   :  { %v29470_v13 = vpop.eup %29469  ;;  %3402 = vadd.xlane.f32.xlu0 %v3401_v12  ;;  %v4001_v12 = vsub.f32 %v3928_v1, %v30272_v5 }
 0x67b   :  { %v3398_v15 = vsel %vm1277_vm9, %v29470_v13, 0.0 }
 0x67c   :  { %3399 = vadd.xlane.f32.xlu1 %v3398_v15 }
 0x703   :  { %v3403_v26 = vpop.xlane.xlu0 %3402 }
 0x704   :  { %29471 = vrcp.f32 %v3403_v26 }
 0x705   :  { %v3400_v27 = vpop.xlane.xlu1 %3399 }
 0x706   :  { %29473 = vrcp.f32 %v3400_v27 }
 0x711   :  { %v29472_v17 = vpop.eup %29471 }
 0x712   :  { %v3407_v22 = vmul.f32 %v29472_v17, %v29468_v10 }
 0x713   :  { %v29474_v32 = vpop.eup %29473 }
 0x714   :  { %v3406_v34 = vmul.f32 %v29474_v32, %v29470_v13  ;;  %v3414_v30 = vsel %vm1277_vm9, %v3407_v22, 0  ;;  %v4002_v13 = vand.u32 4294901760, %v4001_v12 }
 0x715   :  { %v3493_v35 = vand.u32 4294901760, %v3414_v30 }
 0x716   :  { %v3411_v33 = vsel %vm1277_vm9, %v3406_v34, 0 }
 0x717   :  { %v3483_v43 = vand.u32 4294901760, %v3411_v33  ;;  %v3494_v44 = vsub.f32 %v3414_v30, %v3493_v35 }
 0x719   :  { %27092 = vmatprep.mubr.f32.mxu1 %v3483_v43  ;;  %v3484_v45 = vsub.f32 %v3411_v33, %v3483_v43  ;;  %v3495_v61 = vand.u32 4294901760, %v3494_v44 }
 0x71a   :  { %27093 = vmatmul.mubr.f32.vlgmr.msra.gmra.mxu1 %v3493_v35 }
 0x71b   :  { %27103 = vmatpush3.msra.mxu1 %v30163_v42  ;;  %v3485_v2 = vand.u32 4294901760, %v3484_v45  ;;  %v3496_v4 = vsub.f32 %v3494_v44, %v3495_v61 }
 0x71c   :  { %27104 = vmatprep.subr.mxu1 %v30180_v48 }
 0x71d   :  { %27105 = vmatpush3.msra.mxu1 %v30180_v48  ;;  %27106 = vmatprep.mubr.f32.mxu1 %v3485_v2  ;;  %v3486_v0 = vsub.f32 %v3484_v45, %v3485_v2  ;;  %v3497_v10 = vand.u32 4294901760, %v3496_v4 }
 0x71e   :  { %27116 = vmatprep.subr.mxu1 %v30163_v42  ;;  %27107 = vmatmul.mubr.f32.vlgmr.msra.gmra.mxu1 %v3495_v61 }
 0x71f   :  { %27117 = vmatpush3.msra.mxu1 %v30163_v42  ;;  %27120 = vmatprep.mubr.f32.mxu1 %v3483_v43  ;;  %v3487_v7 = vand.u32 4294901760, %v3486_v0  ;;  %v4462_v42 = vsel %vm30261_vm2, %v30025_v11, 0.0  ;;  %v4461_v11 = vsel %vm30261_vm2, %v30033_v38, 0.0 }
 0x720   :  { %27118 = vmatprep.subr.mxu1 %v30180_v48 }
 0x721   :  { %27119 = vmatpush3.msra.mxu1 %v30180_v48  ;;  %27085 = vmatprep.mubr.f32.mxu0 %v3487_v7  ;;  %v4011_v48 = vsub.f32 %v3931_v3, %v30285_v25 }
 0x722   :  { %27130 = vmatprep.subr.mxu1 %v29906_v60  ;;  %27086 = vmatmul.mubr.f32.vlgmr.msra.gmra.mxu0 %v3497_v10 }
 0x723   :  { %27096 = vmatpush3.msra.mxu0 %v30176_v47  ;;  %27121 = vmatmul.mubr.f32.vlgmr.msra.gmra.mxu1 %v3493_v35  ;;  %v30297_v47 = vand.u32 4294901760, %v4462_v42 }
 0x724   :  { %27131 = vmatpush3.xpose.msra.mxu1 %v29906_v60  ;;  %27097 = vmatprep.subr.mxu0 %v30191_v58  ;;  %v4003_v60 = vsub.f32 %v4001_v12, %v4002_v13 }
 0x725   :  { %27099 = vmatprep.mubr.f32.mxu0 %v3484_v45  ;;  %27132 = vmatprep.subr.mxu1 %v29912_v63  ;;  %v30309_v15 = vsub.f32 %v4462_v42, %v30297_v47 }
 0x726   :  { %27134 = vmatprep.mubr.f32.mxu1 %v30272_v5  ;;  %27098 = vmatpush3.msra.mxu0 %v30191_v58  ;;  %v4012_v58 = vand.u32 4294901760, %v4011_v48  ;;  %v4004_v38 = vand.u32 4294901760, %v4003_v60 }
 0x727   :  { %27109 = vmatprep.subr.mxu0 %v30188_v56  ;;  %27100 = vmatmul.mubr.f32.vlgmr.msra.gmra.mxu0 %v3494_v44 }
 0x728   :  { %27110 = vmatpush3.msra.mxu0 %v30188_v56  ;;  %27133 = vmatpush3.xpose.msra.mxu1 %v29912_v63  ;;  %v30313_v63 = vand.u32 4294901760, %v4461_v11  ;;  %v4013_v56 = vsub.f32 %v4011_v48, %v4012_v58 }
 0x729   :  { %27111 = vmatprep.subr.mxu0 %v30201_v62  ;;  %27113 = vmatprep.mubr.f32.mxu0 %v3483_v43 }
 0x72a   :  { %27144 = vmatprep.subr.mxu1 %v29873_v46  ;;  %27112 = vmatpush3.msra.mxu0 %v30201_v62  ;;  %v30320_v62 = vand.u32 4294901760, %v30309_v15  ;;  %v30323_v26 = vsub.f32 %v4461_v11, %v30313_v63  ;;  %v4014_v27 = vand.u32 4294901760, %v4013_v56 }
 0x72b   :  { %27123 = vmatprep.subr.mxu0 %v29873_v46  ;;  %27135 = vmatmul.mubr.f32.vlgmr.msra.gmra.mxu1 %v30285_v25 }
 0x72c   :  { %27114 = vmatmul.mubr.f32.vlgmr.msra.gmra.mxu0 %v3493_v35  ;;  %27145 = vmatpush3.xpose.msra.mxu1 %v29873_v46  ;;  %v4588_v17 = vsub.f32 %v30309_v15, %v30320_v62  ;;  %v30333_v22 = vand.u32 4294901760, %v30323_v26 }
 0x72d   :  { %27124 = vmatpush3.xpose.msra.mxu0 %v29873_v46  ;;  %27148 = vmatprep.mubr.f32.mxu1 %v4002_v13 }
 0x72e   :  { %27125 = vmatprep.subr.mxu0 %v29881_v51  ;;  %27127 = vmatprep.mubr.f32.mxu0 %v4004_v38  ;;  %v4589_v32 = vand.u32 4294901760, %v4588_v17  ;;  %v4595_v34 = vsub.f32 %v30323_v26, %v30333_v22 }
 0x72f   :  { %27146 = vmatprep.subr.mxu1 %v29881_v51 }
 0x730   :  { %27147 = vmatpush3.xpose.msra.mxu1 %v29881_v51 }
 0x731   :  { %27126 = vmatpush3.xpose.msra.mxu0 %v29881_v51  ;;  %27158 = vmatprep.subr.mxu1 %v29873_v46 }
 0x732   :  { %27137 = vmatprep.subr.mxu0 %v29879_v50 }
 0x733   :  { %27149 = vmatmul.mubr.f32.vlgmr.msra.gmra.mxu1 %v4012_v58 }
 0x734   :  { %27128 = vmatmul.mubr.f32.vlgmr.msra.gmra.mxu0 %v4014_v27  ;;  %27159 = vmatpush3.xpose.msra.mxu1 %v29873_v46  ;;  %v4596_v46 = vand.u32 4294901760, %v4595_v34 }
 0x735   :  { %27138 = vmatpush3.xpose.msra.mxu0 %v29879_v50  ;;  %27141 = vmatprep.mubr.f32.mxu0 %v4001_v12 }
 0x736   :  { %27162 = vmatprep.mubr.f32.mxu1 %v30272_v5  ;;  %27139 = vmatprep.subr.mxu0 %v29889_v53 }
 0x737   :  { %27160 = vmatprep.subr.mxu1 %v29881_v51 }
 0x738   :  { %27161 = vmatpush3.xpose.msra.mxu1 %v29881_v51 }
 0x739   :  { %27140 = vmatpush3.xpose.msra.mxu0 %v29889_v53  ;;  %27172 = vmatprep.subr.mxu1 %v4589_v32 }
 0x73a   :  { %27151 = vmatprep.subr.mxu0 %v29886_v52 }
 0x73b   :  { %27163 = vmatmul.mubr.f32.vlgmr.msra.gmra.mxu1 %v30285_v25 }
 0x73c   :  { %27142 = vmatmul.mubr.f32.vlgmr.msra.gmra.mxu0 %v4011_v48  ;;  %27173 = vmatpush3.msra.mxu1 %v4589_v32 }
 0x73d   :  { %27152 = vmatpush3.xpose.msra.mxu0 %v29886_v52  ;;  %27155 = vmatprep.mubr.f32.mxu0 %v30272_v5 }
 0x73e   :  { %27153 = vmatprep.subr.mxu0 %v29900_v57  ;;  %27174 = vmatprep.subr.mxu1 %v4596_v46 }
 0x73f   :  { %27175 = vmatpush3.msra.mxu1 %v4596_v46 }
 0x740   :  { %27186 = vmatprep.subr.mxu1 %v30297_v47 }
 0x741   :  { %27154 = vmatpush3.xpose.msra.mxu0 %v29900_v57 }
 0x742   :  { %27165 = vmatprep.subr.mxu0 %v30297_v47 }
 0x744   :  { %27156 = vmatmul.mubr.f32.vlgmr.msra.gmra.mxu0 %v30285_v25 }
 0x745   :  { %27166 = vmatpush3.msra.mxu0 %v30297_v47 }
 0x746   :  { %27167 = vmatprep.subr.mxu0 %v30313_v63 }
 0x747   :  { %27168 = vmatpush3.msra.mxu0 %v30313_v63 }
 0x748   :  { %27179 = vmatprep.subr.mxu0 %v30309_v15 }
 0x7da   :  { %v27094_v50 = vpop.f32.mrf.mxu1 }
 0x7dc   :  { %v30356_v51 = vpop.f32.mrf.mxu1 }
 0x7de   :  { %v27108_v57 = vpop.f32.mrf.mxu1 }
 0x7e0   :  { %v30362_v43 = vpop.f32.mrf.mxu1 }
 0x7e2   :  { %v27087_v52 = vpop.f32.mrf.mxu0 }
 0x7e3   :  { %v3587_v53 = vadd.f32 %v27094_v50, %v27087_v52  ;;  %v27122_v1 = vpop.f32.mrf.mxu1 }
 0x7e4   :  { %v30358_v30 = vpop.f32.mrf.mxu0 }
 0x7e5   :  { %v30369_v28 = vpop.f32.mrf.mxu1 }
 0x7e7   :  { %v27101_v35 = vpop.f32.mrf.mxu0 }
 0x7e8   :  { %v3670_v33 = vadd.f32 %v27101_v35, %v3587_v53 }
 0x7e9   :  { %v30360_v41 = vpop.f32.mrf.mxu0 }
 0x7ea   :  { %v3753_v44 = vadd.f32 %v27108_v57, %v3670_v33 }
 0x7eb   :  { %v27136_v7 = vpop.f32.mrf.mxu1 }
 0x7ec   :  { %v27115_v45 = vpop.f32.mrf.mxu0 }
 0x7ed   :  { %v3836_v61 = vadd.f32 %v27115_v45, %v3753_v44  ;;  %v4097_v10 = vpop.f32.mrf.mxu1 }
 0x7ee   :  { %v30367_v5 = vpop.f32.mrf.mxu0 }
 0x7ef   :  { %v3915_v2 = vadd.f32 %v27122_v1, %v3836_v61 }
 0x7f1   :  { %v30365_v4 = vadd.f32 %v3915_v2, %v30244_v49 }
 0x7f3   :  { %v27150_v42 = vpop.f32.mrf.mxu1 }
 0x7f4   :  { %v27129_v0 = vpop.f32.mrf.mxu0 }
 0x7f5   :  { %v4104_v25 = vadd.f32 %v27136_v7, %v27129_v0  ;;  %v4261_v58 = vpop.f32.mrf.mxu1 }
 0x7f6   :  { %v4006_v3 = vpop.f32.mrf.mxu0 }
 0x7f7   :  { %v4098_v48 = vadd.f32 %v4097_v10, %v4006_v3 }
 0x7fb   :  { %v27164_v56 = vpop.f32.mrf.mxu1 }
 0x7fc   :  { %v27143_v12 = vpop.f32.mrf.mxu0 }
 0x7fd   :  { %v4187_v60 = vadd.f32 %v27143_v12, %v4104_v25  ;;  %v4425_v50 = vpop.f32.mrf.mxu1 }
 0x7fe   :  { %v4179_v13 = vpop.f32.mrf.mxu0 }
 0x7ff   :  { %v4180_v11 = vadd.f32 %v4179_v13, %v4098_v48  ;;  %v4270_v38 = vadd.f32 %v27150_v42, %v4187_v60  ;;  %v29599_v13 = vld [vmem:[%s34065_s5 + $0x18] sm:$0xff]  ;;  %v29600_v48 = vld [vmem:[%s34065_s5 + $0x10] sm:$0xff]  ;;  %v29601_v60 = vld [vmem:[%s34065_s5 + $0x8] sm:$0xff] }
 0x801   :  { %v4262_v17 = vadd.f32 %v4261_v58, %v4180_v11  ;;  %v29602_v11 = vld [vmem:[%s34065_s5] sm:$0xff] }
 0x802   :  { %v29603_v58 = vld [vmem:[%s34066_s6] ss:$0 sm:$0xff] }
 0x804   :  { %v27157_v49 = vpop.f32.mrf.mxu0 }
 0x805   :  { %v4353_v27 = vadd.f32 %v27157_v49, %v4270_v38 }
 0x806   :  { %v4346_v32 = vpop.f32.mrf.mxu0 }
 0x807   :  { %v4432_v34 = vadd.f32 %v27164_v56, %v4353_v27  ;;  %v4347_v46 = vadd.f32 %v4346_v32, %v4262_v17 }
 0x809   :  { %v4436_v52 = vmul.f32 0.35355338, %v4432_v34  ;;  %v4426_v53 = vadd.f32 %v4425_v50, %v4347_v46 }
 0x80b   :  { %v4438_v57 = vsel %vm29995_vm7, %v4436_v52, -1e+09  ;;  %v4435_v35 = vmul.f32 0.35355338, %v4426_v53 }
 0x80c   :  { %v4442_v33 = vsel %vm1277_vm9, %v4438_v57, -inf }
 0x80d   :  { %4443 = vmax.xlane.f32.xlu0 %v4442_v33  ;;  %v4437_v44 = vsel %vm29991_vm6, %v4435_v35, -1e+09 }
 0x80e   :  { %v4439_v45 = vsel %vm1277_vm9, %v4437_v44, -inf }
 0x80f   :  { %4440 = vmax.xlane.f32.xlu1 %v4439_v45 }
 0x896   :  { %v4444_v61 = vpop.xlane.xlu0 %4443 }
 0x897   :  { %v4446_v1 = vsub.f32 %v4438_v57, %v4444_v61 }
 0x898   :  { %v4441_v2 = vpop.xlane.xlu1 %4440 }
 0x899   :  { %v4449_v0 = vmul.f32 1.442695, %v4446_v1  ;;  %v4445_v7 = vsub.f32 %v4437_v44, %v4441_v2 }
 0x89b   :  { %29475 = vpow2.f32 %v4449_v0  ;;  %v4447_v3 = vmul.f32 1.442695, %v4445_v7 }
 0x89d   :  { %29477 = vpow2.f32 %v4447_v3 }
 0x8a8   :  { %v29476_v10 = vpop.eup %29475 }
 0x8a9   :  { %v4454_v12 = vsel %vm1277_vm9, %v29476_v10, 0.0 }
 0x8aa   :  { %v29478_v25 = vpop.eup %29477  ;;  %4455 = vadd.xlane.f32.xlu0 %v4454_v12 }
 0x8ab   :  { %v4451_v42 = vsel %vm1277_vm9, %v29478_v25, 0.0 }
 0x8ac   :  { %4452 = vadd.xlane.f32.xlu1 %v4451_v42 }
 0x8bd   :  { %4983 = vrot.lane.b32.xlu1 %v29599_v13, %s29647_s25 }
 0x8c0   :  { %4981 = vrot.lane.b32.xlu0 %v29600_v48, %s29647_s25 }
 0x8c1   :  { %4979 = vrot.lane.b32.xlu1 %v29601_v60, %s29647_s25 }
 0x8c5   :  { %4977 = vrot.lane.b32.xlu1 %v29602_v11, %s29647_s25 }
 0x8c9   :  { %5525 = vrot.lane.b32.xlu1 %v29603_v58, %s29647_s25 }
 0x933   :  { %v4456_v38 = vpop.xlane.xlu0 %4455 }
 0x934   :  { %29479 = vrcp.f32 %v4456_v38 }
 0x935   :  { %v4453_v56 = vpop.xlane.xlu1 %4452 }
 0x936   :  { %29481 = vrcp.f32 %v4453_v56 }
 0x941   :  { %v29480_v49 = vpop.eup %29479 }
 0x942   :  { %v4460_v27 = vmul.f32 %v29480_v49, %v29476_v10 }
 0x943   :  { %v29482_v17 = vpop.eup %29481 }
 0x944   :  { %v4459_v32 = vmul.f32 %v29482_v17, %v29478_v25  ;;  %v4467_v34 = vsel %vm1277_vm9, %v4460_v27, 0 }
 0x945   :  { %v4546_v46 = vand.u32 4294901760, %v4467_v34 }
 0x946   :  { %v4464_v50 = vsel %vm1277_vm9, %v4459_v32, 0  ;;  %v2022_v32 = vadd.f32 %v30224_v6, %v30228_v9 }
 0x947   :  { %v4536_v52 = vand.u32 4294901760, %v4464_v50  ;;  %v4547_v53 = vsub.f32 %v4467_v34, %v4546_v46 }
 0x948   :  { %v2104_v34 = vadd.f32 %v30230_v16, %v2022_v32 }
 0x949   :  { %27176 = vmatprep.mubr.f32.mxu1 %v4536_v52  ;;  %v4537_v57 = vsub.f32 %v4464_v50, %v4536_v52  ;;  %v4548_v35 = vand.u32 4294901760, %v4547_v53 }
 0x94a   :  { %27177 = vmatmul.mubr.f32.vlgmr.msra.gmra.mxu1 %v4546_v46 }
 0x94b   :  { %27187 = vmatpush3.msra.mxu1 %v30297_v47  ;;  %v4538_v33 = vand.u32 4294901760, %v4537_v57  ;;  %v4549_v44 = vsub.f32 %v4547_v53, %v4548_v35 }
 0x94c   :  { %27188 = vmatprep.subr.mxu1 %v30313_v63 }
 0x94d   :  { %27189 = vmatpush3.msra.mxu1 %v30313_v63  ;;  %27190 = vmatprep.mubr.f32.mxu1 %v4538_v33  ;;  %v4539_v45 = vsub.f32 %v4537_v57, %v4538_v33  ;;  %v4550_v1 = vand.u32 4294901760, %v4549_v44  ;;  %v3581_v33 = vadd.f32 %v30356_v51, %v30358_v30 }
 0x94e   :  { %27200 = vmatprep.subr.mxu1 %v30297_v47  ;;  %27191 = vmatmul.mubr.f32.vlgmr.msra.gmra.mxu1 %v4548_v35 }
 0x94f   :  { %27201 = vmatpush3.msra.mxu1 %v30297_v47  ;;  %27204 = vmatprep.mubr.f32.mxu1 %v4536_v52  ;;  %v4540_v61 = vand.u32 4294901760, %v4539_v45  ;;  %v4984_v47 = vpop.permute.xlu1 %4983  ;;  %v3663_v45 = vadd.f32 %v30360_v41, %v3581_v33 }
 0x950   :  { %27202 = vmatprep.subr.mxu1 %v30313_v63 }
 0x951   :  { %27203 = vmatpush3.msra.mxu1 %v30313_v63  ;;  %27169 = vmatprep.mubr.f32.mxu0 %v4540_v61  ;;  %v30414_v63 = vand.u32 4294901760, %v4984_v47 }
 0x952   :  { %27170 = vmatmul.mubr.f32.vlgmr.msra.gmra.mxu0 %v4550_v1  ;;  %27205 = vmatmul.mubr.f32.vlgmr.msra.gmra.mxu1 %v4546_v46 }
 0x953   :  { %27180 = vmatpush3.msra.mxu0 %v30309_v15  ;;  %27183 = vmatprep.mubr.f32.mxu0 %v4537_v57  ;;  %v4982_v15 = vpop.permute.xlu0 %4981  ;;  %v30420_v2 = vsub.f32 %v4984_v47, %v30414_v63 }
 0x954   :  { %27181 = vmatprep.subr.mxu0 %v30323_v26  ;;  %v30422_v0 = vand.u32 4294901760, %v4982_v15 }
 0x955   :  { %27182 = vmatpush3.msra.mxu0 %v30323_v26  ;;  %v4980_v26 = vpop.permute.xlu1 %4979  ;;  %v30437_v12 = vand.u32 4294901760, %v30420_v2 }
 0x956   :  { %27193 = vmatprep.subr.mxu0 %v30320_v62  ;;  %27184 = vmatmul.mubr.f32.vlgmr.msra.gmra.mxu0 %v4547_v53  ;;  %v30427_v7 = vsub.f32 %v4982_v15, %v30422_v0 }
 0x957   :  { %27194 = vmatpush3.msra.mxu0 %v30320_v62  ;;  %27197 = vmatprep.mubr.f32.mxu0 %v4536_v52  ;;  %v30424_v62 = vand.u32 4294901760, %v4980_v26  ;;  %v5112_v42 = vsub.f32 %v30420_v2, %v30437_v12 }
 0x958   :  { %27195 = vmatprep.subr.mxu0 %v30333_v22  ;;  %v30447_v13 = vand.u32 4294901760, %v30427_v7 }
 0x959   :  { %27196 = vmatpush3.msra.mxu0 %v30333_v22  ;;  %v4978_v22 = vpop.permute.xlu1 %4977  ;;  %v30432_v3 = vsub.f32 %v4980_v26, %v30424_v62  ;;  %v5113_v48 = vand.u32 4294901760, %v5112_v42 }
 0x95a   :  { %27198 = vmatmul.mubr.f32.vlgmr.msra.gmra.mxu0 %v4546_v46  ;;  %27207 = vmatprep.subr.mxu0 %v30414_v63  ;;  %v30434_v10 = vand.u32 4294901760, %v4978_v22  ;;  %v5119_v60 = vsub.f32 %v30427_v7, %v30447_v13  ;;  %v2186_v46 = vadd.f32 %v30226_v8, %v2104_v34  ;;  %v3745_v8 = vadd.f32 %v30362_v43, %v3663_v45 }
 0x95b   :  { %27208 = vmatpush3.msra.mxu0 %v30414_v63  ;;  %v30454_v11 = vand.u32 4294901760, %v30432_v3  ;;  %27218 = vmatprep.subr.mxu1 %v5113_v48 }
 0x95c   :  { %27209 = vmatprep.subr.mxu0 %v30422_v0  ;;  %v30442_v25 = vsub.f32 %v4978_v22, %v30434_v10  ;;  %v5120_v58 = vand.u32 4294901760, %v5119_v60  ;;  %27219 = vmatpush3.msra.mxu1 %v5113_v48  ;;  %v2271_v50 = vadd.f32 %v30234_v29, %v2186_v46 }
 0x95d   :  { %27210 = vmatpush3.msra.mxu0 %v30422_v0  ;;  %v5126_v38 = vsub.f32 %v30432_v3, %v30454_v11 }
 0x95e   :  { %27211 = vmatprep.subr.mxu0 %v30424_v62  ;;  %v30460_v56 = vand.u32 4294901760, %v30442_v25  ;;  %27220 = vmatprep.subr.mxu1 %v5120_v58  ;;  %v2350_v52 = vadd.f32 %v30232_v14, %v2271_v50 }
 0x95f   :  { %27212 = vmatpush3.msra.mxu0 %v30424_v62  ;;  %v5127_v49 = vand.u32 4294901760, %v5126_v38  ;;  %27221 = vmatpush3.msra.mxu1 %v5120_v58 }
 0x960   :  { %27213 = vmatprep.subr.mxu0 %v30434_v10  ;;  %v5133_v27 = vsub.f32 %v30442_v25, %v30460_v56  ;;  %v2439_v53 = vadd.f32 %v30238_v36, %v2350_v52 }
 0x961   :  { %27214 = vmatpush3.msra.mxu0 %v30434_v10  ;;  %27222 = vmatprep.subr.mxu1 %v5127_v49 }
 0x962   :  { %27229 = vmatprep.subr.mxu0 %v30420_v2  ;;  %v5134_v17 = vand.u32 4294901760, %v5133_v27  ;;  %27223 = vmatpush3.msra.mxu1 %v5127_v49  ;;  %v2530_v35 = vadd.f32 %v30236_v19, %v2439_v53  ;;  %v3830_v19 = vadd.f32 %v30367_v5, %v3745_v8 }
 0x964   :  { %27224 = vmatprep.subr.mxu1 %v5134_v17  ;;  %v2612_v6 = vadd.f32 %v30240_v39, %v2530_v35  ;;  %v3909_v42 = vadd.f32 %v30369_v28, %v3830_v19 }
 0x965   :  { %27225 = vmatpush3.msra.mxu1 %v5134_v17 }
 0x966   :  { %27240 = vmatprep.subr.mxu1 %v30414_v63  ;;  %v2694_v14 = vadd.f32 %v30242_v40, %v2612_v6 }
 0x968   :  { %v2779_v30 = vadd.f32 %v30246_v54, %v2694_v14 }
 0x96a   :  { %v2858_v40 = vadd.f32 %v30248_v59, %v2779_v30 }
 0x96c   :  { %v3918_v5 = vadd.f32 %v3909_v42, %v2858_v40  ;;  %v113_v42 = vld [vmem:[%s34065_s5 + $0x38] sm:$0xff] }
 0xa0a   :  { %v27178_v57 = vpop.f32.mrf.mxu1 }
 0xa0c   :  { %v4633_v44 = vpop.f32.mrf.mxu1 }
 0xa0e   :  { %v27192_v9 = vpop.f32.mrf.mxu1 }
 0xa10   :  { %v4797_v36 = vpop.f32.mrf.mxu1 }
 0xa12   :  { %v27171_v16 = vpop.f32.mrf.mxu0  ;;  %v27206_v39 = vpop.f32.mrf.mxu1 }
 0xa13   :  { %v4640_v61 = vadd.f32 %v27178_v57, %v27171_v16 }
 0xa14   :  { %v4542_v29 = vpop.f32.mrf.mxu0  ;;  %v4961_v49 = vpop.f32.mrf.mxu1 }
 0xa15   :  { %v4634_v47 = vadd.f32 %v4633_v44, %v4542_v29 }
 0xa16   :  { %v27185_v1 = vpop.f32.mrf.mxu0 }
 0xa17   :  { %v4723_v15 = vadd.f32 %v27185_v1, %v4640_v61  ;;  %v29604_v1 = vld [vmem:[%s34060_s0 + $0x8] sm:$0xff] }
 0xa18   :  { %v4715_v51 = vpop.f32.mrf.mxu0 }
 0xa19   :  { %v4716_v41 = vadd.f32 %v4715_v51, %v4634_v47  ;;  %v4806_v26 = vadd.f32 %v27192_v9, %v4723_v15  ;;  %v29605_v15 = vld [vmem:[%s34060_s0] sm:$0xff] }
 0xa1a   :  { %v27199_v22 = vpop.f32.mrf.mxu0 }
 0xa1b   :  { %v4889_v43 = vadd.f32 %v27199_v22, %v4806_v26  ;;  %v4798_v48 = vadd.f32 %v4797_v36, %v4716_v41  ;;  %v5526_v36 = vpop.permute.xlu1 %5525  ;;  %v112_v22 = vld [vmem:[%s34065_s5 + $0x30] sm:$0xff] }
 0xa1c   :  { %v4882_v60 = vpop.f32.mrf.mxu0 }
 0xa1d   :  { %v4968_v58 = vadd.f32 %v27206_v39, %v4889_v43  ;;  %v4883_v38 = vadd.f32 %v4882_v60, %v4798_v48  ;;  %v30537_v43 = vand.u32 4294901760, %v113_v42  ;;  %v30539_v48 = vand.u32 4294901760, %v112_v22  ;;  %v111_v60 = vld [vmem:[%s34065_s5 + $0x28] sm:$0xff] }
 0xa1e   :  { %v30548_v40 = vand.u32 4294901760, %v111_v60 }
 0xa1f   :  { %v4972_v27 = vadd.f32 %v4968_v58, %v30365_v4  ;;  %v4962_v17 = vadd.f32 %v4961_v49, %v4883_v38  ;;  %v110_v58 = vld [vmem:[%s34065_s5 + $0x20] sm:$0xff]  ;;  %v30559_v49 = vsub.f32 %v113_v42, %v30537_v43 }
 0xa20   :  { %v30554_v38 = vand.u32 4294901760, %v110_v58 }
 0xa21   :  { %v4993_v54 = vsel %vm164_vm0, %v4972_v27, 0  ;;  %v4971_v32 = vadd.f32 %v4962_v17, %v3918_v5 }
 0xa22   :  { %v5074_v34 = vand.u32 4294901760, %v4993_v54 }
 0xa23   :  { %v4990_v46 = vsel %vm164_vm0, %v4971_v32, 0 }
 0xa24   :  { %v5075_v50 = vsub.f32 %v4993_v54, %v5074_v34  ;;  %v5064_v28 = vand.u32 4294901760, %v4990_v46 }
 0xa26   :  { %27226 = vmatprep.mubr.f32.mxu1 %v5064_v28  ;;  %v5065_v52 = vsub.f32 %v4990_v46, %v5064_v28  ;;  %v5076_v53 = vand.u32 4294901760, %v5075_v50 }
 0xa27   :  { %27227 = vmatmul.mubr.f32.vlgmr.msra.gmra.mxu1 %v5074_v34 }
 0xa28   :  { %27241 = vmatpush3.msra.mxu1 %v30414_v63  ;;  %v5066_v59 = vand.u32 4294901760, %v5065_v52  ;;  %v5077_v57 = vsub.f32 %v5075_v50, %v5076_v53 }
 0xa29   :  { %27242 = vmatprep.subr.mxu1 %v30422_v0 }
 0xa2a   :  { %27243 = vmatpush3.msra.mxu1 %v30422_v0  ;;  %27248 = vmatprep.mubr.f32.mxu1 %v5066_v59  ;;  %v5067_v4 = vsub.f32 %v5065_v52, %v5066_v59  ;;  %v5078_v33 = vand.u32 4294901760, %v5077_v57  ;;  %v30573_v59 = vsub.f32 %v111_v60, %v30548_v40 }
 0xa2b   :  { %27244 = vmatprep.subr.mxu1 %v30424_v62 }
 0xa2c   :  { %27245 = vmatpush3.msra.mxu1 %v30424_v62  ;;  %v5068_v35 = vand.u32 4294901760, %v5067_v4  ;;  %v30576_v4 = vand.u32 4294901760, %v30559_v49 }
 0xa2d   :  { %27246 = vmatprep.subr.mxu1 %v30434_v10 }
 0xa2e   :  { %27247 = vmatpush3.msra.mxu1 %v30434_v10  ;;  %27215 = vmatprep.mubr.f32.mxu0 %v5068_v35  ;;  %v30582_v35 = vand.u32 4294901760, %v30573_v59 }
 0xa2f   :  { %27249 = vmatmul.mubr.f32.vlgmr.msra.gmra.mxu1 %v5076_v53  ;;  %27262 = vmatprep.subr.mxu1 %v30414_v63  ;;  %v30570_v53 = vsub.f32 %v112_v22, %v30539_v48 }
 0xa30   :  { %27216 = vmatmul.mubr.f32.vlgmr.msra.gmra.mxu0 %v5078_v33  ;;  %27263 = vmatpush3.msra.mxu1 %v30414_v63  ;;  %v5701_v33 = vsub.f32 %v30559_v49, %v30576_v4 }
 0xa31   :  { %27230 = vmatpush3.msra.mxu0 %v30420_v2  ;;  %27270 = vmatprep.mubr.f32.mxu1 %v5064_v28  ;;  %v30579_v57 = vand.u32 4294901760, %v30570_v53 }
 0xa32   :  { %27231 = vmatprep.subr.mxu0 %v30427_v7  ;;  %27237 = vmatprep.mubr.f32.mxu0 %v5065_v52 }
 0xa33   :  { %27264 = vmatprep.subr.mxu1 %v30422_v0  ;;  %27232 = vmatpush3.msra.mxu0 %v30427_v7 }
 0xa34   :  { %27265 = vmatpush3.msra.mxu1 %v30422_v0  ;;  %27233 = vmatprep.subr.mxu0 %v30432_v3 }
 0xa35   :  { %27266 = vmatprep.subr.mxu1 %v30424_v62  ;;  %27234 = vmatpush3.msra.mxu0 %v30432_v3 }
 0xa36   :  { %27267 = vmatpush3.msra.mxu1 %v30424_v62  ;;  %27235 = vmatprep.subr.mxu0 %v30442_v25 }
 0xa37   :  { %27268 = vmatprep.subr.mxu1 %v30434_v10  ;;  %27236 = vmatpush3.msra.mxu0 %v30442_v25 }
 0xa38   :  { %27269 = vmatpush3.msra.mxu1 %v30434_v10  ;;  %27238 = vmatmul.mubr.f32.vlgmr.msra.gmra.mxu0 %v5075_v50 }
 0xa39   :  { %27251 = vmatprep.subr.mxu0 %v30437_v12  ;;  %27271 = vmatmul.mubr.f32.vlgmr.msra.gmra.mxu1 %v5074_v34 }
 0xa3a   :  { %27252 = vmatpush3.msra.mxu0 %v30437_v12  ;;  %27259 = vmatprep.mubr.f32.mxu0 %v5064_v28 }
 0xa3b   :  { %27253 = vmatprep.subr.mxu0 %v30447_v13 }
 0xa3c   :  { %27254 = vmatpush3.msra.mxu0 %v30447_v13 }
 0xa3d   :  { %27255 = vmatprep.subr.mxu0 %v30454_v11 }
 0xa3e   :  { %27256 = vmatpush3.msra.mxu0 %v30454_v11 }
 0xa3f   :  { %27257 = vmatprep.subr.mxu0 %v30460_v56 }
 0xa40   :  { %27258 = vmatpush3.msra.mxu0 %v30460_v56 }
 0xa41   :  { %27260 = vmatmul.mubr.f32.vlgmr.msra.gmra.mxu0 %v5074_v34  ;;  %27273 = vmatprep.subr.mxu0 %v30537_v43 }
 0xa42   :  { %27274 = vmatpush3.msra.mxu0 %v30537_v43 }
 0xa43   :  { %27275 = vmatprep.subr.mxu0 %v30539_v48 }
 0xa44   :  { %27276 = vmatpush3.msra.mxu0 %v30539_v48 }
 0xa45   :  { %27277 = vmatprep.subr.mxu0 %v30548_v40 }
 0xa46   :  { %27278 = vmatpush3.msra.mxu0 %v30548_v40 }
 0xa47   :  { %27279 = vmatprep.subr.mxu0 %v30554_v38 }
 0xa48   :  { %27280 = vmatpush3.msra.mxu0 %v30554_v38 }
 0xa49   :  { %27295 = vmatprep.subr.mxu0 %v30559_v49 }
 0xae7   :  { %v27228_v2 = vpop.f32.mrf.mxu1 }
 0xae9   :  { %v5171_v7 = vpop.f32.mrf.mxu1 }
 0xaef   :  { %v27250_v10 = vpop.f32.mrf.mxu1 }
 0xaf0   :  { %v27217_v63 = vpop.f32.mrf.mxu0 }
 0xaf1   :  { %v5178_v3 = vadd.f32 %v27228_v2, %v27217_v63  ;;  %v5341_v45 = vpop.f32.mrf.mxu1  ;;  %v5708_v63 = vsub.f32 %v30570_v53, %v30579_v57  ;;  %v5715_v2 = vsub.f32 %v30573_v59, %v30582_v35 }
 0xaf2   :  { %v5070_v0 = vpop.f32.mrf.mxu0 }
 0xaf3   :  { %v5172_v25 = vadd.f32 %v5171_v7, %v5070_v0  ;;  %v5702_v0 = vand.u32 4294901760, %v5701_v33  ;;  %v5716_v7 = vand.u32 4294901760, %v5715_v2 }
 0xaf5   :  { %27284 = vmatprep.subr.mxu1 %v5702_v0 }
 0xaf6   :  { %27285 = vmatpush3.msra.mxu1 %v5702_v0 }
 0xaf8   :  { %v27239_v62 = vpop.f32.mrf.mxu0 }
 0xaf9   :  { %v5265_v44 = vadd.f32 %v27239_v62, %v5178_v3  ;;  %v27272_v9 = vpop.f32.mrf.mxu1  ;;  %v5709_v62 = vand.u32 4294901760, %v5708_v63  ;;  %v30592_v3 = vsub.f32 %v110_v58, %v30554_v38 }
 0xafa   :  { %v5257_v12 = vpop.f32.mrf.mxu0 }
 0xafb   :  { %v5258_v13 = vadd.f32 %v5257_v12, %v5172_v25  ;;  %v5350_v6 = vadd.f32 %v27250_v10, %v5265_v44  ;;  %v5513_v61 = vpop.f32.mrf.mxu1  ;;  %27286 = vmatprep.subr.mxu1 %v5709_v62  ;;  %v30595_v10 = vand.u32 4294901760, %v30592_v3  ;;  %v30603_v44 = vld [vmem:[%s34066_s6 + $0x1] ss:$0 sm:$0xff] }
 0xafc   :  { %27287 = vmatpush3.msra.mxu1 %v5709_v62 }
 0xafd   :  { %v5342_v8 = vadd.f32 %v5341_v45, %v5258_v13  ;;  %27288 = vmatprep.subr.mxu1 %v5716_v7  ;;  %v5722_v12 = vsub.f32 %v30592_v3, %v30595_v10 }
 0xafe   :  { %27289 = vmatpush3.msra.mxu1 %v5716_v7 }
 0xaff   :  { %v5723_v25 = vand.u32 4294901760, %v5722_v12 }
 0xb01   :  { %v27261_v11 = vpop.f32.mrf.mxu0  ;;  %27290 = vmatprep.subr.mxu1 %v5723_v25 }
 0xb02   :  { %v5439_v16 = vadd.f32 %v27261_v11, %v5350_v6  ;;  %27291 = vmatpush3.msra.mxu1 %v5723_v25 }
 0xb03   :  { %v5432_v29 = vpop.f32.mrf.mxu0  ;;  %27306 = vmatprep.subr.mxu1 %v30537_v43 }
 0xb04   :  { %v5520_v56 = vadd.f32 %v27272_v9, %v5439_v16  ;;  %v5433_v14 = vadd.f32 %v5432_v29, %v5342_v8  ;;  %v25362_v29 = vld [vmem:[%s34067_s7 + $0x2] ss:$0 sm:$0xff] }
 0xb06   :  { %v5524_v19 = vadd.f32 %v29604_v1, %v5520_v56  ;;  %v5514_v47 = vadd.f32 %v5513_v61, %v5433_v14  ;;  %v25363_v14 = vld [vmem:[%s34067_s7 + $0x3] ss:$0 sm:$0xff] }
 0xb08   :  { %v5523_v51 = vadd.f32 %v29605_v15, %v5514_v47  ;;  %v30522_v30 = vadd.f32 %v5526_v36, %v5524_v19 }
 0xb0a   :  { %34120 = vst [vmem:[#allocation10_spill] sm:$0xff] %v30522_v30  ;;  %v30524_v41 = vadd.f32 %v5526_v36, %v5523_v51  ;;  %v5533_v26 = vsel %vm164_vm0, %v30522_v30, 0.0 }
 0xb0b   :  { %5534 = vadd.xlane.f32.xlu1 %v5533_v26 }
 0xb0c   :  { %34121 = vst [vmem:[#allocation11_spill] sm:$0xff] %v30524_v41  ;;  %v5530_v39 = vsel %vm164_vm0, %v30524_v41, 0.0 }
 0xb0d   :  { %5531 = vadd.xlane.f32.xlu0 %v5530_v39 }
 0xb1c   :  { %6120 = vrot.lane.b32.xlu1 %v112_v22, %s29643_s16 }
 0xb20   :  { %6118 = vrot.lane.b32.xlu1 %v111_v60, %s29643_s16 }
 0xb24   :  { %6116 = vrot.lane.b32.xlu1 %v110_v58, %s29643_s16 }
 0xb94   :  { %v5535_v5 = vpop.xlane.xlu1 %5534 }
 0xb95   :  { %v5537_v27 = vmul.f32 0.03125, %v5535_v5 }
 0xb96   :  { %v5532_v17 = vpop.xlane.xlu0 %5531 }
 0xb97   :  { %v5536_v54 = vmul.f32 0.03125, %v5532_v17  ;;  %v5539_v32 = vsub.f32 %v30522_v30, %v5537_v27 }
 0xb98   :  { %v6121_v47 = vpop.permute.xlu1 %6120 }
 0xb99   :  { %v5538_v34 = vsub.f32 %v30524_v41, %v5536_v54  ;;  %v5541_v28 = vmul.f32 %v5539_v32, %v5539_v32 }
 0xb9b   :  { %v5540_v46 = vmul.f32 %v5538_v34, %v5538_v34  ;;  %v5545_v52 = vsel %vm164_vm0, %v5541_v28, 0.0 }
 0xb9c   :  { %v6119_v58 = vpop.permute.xlu1 %6118 }
 0xb9d   :  { %v5542_v50 = vsel %vm164_vm0, %v5540_v46, 0.0  ;;  %v30634_v33 = vand.u32 4294901760, %v6119_v58 }
 0xb9e   :  { %5543 = vadd.xlane.f32.xlu0 %v5542_v50 }
 0xb9f   :  { %v30646_v12 = vsub.f32 %v6119_v58, %v30634_v33 }
 0xba0   :  { %v6117_v28 = vpop.permute.xlu1 %6116 }
 0xba1   :  { %v30641_v62 = vand.u32 4294901760, %v6117_v28 }
 0xba2   :  { %5546 = vadd.xlane.f32.xlu0 %v5545_v52 }
 0xbb8   :  { %6122 = vrot.lane.b32.xlu0 %v113_v42, %s29643_s16 }
 0xbbc   :  { %6128 = vrot.lane.b32.xlu0 %v30603_v44, %s29643_s16 }
 0xc27   :  { %v5544_v13 = vpop.xlane.xlu0 %5543 }
 0xc28   :  { %v5548_v45 = vmul.f32 0.03125, %v5544_v13  ;;  %v30654_v13 = vsub.f32 %v6117_v28, %v30641_v62 }
 0xc2a   :  { %v5550_v6 = vadd.f32 1e-05, %v5548_v45  ;;  %v6280_v45 = vand.u32 4294901760, %v30646_v12 }
 0xc2b   :  { %v5547_v9 = vpop.xlane.xlu0 %5546 }
 0xc2c   :  { %29483 = vrsqrt.f32 %v5550_v6  ;;  %v5549_v11 = vmul.f32 0.03125, %v5547_v9  ;;  %v6287_v6 = vand.u32 4294901760, %v30654_v13 }
 0xc2e   :  { %v5551_v16 = vadd.f32 1e-05, %v5549_v11 }
 0xc2f   :  { %v6123_v60 = vpop.permute.xlu0 %6122 }
 0xc30   :  { %29485 = vrsqrt.f32 %v5551_v16 }
 0xc39   :  { %v29484_v8 = vpop.eup %29483 }
 0xc3a   :  { %v5554_v56 = vmul.f32 %v29484_v8, %v5538_v34  ;;  %v30627_v34 = vand.u32 4294901760, %v6121_v47 }
 0xc3c   :  { %v5562_v61 = vmul.f32 %v25362_v29, %v5554_v56  ;;  %v30638_v2 = vsub.f32 %v6121_v47, %v30627_v34 }
 0xc3d   :  { %v29486_v36 = vpop.eup %29485 }
 0xc3e   :  { %v5570_v1 = vadd.f32 %v25363_v14, %v5562_v61  ;;  %v5555_v19 = vmul.f32 %v29486_v36, %v5539_v32  ;;  %v30623_v32 = vand.u32 4294901760, %v6123_v60  ;;  %v6273_v25 = vand.u32 4294901760, %v30638_v2 }
 0xc40   :  { %v5579_v15 = vsel %vm164_vm0, %v5570_v1, 0  ;;  %v5563_v51 = vmul.f32 %v25362_v29, %v5555_v19  ;;  %v30632_v52 = vsub.f32 %v6123_v60, %v30623_v32 }
 0xc41   :  { %v30614_v26 = vand.u32 4294901760, %v5579_v15 }
 0xc42   :  { %v5571_v39 = vadd.f32 %v25363_v14, %v5563_v51  ;;  %v6266_v7 = vand.u32 4294901760, %v30632_v52 }
 0xc43   :  { %27292 = vmatprep.mubr.f32.mxu1 %v30614_v26  ;;  %v5654_v22 = vsub.f32 %v5579_v15, %v30614_v26 }
 0xc44   :  { %v5582_v42 = vsel %vm164_vm0, %v5571_v39, 0 }
 0xc45   :  { %v30619_v5 = vand.u32 4294901760, %v5582_v42  ;;  %v5655_v27 = vand.u32 4294901760, %v5654_v22 }
 0xc47   :  { %v5664_v17 = vsub.f32 %v5582_v42, %v30619_v5  ;;  %27293 = vmatmul.mubr.f32.vlgmr.msra.gmra.mxu1 %v30619_v5  ;;  %v5656_v54 = vsub.f32 %v5654_v22, %v5655_v27 }
 0xc48   :  { %27307 = vmatpush3.msra.mxu1 %v30537_v43  ;;  %27314 = vmatprep.mubr.f32.mxu1 %v5655_v27 }
 0xc49   :  { %27308 = vmatprep.subr.mxu1 %v30539_v48  ;;  %v5657_v46 = vand.u32 4294901760, %v5656_v54  ;;  %v5665_v50 = vand.u32 4294901760, %v5664_v17 }
 0xc4a   :  { %27309 = vmatpush3.msra.mxu1 %v30539_v48 }
 0xc4b   :  { %27310 = vmatprep.subr.mxu1 %v30548_v40  ;;  %27281 = vmatprep.mubr.f32.mxu0 %v5657_v46  ;;  %v5666_v63 = vsub.f32 %v5664_v17, %v5665_v50 }
 0xc4c   :  { %27311 = vmatpush3.msra.mxu1 %v30548_v40 }
 0xc4d   :  { %27312 = vmatprep.subr.mxu1 %v30554_v38  ;;  %v5667_v0 = vand.u32 4294901760, %v5666_v63 }
 0xc4e   :  { %27313 = vmatpush3.msra.mxu1 %v30554_v38 }
 0xc4f   :  { %27315 = vmatmul.mubr.f32.vlgmr.msra.gmra.mxu1 %v5665_v50  ;;  %27328 = vmatprep.subr.mxu1 %v30537_v43 }
 0xc50   :  { %27282 = vmatmul.mubr.f32.vlgmr.msra.gmra.mxu0 %v5667_v0  ;;  %27329 = vmatpush3.msra.mxu1 %v30537_v43  ;;  %v6267_v43 = vsub.f32 %v30632_v52, %v6266_v7 }
 0xc51   :  { %27296 = vmatpush3.msra.mxu0 %v30559_v49  ;;  %27336 = vmatprep.mubr.f32.mxu1 %v30614_v26  ;;  %v41_v49 = vld [vmem:[%s34061_s1] sm:$0xff] }
 0xc52   :  { %27297 = vmatprep.subr.mxu0 %v30570_v53  ;;  %27303 = vmatprep.mubr.f32.mxu0 %v5654_v22  ;;  %v6132_v9 = vsel %vm164_vm0, %v41_v49, 0  ;;  %v6268_v11 = vand.u32 4294901760, %v6267_v43 }
 0xc53   :  { %27330 = vmatprep.subr.mxu1 %v30539_v48  ;;  %27298 = vmatpush3.msra.mxu0 %v30570_v53  ;;  %v6274_v53 = vsub.f32 %v30638_v2, %v6273_v25  ;;  %v30691_v8 = vand.u32 4294901760, %v6132_v9 }
 0xc54   :  { %27331 = vmatpush3.msra.mxu1 %v30539_v48  ;;  %27299 = vmatprep.subr.mxu0 %v30573_v59  ;;  %v6281_v48 = vsub.f32 %v30646_v12, %v6280_v45 }
 0xc55   :  { %27332 = vmatprep.subr.mxu1 %v30548_v40  ;;  %27300 = vmatpush3.msra.mxu0 %v30573_v59  ;;  %v6288_v59 = vsub.f32 %v30654_v13, %v6287_v6  ;;  %v6275_v16 = vand.u32 4294901760, %v6274_v53  ;;  %34122 = vst [vmem:[#allocation12_spill] sm:$0xff] %v30691_v8  ;;  %v30701_v14 = vsub.f32 %v6132_v9, %v30691_v8 }
 0xc56   :  { %27333 = vmatpush3.msra.mxu1 %v30548_v40  ;;  %27301 = vmatprep.subr.mxu0 %v30592_v3  ;;  %v42_v40 = vld [vmem:[%s34061_s1 + $0x8] sm:$0xff] }
 0xc57   :  { %27334 = vmatprep.subr.mxu1 %v30554_v38  ;;  %27302 = vmatpush3.msra.mxu0 %v30592_v3  ;;  %v34072_v3 = vmov 0.0   ;;  %v6135_v29 = vsel %vm164_vm0, %v42_v40, 0  ;;  %v6289_v56 = vand.u32 4294901760, %v6288_v59  ;;  %34123 = vst [vmem:[#allocation13_spill] sm:$0xff] %v30701_v14  ;;  %v30716_v36 = vand.u32 4294901760, %v30701_v14 }
 0xc58   :  { %27335 = vmatpush3.msra.mxu1 %v30554_v38  ;;  %27304 = vmatmul.mubr.f32.vlgmr.msra.gmra.mxu0 %v5664_v17  ;;  %v6282_v38 = vand.u32 4294901760, %v6281_v48  ;;  %v30708_v61 = vand.u32 4294901760, %v6135_v29 }
 0xc59   :  { %27317 = vmatprep.subr.mxu0 %v30576_v4  ;;  %27337 = vmatmul.mubr.f32.vlgmr.msra.gmra.mxu1 %v30619_v5  ;;  %34125 = vst [vmem:[#allocation15_spill] sm:$0xff] %v30716_v36 }
 0xc5a   :  { %27356 = vmatprep.subr.mxu1 %v34072_v3  ;;  %27318 = vmatpush3.msra.mxu0 %v30576_v4  ;;  %v43_v4 = vld [vmem:[%s34061_s1 + $0x10] sm:$0xf]  ;;  %34124 = vst [vmem:[#allocation14_spill] sm:$0xff] %v30708_v61 }
 0xc5b   :  { %27325 = vmatprep.mubr.f32.mxu0 %v30614_v26  ;;  %27357 = vmatpush3.msra.mxu1 %v6268_v11 }
 0xc5c   :  { %27319 = vmatprep.subr.mxu0 %v30579_v57  ;;  %27358 = vmatprep.subr.mxu1 %v34072_v3 }
 0xc5d   :  { %27320 = vmatpush3.msra.mxu0 %v30579_v57  ;;  %27359 = vmatpush3.msra.mxu1 %v6275_v16  ;;  %v6138_v57 = vsel %vm164_vm0, %v43_v4, 0 }
 0xc5e   :  { %27321 = vmatprep.subr.mxu0 %v30582_v35  ;;  %27360 = vmatprep.subr.mxu1 %v34072_v3  ;;  %v30726_v1 = vand.u32 4294901760, %v6138_v57 }
 0xc5f   :  { %27322 = vmatpush3.msra.mxu0 %v30582_v35  ;;  %27361 = vmatpush3.msra.mxu1 %v6282_v38  ;;  %v30722_v35 = vsub.f32 %v6135_v29, %v30708_v61 }
 0xc60   :  { %27323 = vmatprep.subr.mxu0 %v30595_v10  ;;  %27362 = vmatprep.subr.mxu1 %v34072_v3  ;;  %34127 = vst [vmem:[#allocation17_spill] sm:$0xff] %v30726_v1  ;;  %v30743_v47 = vsub.f32 %v6138_v57, %v30726_v1 }
 0xc61   :  { %27324 = vmatpush3.msra.mxu0 %v30595_v10  ;;  %27363 = vmatpush3.msra.mxu1 %v6289_v56  ;;  %34126 = vst [vmem:[#allocation16_spill] sm:$0xff] %v30722_v35  ;;  %v6212_v10 = vsub.f32 %v30701_v14, %v30716_v36  ;;  %v30737_v19 = vand.u32 4294901760, %v30722_v35 }
 0xc62   :  { %27364 = vmatprep.mubr.msk.f32.mxu1 %vm29649_vm3, %v34072_v3  ;;  %27326 = vmatmul.mubr.f32.vlgmr.msra.gmra.mxu0 %v30619_v5  ;;  %34129 = vst [vmem:[#allocation19_spill] sm:$0xff] %v30743_v47  ;;  %v30758_v26 = vand.u32 4294901760, %v30743_v47 }
 0xc63   :  { %27339 = vmatprep.subr.mxu0 %v34072_v3  ;;  %27365 = vmatmul.mubr.f32.vlgmr.msra.gmra.mxu1 %v30691_v8  ;;  %34128 = vst [vmem:[#allocation18_spill] sm:$0xff] %v30737_v19  ;;  %v30749_v15 = vand.u32 4294901760, %v6212_v10  ;;  %v6222_v51 = vsub.f32 %v30722_v35, %v30737_v19 }
 0xc64   :  { %27390 = vmatprep.subr.mxu1 %v34072_v3  ;;  %27340 = vmatpush3.msra.mxu0 %v30623_v32  ;;  %34131 = vst [vmem:[#allocation21_spill] sm:$0xff] %v30758_v26  ;;  %v6232_v22 = vsub.f32 %v30743_v47, %v30758_v26 }
 0xc65   :  { %27391 = vmatpush3.msra.mxu1 %v30623_v32  ;;  %27341 = vmatprep.subr.mxu0 %v34072_v3  ;;  %34130 = vst [vmem:[#allocation20_spill] sm:$0xff] %v30749_v15  ;;  %v30768_v39 = vand.u32 4294901760, %v6222_v51 }
 0xc66   :  { %27392 = vmatprep.subr.mxu1 %v34072_v3  ;;  %27342 = vmatpush3.msra.mxu0 %v30627_v34  ;;  %v30784_v42 = vand.u32 4294901760, %v6232_v22  ;;  %v6129_v22 = vpop.permute.xlu0 %6128 }
 0xc67   :  { %27367 = vmatprep.mubr.msk.f32.mxu1 %vm29649_vm3, %v34072_v3  ;;  %27393 = vmatpush3.msra.mxu1 %v30627_v34  ;;  %34132 = vst [vmem:[#allocation22_spill] sm:$0xff] %v30768_v39 }
 0xc68   :  { %27343 = vmatprep.subr.mxu0 %v34072_v3  ;;  %27368 = vmatmul.mubr.f32.gmra.mxu1 %v30708_v61  ;;  %34133 = vst [vmem:[#allocation23_spill] sm:$0xff] %v30784_v42 }
 0xc69   :  { %27394 = vmatprep.subr.mxu1 %v34072_v3  ;;  %27344 = vmatpush3.msra.mxu0 %v30634_v33 }
 0xc6a   :  { %27395 = vmatpush3.msra.mxu1 %v30634_v33  ;;  %27345 = vmatprep.subr.mxu0 %v34072_v3 }
 0xc6b   :  { %27396 = vmatprep.subr.mxu1 %v34072_v3  ;;  %27346 = vmatpush3.msra.mxu0 %v30641_v62 }
 0xc6c   :  { %27347 = vmatprep.mubr.msk.f32.mxu0 %vm29649_vm3, %v34072_v3  ;;  %27370 = vmatprep.mubr.msk.f32.mxu1 %vm29649_vm3, %v34072_v3 }
 0xc6d   :  { %27397 = vmatpush3.msra.mxu1 %v30641_v62  ;;  %27348 = vmatmul.mubr.f32.vlgmr.msra.gmra.mxu0 %v30749_v15 }
 0xc6e   :  { %27371 = vmatmul.mubr.f32.gmra.mxu1 %v30726_v1  ;;  %27373 = vmatprep.subr.mxu0 %v34072_v3 }
 0xc6f   :  { %27374 = vmatpush3.msra.mxu0 %v30632_v52  ;;  %27350 = vmatprep.mubr.msk.f32.mxu0 %vm29649_vm3, %v34072_v3 }
 0xc70   :  { %27375 = vmatprep.subr.mxu0 %v34072_v3  ;;  %27398 = vmatprep.mubr.msk.f32.mxu1 %vm29649_vm3, %v34072_v3 }
 0xc71   :  { %27376 = vmatpush3.msra.mxu0 %v30638_v2  ;;  %27424 = vmatprep.subr.mxu1 %v34072_v3 }
 0xc72   :  { %27351 = vmatmul.mubr.f32.gmra.mxu0 %v30768_v39  ;;  %27377 = vmatprep.subr.mxu0 %v34072_v3 }
 0xc73   :  { %27399 = vmatmul.mubr.f32.vlgmr.msra.gmra.mxu1 %v30716_v36  ;;  %27378 = vmatpush3.msra.mxu0 %v30646_v12 }
 0xc74   :  { %27425 = vmatpush3.msra.mxu1 %v30623_v32  ;;  %27379 = vmatprep.subr.mxu0 %v34072_v3 }
 0xc75   :  { %27426 = vmatprep.subr.mxu1 %v34072_v3  ;;  %27353 = vmatprep.mubr.msk.f32.mxu0 %vm29649_vm3, %v34072_v3 }
 0xc76   :  { %27427 = vmatpush3.msra.mxu1 %v30627_v34  ;;  %27380 = vmatpush3.msra.mxu0 %v30654_v13 }
 0xc77   :  { %27428 = vmatprep.subr.mxu1 %v34072_v3  ;;  %27354 = vmatmul.mubr.f32.gmra.mxu0 %v30784_v42 }
 0xc78   :  { %27429 = vmatpush3.msra.mxu1 %v30634_v33  ;;  %27381 = vmatprep.mubr.msk.f32.mxu0 %vm29649_vm3, %v34072_v3 }
 0xc79   :  { %27430 = vmatprep.subr.mxu1 %v34072_v3  ;;  %27407 = vmatprep.subr.mxu0 %v34072_v3 }
 0xc7a   :  { %27431 = vmatpush3.msra.mxu1 %v30641_v62  ;;  %27401 = vmatprep.mubr.msk.f32.mxu1 %vm29649_vm3, %v34072_v3 }
 0xc7b   :  { %27382 = vmatmul.mubr.f32.vlgmr.msra.gmra.mxu0 %v30701_v14  ;;  %27402 = vmatmul.mubr.f32.gmra.mxu1 %v30737_v19 }
 0xc7c   :  { %27408 = vmatpush3.msra.mxu0 %v6266_v7  ;;  %27384 = vmatprep.mubr.msk.f32.mxu0 %vm29649_vm3, %v34072_v3 }
 0xc7d   :  { %27409 = vmatprep.subr.mxu0 %v34072_v3  ;;  %27404 = vmatprep.mubr.msk.f32.mxu1 %vm29649_vm3, %v34072_v3 }
 0xc7e   :  { %27410 = vmatpush3.msra.mxu0 %v6273_v25 }
 0xc7f   :  { %27411 = vmatprep.subr.mxu0 %v34072_v3  ;;  %27385 = vmatmul.mubr.f32.gmra.mxu0 %v30722_v35 }
 0xc80   :  { %27412 = vmatpush3.msra.mxu0 %v6280_v45  ;;  %27387 = vmatprep.mubr.msk.f32.mxu0 %vm29649_vm3, %v34072_v3 }
 0xc81   :  { %27413 = vmatprep.subr.mxu0 %v34072_v3  ;;  %27405 = vmatmul.mubr.f32.gmra.mxu1 %v30758_v26 }
 0xc82   :  { %27414 = vmatpush3.msra.mxu0 %v6287_v6  ;;  %27432 = vmatprep.mubr.msk.f32.mxu1 %vm29649_vm3, %v34072_v3 }
 0xc83   :  { %27388 = vmatmul.mubr.f32.gmra.mxu0 %v30743_v47 }
 0xc84   :  { %27415 = vmatprep.mubr.msk.f32.mxu0 %vm29649_vm3, %v34072_v3 }
 0xc85   :  { %27433 = vmatmul.mubr.f32.vlgmr.msra.gmra.mxu1 %v30691_v8 }
 0xc86   :  { %27435 = vmatprep.mubr.msk.f32.mxu1 %vm29649_vm3, %v34072_v3 }
 0xc87   :  { %27416 = vmatmul.mubr.f32.vlgmr.msra.gmra.mxu0 %v30691_v8 }
 0xc88   :  { %27418 = vmatprep.mubr.msk.f32.mxu0 %vm29649_vm3, %v34072_v3 }
 0xc89   :  { %27436 = vmatmul.mubr.f32.gmra.mxu1 %v30708_v61 }
 0xc8a   :  { %27438 = vmatprep.mubr.msk.f32.mxu1 %vm29649_vm3, %v34072_v3 }
 0xc8b   :  { %27419 = vmatmul.mubr.f32.gmra.mxu0 %v30708_v61 }
 0xc8c   :  { %27421 = vmatprep.mubr.msk.f32.mxu0 %vm29649_vm3, %v34072_v3 }
 0xc8d   :  { %27439 = vmatmul.mubr.f32.gmra.mxu1 %v30726_v1 }
 0xc8f   :  { %27422 = vmatmul.mubr.f32.gmra.mxu0 %v30726_v1 }
 0xd07   :  { %v27294_v60 = vpop.f32.mrf.mxu1 }
 0xd09   :  { %v5760_v5 = vpop.f32.mrf.mxu1 }
 0xd0f   :  { %v27316_v17 = vpop.f32.mrf.mxu1 }
 0xd10   :  { %v27283_v58 = vpop.f32.mrf.mxu0 }
 0xd11   :  { %v5930_v34 = vpop.f32.mrf.mxu1  ;;  %v5670_v10 = vadd.f32 %v27283_v58, %v30603_v44 }
 0xd12   :  { %v5659_v27 = vpop.f32.mrf.mxu0 }
 0xd13   :  { %v5660_v32 = vadd.f32 %v30603_v44, %v5659_v27  ;;  %v5767_v27 = vadd.f32 %v27294_v60, %v5670_v10 }
 0xd15   :  { %v5761_v28 = vadd.f32 %v5760_v5, %v5660_v32 }
 0xd18   :  { %v27305_v54 = vpop.f32.mrf.mxu0 }
 0xd19   :  { %v27338_v50 = vpop.f32.mrf.mxu1 }
 0xd1a   :  { %v5846_v46 = vpop.f32.mrf.mxu0 }
 0xd1b   :  { %v5847_v52 = vadd.f32 %v5846_v46, %v5761_v28  ;;  %v6102_v33 = vpop.f32.mrf.mxu1  ;;  %v5854_v28 = vadd.f32 %v27305_v54, %v5767_v27 }
 0xd1d   :  { %v5931_v2 = vadd.f32 %v5930_v34, %v5847_v52 }
 0xd22   :  { %v27327_v63 = vpop.f32.mrf.mxu0 }
 0xd23   :  { %v6326_v0 = vpop.f32.mrf.mxu1 }
 0xd24   :  { %v6021_v62 = vpop.f32.mrf.mxu0 }
 0xd25   :  { %v6022_v7 = vadd.f32 %v6021_v62, %v5931_v2  ;;  %v27366_v12 = vpop.f32.mrf.mxu1 }
 0xd26   :  { %v5939_v12 = vadd.f32 %v27316_v17, %v5854_v28 }
 0xd27   :  { %v30844_v25 = vadd.f32 %v6102_v33, %v6022_v7 }
 0xd28   :  { %v6332_v13 = vpop.f32.mrf.mxu1 }
 0xd29   :  { %v6711_v45 = vsel %vm749_vm1, %v30844_v25, 0.0 }
 0xd2a   :  { %v6714_v43 = vsel %vm164_vm0, %v6711_v45, 0  ;;  %v27369_v49 = vpop.f32.mrf.mxu1 }
 0xd2b   :  { %v30850_v6 = vand.u32 4294901760, %v6714_v43 }
 0xd2d   :  { %v6215_v53 = vpop.f32.mrf.mxu0  ;;  %27456 = vmatprep.mubr.f32.mxu1 %v30850_v6  ;;  %v30854_v9 = vsub.f32 %v6714_v43, %v30850_v6 }
 0xd2e   :  { %v6338_v48 = vpop.f32.mrf.mxu1  ;;  %v6216_v46 = vadd.f32 %v6215_v53, %v6129_v22 }
 0xd2f   :  { %v27349_v11 = vpop.f32.mrf.mxu0  ;;  %v6798_v40 = vand.u32 4294901760, %v30854_v9 }
 0xd30   :  { %v27372_v59 = vpop.f32.mrf.mxu1  ;;  %v6327_v7 = vadd.f32 %v6326_v0, %v6216_v46  ;;  %v6028_v11 = vadd.f32 %v27327_v63, %v5939_v12 }
 0xd31   :  { %v6799_v16 = vsub.f32 %v30854_v9, %v6798_v40 }
 0xd32   :  { %v6225_v38 = vpop.f32.mrf.mxu0  ;;  %v30861_v53 = vadd.f32 %v27338_v50, %v6028_v11 }
 0xd33   :  { %v6800_v29 = vand.u32 4294901760, %v6799_v16  ;;  %v6509_v56 = vpop.f32.mrf.mxu1  ;;  %v6226_v62 = vadd.f32 %v6225_v38, %v6129_v22 }
 0xd34   :  { %v27352_v4 = vpop.f32.mrf.mxu0  ;;  %v6712_v63 = vsel %vm749_vm1, %v30861_v53, 0.0 }
 0xd35   :  { %27447 = vmatprep.mubr.f32.mxu0 %v6800_v29  ;;  %v27400_v57 = vpop.f32.mrf.mxu1  ;;  %v6333_v58 = vadd.f32 %v6332_v13, %v6226_v62  ;;  %v6717_v28 = vsel %vm164_vm0, %v6712_v63, 0 }
 0xd36   :  { %v30875_v12 = vand.u32 4294901760, %v6717_v28 }
 0xd37   :  { %v6235_v51 = vpop.f32.mrf.mxu0 }
 0xd38   :  { %v6236_v16 = vadd.f32 %v6235_v51, %v6129_v22 }
 0xd39   :  { %v27355_v5 = vpop.f32.mrf.mxu0 }
 0xd3a   :  { %v6339_v5 = vadd.f32 %v6338_v48, %v6236_v16 }
 0xd3b   :  { %v6418_v32 = vpop.f32.mrf.mxu0  ;;  %v6517_v34 = vpop.f32.mrf.mxu1 }
 0xd3c   :  { %v6419_v49 = vadd.f32 %v6418_v32, %v6327_v7 }
 0xd3d   :  { %v27383_v52 = vpop.f32.mrf.mxu0  ;;  %v27403_v33 = vpop.f32.mrf.mxu1 }
 0xd3e   :  { %v6510_v4 = vadd.f32 %v6509_v56, %v6419_v49 }
 0xd3f   :  { %v6425_v2 = vpop.f32.mrf.mxu0 }
 0xd40   :  { %v6426_v57 = vadd.f32 %v6425_v2, %v6333_v58  ;;  %v6807_v58 = vsub.f32 %v6717_v28, %v30875_v12 }
 0xd41   :  { %v27386_v45 = vpop.f32.mrf.mxu0  ;;  %v6525_v43 = vpop.f32.mrf.mxu1 }
 0xd42   :  { %v6518_v27 = vadd.f32 %v6517_v34, %v6426_v57 }
 0xd43   :  { %v6432_v59 = vpop.f32.mrf.mxu0  ;;  %v27406_v44 = vpop.f32.mrf.mxu1 }
 0xd44   :  { %v6433_v46 = vadd.f32 %v6432_v59, %v6339_v5 }
 0xd45   :  { %v27389_v29 = vpop.f32.mrf.mxu0  ;;  %v6695_v60 = vpop.f32.mrf.mxu1 }
 0xd46   :  { %v6526_v52 = vadd.f32 %v6525_v43, %v6433_v46 }
 0xd47   :  { %v6608_v54 = vpop.f32.mrf.mxu0  ;;  %v27434_v10 = vpop.f32.mrf.mxu1 }
 0xd48   :  { %v6609_v38 = vadd.f32 %v6608_v54, %v6510_v4  ;;  %v6808_v54 = vand.u32 4294901760, %v6807_v58 }
 0xd49   :  { %v27417_v0 = vpop.f32.mrf.mxu0  ;;  %v6701_v17 = vpop.f32.mrf.mxu1 }
 0xd4a   :  { %v30866_v22 = vadd.f32 %v6695_v60, %v6609_v38 }
 0xd4b   :  { %v6614_v13 = vpop.f32.mrf.mxu0  ;;  %v27437_v51 = vpop.f32.mrf.mxu1 }
 0xd4c   :  { %v6615_v56 = vadd.f32 %v6614_v13, %v6518_v27  ;;  %v6720_v34 = vsel %vm164_vm0, %v30866_v22, 0  ;;  %v7282_v51 = vsel %vm29892_vm4, %v30844_v25, 0.0 }
 0xd4d   :  { %v27420_v32 = vpop.f32.mrf.mxu0  ;;  %v6707_v50 = vpop.f32.mrf.mxu1  ;;  %v30881_v59 = vand.u32 4294901760, %v6720_v34 }
 0xd4e   :  { %v30869_v48 = vadd.f32 %v6701_v17, %v6615_v56  ;;  %v6809_v17 = vsub.f32 %v6807_v58, %v6808_v54  ;;  %v7285_v56 = vsel %vm164_vm0, %v7282_v51, 0 }
 0xd4f   :  { %v6620_v33 = vpop.f32.mrf.mxu0  ;;  %v27440_v2 = vpop.f32.mrf.mxu1  ;;  %v30892_v29 = vsub.f32 %v6720_v34, %v30881_v59  ;;  %v30942_v32 = vand.u32 4294901760, %v7285_v56 }
 0xd50   :  { %v6723_v62 = vsel %vm164_vm0, %v30869_v48, 0  ;;  %v6621_v7 = vadd.f32 %v6620_v33, %v6526_v52  ;;  %v6810_v63 = vand.u32 4294901760, %v6809_v17 }
 0xd51   :  { %v30877_v45 = vand.u32 4294901760, %v6723_v62  ;;  %v27423_v49 = vpop.f32.mrf.mxu0  ;;  %v30907_v10 = vand.u32 4294901760, %v30892_v29  ;;  %v7359_v28 = vsub.f32 %v7285_v56, %v30942_v32 }
 0xd52   :  { %v30879_v11 = vadd.f32 %v6707_v50, %v6621_v7  ;;  %v7283_v50 = vsel %vm29892_vm4, %v30861_v53, 0.0 }
 0xd53   :  { %v30884_v43 = vsub.f32 %v6723_v62, %v30877_v45  ;;  %v6860_v46 = vsub.f32 %v30892_v29, %v30907_v10 }
 0xd54   :  { %v6726_v44 = vsel %vm164_vm0, %v30879_v11, 0 }
 0xd55   :  { %v30889_v16 = vand.u32 4294901760, %v6726_v44  ;;  %v30895_v60 = vand.u32 4294901760, %v30884_v43  ;;  %v30926_v13 = vand.u32 4294901760, %v6860_v46 }
 0xd57   :  { %v30898_v4 = vsub.f32 %v6726_v44, %v30889_v16  ;;  %27441 = vmatprep.subr.mxu0 %v30889_v16  ;;  %v6853_v38 = vsub.f32 %v30884_v43, %v30895_v60 }
 0xd58   :  { %27442 = vmatpush3.xpose.msra.mxu0 %v30889_v16 }
 0xd59   :  { %v30903_v57 = vand.u32 4294901760, %v30898_v4  ;;  %27443 = vmatprep.subr.mxu0 %v30877_v45  ;;  %v30918_v27 = vand.u32 4294901760, %v6853_v38 }
 0xd5b   :  { %v6846_v5 = vsub.f32 %v30898_v4, %v30903_v57 }
 0xd5c   :  { %27444 = vmatpush3.xpose.msra.mxu0 %v30877_v45 }
 0xd5d   :  { %27445 = vmatprep.subr.mxu0 %v30881_v59  ;;  %v30915_v0 = vand.u32 4294901760, %v6846_v5 }
 0xd5f   :  { %27450 = vmatprep.subr.mxu1 %v30915_v0 }
 0xd60   :  { %27446 = vmatpush3.xpose.msra.mxu0 %v30881_v59  ;;  %27451 = vmatpush3.xpose.msra.mxu1 %v30915_v0 }
 0xd61   :  { %27452 = vmatprep.subr.mxu1 %v30918_v27  ;;  %27459 = vmatprep.subr.mxu0 %v30898_v4 }
 0xd63   :  { %27448 = vmatmul.mubr.f32.vlgmr.msra.gmra.mxu0 %v6810_v63 }
 0xd64   :  { %27453 = vmatpush3.xpose.msra.mxu1 %v30918_v27  ;;  %27460 = vmatpush3.xpose.msra.mxu0 %v30898_v4 }
 0xd65   :  { %27465 = vmatprep.mubr.f32.mxu0 %v30854_v9  ;;  %27454 = vmatprep.subr.mxu1 %v30926_v13  ;;  %v7288_v9 = vsel %vm164_vm0, %v7283_v50, 0 }
 0xd66   :  { %27461 = vmatprep.subr.mxu0 %v30884_v43  ;;  %v30962_v52 = vand.u32 4294901760, %v7288_v9 }
 0xd68   :  { %27455 = vmatpush3.xpose.msra.mxu1 %v30926_v13  ;;  %27462 = vmatpush3.xpose.msra.mxu0 %v30884_v43  ;;  %v7369_v2 = vsub.f32 %v7288_v9, %v30962_v52 }
 0xd69   :  { %27463 = vmatprep.subr.mxu0 %v30892_v29  ;;  %27468 = vmatprep.subr.mxu1 %v30889_v16 }
 0xd6a   :  { %v7370_v62 = vand.u32 4294901760, %v7369_v2 }
 0xd6b   :  { %27457 = vmatmul.mubr.f32.vlgmr.msra.gmra.mxu1 %v30875_v12 }
 0xd6c   :  { %27464 = vmatpush3.xpose.msra.mxu0 %v30892_v29  ;;  %27469 = vmatpush3.xpose.msra.mxu1 %v30889_v16 }
 0xd6d   :  { %27474 = vmatprep.mubr.f32.mxu1 %v6798_v40  ;;  %27470 = vmatprep.subr.mxu1 %v30877_v45  ;;  %v7360_v40 = vand.u32 4294901760, %v7359_v28 }
 0xd6e   :  { %27477 = vmatprep.subr.mxu0 %v30903_v57 }
 0xd6f   :  { %27466 = vmatmul.mubr.f32.vlgmr.msra.gmra.mxu0 %v6807_v58  ;;  %v7361_v33 = vsub.f32 %v7359_v28, %v7360_v40 }
 0xd70   :  { %27471 = vmatpush3.xpose.msra.mxu1 %v30877_v45  ;;  %27478 = vmatpush3.xpose.msra.mxu0 %v30903_v57 }
 0xd71   :  { %27483 = vmatprep.mubr.f32.mxu0 %v30850_v6  ;;  %27472 = vmatprep.subr.mxu1 %v30881_v59  ;;  %v7362_v34 = vand.u32 4294901760, %v7361_v33 }
 0xd72   :  { %27479 = vmatprep.subr.mxu0 %v30895_v60 }
 0xd74   :  { %27473 = vmatpush3.xpose.msra.mxu1 %v30881_v59  ;;  %27480 = vmatpush3.xpose.msra.mxu0 %v30895_v60 }
 0xd75   :  { %27481 = vmatprep.subr.mxu0 %v30907_v10  ;;  %27486 = vmatprep.subr.mxu1 %v30889_v16 }
 0xd77   :  { %27475 = vmatmul.mubr.f32.vlgmr.msra.gmra.mxu1 %v6808_v54 }
 0xd78   :  { %27482 = vmatpush3.xpose.msra.mxu0 %v30907_v10  ;;  %27487 = vmatpush3.xpose.msra.mxu1 %v30889_v16 }
 0xd79   :  { %27492 = vmatprep.mubr.f32.mxu1 %v30850_v6  ;;  %27488 = vmatprep.subr.mxu1 %v30877_v45  ;;  %v7371_v6 = vsub.f32 %v7369_v2, %v7370_v62 }
 0xd7a   :  { %27495 = vmatprep.subr.mxu0 %v30889_v16 }
 0xd7b   :  { %27484 = vmatmul.mubr.f32.vlgmr.msra.gmra.mxu0 %v30875_v12  ;;  %v7372_v7 = vand.u32 4294901760, %v7371_v6 }
 0xd7c   :  { %27489 = vmatpush3.xpose.msra.mxu1 %v30877_v45  ;;  %27496 = vmatpush3.xpose.msra.mxu0 %v30889_v16 }
 0xd7d   :  { %27501 = vmatprep.mubr.f32.mxu0 %v7362_v34  ;;  %27490 = vmatprep.subr.mxu1 %v30881_v59 }
 0xd7e   :  { %27497 = vmatprep.subr.mxu0 %v30877_v45 }
 0xd80   :  { %27491 = vmatpush3.xpose.msra.mxu1 %v30881_v59  ;;  %27498 = vmatpush3.xpose.msra.mxu0 %v30877_v45 }
 0xd81   :  { %27499 = vmatprep.subr.mxu0 %v30881_v59  ;;  %27504 = vmatprep.subr.mxu1 %v30915_v0 }
 0xd83   :  { %27493 = vmatmul.mubr.f32.vlgmr.msra.gmra.mxu1 %v30875_v12 }
 0xd84   :  { %27500 = vmatpush3.xpose.msra.mxu0 %v30881_v59  ;;  %27505 = vmatpush3.xpose.msra.mxu1 %v30915_v0 }
 0xd85   :  { %27510 = vmatprep.mubr.f32.mxu1 %v30942_v32  ;;  %27506 = vmatprep.subr.mxu1 %v30918_v27 }
 0xd86   :  { %27513 = vmatprep.subr.mxu0 %v30898_v4 }
 0xd87   :  { %27502 = vmatmul.mubr.f32.vlgmr.msra.gmra.mxu0 %v7372_v7 }
 0xd88   :  { %27507 = vmatpush3.xpose.msra.mxu1 %v30918_v27  ;;  %27514 = vmatpush3.xpose.msra.mxu0 %v30898_v4 }
 0xd89   :  { %27519 = vmatprep.mubr.f32.mxu0 %v7359_v28  ;;  %27508 = vmatprep.subr.mxu1 %v30926_v13 }
 0xd8a   :  { %27515 = vmatprep.subr.mxu0 %v30884_v43 }
 0xd8c   :  { %27509 = vmatpush3.xpose.msra.mxu1 %v30926_v13  ;;  %27516 = vmatpush3.xpose.msra.mxu0 %v30884_v43 }
 0xd8d   :  { %27517 = vmatprep.subr.mxu0 %v30892_v29  ;;  %27522 = vmatprep.subr.mxu1 %v30889_v16 }
 0xd8f   :  { %27511 = vmatmul.mubr.f32.vlgmr.msra.gmra.mxu1 %v30962_v52 }
 0xd90   :  { %27518 = vmatpush3.xpose.msra.mxu0 %v30892_v29  ;;  %27523 = vmatpush3.xpose.msra.mxu1 %v30889_v16 }
 0xd91   :  { %27528 = vmatprep.mubr.f32.mxu1 %v7360_v40  ;;  %27524 = vmatprep.subr.mxu1 %v30877_v45 }
 0xd92   :  { %27531 = vmatprep.subr.mxu0 %v30903_v57 }
 0xd93   :  { %27520 = vmatmul.mubr.f32.vlgmr.msra.gmra.mxu0 %v7369_v2 }
 0xd94   :  { %27525 = vmatpush3.xpose.msra.mxu1 %v30877_v45  ;;  %27532 = vmatpush3.xpose.msra.mxu0 %v30903_v57 }
 0xd95   :  { %27537 = vmatprep.mubr.f32.mxu0 %v30942_v32  ;;  %27526 = vmatprep.subr.mxu1 %v30881_v59 }
 0xd96   :  { %27533 = vmatprep.subr.mxu0 %v30895_v60 }
 0xd98   :  { %27527 = vmatpush3.xpose.msra.mxu1 %v30881_v59  ;;  %27534 = vmatpush3.xpose.msra.mxu0 %v30895_v60 }
 0xd99   :  { %27535 = vmatprep.subr.mxu0 %v30907_v10  ;;  %27540 = vmatprep.subr.mxu1 %v30889_v16 }
 0xd9b   :  { %27529 = vmatmul.mubr.f32.vlgmr.msra.gmra.mxu1 %v7370_v62 }
 0xd9c   :  { %27536 = vmatpush3.xpose.msra.mxu0 %v30907_v10  ;;  %27541 = vmatpush3.xpose.msra.mxu1 %v30889_v16 }
 0xd9d   :  { %27546 = vmatprep.mubr.f32.mxu1 %v30942_v32  ;;  %27542 = vmatprep.subr.mxu1 %v30877_v45 }
 0xd9f   :  { %27538 = vmatmul.mubr.f32.vlgmr.msra.gmra.mxu0 %v30962_v52 }
 0xda0   :  { %27543 = vmatpush3.xpose.msra.mxu1 %v30877_v45 }
 0xda1   :  { %27544 = vmatprep.subr.mxu1 %v30881_v59 }
 0xda4   :  { %27545 = vmatpush3.xpose.msra.mxu1 %v30881_v59 }
 0xda7   :  { %27547 = vmatmul.mubr.f32.vlgmr.msra.gmra.mxu1 %v30962_v52 }
 0xe23   :  { %v27449_v12 = vpop.f32.mrf.mxu0 }
 0xe25   :  { %v6802_v49 = vpop.f32.mrf.mxu0 }
 0xe2b   :  { %v27458_v44 = vpop.f32.mrf.mxu1 }
 0xe2c   :  { %v6905_v7 = vadd.f32 %v27458_v44, %v27449_v12 }
 0xe2d   :  { %v6898_v54 = vpop.f32.mrf.mxu1 }
 0xe2e   :  { %v6899_v33 = vadd.f32 %v6898_v54, %v6802_v49 }
 0xe2f   :  { %v27467_v58 = vpop.f32.mrf.mxu0 }
 0xe30   :  { %v6990_v19 = vadd.f32 %v27467_v58, %v6905_v7 }
 0xe31   :  { %v6982_v5 = vpop.f32.mrf.mxu0 }
 0xe32   :  { %v6983_v34 = vadd.f32 %v6982_v5, %v6899_v33 }
 0xe37   :  { %v27476_v38 = vpop.f32.mrf.mxu1 }
 0xe38   :  { %v7074_v1 = vadd.f32 %v27476_v38, %v6990_v19 }
 0xe39   :  { %v7065_v46 = vpop.f32.mrf.mxu1 }
 0xe3a   :  { %v7066_v3 = vadd.f32 %v7065_v46, %v6983_v34 }
 0xe3b   :  { %v27485_v17 = vpop.f32.mrf.mxu0 }
 0xe3c   :  { %v7160_v54 = vadd.f32 %v27485_v17, %v7074_v1 }
 0xe3d   :  { %v7153_v63 = vpop.f32.mrf.mxu0 }
 0xe3e   :  { %v7154_v14 = vadd.f32 %v7153_v63, %v7066_v3 }
 0xe43   :  { %v27494_v51 = vpop.f32.mrf.mxu1 }
 0xe45   :  { %v7233_v32 = vpop.f32.mrf.mxu1 }
 0xe46   :  { %v7234_v15 = vadd.f32 %v7233_v32, %v7154_v14 }
 0xe47   :  { %v27503_v56 = vpop.f32.mrf.mxu0 }
 0xe48   :  { %v7243_v12 = vmul.f32 0.35355338, %v7234_v15 }
 0xe49   :  { %v7364_v50 = vpop.f32.mrf.mxu0 }
 0xe4f   :  { %v27512_v28 = vpop.f32.mrf.mxu1 }
 0xe50   :  { %v7467_v62 = vadd.f32 %v27512_v28, %v27503_v56  ;;  %v7240_v28 = vadd.f32 %v27494_v51, %v7160_v54 }
 0xe51   :  { %v7460_v40 = vpop.f32.mrf.mxu1 }
 0xe52   :  { %v7461_v47 = vadd.f32 %v7460_v40, %v7364_v50  ;;  %v7244_v19 = vmul.f32 0.35355338, %v7240_v28 }
 0xe53   :  { %v27521_v9 = vpop.f32.mrf.mxu0 }
 0xe54   :  { %v7552_v26 = vadd.f32 %v27521_v9, %v7467_v62 }
 0xe55   :  { %v7544_v2 = vpop.f32.mrf.mxu0 }
 0xe56   :  { %v7545_v42 = vadd.f32 %v7544_v2, %v7461_v47 }
 0xe5b   :  { %v27530_v52 = vpop.f32.mrf.mxu1 }
 0xe5c   :  { %v7636_v36 = vadd.f32 %v27530_v52, %v7552_v26 }
 0xe5d   :  { %v7627_v35 = vpop.f32.mrf.mxu1 }
 0xe5e   :  { %v7628_v61 = vadd.f32 %v7627_v35, %v7545_v42 }
 0xe5f   :  { %v27539_v6 = vpop.f32.mrf.mxu0 }
 0xe60   :  { %v7722_v8 = vadd.f32 %v27539_v6, %v7636_v36  ;;  %v7246_v36 = vsel %vm29983_vm10, %v7244_v19, -1e+09 }
 0xe61   :  { %v7715_v39 = vpop.f32.mrf.mxu0  ;;  %v7251_v35 = vsel %vm7247_vm5, %v7246_v36, -inf }
 0xe62   :  { %v7716_v20 = vadd.f32 %v7715_v39, %v7628_v61 }
 0xe67   :  { %v27548_v49 = vpop.f32.mrf.mxu1 }
 0xe68   :  { %v7802_v5 = vadd.f32 %v27548_v49, %v7722_v8  ;;  %v7245_v8 = vsel %vm29979_vm8, %v7243_v12, -1e+09 }
 0xe69   :  { %v7795_v56 = vpop.f32.mrf.mxu1 }
 0xe6a   :  { %v7806_v44 = vmul.f32 0.35355338, %v7802_v5  ;;  %v7796_v46 = vadd.f32 %v7795_v56, %v7716_v20  ;;  %v7248_v20 = vsel %vm7247_vm5, %v7245_v8, -inf }
 0xe6c   :  { %v7805_v50 = vmul.f32 0.35355338, %v7796_v46  ;;  %v7808_v3 = vsel %vm29983_vm10, %v7806_v44, -1e+09 }
 0xe6d   :  { %v7812_v47 = vsel %vm7247_vm5, %v7808_v3, -inf }
 0xe6e   :  { %7813 = vmax.xlane.f32.xlu0 %v7812_v47  ;;  %v7807_v14 = vsel %vm29979_vm8, %v7805_v50, -1e+09 }
 0xe6f   :  { %v7809_v61 = vsel %vm7247_vm5, %v7807_v14, -inf }
 0xe70   :  { %7810 = vmax.xlane.f32.xlu1 %v7809_v61 }
 0xe72   :  { %7249 = vmax.xlane.f32.xlu0 %v7248_v20 }
 0xe76   :  { %7252 = vmax.xlane.f32.xlu0 %v7251_v35 }
 0xe81   :  { %7274 = vrot.lane.b32.xlu1 %v30879_v11, %s29643_s16 }
 0xef7   :  { %v7814_v1 = vpop.xlane.xlu0 %7813 }
 0xef8   :  { %v7816_v51 = vsub.f32 %v7808_v3, %v7814_v1 }
 0xef9   :  { %v7811_v15 = vpop.xlane.xlu1 %7810 }
 0xefa   :  { %v7815_v26 = vsub.f32 %v7807_v14, %v7811_v15  ;;  %v7819_v2 = vmul.f32 1.442695, %v7816_v51 }
 0xefb   :  { %v7250_v39 = vpop.xlane.xlu0 %7249 }
 0xefc   :  { %v7254_v42 = vsub.f32 %v7245_v8, %v7250_v39  ;;  %v7817_v38 = vmul.f32 1.442695, %v7815_v26 }
 0xefd   :  { %v31032_v58 = vpop.permute.xlu1 %7274 }
 0xefe   :  { %v7256_v17 = vmul.f32 1.442695, %v7254_v42  ;;  %v7833_v63 = vsel %vm29892_vm4, %v31032_v58, 0.0  ;;  %v7281_v39 = vsel %vm749_vm1, %v31032_v58, 0.0 }
 0xeff   :  { %v7842_v32 = vsel %vm7840_vm11, %v7833_v63, 0  ;;  %v7253_v9 = vpop.xlane.xlu0 %7252  ;;  %v8366_v51 = vsel %vm7840_vm11, %v7281_v39, 0 }
 0xf00   :  { %29487 = vpow2.f32 %v7256_v17  ;;  %v31038_v11 = vand.u32 4294901760, %v7842_v32  ;;  %v7255_v40 = vsub.f32 %v7246_v36, %v7253_v9 }
 0xf01   :  { %29489 = vpow2.f32 %v7817_v38 }
 0xf02   :  { %v31041_v33 = vsub.f32 %v7842_v32, %v31038_v11  ;;  %27549 = vmatprep.subr.mxu0 %v31038_v11  ;;  %v7258_v52 = vmul.f32 1.442695, %v7255_v40 }
 0xf03   :  { %27550 = vmatpush3.msra.mxu0 %v31038_v11 }
 0xf04   :  { %v31046_v34 = vand.u32 4294901760, %v31041_v33  ;;  %29491 = vpow2.f32 %v7258_v52 }
 0xf05   :  { %29493 = vpow2.f32 %v7819_v2 }
 0xf06   :  { %v7962_v62 = vsub.f32 %v31041_v33, %v31046_v34 }
 0xf08   :  { %v7963_v6 = vand.u32 4294901760, %v7962_v62  ;;  %v31108_v62 = vand.u32 4294901760, %v8366_v51 }
 0xf0a   :  { %27558 = vmatprep.subr.mxu1 %v7963_v6 }
 0xf0b   :  { %27559 = vmatpush3.msra.mxu1 %v7963_v6 }
 0xf0d   :  { %v31050_v7 = vpop.eup %29487 }
 0xf0e   :  { %v7260_v49 = vsel %vm7247_vm5, %v31050_v7, 0.0  ;;  %v29490_v54 = vpop.eup %29489 }
 0xf0f   :  { %7261 = vadd.xlane.f32.xlu1 %v7260_v49  ;;  %v7821_v56 = vsel %vm7247_vm5, %v29490_v54, 0.0 }
 0xf11   :  { %v31054_v5 = vpop.eup %29491 }
 0xf12   :  { %v7263_v28 = vsel %vm7247_vm5, %v31054_v5, 0.0  ;;  %v29494_v12 = vpop.eup %29493 }
 0xf13   :  { %7822 = vadd.xlane.f32.xlu1 %v7821_v56  ;;  %7264 = vadd.xlane.f32.xlu0 %v7263_v28  ;;  %v7824_v44 = vsel %vm7247_vm5, %v29494_v12, 0.0 }
 0xf17   :  { %7825 = vadd.xlane.f32.xlu0 %v7824_v44 }
 0xf24   :  { %7270 = vrot.lane.b32.xlu1 %v30866_v22, %s29643_s16 }
 0xf2d   :  { %7272 = vrot.lane.b32.xlu0 %v30869_v48, %s29643_s16 }
 0xf98   :  { %v7262_v46 = vpop.xlane.xlu1 %7261 }
 0xf9c   :  { %v7823_v50 = vpop.xlane.xlu1 %7822  ;;  %v7265_v3 = vpop.xlane.xlu0 %7264 }
 0xf9d   :  { %29495 = vrcp.f32 %v7823_v50  ;;  %v31123_v50 = vsub.f32 %v8366_v51, %v31108_v62 }
 0xfa0   :  { %v31064_v47 = vpop.permute.xlu1 %7270  ;;  %v7826_v14 = vpop.xlane.xlu0 %7825 }
 0xfa1   :  { %v7831_v19 = vsel %vm29892_vm4, %v31064_v47, 0.0  ;;  %29497 = vrcp.f32 %v7826_v14  ;;  %v7279_v28 = vsel %vm749_vm1, %v31064_v47, 0.0 }
 0xfa2   :  { %v31069_v8 = vand.u32 4294901760, %v7831_v19  ;;  %29499 = vrcp.f32 %v7262_v46 }
 0xfa3   :  { %29501 = vrcp.f32 %v7265_v3 }
 0xfa4   :  { %v31072_v61 = vsub.f32 %v7831_v19, %v31069_v8  ;;  %v31074_v22 = vpop.permute.xlu0 %7272 }
 0xfa5   :  { %v7832_v48 = vsel %vm29892_vm4, %v31074_v22, 0.0  ;;  %v7280_v6 = vsel %vm749_vm1, %v31074_v22, 0.0 }
 0xfa6   :  { %v31079_v20 = vand.u32 4294901760, %v7832_v48  ;;  %v31086_v35 = vand.u32 4294901760, %v31072_v61  ;;  %v31119_v46 = vand.u32 4294901760, %v7280_v6 }
 0xfa8   :  { %v31082_v36 = vsub.f32 %v7832_v48, %v31079_v20  ;;  %27551 = vmatprep.subr.mxu0 %v31079_v20  ;;  %v7976_v17 = vsub.f32 %v31072_v61, %v31086_v35  ;;  %v31128_v48 = vand.u32 4294901760, %v7279_v28  ;;  %v31133_v39 = vsub.f32 %v7280_v6, %v31119_v46 }
 0xfa9   :  { %27552 = vmatpush3.msra.mxu0 %v31079_v20 }
 0xfaa   :  { %v29496_v1 = vpop.eup %29495  ;;  %27553 = vmatprep.subr.mxu0 %v31069_v8  ;;  %v31091_v15 = vand.u32 4294901760, %v31082_v36  ;;  %v7977_v2 = vand.u32 4294901760, %v7976_v17  ;;  %v31142_v17 = vsub.f32 %v7279_v28, %v31128_v48 }
 0xfab   :  { %v7829_v26 = vmul.f32 %v29496_v1, %v29490_v54  ;;  %27554 = vmatpush3.msra.mxu0 %v31069_v8 }
 0xfac   :  { %27567 = vmatprep.subr.mxu0 %v31041_v33  ;;  %v7969_v42 = vsub.f32 %v31082_v36, %v31091_v15 }
 0xfad   :  { %v7835_v38 = vsel %vm7247_vm5, %v7829_v26, 0 }
 0xfae   :  { %v31103_v63 = vand.u32 4294901760, %v7835_v38  ;;  %v7970_v32 = vand.u32 4294901760, %v7969_v42  ;;  %v29498_v9 = vpop.eup %29497 }
 0xfaf   :  { %v7830_v52 = vmul.f32 %v29498_v9, %v29494_v12  ;;  %v29500_v54 = vpop.eup %29499 }
 0xfb0   :  { %27564 = vmatprep.mubr.f32.mxu1 %v31103_v63  ;;  %v7913_v40 = vsub.f32 %v7835_v38, %v31103_v63  ;;  %27560 = vmatprep.subr.mxu1 %v7970_v32  ;;  %v7268_v14 = vmul.f32 %v29500_v54, %v31050_v7  ;;  %v29502_v1 = vpop.eup %29501  ;;  %v31138_v7 = vand.u32 4294901760, %v31123_v50 }
 0xfb1   :  { %27561 = vmatpush3.msra.mxu1 %v7970_v32  ;;  %v7838_v56 = vsel %vm7247_vm5, %v7830_v52, 0  ;;  %v7269_v51 = vmul.f32 %v29502_v1, %v31054_v5  ;;  %v31159_v5 = vand.u32 4294901760, %v31142_v17 }
 0xfb2   :  { %v7914_v49 = vand.u32 4294901760, %v7913_v40  ;;  %27562 = vmatprep.subr.mxu1 %v7977_v2  ;;  %v31117_v44 = vand.u32 4294901760, %v7838_v56  ;;  %v8360_v38 = vsel %vm7247_vm5, %v7268_v14, 0  ;;  %v8486_v52 = vsub.f32 %v31123_v50, %v31138_v7 }
 0xfb3   :  { %27563 = vmatpush3.msra.mxu1 %v7977_v2  ;;  %v31149_v9 = vand.u32 4294901760, %v8360_v38  ;;  %v31152_v2 = vand.u32 4294901760, %v31133_v39 }
 0xfb4   :  { %v7915_v12 = vsub.f32 %v7913_v40, %v7914_v49  ;;  %27576 = vmatprep.subr.mxu1 %v31038_v11  ;;  %v7923_v3 = vsub.f32 %v7838_v56, %v31117_v44  ;;  %27565 = vmatmul.mubr.f32.vlgmr.msra.gmra.mxu1 %v31117_v44 }
 0xfb5   :  { %27577 = vmatpush3.msra.mxu1 %v31038_v11  ;;  %27582 = vmatprep.mubr.f32.mxu1 %v7914_v49  ;;  %v8493_v6 = vsub.f32 %v31133_v39, %v31152_v2  ;;  %v8437_v49 = vsub.f32 %v8360_v38, %v31149_v9 }
 0xfb6   :  { %v7916_v19 = vand.u32 4294901760, %v7915_v12  ;;  %27578 = vmatprep.subr.mxu1 %v31079_v20  ;;  %v7924_v26 = vand.u32 4294901760, %v7923_v3 }
 0xfb7   :  { %27579 = vmatpush3.msra.mxu1 %v31079_v20  ;;  %v8438_v54 = vand.u32 4294901760, %v8437_v49 }
 0xfb8   :  { %27555 = vmatprep.mubr.f32.mxu0 %v7916_v19  ;;  %27580 = vmatprep.subr.mxu1 %v31069_v8  ;;  %v7925_v42 = vsub.f32 %v7923_v3, %v7924_v26  ;;  %v8884_v19 = vsel %vm30113_vm13, %v30861_v53, 0.0 }
 0xfb9   :  { %27581 = vmatpush3.msra.mxu1 %v31069_v8  ;;  %v8439_v56 = vsub.f32 %v8437_v49, %v8438_v54 }
 0xfba   :  { %27583 = vmatmul.mubr.f32.vlgmr.msra.gmra.mxu1 %v7924_v26  ;;  %27594 = vmatprep.subr.mxu1 %v31038_v11  ;;  %v7926_v32 = vand.u32 4294901760, %v7925_v42 }
 0xfbb   :  { %27595 = vmatpush3.msra.mxu1 %v31038_v11  ;;  %27600 = vmatprep.mubr.f32.mxu1 %v31103_v63  ;;  %v8363_v11 = vsel %vm7247_vm5, %v7269_v51, 0 }
 0xfbc   :  { %27556 = vmatmul.mubr.f32.vlgmr.msra.gmra.mxu0 %v7926_v32  ;;  %27596 = vmatprep.subr.mxu1 %v31079_v20  ;;  %v9432_v32 = vsel %vm30113_vm13, %v31064_v47, 0.0 }
 0xfbd   :  { %27568 = vmatpush3.msra.mxu0 %v31041_v33  ;;  %27573 = vmatprep.mubr.f32.mxu0 %v7913_v40  ;;  %v8487_v33 = vand.u32 4294901760, %v8486_v52  ;;  %v31171_v40 = vand.u32 4294901760, %v8363_v11  ;;  %v31276_v52 = vand.u32 4294901760, %v9432_v32 }
 0xfbe   :  { %27569 = vmatprep.subr.mxu0 %v31082_v36  ;;  %27597 = vmatpush3.msra.mxu1 %v31079_v20  ;;  %v8500_v20 = vsub.f32 %v31142_v17, %v31159_v5 }
 0xfbf   :  { %27570 = vmatpush3.msra.mxu0 %v31082_v36  ;;  %27598 = vmatprep.subr.mxu1 %v31069_v8  ;;  %v8494_v36 = vand.u32 4294901760, %v8493_v6  ;;  %v31289_v6 = vsub.f32 %v9432_v32, %v31276_v52 }
 0xfc0   :  { %27571 = vmatprep.subr.mxu0 %v31072_v61  ;;  %27599 = vmatpush3.msra.mxu1 %v31069_v8  ;;  %v8447_v8 = vsub.f32 %v8363_v11, %v31171_v40 }
 0xfc1   :  { %27572 = vmatpush3.msra.mxu0 %v31072_v61  ;;  %27601 = vmatmul.mubr.f32.vlgmr.msra.gmra.mxu1 %v31117_v44  ;;  %v8501_v61 = vand.u32 4294901760, %v8500_v20 }
 0xfc2   :  { %27612 = vmatprep.subr.mxu1 %v8487_v33  ;;  %27574 = vmatmul.mubr.f32.vlgmr.msra.gmra.mxu0 %v7923_v3  ;;  %v8448_v28 = vand.u32 4294901760, %v8447_v8 }
 0xfc3   :  { %27585 = vmatprep.subr.mxu0 %v31046_v34  ;;  %27613 = vmatpush3.msra.mxu1 %v8487_v33 }
 0xfc4   :  { %27618 = vmatprep.mubr.f32.mxu1 %v31149_v9  ;;  %27586 = vmatpush3.msra.mxu0 %v31046_v34  ;;  %v8440_v34 = vand.u32 4294901760, %v8439_v56 }
 0xfc5   :  { %27591 = vmatprep.mubr.f32.mxu0 %v31103_v63  ;;  %27614 = vmatprep.subr.mxu1 %v8494_v36  ;;  %v8449_v63 = vsub.f32 %v8447_v8, %v8448_v28 }
 0xfc6   :  { %27587 = vmatprep.subr.mxu0 %v31091_v15  ;;  %27615 = vmatpush3.msra.mxu1 %v8494_v36 }
 0xfc7   :  { %27588 = vmatpush3.msra.mxu0 %v31091_v15  ;;  %27616 = vmatprep.subr.mxu1 %v8501_v61  ;;  %v8883_v15 = vsel %vm30113_vm13, %v30844_v25, 0.0 }
 0xfc8   :  { %27589 = vmatprep.subr.mxu0 %v31086_v35  ;;  %27617 = vmatpush3.msra.mxu1 %v8501_v61 }
 0xfc9   :  { %27590 = vmatpush3.msra.mxu0 %v31086_v35  ;;  %27619 = vmatmul.mubr.f32.vlgmr.msra.gmra.mxu1 %v31171_v40  ;;  %v8886_v35 = vsel %vm164_vm0, %v8883_v15, 0 }
 0xfca   :  { %27630 = vmatprep.subr.mxu1 %v31108_v62  ;;  %27592 = vmatmul.mubr.f32.vlgmr.msra.gmra.mxu0 %v31117_v44  ;;  %v8450_v44 = vand.u32 4294901760, %v8449_v63  ;;  %v31204_v12 = vand.u32 4294901760, %v8886_v35 }
 0xfcb   :  { %27603 = vmatprep.subr.mxu0 %v31108_v62  ;;  %27631 = vmatpush3.msra.mxu1 %v31108_v62 }
 0xfcc   :  { %27636 = vmatprep.mubr.f32.mxu1 %v8438_v54  ;;  %27604 = vmatpush3.msra.mxu0 %v31108_v62  ;;  %v8960_v3 = vsub.f32 %v8886_v35, %v31204_v12 }
 0xfcd   :  { %27609 = vmatprep.mubr.f32.mxu0 %v8440_v34  ;;  %27632 = vmatprep.subr.mxu1 %v31119_v46 }
 0xfce   :  { %27605 = vmatprep.subr.mxu0 %v31119_v46  ;;  %27633 = vmatpush3.msra.mxu1 %v31119_v46 }
 0xfcf   :  { %27606 = vmatpush3.msra.mxu0 %v31119_v46  ;;  %27634 = vmatprep.subr.mxu1 %v31128_v48 }
 0xfd0   :  { %27607 = vmatprep.subr.mxu0 %v31128_v48  ;;  %27635 = vmatpush3.msra.mxu1 %v31128_v48 }
 0xfd1   :  { %27608 = vmatpush3.msra.mxu0 %v31128_v48  ;;  %27637 = vmatmul.mubr.f32.vlgmr.msra.gmra.mxu1 %v8448_v28 }
 0xfd2   :  { %27648 = vmatprep.subr.mxu1 %v31108_v62  ;;  %27610 = vmatmul.mubr.f32.vlgmr.msra.gmra.mxu0 %v8450_v44 }
 0xfd3   :  { %27621 = vmatprep.subr.mxu0 %v31123_v50  ;;  %27649 = vmatpush3.msra.mxu1 %v31108_v62  ;;  %v8961_v62 = vand.u32 4294901760, %v8960_v3 }
 0xfd4   :  { %27654 = vmatprep.mubr.f32.mxu1 %v31149_v9  ;;  %27622 = vmatpush3.msra.mxu0 %v31123_v50  ;;  %v8889_v50 = vsel %vm164_vm0, %v8884_v19, 0 }
 0xfd5   :  { %27627 = vmatprep.mubr.f32.mxu0 %v8437_v49  ;;  %27650 = vmatprep.subr.mxu1 %v31119_v46  ;;  %v8962_v14 = vsub.f32 %v8960_v3, %v8961_v62 }
 0xfd6   :  { %27623 = vmatprep.subr.mxu0 %v31133_v39  ;;  %27651 = vmatpush3.msra.mxu1 %v31119_v46  ;;  %v31230_v46 = vand.u32 4294901760, %v8889_v50 }
 0xfd7   :  { %27624 = vmatpush3.msra.mxu0 %v31133_v39  ;;  %27652 = vmatprep.subr.mxu1 %v31128_v48  ;;  %v8963_v1 = vand.u32 4294901760, %v8962_v14  ;;  %v9434_v39 = vsel %vm30113_vm13, %v31032_v58, 0.0 }
 0xfd8   :  { %27625 = vmatprep.subr.mxu0 %v31142_v17  ;;  %27653 = vmatpush3.msra.mxu1 %v31128_v48  ;;  %v8970_v48 = vsub.f32 %v8889_v50, %v31230_v46  ;;  %v9442_v42 = vsel %vm7840_vm11, %v9434_v39, 0 }
 0xfd9   :  { %27626 = vmatpush3.msra.mxu0 %v31142_v17  ;;  %27655 = vmatmul.mubr.f32.vlgmr.msra.gmra.mxu1 %v31171_v40  ;;  %v31256_v38 = vand.u32 4294901760, %v9442_v42  ;;  %v9433_v17 = vsel %vm30113_vm13, %v31074_v22, 0.0 }
 0xfda   :  { %27666 = vmatprep.subr.mxu1 %v30915_v0  ;;  %27628 = vmatmul.mubr.f32.vlgmr.msra.gmra.mxu0 %v8447_v8  ;;  %v8971_v26 = vand.u32 4294901760, %v8970_v48 }
 0xfdb   :  { %27639 = vmatprep.subr.mxu0 %v31138_v7  ;;  %27667 = vmatpush3.xpose.msra.mxu1 %v30915_v0 }
 0xfdc   :  { %27672 = vmatprep.mubr.f32.mxu1 %v31204_v12  ;;  %27640 = vmatpush3.msra.mxu0 %v31138_v7  ;;  %v8972_v7 = vsub.f32 %v8970_v48, %v8971_v26 }
 0xfdd   :  { %27645 = vmatprep.mubr.f32.mxu0 %v31149_v9  ;;  %27668 = vmatprep.subr.mxu1 %v30918_v27  ;;  %v31269_v9 = vsub.f32 %v9442_v42, %v31256_v38 }
 0xfde   :  { %27641 = vmatprep.subr.mxu0 %v31152_v2  ;;  %v8973_v51 = vand.u32 4294901760, %v8972_v7 }
 0xfdf   :  { %27642 = vmatpush3.msra.mxu0 %v31152_v2  ;;  %27669 = vmatpush3.xpose.msra.mxu1 %v30918_v27  ;;  %v31271_v2 = vand.u32 4294901760, %v9433_v17  ;;  %v31284_v11 = vand.u32 4294901760, %v31269_v9 }
 0xfe0   :  { %27643 = vmatprep.subr.mxu0 %v31159_v5  ;;  %27670 = vmatprep.subr.mxu1 %v30926_v13 }
 0xfe1   :  { %27644 = vmatpush3.msra.mxu0 %v31159_v5  ;;  %v31280_v5 = vsub.f32 %v9433_v17, %v31271_v2  ;;  %v9562_v49 = vsub.f32 %v31269_v9, %v31284_v11 }
 0xfe2   :  { %27646 = vmatmul.mubr.f32.vlgmr.msra.gmra.mxu0 %v31171_v40  ;;  %27657 = vmatprep.subr.mxu0 %v30889_v16  ;;  %v31303_v40 = vand.u32 4294901760, %v31289_v6 }
 0xfe3   :  { %27658 = vmatpush3.xpose.msra.mxu0 %v30889_v16  ;;  %27663 = vmatprep.mubr.f32.mxu0 %v8963_v1  ;;  %v31297_v33 = vand.u32 4294901760, %v31280_v5  ;;  %v9563_v20 = vand.u32 4294901760, %v9562_v49 }
 0xfe4   :  { %27659 = vmatprep.subr.mxu0 %v30877_v45  ;;  %27671 = vmatpush3.xpose.msra.mxu1 %v30926_v13  ;;  %v9576_v54 = vsub.f32 %v31289_v6, %v31303_v40 }
 0xfe5   :  { %27684 = vmatprep.subr.mxu1 %v30889_v16  ;;  %v9569_v36 = vsub.f32 %v31280_v5, %v31297_v33 }
 0xfe6   :  { %v9577_v61 = vand.u32 4294901760, %v9576_v54 }
 0xfe7   :  { %27660 = vmatpush3.xpose.msra.mxu0 %v30877_v45  ;;  %27673 = vmatmul.mubr.f32.vlgmr.msra.gmra.mxu1 %v31230_v46  ;;  %v9570_v8 = vand.u32 4294901760, %v9569_v36 }
 0xfe8   :  { %27661 = vmatprep.subr.mxu0 %v30881_v59  ;;  %27685 = vmatpush3.xpose.msra.mxu1 %v30889_v16 }
 0xfe9   :  { %27690 = vmatprep.mubr.f32.mxu1 %v8961_v62  ;;  %27686 = vmatprep.subr.mxu1 %v30877_v45 }
 0xfeb   :  { %27662 = vmatpush3.xpose.msra.mxu0 %v30881_v59 }
 0xfec   :  { %27675 = vmatprep.subr.mxu0 %v30898_v4  ;;  %27687 = vmatpush3.xpose.msra.mxu1 %v30877_v45 }
 0xfed   :  { %27688 = vmatprep.subr.mxu1 %v30881_v59 }
 0xfee   :  { %27664 = vmatmul.mubr.f32.vlgmr.msra.gmra.mxu0 %v8973_v51 }
 0xfef   :  { %27676 = vmatpush3.xpose.msra.mxu0 %v30898_v4  ;;  %27681 = vmatprep.mubr.f32.mxu0 %v8960_v3 }
 0xff0   :  { %27677 = vmatprep.subr.mxu0 %v30884_v43  ;;  %27689 = vmatpush3.xpose.msra.mxu1 %v30881_v59 }
 0xff1   :  { %27702 = vmatprep.subr.mxu1 %v30889_v16 }
 0xff3   :  { %27678 = vmatpush3.xpose.msra.mxu0 %v30884_v43  ;;  %27691 = vmatmul.mubr.f32.vlgmr.msra.gmra.mxu1 %v8971_v26 }
 0xff4   :  { %27679 = vmatprep.subr.mxu0 %v30892_v29  ;;  %27703 = vmatpush3.xpose.msra.mxu1 %v30889_v16 }
 0xff5   :  { %27708 = vmatprep.mubr.f32.mxu1 %v31204_v12  ;;  %27704 = vmatprep.subr.mxu1 %v30877_v45 }
 0xff7   :  { %27680 = vmatpush3.xpose.msra.mxu0 %v30892_v29 }
 0xff8   :  { %27693 = vmatprep.subr.mxu0 %v30903_v57  ;;  %27705 = vmatpush3.xpose.msra.mxu1 %v30877_v45 }
 0xff9   :  { %27706 = vmatprep.subr.mxu1 %v30881_v59 }
 0xffa   :  { %27682 = vmatmul.mubr.f32.vlgmr.msra.gmra.mxu0 %v8970_v48 }
 0xffb   :  { %27694 = vmatpush3.xpose.msra.mxu0 %v30903_v57  ;;  %27699 = vmatprep.mubr.f32.mxu0 %v31204_v12 }
 0xffc   :  { %27695 = vmatprep.subr.mxu0 %v30895_v60  ;;  %27707 = vmatpush3.xpose.msra.mxu1 %v30881_v59 }
 0xffd   :  { %27720 = vmatprep.subr.mxu1 %v9563_v20 }
 0xfff   :  { %27696 = vmatpush3.xpose.msra.mxu0 %v30895_v60  ;;  %27709 = vmatmul.mubr.f32.vlgmr.msra.gmra.mxu1 %v31230_v46 }
0x1000   :  { %27697 = vmatprep.subr.mxu0 %v30907_v10  ;;  %27721 = vmatpush3.msra.mxu1 %v9563_v20 }
0x1001   :  { %27722 = vmatprep.subr.mxu1 %v9570_v8 }
0x1002   :  { %27723 = vmatpush3.msra.mxu1 %v9570_v8 }
0x1003   :  { %27698 = vmatpush3.xpose.msra.mxu0 %v30907_v10  ;;  %27724 = vmatprep.subr.mxu1 %v9577_v61 }
0x1004   :  { %27711 = vmatprep.subr.mxu0 %v31256_v38  ;;  %27725 = vmatpush3.msra.mxu1 %v9577_v61 }
0x1005   :  { %27738 = vmatprep.subr.mxu1 %v31256_v38 }
0x1006   :  { %27700 = vmatmul.mubr.f32.vlgmr.msra.gmra.mxu0 %v31230_v46 }
0x1007   :  { %27712 = vmatpush3.msra.mxu0 %v31256_v38 }
0x1008   :  { %27713 = vmatprep.subr.mxu0 %v31271_v2 }
0x1009   :  { %27714 = vmatpush3.msra.mxu0 %v31271_v2 }
0x100a   :  { %27715 = vmatprep.subr.mxu0 %v31276_v52 }
0x100b   :  { %27716 = vmatpush3.msra.mxu0 %v31276_v52 }
0x100c   :  { %27729 = vmatprep.subr.mxu0 %v31269_v9 }
0x1074   :  { %v27566_v56 = vpop.f32.mrf.mxu1 }
0x1076   :  { %v31328_v63 = vpop.f32.mrf.mxu1 }
0x107a   :  { %v27584_v12 = vpop.f32.mrf.mxu1 }
0x107c   :  { %v27557_v28 = vpop.f32.mrf.mxu0  ;;  %v31332_v62 = vpop.f32.mrf.mxu1 }
0x107d   :  { %v8021_v34 = vadd.f32 %v27566_v56, %v27557_v28 }
0x107e   :  { %v31326_v15 = vpop.f32.mrf.mxu0 }
0x1081   :  { %v27602_v14 = vpop.f32.mrf.mxu1 }
0x1082   :  { %v27575_v35 = vpop.f32.mrf.mxu0 }
0x1083   :  { %v8106_v44 = vadd.f32 %v27575_v35, %v8021_v34  ;;  %v31336_v26 = vpop.f32.mrf.mxu1 }
0x1084   :  { %v31330_v19 = vpop.f32.mrf.mxu0 }
0x1085   :  { %v8190_v3 = vadd.f32 %v27584_v12, %v8106_v44 }
0x1089   :  { %v27620_v7 = vpop.f32.mrf.mxu1 }
0x108a   :  { %v27593_v50 = vpop.f32.mrf.mxu0 }
0x108b   :  { %v8276_v46 = vadd.f32 %v27593_v50, %v8190_v3  ;;  %v31340_v32 = vpop.f32.mrf.mxu1 }
0x108c   :  { %v31334_v1 = vpop.f32.mrf.mxu0 }
0x108d   :  { %v8356_v48 = vadd.f32 %v27602_v14, %v8276_v46 }
0x1091   :  { %v27638_v36 = vpop.f32.mrf.mxu1 }
0x1092   :  { %v27611_v39 = vpop.f32.mrf.mxu0 }
0x1093   :  { %v8453_v42 = vadd.f32 %v27611_v39, %v8356_v48  ;;  %v31344_v61 = vpop.f32.mrf.mxu1 }
0x1094   :  { %v31338_v51 = vpop.f32.mrf.mxu0 }
0x1095   :  { %v8545_v17 = vadd.f32 %v27620_v7, %v8453_v42 }
0x1099   :  { %v27656_v34 = vpop.f32.mrf.mxu1 }
0x109a   :  { %v27629_v49 = vpop.f32.mrf.mxu0 }
0x109b   :  { %v8630_v20 = vadd.f32 %v27629_v49, %v8545_v17  ;;  %v31350_v3 = vpop.f32.mrf.mxu1 }
0x109c   :  { %v31342_v8 = vpop.f32.mrf.mxu0  ;;  %34134 = vst [vmem:[#allocation24_spill] sm:$0xff] %v31350_v3 }
0x109d   :  { %v8714_v54 = vadd.f32 %v27638_v36, %v8630_v20 }
0x10a2   :  { %v27647_v56 = vpop.f32.mrf.mxu0 }
0x10a3   :  { %v8800_v28 = vadd.f32 %v27647_v56, %v8714_v54 }
0x10a4   :  { %v31348_v44 = vpop.f32.mrf.mxu0 }
0x10a5   :  { %v31346_v35 = vadd.f32 %v27656_v34, %v8800_v28 }
0x10a7   :  { %v27674_v50 = vpop.f32.mrf.mxu1 }
0x10a9   :  { %v9061_v48 = vpop.f32.mrf.mxu1 }
0x10ae   :  { %v27665_v12 = vpop.f32.mrf.mxu0 }
0x10af   :  { %v9068_v39 = vadd.f32 %v27674_v50, %v27665_v12 }
0x10b0   :  { %v8965_v46 = vpop.f32.mrf.mxu0 }
0x10b1   :  { %v9062_v17 = vadd.f32 %v9061_v48, %v8965_v46 }
0x10b3   :  { %v27692_v42 = vpop.f32.mrf.mxu1 }
0x10b5   :  { %v9228_v36 = vpop.f32.mrf.mxu1 }
0x10ba   :  { %v27683_v14 = vpop.f32.mrf.mxu0 }
0x10bb   :  { %v9153_v49 = vadd.f32 %v27683_v14, %v9068_v39 }
0x10bc   :  { %v9145_v7 = vpop.f32.mrf.mxu0 }
0x10bd   :  { %v9146_v20 = vadd.f32 %v9145_v7, %v9062_v17  ;;  %v9237_v54 = vadd.f32 %v27692_v42, %v9153_v49 }
0x10bf   :  { %v27710_v56 = vpop.f32.mrf.mxu1  ;;  %v9229_v18 = vadd.f32 %v9228_v36, %v9146_v20 }
0x10c1   :  { %v9396_v41 = vpop.f32.mrf.mxu1 }
0x10c6   :  { %v27701_v28 = vpop.f32.mrf.mxu0 }
0x10c7   :  { %v9323_v34 = vadd.f32 %v27701_v28, %v9237_v54 }
0x10c8   :  { %v9316_v31 = vpop.f32.mrf.mxu0 }
0x10c9   :  { %v9403_v55 = vadd.f32 %v27710_v56, %v9323_v34  ;;  %v9317_v24 = vadd.f32 %v9316_v31, %v9229_v18 }
0x10cb   :  { %v9407_v30 = vmul.f32 0.35355338, %v9403_v55  ;;  %v9397_v3 = vadd.f32 %v9396_v41, %v9317_v24 }
0x10cd   :  { %v9409_v12 = vsel %vm29983_vm10, %v9407_v30, -1e+09  ;;  %v9406_v50 = vmul.f32 0.35355338, %v9397_v3 }
0x10ce   :  { %v9413_v46 = vsel %vm7247_vm5, %v9409_v12, -inf }
0x10cf   :  { %9414 = vmax.xlane.f32.xlu0 %v9413_v46  ;;  %v9408_v14 = vsel %vm29979_vm8, %v9406_v50, -1e+09 }
0x10d0   :  { %v9410_v48 = vsel %vm7247_vm5, %v9408_v14, -inf }
0x10d1   :  { %9411 = vmax.xlane.f32.xlu1 %v9410_v48 }
0x1158   :  { %v9415_v39 = vpop.xlane.xlu0 %9414 }
0x1159   :  { %v9417_v42 = vsub.f32 %v9409_v12, %v9415_v39  ;;  %v9961_v39 = vsel %vm30261_vm2, %v30844_v25, 0.0 }
0x115a   :  { %v9412_v7 = vpop.xlane.xlu1 %9411 }
0x115b   :  { %v9420_v31 = vmul.f32 1.442695, %v9417_v42  ;;  %v9416_v18 = vsub.f32 %v9408_v14, %v9412_v7  ;;  %v9964_v7 = vsel %vm164_vm0, %v9961_v39, 0 }
0x115d   :  { %29503 = vpow2.f32 %v9420_v31  ;;  %v9418_v24 = vmul.f32 1.442695, %v9416_v18 }
0x115f   :  { %29505 = vpow2.f32 %v9418_v24 }
0x116a   :  { %v29504_v55 = vpop.eup %29503 }
0x116b   :  { %v9425_v30 = vsel %vm7247_vm5, %v29504_v55, 0.0 }
0x116c   :  { %v29506_v41 = vpop.eup %29505  ;;  %9426 = vadd.xlane.f32.xlu1 %v9425_v30 }
0x116d   :  { %v9422_v3 = vsel %vm7247_vm5, %v29506_v41, 0.0 }
0x116e   :  { %9423 = vadd.xlane.f32.xlu0 %v9422_v3 }
0x11f5   :  { %v9427_v17 = vpop.xlane.xlu1 %9426 }
0x11f6   :  { %29507 = vrcp.f32 %v9427_v17 }
0x11f7   :  { %v9424_v49 = vpop.xlane.xlu0 %9423 }
0x11f8   :  { %29509 = vrcp.f32 %v9424_v49 }
0x1203   :  { %v29508_v20 = vpop.eup %29507 }
0x1204   :  { %v9431_v36 = vmul.f32 %v29508_v20, %v29504_v55  ;;  %v31371_v55 = vand.u32 4294901760, %v9964_v7 }
0x1205   :  { %v29510_v54 = vpop.eup %29509 }
0x1206   :  { %v9430_v56 = vmul.f32 %v29510_v54, %v29506_v41  ;;  %v9439_v28 = vsel %vm7247_vm5, %v9431_v36, 0  ;;  %v10038_v30 = vsub.f32 %v9964_v7, %v31371_v55  ;;  %v9962_v41 = vsel %vm30261_vm2, %v30861_v53, 0.0 }
0x1207   :  { %v9522_v34 = vand.u32 4294901760, %v9439_v28 }
0x1208   :  { %v9436_v12 = vsel %vm7247_vm5, %v9430_v56, 0 }
0x1209   :  { %v9512_v50 = vand.u32 4294901760, %v9436_v12  ;;  %v9523_v46 = vsub.f32 %v9439_v28, %v9522_v34 }
0x120b   :  { %27726 = vmatprep.mubr.f32.mxu1 %v9512_v50  ;;  %v9513_v14 = vsub.f32 %v9436_v12, %v9512_v50  ;;  %v9524_v48 = vand.u32 4294901760, %v9523_v46 }
0x120c   :  { %27727 = vmatmul.mubr.f32.vlgmr.msra.gmra.mxu1 %v9522_v34 }
0x120d   :  { %27739 = vmatpush3.msra.mxu1 %v31256_v38  ;;  %v9514_v42 = vand.u32 4294901760, %v9513_v14  ;;  %v9525_v18 = vsub.f32 %v9523_v46, %v9524_v48 }
0x120e   :  { %27740 = vmatprep.subr.mxu1 %v31271_v2 }
0x120f   :  { %27741 = vmatpush3.msra.mxu1 %v31271_v2  ;;  %27744 = vmatprep.mubr.f32.mxu1 %v9514_v42  ;;  %v9515_v31 = vsub.f32 %v9513_v14, %v9514_v42  ;;  %v9526_v25 = vand.u32 4294901760, %v9525_v18 }
0x1210   :  { %27742 = vmatprep.subr.mxu1 %v31276_v52 }
0x1211   :  { %27743 = vmatpush3.msra.mxu1 %v31276_v52  ;;  %v9516_v24 = vand.u32 4294901760, %v9515_v31 }
0x1212   :  { %27745 = vmatmul.mubr.f32.vlgmr.msra.gmra.mxu1 %v9524_v48  ;;  %27756 = vmatprep.subr.mxu1 %v31256_v38 }
0x1213   :  { %27757 = vmatpush3.msra.mxu1 %v31256_v38  ;;  %27762 = vmatprep.mubr.f32.mxu1 %v9512_v50  ;;  %v9967_v38 = vsel %vm164_vm0, %v9962_v41, 0 }
0x1214   :  { %27717 = vmatprep.mubr.f32.mxu0 %v9516_v24  ;;  %27758 = vmatprep.subr.mxu1 %v31271_v2  ;;  %v31393_v53 = vand.u32 4294901760, %v9967_v38 }
0x1215   :  { %27718 = vmatmul.mubr.f32.vlgmr.msra.gmra.mxu0 %v9526_v25  ;;  %27759 = vmatpush3.msra.mxu1 %v31271_v2  ;;  %v10039_v2 = vand.u32 4294901760, %v10038_v30 }
0x1216   :  { %27730 = vmatpush3.msra.mxu0 %v31269_v9  ;;  %27735 = vmatprep.mubr.f32.mxu0 %v9513_v14 }
0x1217   :  { %27731 = vmatprep.subr.mxu0 %v31280_v5  ;;  %27760 = vmatprep.subr.mxu1 %v31276_v52  ;;  %v10040_v9 = vsub.f32 %v10038_v30, %v10039_v2 }
0x1218   :  { %27732 = vmatpush3.msra.mxu0 %v31280_v5  ;;  %27761 = vmatpush3.msra.mxu1 %v31276_v52  ;;  %v10512_v5 = vsel %vm30261_vm2, %v31032_v58, 0.0  ;;  %v10511_v58 = vsel %vm30261_vm2, %v31074_v22, 0.0 }
0x1219   :  { %27733 = vmatprep.subr.mxu0 %v31289_v6  ;;  %27763 = vmatmul.mubr.f32.vlgmr.msra.gmra.mxu1 %v9522_v34  ;;  %v10041_v52 = vand.u32 4294901760, %v10040_v9  ;;  %v31433_v17 = vand.u32 4294901760, %v10511_v58 }
0x121a   :  { %27774 = vmatprep.subr.mxu1 %v30915_v0  ;;  %27734 = vmatpush3.msra.mxu0 %v31289_v6 }
0x121b   :  { %27775 = vmatpush3.xpose.msra.mxu1 %v30915_v0  ;;  %27780 = vmatprep.mubr.f32.mxu1 %v31371_v55  ;;  %v10048_v0 = vsub.f32 %v9967_v38, %v31393_v53  ;;  %v31442_v49 = vsub.f32 %v10511_v58, %v31433_v17 }
0x121c   :  { %27736 = vmatmul.mubr.f32.vlgmr.msra.gmra.mxu0 %v9523_v46  ;;  %27747 = vmatprep.subr.mxu0 %v31284_v11 }
0x121d   :  { %27776 = vmatprep.subr.mxu1 %v30918_v27  ;;  %27748 = vmatpush3.msra.mxu0 %v31284_v11  ;;  %v10520_v11 = vsel %vm7840_vm11, %v10512_v5, 0 }
0x121e   :  { %27753 = vmatprep.mubr.f32.mxu0 %v9512_v50  ;;  %27749 = vmatprep.subr.mxu0 %v31297_v33 }
0x121f   :  { %27750 = vmatpush3.msra.mxu0 %v31297_v33  ;;  %27777 = vmatpush3.xpose.msra.mxu1 %v30918_v27  ;;  %v10049_v27 = vand.u32 4294901760, %v10048_v0 }
0x1220   :  { %27751 = vmatprep.subr.mxu0 %v31303_v40  ;;  %27778 = vmatprep.subr.mxu1 %v30926_v13 }
0x1221   :  { %27752 = vmatpush3.msra.mxu0 %v31303_v40  ;;  %v10050_v6 = vsub.f32 %v10048_v0, %v10049_v27  ;;  %v10510_v40 = vsel %vm30261_vm2, %v31064_v47, 0.0 }
0x1222   :  { %27754 = vmatmul.mubr.f32.vlgmr.msra.gmra.mxu0 %v9522_v34  ;;  %27765 = vmatprep.subr.mxu0 %v30889_v16  ;;  %v31438_v22 = vand.u32 4294901760, %v10510_v40 }
0x1223   :  { %27766 = vmatpush3.xpose.msra.mxu0 %v30889_v16  ;;  %27771 = vmatprep.mubr.f32.mxu0 %v10041_v52  ;;  %v10051_v33 = vand.u32 4294901760, %v10050_v6 }
0x1224   :  { %27779 = vmatpush3.xpose.msra.mxu1 %v30926_v13  ;;  %27767 = vmatprep.subr.mxu0 %v30877_v45  ;;  %v31418_v13 = vand.u32 4294901760, %v10520_v11 }
0x1225   :  { %27792 = vmatprep.subr.mxu1 %v30889_v16 }
0x1226   :  { %v31431_v3 = vsub.f32 %v10520_v11, %v31418_v13 }
0x1227   :  { %27781 = vmatmul.mubr.f32.vlgmr.msra.gmra.mxu1 %v31393_v53  ;;  %27768 = vmatpush3.xpose.msra.mxu0 %v30877_v45 }
0x1228   :  { %27793 = vmatpush3.xpose.msra.mxu1 %v30889_v16  ;;  %27798 = vmatprep.mubr.f32.mxu1 %v10039_v2  ;;  %v31446_v47 = vand.u32 4294901760, %v31431_v3 }
0x1229   :  { %27769 = vmatprep.subr.mxu0 %v30881_v59  ;;  %27794 = vmatprep.subr.mxu1 %v30877_v45 }
0x122a   :  { %v10640_v20 = vsub.f32 %v31431_v3, %v31446_v47 }
0x122b   :  { %27770 = vmatpush3.xpose.msra.mxu0 %v30881_v59 }
0x122c   :  { %27795 = vmatpush3.xpose.msra.mxu1 %v30877_v45  ;;  %27783 = vmatprep.subr.mxu0 %v30898_v4 }
0x122d   :  { %27796 = vmatprep.subr.mxu1 %v30881_v59 }
0x122e   :  { %27772 = vmatmul.mubr.f32.vlgmr.msra.gmra.mxu0 %v10051_v33 }
0x122f   :  { %27784 = vmatpush3.xpose.msra.mxu0 %v30898_v4  ;;  %27789 = vmatprep.mubr.f32.mxu0 %v10038_v30  ;;  %v31451_v4 = vsub.f32 %v10510_v40, %v31438_v22 }
0x1230   :  { %27797 = vmatpush3.xpose.msra.mxu1 %v30881_v59  ;;  %27785 = vmatprep.subr.mxu0 %v30884_v43 }
0x1231   :  { %27810 = vmatprep.subr.mxu1 %v30889_v16 }
0x1233   :  { %27799 = vmatmul.mubr.f32.vlgmr.msra.gmra.mxu1 %v10049_v27  ;;  %27786 = vmatpush3.xpose.msra.mxu0 %v30884_v43  ;;  %v31459_v43 = vand.u32 4294901760, %v31442_v49 }
0x1234   :  { %27811 = vmatpush3.xpose.msra.mxu1 %v30889_v16  ;;  %27816 = vmatprep.mubr.f32.mxu1 %v31371_v55  ;;  %v31465_v16 = vand.u32 4294901760, %v31451_v4 }
0x1235   :  { %27787 = vmatprep.subr.mxu0 %v30892_v29  ;;  %27812 = vmatprep.subr.mxu1 %v30877_v45  ;;  %v10647_v36 = vsub.f32 %v31442_v49, %v31459_v43 }
0x1237   :  { %27788 = vmatpush3.xpose.msra.mxu0 %v30892_v29  ;;  %v10641_v29 = vand.u32 4294901760, %v10640_v20  ;;  %v10648_v54 = vand.u32 4294901760, %v10647_v36 }
0x1238   :  { %27813 = vmatpush3.xpose.msra.mxu1 %v30877_v45  ;;  %27801 = vmatprep.subr.mxu0 %v30903_v57  ;;  %v10654_v45 = vsub.f32 %v31451_v4, %v31465_v16 }
0x1239   :  { %27814 = vmatprep.subr.mxu1 %v30881_v59 }
0x123a   :  { %27790 = vmatmul.mubr.f32.vlgmr.msra.gmra.mxu0 %v10048_v0 }
0x123b   :  { %27802 = vmatpush3.xpose.msra.mxu0 %v30903_v57  ;;  %27807 = vmatprep.mubr.f32.mxu0 %v31371_v55  ;;  %v10655_v57 = vand.u32 4294901760, %v10654_v45 }
0x123c   :  { %27815 = vmatpush3.xpose.msra.mxu1 %v30881_v59  ;;  %27803 = vmatprep.subr.mxu0 %v30895_v60 }
0x123d   :  { %27828 = vmatprep.subr.mxu1 %v10641_v29 }
0x123f   :  { %27817 = vmatmul.mubr.f32.vlgmr.msra.gmra.mxu1 %v31393_v53  ;;  %27804 = vmatpush3.xpose.msra.mxu0 %v30895_v60 }
0x1240   :  { %27829 = vmatpush3.msra.mxu1 %v10641_v29  ;;  %27805 = vmatprep.subr.mxu0 %v30907_v10 }
0x1241   :  { %27830 = vmatprep.subr.mxu1 %v10648_v54 }
0x1242   :  { %27831 = vmatpush3.msra.mxu1 %v10648_v54 }
0x1243   :  { %27832 = vmatprep.subr.mxu1 %v10655_v57  ;;  %27806 = vmatpush3.xpose.msra.mxu0 %v30907_v10 }
0x1244   :  { %27833 = vmatpush3.msra.mxu1 %v10655_v57  ;;  %27819 = vmatprep.subr.mxu0 %v31418_v13 }
0x1245   :  { %27846 = vmatprep.subr.mxu1 %v31418_v13 }
0x1246   :  { %27808 = vmatmul.mubr.f32.vlgmr.msra.gmra.mxu0 %v31393_v53 }
0x1247   :  { %27820 = vmatpush3.msra.mxu0 %v31418_v13 }
0x1248   :  { %27821 = vmatprep.subr.mxu0 %v31433_v17 }
0x1249   :  { %27822 = vmatpush3.msra.mxu0 %v31433_v17 }
0x124a   :  { %27823 = vmatprep.subr.mxu0 %v31438_v22 }
0x124b   :  { %27824 = vmatpush3.msra.mxu0 %v31438_v22 }
0x124c   :  { %27837 = vmatprep.subr.mxu0 %v31431_v3 }
0x12cc   :  { %v27728_v59 = vpop.f32.mrf.mxu1 }
0x12ce   :  { %v31490_v28 = vpop.f32.mrf.mxu1 }
0x12d2   :  { %v27746_v50 = vpop.f32.mrf.mxu1 }
0x12d4   :  { %v31494_v48 = vpop.f32.mrf.mxu1 }
0x12d5   :  { %v27719_v60 = vpop.f32.mrf.mxu0 }
0x12d6   :  { %v9621_v10 = vadd.f32 %v27728_v59, %v27719_v60 }
0x12d7   :  { %v31488_v56 = vpop.f32.mrf.mxu0 }
0x12d9   :  { %v27764_v7 = vpop.f32.mrf.mxu1 }
0x12db   :  { %v31501_v25 = vpop.f32.mrf.mxu1 }
0x12dc   :  { %v27737_v34 = vpop.f32.mrf.mxu0 }
0x12dd   :  { %v9706_v12 = vadd.f32 %v27737_v34, %v9621_v10 }
0x12de   :  { %v31492_v14 = vpop.f32.mrf.mxu0 }
0x12df   :  { %v9790_v46 = vadd.f32 %v27746_v50, %v9706_v12 }
0x12e2   :  { %v27755_v39 = vpop.f32.mrf.mxu0 }
0x12e3   :  { %v9876_v42 = vadd.f32 %v27755_v39, %v9790_v46 }
0x12e4   :  { %v31499_v24 = vpop.f32.mrf.mxu0 }
0x12e5   :  { %v9956_v31 = vadd.f32 %v27764_v7, %v9876_v42 }
0x12e7   :  { %v31497_v18 = vadd.f32 %v9956_v31, %v31346_v35  ;;  %v27782_v30 = vpop.f32.mrf.mxu1 }
0x12e9   :  { %v10139_v2 = vpop.f32.mrf.mxu1 }
0x12ee   :  { %v27773_v55 = vpop.f32.mrf.mxu0 }
0x12ef   :  { %v10146_v53 = vadd.f32 %v27782_v30, %v27773_v55 }
0x12f0   :  { %v10043_v41 = vpop.f32.mrf.mxu0 }
0x12f1   :  { %v10140_v52 = vadd.f32 %v10139_v2, %v10043_v41  ;;  %v29606_v2 = vld [vmem:[%s34065_s5 + $0x30] sm:$0xff] }
0x12f3   :  { %v27800_v9 = vpop.f32.mrf.mxu1 }
0x12f5   :  { %v10306_v11 = vpop.f32.mrf.mxu1 }
0x12fa   :  { %v27791_v38 = vpop.f32.mrf.mxu0 }
0x12fb   :  { %v10231_v27 = vadd.f32 %v27791_v38, %v10146_v53  ;;  %v29607_v53 = vld [vmem:[%s34065_s5 + $0x28] sm:$0xff] }
0x12fc   :  { %v10223_v0 = vpop.f32.mrf.mxu0 }
0x12fd   :  { %v10224_v5 = vadd.f32 %v10223_v0, %v10140_v52  ;;  %v10315_v6 = vadd.f32 %v27800_v9, %v10231_v27  ;;  %v29608_v9 = vld [vmem:[%s34065_s5 + $0x38] sm:$0xff]  ;;  %v29609_v0 = vld [vmem:[%s34065_s5 + $0x20] sm:$0xff] }
0x12fe   :  { %v29610_v52 = vld [vmem:[%s34066_s6 + $0x1] ss:$0 sm:$0xff] }
0x12ff   :  { %v27818_v58 = vpop.f32.mrf.mxu1  ;;  %v10307_v40 = vadd.f32 %v10306_v11, %v10224_v5 }
0x1301   :  { %v10474_v45 = vpop.f32.mrf.mxu1 }
0x1306   :  { %v27809_v35 = vpop.f32.mrf.mxu0 }
0x1307   :  { %v10401_v33 = vadd.f32 %v27809_v35, %v10315_v6 }
0x1308   :  { %v10394_v20 = vpop.f32.mrf.mxu0 }
0x1309   :  { %v10481_v29 = vadd.f32 %v27818_v58, %v10401_v33  ;;  %v10395_v36 = vadd.f32 %v10394_v20, %v10307_v40 }
0x130b   :  { %v10485_v54 = vmul.f32 0.35355338, %v10481_v29  ;;  %v10475_v57 = vadd.f32 %v10474_v45, %v10395_v36 }
0x130d   :  { %v10487_v59 = vsel %vm29983_vm10, %v10485_v54, -1e+09  ;;  %v10484_v60 = vmul.f32 0.35355338, %v10475_v57 }
0x130e   :  { %v10491_v10 = vsel %vm7247_vm5, %v10487_v59, -inf }
0x130f   :  { %10492 = vmax.xlane.f32.xlu1 %v10491_v10  ;;  %v10486_v34 = vsel %vm29979_vm8, %v10484_v60, -1e+09 }
0x1310   :  { %v10488_v12 = vsel %vm7247_vm5, %v10486_v34, -inf }
0x1311   :  { %10489 = vmax.xlane.f32.xlu0 %v10488_v12 }
0x1398   :  { %v10493_v50 = vpop.xlane.xlu1 %10492 }
0x1399   :  { %v10495_v46 = vsub.f32 %v10487_v59, %v10493_v50 }
0x139a   :  { %v10490_v39 = vpop.xlane.xlu0 %10489 }
0x139b   :  { %v10498_v42 = vmul.f32 1.442695, %v10495_v46  ;;  %v10494_v7 = vsub.f32 %v10486_v34, %v10490_v39 }
0x139d   :  { %29511 = vpow2.f32 %v10498_v42  ;;  %v10496_v31 = vmul.f32 1.442695, %v10494_v7 }
0x139f   :  { %29513 = vpow2.f32 %v10496_v31 }
0x13aa   :  { %v29512_v55 = vpop.eup %29511 }
0x13ab   :  { %v10503_v30 = vsel %vm7247_vm5, %v29512_v55, 0.0 }
0x13ac   :  { %v29514_v41 = vpop.eup %29513  ;;  %10504 = vadd.xlane.f32.xlu1 %v10503_v30 }
0x13ad   :  { %v10500_v38 = vsel %vm7247_vm5, %v29514_v41, 0.0 }
0x13ae   :  { %10501 = vadd.xlane.f32.xlu0 %v10500_v38 }
0x13bd   :  { %11043 = vrot.lane.b32.xlu1 %v29606_v2, %s29647_s25 }
0x13c1   :  { %11041 = vrot.lane.b32.xlu1 %v29607_v53, %s29647_s25 }
0x13c4   :  { %11045 = vrot.lane.b32.xlu0 %v29608_v9, %s29647_s25 }
0x13c5   :  { %11039 = vrot.lane.b32.xlu1 %v29609_v0, %s29647_s25 }
0x13c8   :  { %11587 = vrot.lane.b32.xlu0 %v29610_v52, %s29647_s25  ;;  %v8015_v52 = vadd.f32 %v31328_v63, %v31326_v15 }
0x1435   :  { %v10505_v27 = vpop.xlane.xlu1 %10504 }
0x1436   :  { %29515 = vrcp.f32 %v10505_v27  ;;  %v8099_v27 = vadd.f32 %v31330_v19, %v8015_v52 }
0x1437   :  { %v10502_v5 = vpop.xlane.xlu0 %10501 }
0x1438   :  { %29517 = vrcp.f32 %v10502_v5  ;;  %v8182_v5 = vadd.f32 %v31332_v62, %v8099_v27 }
0x1443   :  { %v29516_v11 = vpop.eup %29515 }
0x1444   :  { %v10509_v6 = vmul.f32 %v29516_v11, %v29512_v55  ;;  %v8270_v11 = vadd.f32 %v31334_v1, %v8182_v5 }
0x1445   :  { %v29518_v58 = vpop.eup %29517 }
0x1446   :  { %v10508_v35 = vmul.f32 %v29518_v58, %v29514_v41  ;;  %v10517_v33 = vsel %vm7247_vm5, %v10509_v6, 0  ;;  %v8350_v6 = vadd.f32 %v31336_v26, %v8270_v11 }
0x1447   :  { %v10600_v40 = vand.u32 4294901760, %v10517_v33 }
0x1448   :  { %v10514_v20 = vsel %vm7247_vm5, %v10508_v35, 0  ;;  %v8443_v35 = vadd.f32 %v31338_v51, %v8350_v6 }
0x1449   :  { %v10590_v29 = vand.u32 4294901760, %v10514_v20  ;;  %v10601_v36 = vsub.f32 %v10517_v33, %v10600_v40 }
0x144b   :  { %27834 = vmatprep.mubr.f32.mxu1 %v10590_v29  ;;  %v10591_v45 = vsub.f32 %v10514_v20, %v10590_v29  ;;  %v10602_v54 = vand.u32 4294901760, %v10601_v36 }
0x144c   :  { %27835 = vmatmul.mubr.f32.vlgmr.msra.gmra.mxu1 %v10600_v40 }
0x144d   :  { %27847 = vmatpush3.msra.mxu1 %v31418_v13  ;;  %v10592_v57 = vand.u32 4294901760, %v10591_v45  ;;  %v10603_v60 = vsub.f32 %v10601_v36, %v10602_v54 }
0x144e   :  { %27848 = vmatprep.subr.mxu1 %v31433_v17 }
0x144f   :  { %27849 = vmatpush3.msra.mxu1 %v31433_v17  ;;  %27852 = vmatprep.mubr.f32.mxu1 %v10592_v57  ;;  %v10593_v59 = vsub.f32 %v10591_v45, %v10592_v57  ;;  %v10604_v34 = vand.u32 4294901760, %v10603_v60 }
0x1450   :  { %27850 = vmatprep.subr.mxu1 %v31438_v22 }
0x1451   :  { %27851 = vmatpush3.msra.mxu1 %v31438_v22  ;;  %v10594_v10 = vand.u32 4294901760, %v10593_v59 }
0x1452   :  { %27853 = vmatmul.mubr.f32.vlgmr.msra.gmra.mxu1 %v10602_v54  ;;  %27864 = vmatprep.subr.mxu1 %v31418_v13 }
0x1453   :  { %27865 = vmatpush3.msra.mxu1 %v31418_v13  ;;  %27870 = vmatprep.mubr.f32.mxu1 %v10590_v29  ;;  %v11044_v13 = vpop.permute.xlu1 %11043 }
0x1454   :  { %27825 = vmatprep.mubr.f32.mxu0 %v10594_v10  ;;  %27866 = vmatprep.subr.mxu1 %v31433_v17 }
0x1455   :  { %27826 = vmatmul.mubr.f32.vlgmr.msra.gmra.mxu0 %v10604_v34  ;;  %27867 = vmatpush3.msra.mxu1 %v31433_v17  ;;  %v31555_v17 = vand.u32 4294901760, %v11044_v13 }
0x1456   :  { %27838 = vmatpush3.msra.mxu0 %v31431_v3  ;;  %27843 = vmatprep.mubr.f32.mxu0 %v10591_v45  ;;  %v11046_v3 = vpop.permute.xlu0 %11045 }
0x1457   :  { %27839 = vmatprep.subr.mxu0 %v31442_v49  ;;  %27868 = vmatprep.subr.mxu1 %v31438_v22 }
0x1458   :  { %27840 = vmatpush3.msra.mxu0 %v31442_v49  ;;  %27869 = vmatpush3.msra.mxu1 %v31438_v22  ;;  %v31557_v22 = vand.u32 4294901760, %v11046_v3  ;;  %v11042_v49 = vpop.permute.xlu1 %11041 }
0x1459   :  { %27841 = vmatprep.subr.mxu0 %v31451_v4  ;;  %27871 = vmatmul.mubr.f32.vlgmr.msra.gmra.mxu1 %v10600_v40 }
0x145a   :  { %27842 = vmatpush3.msra.mxu0 %v31451_v4  ;;  %v31560_v4 = vsub.f32 %v11046_v3, %v31557_v22 }
0x145b   :  { %27844 = vmatmul.mubr.f32.vlgmr.msra.gmra.mxu0 %v10601_v36  ;;  %27855 = vmatprep.subr.mxu0 %v31446_v47  ;;  %v8539_v36 = vadd.f32 %v31340_v32, %v8443_v35 }
0x145c   :  { %27856 = vmatpush3.msra.mxu0 %v31446_v47  ;;  %27861 = vmatprep.mubr.f32.mxu0 %v10590_v29  ;;  %v31562_v47 = vand.u32 4294901760, %v11042_v49  ;;  %v11040_v12 = vpop.permute.xlu1 %11039  ;;  %v31575_v50 = vand.u32 4294901760, %v31560_v4 }
0x145d   :  { %27857 = vmatprep.subr.mxu0 %v31459_v43  ;;  %v31578_v46 = vand.u32 4294901760, %v11040_v12  ;;  %v8623_v63 = vadd.f32 %v31342_v8, %v8539_v36 }
0x145e   :  { %27858 = vmatpush3.msra.mxu0 %v31459_v43  ;;  %v31567_v43 = vsub.f32 %v11044_v13, %v31555_v17  ;;  %v11174_v39 = vsub.f32 %v31560_v4, %v31575_v50 }
0x145f   :  { %27859 = vmatprep.subr.mxu0 %v31465_v16  ;;  %v31587_v7 = vsub.f32 %v11040_v12, %v31578_v46  ;;  %v8706_v57 = vadd.f32 %v31344_v61, %v8623_v63 }
0x1460   :  { %27860 = vmatpush3.msra.mxu0 %v31465_v16  ;;  %v31572_v16 = vsub.f32 %v11042_v49, %v31562_v47  ;;  %v31584_v42 = vand.u32 4294901760, %v31567_v43  ;;  %v11175_v31 = vand.u32 4294901760, %v11174_v39 }
0x1461   :  { %27862 = vmatmul.mubr.f32.vlgmr.msra.gmra.mxu0 %v10600_v40  ;;  %27873 = vmatprep.subr.mxu0 %v31557_v22  ;;  %v31600_v2 = vand.u32 4294901760, %v31587_v7  ;;  %v9615_v40 = vadd.f32 %v31490_v28, %v31488_v56  ;;  %v8794_v32 = vadd.f32 %v31348_v44, %v8706_v57 }
0x1462   :  { %27874 = vmatpush3.msra.mxu0 %v31557_v22  ;;  %v11181_v55 = vsub.f32 %v31567_v43, %v31584_v42  ;;  %v31593_v30 = vand.u32 4294901760, %v31572_v16  ;;  %27884 = vmatprep.subr.mxu1 %v11175_v31 }
0x1463   :  { %27875 = vmatprep.subr.mxu0 %v31555_v17  ;;  %27885 = vmatpush3.msra.mxu1 %v11175_v31  ;;  %v11195_v9 = vsub.f32 %v31587_v7, %v31600_v2  ;;  %v9699_v15 = vadd.f32 %v31492_v14, %v9615_v40 }
0x1464   :  { %27876 = vmatpush3.msra.mxu0 %v31555_v17  ;;  %v11182_v41 = vand.u32 4294901760, %v11181_v55  ;;  %v11188_v38 = vsub.f32 %v31572_v16, %v31593_v30 }
0x1465   :  { %27877 = vmatprep.subr.mxu0 %v31562_v47  ;;  %v11196_v0 = vand.u32 4294901760, %v11195_v9  ;;  %v9782_v26 = vadd.f32 %v31494_v48, %v9699_v15  ;;  %v34135_v48 = vld [vmem:[#allocation24_spill] sm:$0xff] }
0x1466   :  { %27878 = vmatpush3.msra.mxu0 %v31562_v47  ;;  %27886 = vmatprep.subr.mxu1 %v11182_v41  ;;  %v11189_v53 = vand.u32 4294901760, %v11188_v38  ;;  %v8874_v49 = vadd.f32 %v34135_v48, %v8794_v32 }
0x1467   :  { %27879 = vmatprep.subr.mxu0 %v31578_v46  ;;  %27887 = vmatpush3.msra.mxu1 %v11182_v41  ;;  %v9870_v56 = vadd.f32 %v31499_v24, %v9782_v26 }
0x1468   :  { %27880 = vmatpush3.msra.mxu0 %v31578_v46  ;;  %27888 = vmatprep.subr.mxu1 %v11189_v53 }
0x1469   :  { %27895 = vmatprep.subr.mxu0 %v31560_v4  ;;  %27889 = vmatpush3.msra.mxu1 %v11189_v53  ;;  %v9950_v8 = vadd.f32 %v31501_v25, %v9870_v56 }
0x146a   :  { %27890 = vmatprep.subr.mxu1 %v11196_v0 }
0x146b   :  { %27891 = vmatpush3.msra.mxu1 %v11196_v0  ;;  %v9959_v61 = vadd.f32 %v9950_v8, %v8874_v49  ;;  %v141_v49 = vld [vmem:[%s34068_s8 + $0x18] sm:$0xff] }
0x146c   :  { %27906 = vmatprep.subr.mxu1 %v31557_v22 }
0x150c   :  { %v27836_v58 = vpop.f32.mrf.mxu1 }
0x150e   :  { %v10692_v20 = vpop.f32.mrf.mxu1 }
0x1512   :  { %v27854_v62 = vpop.f32.mrf.mxu1 }
0x1514   :  { %v10859_v59 = vpop.f32.mrf.mxu1 }
0x1515   :  { %v27827_v33 = vpop.f32.mrf.mxu0 }
0x1516   :  { %v10699_v19 = vadd.f32 %v27836_v58, %v27827_v33 }
0x1517   :  { %v10596_v29 = vpop.f32.mrf.mxu0 }
0x1518   :  { %v10693_v45 = vadd.f32 %v10692_v20, %v10596_v29 }
0x1519   :  { %v27872_v14 = vpop.f32.mrf.mxu1 }
0x151b   :  { %v27845_v1 = vpop.f32.mrf.mxu0  ;;  %v11027_v31 = vpop.f32.mrf.mxu1 }
0x151c   :  { %v10784_v54 = vadd.f32 %v27845_v1, %v10699_v19  ;;  %v11588_v19 = vpop.permute.xlu0 %11587  ;;  %v34136_v1 = vld [vmem:[#allocation10_spill] sm:$0xff] }
0x151d   :  { %v10776_v51 = vpop.f32.mrf.mxu0 }
0x151e   :  { %v10777_v28 = vadd.f32 %v10776_v51, %v10693_v45  ;;  %v10868_v60 = vadd.f32 %v27854_v62, %v10784_v54  ;;  %v34137_v45 = vld [vmem:[#allocation11_spill] sm:$0xff] }
0x1520   :  { %v10860_v13 = vadd.f32 %v10859_v59, %v10777_v28 }
0x1521   :  { %v27863_v10 = vpop.f32.mrf.mxu0 }
0x1522   :  { %v10954_v34 = vadd.f32 %v27863_v10, %v10868_v60 }
0x1523   :  { %v10947_v3 = vpop.f32.mrf.mxu0 }
0x1524   :  { %v11034_v12 = vadd.f32 %v27872_v14, %v10954_v34  ;;  %v10948_v39 = vadd.f32 %v10947_v3, %v10860_v13 }
0x1526   :  { %v11038_v24 = vadd.f32 %v11034_v12, %v31497_v18  ;;  %v11028_v55 = vadd.f32 %v11027_v31, %v10948_v39  ;;  %v31677_v12 = vand.u32 4294901760, %v141_v49  ;;  %v140_v39 = vld [vmem:[%s34068_s8 + $0x10] sm:$0xff] }
0x1528   :  { %v11055_v41 = vsel %vm164_vm0, %v11038_v24, 0  ;;  %v11037_v44 = vadd.f32 %v11028_v55, %v9959_v61  ;;  %v31683_v31 = vsub.f32 %v141_v49, %v31677_v12  ;;  %v31685_v61 = vand.u32 4294901760, %v140_v39  ;;  %v139_v24 = vld [vmem:[%s34068_s8 + $0x8] sm:$0xff] }
0x1529   :  { %v11136_v38 = vand.u32 4294901760, %v11055_v41 }
0x152a   :  { %v11052_v53 = vsel %vm164_vm0, %v11037_v44, 0  ;;  %v31693_v55 = vand.u32 4294901760, %v31683_v31  ;;  %v31698_v44 = vand.u32 4294901760, %v139_v24 }
0x152b   :  { %v11137_v9 = vsub.f32 %v11055_v41, %v11136_v38  ;;  %v11126_v25 = vand.u32 4294901760, %v11052_v53  ;;  %v31696_v41 = vsub.f32 %v140_v39, %v31685_v61 }
0x152d   :  { %v11138_v0 = vand.u32 4294901760, %v11137_v9  ;;  %27892 = vmatprep.mubr.f32.mxu1 %v11126_v25  ;;  %v11127_v52 = vsub.f32 %v11052_v53, %v11126_v25  ;;  %v11763_v53 = vsub.f32 %v31683_v31, %v31693_v55 }
0x152e   :  { %27893 = vmatmul.mubr.f32.vlgmr.msra.gmra.mxu1 %v11136_v38 }
0x152f   :  { %27907 = vmatpush3.msra.mxu1 %v31557_v22  ;;  %v11128_v27 = vand.u32 4294901760, %v11127_v52  ;;  %v11139_v5 = vsub.f32 %v11137_v9, %v11138_v0 }
0x1530   :  { %27908 = vmatprep.subr.mxu1 %v31555_v17 }
0x1531   :  { %27909 = vmatpush3.msra.mxu1 %v31555_v17  ;;  %27914 = vmatprep.mubr.f32.mxu1 %v11128_v27  ;;  %v11129_v18 = vsub.f32 %v11127_v52, %v11128_v27  ;;  %v11140_v6 = vand.u32 4294901760, %v11139_v5 }
0x1532   :  { %27910 = vmatprep.subr.mxu1 %v31562_v47 }
0x1533   :  { %27911 = vmatpush3.msra.mxu1 %v31562_v47  ;;  %v11130_v11 = vand.u32 4294901760, %v11129_v18 }
0x1534   :  { %27912 = vmatprep.subr.mxu1 %v31578_v46 }
0x1535   :  { %27913 = vmatpush3.msra.mxu1 %v31578_v46  ;;  %27881 = vmatprep.mubr.f32.mxu0 %v11130_v11 }
0x1536   :  { %27915 = vmatmul.mubr.f32.vlgmr.msra.gmra.mxu1 %v11138_v0  ;;  %27928 = vmatprep.subr.mxu1 %v31557_v22 }
0x1537   :  { %27882 = vmatmul.mubr.f32.vlgmr.msra.gmra.mxu0 %v11140_v6  ;;  %27929 = vmatpush3.msra.mxu1 %v31557_v22 }
0x1538   :  { %27896 = vmatpush3.msra.mxu0 %v31560_v4  ;;  %27936 = vmatprep.mubr.f32.mxu1 %v11126_v25 }
0x1539   :  { %27897 = vmatprep.subr.mxu0 %v31567_v43  ;;  %27903 = vmatprep.mubr.f32.mxu0 %v11127_v52  ;;  %v11764_v52 = vand.u32 4294901760, %v11763_v53 }
0x153a   :  { %27930 = vmatprep.subr.mxu1 %v31555_v17  ;;  %27898 = vmatpush3.msra.mxu0 %v31567_v43 }
0x153b   :  { %27931 = vmatpush3.msra.mxu1 %v31555_v17  ;;  %27899 = vmatprep.subr.mxu0 %v31572_v16 }
0x153c   :  { %27932 = vmatprep.subr.mxu1 %v31562_v47  ;;  %27900 = vmatpush3.msra.mxu0 %v31572_v16 }
0x153d   :  { %27933 = vmatpush3.msra.mxu1 %v31562_v47  ;;  %27901 = vmatprep.subr.mxu0 %v31587_v7 }
0x153e   :  { %27934 = vmatprep.subr.mxu1 %v31578_v46  ;;  %27902 = vmatpush3.msra.mxu0 %v31587_v7 }
0x153f   :  { %27935 = vmatpush3.msra.mxu1 %v31578_v46  ;;  %27904 = vmatmul.mubr.f32.vlgmr.msra.gmra.mxu0 %v11137_v9  ;;  %v31708_v9 = vand.u32 4294901760, %v31696_v41 }
0x1540   :  { %27917 = vmatprep.subr.mxu0 %v31575_v50  ;;  %27937 = vmatmul.mubr.f32.vlgmr.msra.gmra.mxu1 %v11136_v38 }
0x1541   :  { %27918 = vmatpush3.msra.mxu0 %v31575_v50  ;;  %27925 = vmatprep.mubr.f32.mxu0 %v11126_v25  ;;  %v31711_v25 = vsub.f32 %v139_v24, %v31698_v44  ;;  %v11770_v27 = vsub.f32 %v31696_v41, %v31708_v9 }
0x1542   :  { %27919 = vmatprep.subr.mxu0 %v31584_v42  ;;  %27950 = vmatprep.subr.mxu1 %v11764_v52 }
0x1543   :  { %27920 = vmatpush3.msra.mxu0 %v31584_v42  ;;  %v31720_v5 = vand.u32 4294901760, %v31711_v25  ;;  %v11771_v11 = vand.u32 4294901760, %v11770_v27  ;;  %27951 = vmatpush3.msra.mxu1 %v11764_v52  ;;  %v148_v52 = vld [vmem:[%s34069_s9 + $0x10] sm:$0xff] }
0x1544   :  { %27921 = vmatprep.subr.mxu0 %v31593_v30 }
0x1545   :  { %27922 = vmatpush3.msra.mxu0 %v31593_v30  ;;  %v11777_v6 = vsub.f32 %v31711_v25, %v31720_v5  ;;  %27952 = vmatprep.subr.mxu1 %v11771_v11 }
0x1546   :  { %27923 = vmatprep.subr.mxu0 %v31600_v2  ;;  %27953 = vmatpush3.msra.mxu1 %v11771_v11  ;;  %v31848_v11 = vand.u32 4294901760, %v148_v52 }
0x1547   :  { %27924 = vmatpush3.msra.mxu0 %v31600_v2 }
0x1548   :  { %27926 = vmatmul.mubr.f32.vlgmr.msra.gmra.mxu0 %v11136_v38  ;;  %27939 = vmatprep.subr.mxu0 %v31677_v12  ;;  %v138_v38 = vld [vmem:[%s34068_s8] sm:$0xff] }
0x1549   :  { %27940 = vmatpush3.msra.mxu0 %v31677_v12  ;;  %v31713_v0 = vand.u32 4294901760, %v138_v38 }
0x154a   :  { %27941 = vmatprep.subr.mxu0 %v31685_v61 }
0x154b   :  { %27942 = vmatpush3.msra.mxu0 %v31685_v61  ;;  %v31723_v18 = vsub.f32 %v138_v38, %v31713_v0 }
0x154c   :  { %27943 = vmatprep.subr.mxu0 %v31698_v44 }
0x154d   :  { %27944 = vmatpush3.msra.mxu0 %v31698_v44 }
0x154e   :  { %27945 = vmatprep.subr.mxu0 %v31713_v0 }
0x154f   :  { %27946 = vmatpush3.msra.mxu0 %v31713_v0 }
0x1550   :  { %27961 = vmatprep.subr.mxu0 %v31683_v31 }
0x15ee   :  { %v27894_v22 = vpop.f32.mrf.mxu1 }
0x15f0   :  { %v11233_v43 = vpop.f32.mrf.mxu1 }
0x15f6   :  { %v27916_v50 = vpop.f32.mrf.mxu1 }
0x15f7   :  { %v27883_v17 = vpop.f32.mrf.mxu0 }
0x15f8   :  { %v11240_v16 = vadd.f32 %v27894_v22, %v27883_v17  ;;  %v11403_v35 = vpop.f32.mrf.mxu1  ;;  %v31730_v17 = vand.u32 4294901760, %v31723_v18  ;;  %v11778_v22 = vand.u32 4294901760, %v11777_v6 }
0x15f9   :  { %v11132_v4 = vpop.f32.mrf.mxu0 }
0x15fa   :  { %v11234_v7 = vadd.f32 %v11233_v43, %v11132_v4  ;;  %v11784_v4 = vsub.f32 %v31723_v18, %v31730_v17  ;;  %27954 = vmatprep.subr.mxu1 %v11778_v22 }
0x15fb   :  { %27955 = vmatpush3.msra.mxu1 %v11778_v22 }
0x15ff   :  { %v27905_v47 = vpop.f32.mrf.mxu0 }
0x1600   :  { %v11327_v58 = vadd.f32 %v27905_v47, %v11240_v16  ;;  %v27938_v40 = vpop.f32.mrf.mxu1  ;;  %v11785_v47 = vand.u32 4294901760, %v11784_v4 }
0x1601   :  { %v11319_v46 = vpop.f32.mrf.mxu0 }
0x1602   :  { %v11320_v42 = vadd.f32 %v11319_v46, %v11234_v7  ;;  %v11412_v33 = vadd.f32 %v27916_v50, %v11327_v58  ;;  %v11575_v63 = vpop.f32.mrf.mxu1  ;;  %27956 = vmatprep.subr.mxu1 %v11785_v47 }
0x1603   :  { %27957 = vmatpush3.msra.mxu1 %v11785_v47  ;;  %v31860_v47 = vsub.f32 %v148_v52, %v31848_v11 }
0x1604   :  { %v11404_v29 = vadd.f32 %v11403_v35, %v11320_v42  ;;  %27972 = vmatprep.subr.mxu1 %v31677_v12  ;;  %v25365_v35 = vld [vmem:[%s34067_s7 + $0x4] ss:$0 sm:$0xff] }
0x1608   :  { %v27927_v30 = vpop.f32.mrf.mxu0 }
0x1609   :  { %v11501_v20 = vadd.f32 %v27927_v30, %v11412_v33 }
0x160a   :  { %v11494_v36 = vpop.f32.mrf.mxu0 }
0x160b   :  { %v11582_v2 = vadd.f32 %v27938_v40, %v11501_v20  ;;  %v11495_v15 = vadd.f32 %v11494_v36, %v11404_v29  ;;  %v25366_v40 = vld [vmem:[%s34067_s7 + $0x5] ss:$0 sm:$0xff] }
0x160d   :  { %v11576_v62 = vadd.f32 %v11575_v63, %v11495_v15  ;;  %v11586_v26 = vadd.f32 %v11582_v2, %v34136_v1 }
0x160f   :  { %v11585_v54 = vadd.f32 %v11576_v62, %v34137_v45  ;;  %v31658_v51 = vadd.f32 %v11588_v19, %v11586_v26 }
0x1611   :  { %v31660_v57 = vadd.f32 %v11588_v19, %v11585_v54  ;;  %v11595_v56 = vsel %vm164_vm0, %v31658_v51, 0.0 }
0x1612   :  { %11596 = vadd.xlane.f32.xlu0 %v11595_v56 }
0x1613   :  { %v11592_v28 = vsel %vm164_vm0, %v31660_v57, 0.0 }
0x1614   :  { %11593 = vadd.xlane.f32.xlu1 %v11592_v28 }
0x169b   :  { %v11597_v59 = vpop.xlane.xlu0 %11596 }
0x169c   :  { %v11599_v32 = vmul.f32 0.03125, %v11597_v59 }
0x169d   :  { %v11594_v60 = vpop.xlane.xlu1 %11593 }
0x169e   :  { %v11598_v14 = vmul.f32 0.03125, %v11594_v60  ;;  %v31667_v10 = vsub.f32 %v31658_v51, %v11599_v32 }
0x16a0   :  { %v11600_v8 = vsub.f32 %v31660_v57, %v11598_v14  ;;  %v11603_v3 = vmul.f32 %v31667_v10, %v31667_v10  ;;  %v31778_v14 = vld [vmem:[%s34070_s10] ss:$0 sm:$0xff] }
0x16a1   :  { %12765 = vrot.lane.b32.xlu1 %v31778_v14, %s29646_s3 }
0x16a2   :  { %v11602_v34 = vmul.f32 %v11600_v8, %v11600_v8  ;;  %v11607_v48 = vsel %vm164_vm0, %v11603_v3, 0.0 }
0x16a4   :  { %v11604_v13 = vsel %vm164_vm0, %v11602_v34, 0.0  ;;  %v152_v34 = vld [vmem:[%s34069_s9 + $0x30] sm:$0xff] }
0x16a5   :  { %11605 = vadd.xlane.f32.xlu0 %v11604_v13  ;;  %v31793_v3 = vand.u32 4294901760, %v152_v34 }
0x16a9   :  { %11608 = vadd.xlane.f32.xlu0 %v11607_v48  ;;  %v151_v48 = vld [vmem:[%s34069_s9 + $0x28] sm:$0xff] }
0x16aa   :  { %v31806_v39 = vand.u32 4294901760, %v151_v48 }
0x172e   :  { %v11606_v43 = vpop.xlane.xlu0 %11605 }
0x172f   :  { %v11610_v16 = vmul.f32 0.03125, %v11606_v43 }
0x1731   :  { %v11612_v50 = vadd.f32 1e-05, %v11610_v16 }
0x1732   :  { %v11609_v46 = vpop.xlane.xlu0 %11608 }
0x1733   :  { %29519 = vrsqrt.f32 %v11612_v50  ;;  %v11611_v7 = vmul.f32 0.03125, %v11609_v46  ;;  %v146_v50 = vld [vmem:[%s34069_s9] sm:$0xff] }
0x1735   :  { %v11613_v58 = vadd.f32 1e-05, %v11611_v7  ;;  %v31873_v7 = vand.u32 4294901760, %v31860_v47 }
0x1737   :  { %29521 = vrsqrt.f32 %v11613_v58 }
0x1740   :  { %v29520_v42 = vpop.eup %29519 }
0x1741   :  { %v11616_v33 = vmul.f32 %v29520_v42, %v11600_v8  ;;  %v31878_v42 = vand.u32 4294901760, %v146_v50 }
0x1743   :  { %v11624_v30 = vmul.f32 %v25365_v35, %v11616_v33  ;;  %v12331_v33 = vsub.f32 %v31860_v47, %v31873_v7 }
0x1744   :  { %v29522_v20 = vpop.eup %29521 }
0x1745   :  { %v11617_v29 = vmul.f32 %v29522_v20, %v31667_v10  ;;  %v11632_v36 = vadd.f32 %v25366_v40, %v11624_v30  ;;  %v153_v10 = vld [vmem:[%s34069_s9 + $0x38] sm:$0xff]  ;;  %v31890_v30 = vsub.f32 %v146_v50, %v31878_v42 }
0x1746   :  { %v31785_v8 = vand.u32 4294901760, %v153_v10 }
0x1747   :  { %v11625_v2 = vmul.f32 %v25365_v35, %v11617_v29  ;;  %v11641_v15 = vsel %vm164_vm0, %v11632_v36, 0  ;;  %v12332_v29 = vand.u32 4294901760, %v12331_v33 }
0x1748   :  { %v11715_v63 = vand.u32 4294901760, %v11641_v15  ;;  %v31791_v13 = vsub.f32 %v153_v10, %v31785_v8 }
0x1749   :  { %v11633_v19 = vadd.f32 %v25366_v40, %v11625_v2  ;;  %v31897_v2 = vand.u32 4294901760, %v31890_v30 }
0x174a   :  { %27958 = vmatprep.mubr.f32.mxu1 %v11715_v63  ;;  %v11716_v62 = vsub.f32 %v11641_v15, %v11715_v63  ;;  %v31801_v49 = vand.u32 4294901760, %v31791_v13 }
0x174b   :  { %v11644_v1 = vsel %vm164_vm0, %v11633_v19, 0 }
0x174c   :  { %v11725_v26 = vand.u32 4294901760, %v11644_v1  ;;  %v11717_v45 = vand.u32 4294901760, %v11716_v62 }
0x174e   :  { %v11726_v54 = vsub.f32 %v11644_v1, %v11725_v26  ;;  %27959 = vmatmul.mubr.f32.vlgmr.msra.gmra.mxu1 %v11725_v26  ;;  %v11718_v56 = vsub.f32 %v11716_v62, %v11717_v45 }
0x174f   :  { %27973 = vmatpush3.msra.mxu1 %v31677_v12  ;;  %27980 = vmatprep.mubr.f32.mxu1 %v11717_v45 }
0x1750   :  { %27974 = vmatprep.subr.mxu1 %v31685_v61  ;;  %v11719_v28 = vand.u32 4294901760, %v11718_v56  ;;  %v11727_v59 = vand.u32 4294901760, %v11726_v54 }
0x1751   :  { %27975 = vmatpush3.msra.mxu1 %v31685_v61 }
0x1752   :  { %27976 = vmatprep.subr.mxu1 %v31698_v44  ;;  %27947 = vmatprep.mubr.f32.mxu0 %v11719_v28  ;;  %v11728_v32 = vsub.f32 %v11726_v54, %v11727_v59 }
0x1753   :  { %27977 = vmatpush3.msra.mxu1 %v31698_v44 }
0x1754   :  { %27978 = vmatprep.subr.mxu1 %v31713_v0  ;;  %v11729_v60 = vand.u32 4294901760, %v11728_v32 }
0x1755   :  { %27979 = vmatpush3.msra.mxu1 %v31713_v0 }
0x1756   :  { %27981 = vmatmul.mubr.f32.vlgmr.msra.gmra.mxu1 %v11727_v59  ;;  %27994 = vmatprep.subr.mxu1 %v31677_v12 }
0x1757   :  { %27948 = vmatmul.mubr.f32.vlgmr.msra.gmra.mxu0 %v11729_v60  ;;  %27995 = vmatpush3.msra.mxu1 %v31677_v12  ;;  %v31804_v12 = vsub.f32 %v152_v34, %v31793_v3 }
0x1758   :  { %27962 = vmatpush3.msra.mxu0 %v31683_v31  ;;  %28002 = vmatprep.mubr.f32.mxu1 %v11715_v63  ;;  %v150_v31 = vld [vmem:[%s34069_s9 + $0x20] sm:$0xff] }
0x1759   :  { %27963 = vmatprep.subr.mxu0 %v31696_v41  ;;  %27969 = vmatprep.mubr.f32.mxu0 %v11716_v62  ;;  %v31816_v24 = vand.u32 4294901760, %v31804_v12 }
0x175a   :  { %27996 = vmatprep.subr.mxu1 %v31685_v61  ;;  %27964 = vmatpush3.msra.mxu0 %v31696_v41  ;;  %v31821_v41 = vand.u32 4294901760, %v150_v31 }
0x175b   :  { %27997 = vmatpush3.msra.mxu1 %v31685_v61  ;;  %27965 = vmatprep.subr.mxu0 %v31711_v25  ;;  %v12296_v61 = vsub.f32 %v31791_v13, %v31801_v49  ;;  %v12303_v53 = vsub.f32 %v31804_v12, %v31816_v24 }
0x175c   :  { %27998 = vmatprep.subr.mxu1 %v31698_v44  ;;  %27966 = vmatpush3.msra.mxu0 %v31711_v25  ;;  %v31834_v25 = vsub.f32 %v150_v31, %v31821_v41 }
0x175d   :  { %27999 = vmatpush3.msra.mxu1 %v31698_v44  ;;  %27967 = vmatprep.subr.mxu0 %v31723_v18  ;;  %v149_v44 = vld [vmem:[%s34069_s9 + $0x18] sm:$0xff]  ;;  %v12297_v38 = vand.u32 4294901760, %v12296_v61  ;;  %v12304_v27 = vand.u32 4294901760, %v12303_v53 }
0x175e   :  { %28000 = vmatprep.subr.mxu1 %v31713_v0  ;;  %27968 = vmatpush3.msra.mxu0 %v31723_v18  ;;  %v31846_v18 = vand.u32 4294901760, %v31834_v25 }
0x175f   :  { %28001 = vmatpush3.msra.mxu1 %v31713_v0  ;;  %27970 = vmatmul.mubr.f32.vlgmr.msra.gmra.mxu0 %v11726_v54  ;;  %v31837_v0 = vand.u32 4294901760, %v149_v44 }
0x1760   :  { %27983 = vmatprep.subr.mxu0 %v31693_v55  ;;  %28003 = vmatmul.mubr.f32.vlgmr.msra.gmra.mxu1 %v11725_v26  ;;  %v12317_v4 = vsub.f32 %v31834_v25, %v31846_v18 }
0x1761   :  { %27984 = vmatpush3.msra.mxu0 %v31693_v55  ;;  %27991 = vmatprep.mubr.f32.mxu0 %v11715_v63  ;;  %v31819_v55 = vsub.f32 %v151_v48, %v31806_v39  ;;  %v31851_v6 = vsub.f32 %v149_v44, %v31837_v0  ;;  %v12345_v63 = vsub.f32 %v31890_v30, %v31897_v2 }
0x1762   :  { %27985 = vmatprep.subr.mxu0 %v31708_v9  ;;  %28024 = vmatprep.subr.mxu1 %v12297_v38  ;;  %v12318_v46 = vand.u32 4294901760, %v12317_v4 }
0x1763   :  { %27986 = vmatpush3.msra.mxu0 %v31708_v9  ;;  %v31831_v9 = vand.u32 4294901760, %v31819_v55  ;;  %28025 = vmatpush3.msra.mxu1 %v12297_v38  ;;  %v31866_v16 = vand.u32 4294901760, %v31851_v6  ;;  %v12346_v19 = vand.u32 4294901760, %v12345_v63 }
0x1764   :  { %27987 = vmatprep.subr.mxu0 %v31720_v5  ;;  %28026 = vmatprep.subr.mxu1 %v12304_v27 }
0x1765   :  { %27988 = vmatpush3.msra.mxu0 %v31720_v5  ;;  %v12310_v5 = vsub.f32 %v31819_v55, %v31831_v9  ;;  %28027 = vmatpush3.msra.mxu1 %v12304_v27  ;;  %v12324_v35 = vsub.f32 %v31851_v6, %v31866_v16 }
0x1766   :  { %27989 = vmatprep.subr.mxu0 %v31730_v17 }
0x1767   :  { %27990 = vmatpush3.msra.mxu0 %v31730_v17  ;;  %v147_v17 = vld [vmem:[%s34069_s9 + $0x8] sm:$0xff]  ;;  %v12311_v22 = vand.u32 4294901760, %v12310_v5  ;;  %v12325_v20 = vand.u32 4294901760, %v12324_v35 }
0x1768   :  { %27992 = vmatmul.mubr.f32.vlgmr.msra.gmra.mxu0 %v11725_v26  ;;  %28005 = vmatprep.subr.mxu0 %v31785_v8  ;;  %v31862_v43 = vand.u32 4294901760, %v147_v17 }
0x1769   :  { %28006 = vmatpush3.msra.mxu0 %v31785_v8  ;;  %28028 = vmatprep.subr.mxu1 %v12311_v22 }
0x176a   :  { %28007 = vmatprep.subr.mxu0 %v31793_v3  ;;  %v31876_v58 = vsub.f32 %v147_v17, %v31862_v43  ;;  %28029 = vmatpush3.msra.mxu1 %v12311_v22 }
0x176b   :  { %28008 = vmatpush3.msra.mxu0 %v31793_v3  ;;  %28030 = vmatprep.subr.mxu1 %v12318_v46 }
0x176c   :  { %28009 = vmatprep.subr.mxu0 %v31806_v39  ;;  %v31887_v40 = vand.u32 4294901760, %v31876_v58  ;;  %28031 = vmatpush3.msra.mxu1 %v12318_v46 }
0x176d   :  { %28010 = vmatpush3.msra.mxu0 %v31806_v39  ;;  %28032 = vmatprep.subr.mxu1 %v12325_v20 }
0x176e   :  { %28011 = vmatprep.subr.mxu0 %v31821_v41  ;;  %v12338_v36 = vsub.f32 %v31876_v58, %v31887_v40  ;;  %28033 = vmatpush3.msra.mxu1 %v12325_v20 }
0x176f   :  { %28012 = vmatpush3.msra.mxu0 %v31821_v41  ;;  %28034 = vmatprep.subr.mxu1 %v12332_v29 }
0x1770   :  { %28013 = vmatprep.subr.mxu0 %v31837_v0  ;;  %v12339_v15 = vand.u32 4294901760, %v12338_v36  ;;  %28035 = vmatpush3.msra.mxu1 %v12332_v29 }
0x1771   :  { %28014 = vmatpush3.msra.mxu0 %v31837_v0 }
0x1772   :  { %28015 = vmatprep.subr.mxu0 %v31848_v11  ;;  %28036 = vmatprep.subr.mxu1 %v12339_v15 }
0x1773   :  { %28016 = vmatpush3.msra.mxu0 %v31848_v11  ;;  %28037 = vmatpush3.msra.mxu1 %v12339_v15 }
0x1774   :  { %28017 = vmatprep.subr.mxu0 %v31862_v43  ;;  %28038 = vmatprep.subr.mxu1 %v12346_v19 }
0x1775   :  { %28018 = vmatpush3.msra.mxu0 %v31862_v43  ;;  %28039 = vmatpush3.msra.mxu1 %v12346_v19 }
0x1776   :  { %28019 = vmatprep.subr.mxu0 %v31878_v42  ;;  %28062 = vmatprep.subr.mxu1 %v31785_v8 }
0x1777   :  { %28020 = vmatpush3.msra.mxu0 %v31878_v42 }
0x1778   :  { %28043 = vmatprep.subr.mxu0 %v31791_v13 }
0x180e   :  { %v27960_v1 = vpop.f32.mrf.mxu1 }
0x1810   :  { %v11822_v28 = vpop.f32.mrf.mxu1 }
0x1816   :  { %v27982_v32 = vpop.f32.mrf.mxu1 }
0x1817   :  { %v27949_v62 = vpop.f32.mrf.mxu0 }
0x1818   :  { %v11732_v45 = vadd.f32 %v27949_v62, %v31778_v14  ;;  %v11992_v31 = vpop.f32.mrf.mxu1 }
0x1819   :  { %v11721_v26 = vpop.f32.mrf.mxu0 }
0x181a   :  { %v11722_v54 = vadd.f32 %v31778_v14, %v11721_v26  ;;  %v11829_v59 = vadd.f32 %v27960_v1, %v11732_v45  ;;  %v12766_v45 = vpop.permute.xlu1 %12765 }
0x181c   :  { %v11823_v34 = vadd.f32 %v11822_v28, %v11722_v54 }
0x181f   :  { %v27971_v56 = vpop.f32.mrf.mxu0 }
0x1820   :  { %v11916_v10 = vadd.f32 %v27971_v56, %v11829_v59  ;;  %v28004_v44 = vpop.f32.mrf.mxu1 }
0x1821   :  { %v11908_v60 = vpop.f32.mrf.mxu0 }
0x1822   :  { %v11909_v48 = vadd.f32 %v11908_v60, %v11823_v34  ;;  %v12001_v61 = vadd.f32 %v27982_v32, %v11916_v10  ;;  %v12164_v22 = vpop.f32.mrf.mxu1 }
0x1824   :  { %v11993_v52 = vadd.f32 %v11992_v31, %v11909_v48 }
0x1828   :  { %v27993_v38 = vpop.f32.mrf.mxu0 }
0x1829   :  { %v12090_v53 = vadd.f32 %v27993_v38, %v12001_v61  ;;  %v117_v38 = vld [vmem:[%s34065_s5 + $0x58] sm:$0xff] }
0x182a   :  { %v12083_v27 = vpop.f32.mrf.mxu0 }
0x182b   :  { %v12171_v5 = vadd.f32 %v28004_v44, %v12090_v53  ;;  %v12084_v17 = vadd.f32 %v12083_v27, %v11993_v52  ;;  %v31993_v53 = vand.u32 4294901760, %v117_v38  ;;  %v116_v52 = vld [vmem:[%s34065_s5 + $0x50] sm:$0xff] }
0x182d   :  { %v12175_v14 = vmax.f32 %v12171_v5, 0.0  ;;  %v12165_v4 = vadd.f32 %v12164_v22, %v12084_v17  ;;  %v31999_v27 = vsub.f32 %v117_v38, %v31993_v53  ;;  %v32001_v5 = vand.u32 4294901760, %v116_v52  ;;  %v115_v17 = vld [vmem:[%s34065_s5 + $0x48] sm:$0xff] }
0x182f   :  { %v12181_v50 = vsel %vm12176_vm12, %v12175_v14, 0  ;;  %v12174_v46 = vmax.f32 %v12165_v4, 0.0  ;;  %v32009_v22 = vand.u32 4294901760, %v31999_v27  ;;  %v32012_v14 = vsub.f32 %v116_v52, %v32001_v5 }
0x1830   :  { %v31907_v35 = vand.u32 4294901760, %v12181_v50  ;;  %v32014_v4 = vand.u32 4294901760, %v115_v17 }
0x1831   :  { %v12178_v33 = vsel %vm12176_vm12, %v12174_v46, 0  ;;  %v12941_v46 = vsub.f32 %v31999_v27, %v32009_v22 }
0x1832   :  { %v12267_v20 = vsub.f32 %v12181_v50, %v31907_v35  ;;  %v12256_v29 = vand.u32 4294901760, %v12178_v33  ;;  %v114_v50 = vld [vmem:[%s34065_s5 + $0x40] sm:$0xff] }
0x1834   :  { %v12268_v36 = vand.u32 4294901760, %v12267_v20  ;;  %v12257_v15 = vsub.f32 %v12178_v33, %v12256_v29  ;;  %28040 = vmatprep.mubr.f32.mxu1 %v12256_v29  ;;  %v32027_v33 = vsub.f32 %v115_v17, %v32014_v4 }
0x1835   :  { %28041 = vmatmul.mubr.f32.vlgmr.msra.gmra.mxu1 %v31907_v35 }
0x1836   :  { %28063 = vmatpush3.msra.mxu1 %v31785_v8  ;;  %v12258_v63 = vand.u32 4294901760, %v12257_v15  ;;  %v12269_v19 = vsub.f32 %v12267_v20, %v12268_v36 }
0x1837   :  { %28064 = vmatprep.subr.mxu1 %v31793_v3 }
0x1838   :  { %28065 = vmatpush3.msra.mxu1 %v31793_v3  ;;  %28078 = vmatprep.mubr.f32.mxu1 %v12258_v63  ;;  %v12259_v62 = vsub.f32 %v12257_v15, %v12258_v63  ;;  %v12270_v26 = vand.u32 4294901760, %v12269_v19 }
0x1839   :  { %28066 = vmatprep.subr.mxu1 %v31806_v39 }
0x183a   :  { %28067 = vmatpush3.msra.mxu1 %v31806_v39  ;;  %v12260_v1 = vand.u32 4294901760, %v12259_v62 }
0x183b   :  { %28068 = vmatprep.subr.mxu1 %v31821_v41 }
0x183c   :  { %28069 = vmatpush3.msra.mxu1 %v31821_v41  ;;  %28021 = vmatprep.mubr.f32.mxu0 %v12260_v1 }
0x183d   :  { %28070 = vmatprep.subr.mxu1 %v31837_v0  ;;  %28022 = vmatmul.mubr.f32.vlgmr.msra.gmra.mxu0 %v12270_v26 }
0x183e   :  { %28044 = vmatpush3.msra.mxu0 %v31791_v13  ;;  %28071 = vmatpush3.msra.mxu1 %v31837_v0 }
0x183f   :  { %28045 = vmatprep.subr.mxu0 %v31804_v12  ;;  %28059 = vmatprep.mubr.f32.mxu0 %v12257_v15  ;;  %v32036_v15 = vand.u32 4294901760, %v32027_v33 }
0x1840   :  { %28072 = vmatprep.subr.mxu1 %v31848_v11  ;;  %28046 = vmatpush3.msra.mxu0 %v31804_v12 }
0x1841   :  { %28073 = vmatpush3.msra.mxu1 %v31848_v11  ;;  %28047 = vmatprep.subr.mxu0 %v31819_v55  ;;  %v12955_v62 = vsub.f32 %v32027_v33, %v32036_v15 }
0x1842   :  { %28074 = vmatprep.subr.mxu1 %v31862_v43  ;;  %28048 = vmatpush3.msra.mxu0 %v31819_v55 }
0x1843   :  { %28075 = vmatpush3.msra.mxu1 %v31862_v43  ;;  %28049 = vmatprep.subr.mxu0 %v31834_v25  ;;  %v12956_v26 = vand.u32 4294901760, %v12955_v62 }
0x1844   :  { %28076 = vmatprep.subr.mxu1 %v31878_v42  ;;  %28050 = vmatpush3.msra.mxu0 %v31834_v25 }
0x1845   :  { %28077 = vmatpush3.msra.mxu1 %v31878_v42  ;;  %28051 = vmatprep.subr.mxu0 %v31851_v6 }
0x1846   :  { %28079 = vmatmul.mubr.f32.vlgmr.msra.gmra.mxu1 %v12268_v36  ;;  %28100 = vmatprep.subr.mxu1 %v31785_v8 }
0x1847   :  { %28052 = vmatpush3.msra.mxu0 %v31851_v6  ;;  %28101 = vmatpush3.msra.mxu1 %v31785_v8 }
0x1848   :  { %28116 = vmatprep.mubr.f32.mxu1 %v12256_v29  ;;  %28053 = vmatprep.subr.mxu0 %v31860_v47 }
0x1849   :  { %28102 = vmatprep.subr.mxu1 %v31793_v3  ;;  %28054 = vmatpush3.msra.mxu0 %v31860_v47 }
0x184a   :  { %28103 = vmatpush3.msra.mxu1 %v31793_v3  ;;  %28055 = vmatprep.subr.mxu0 %v31876_v58 }
0x184b   :  { %28104 = vmatprep.subr.mxu1 %v31806_v39  ;;  %28056 = vmatpush3.msra.mxu0 %v31876_v58 }
0x184c   :  { %28105 = vmatpush3.msra.mxu1 %v31806_v39  ;;  %28057 = vmatprep.subr.mxu0 %v31890_v30 }
0x184d   :  { %28106 = vmatprep.subr.mxu1 %v31821_v41  ;;  %28058 = vmatpush3.msra.mxu0 %v31890_v30 }
0x184e   :  { %28107 = vmatpush3.msra.mxu1 %v31821_v41  ;;  %28060 = vmatmul.mubr.f32.vlgmr.msra.gmra.mxu0 %v12267_v20  ;;  %v32029_v20 = vand.u32 4294901760, %v114_v50 }
0x184f   :  { %28081 = vmatprep.subr.mxu0 %v31801_v49  ;;  %28108 = vmatprep.subr.mxu1 %v31837_v0 }
0x1850   :  { %28082 = vmatpush3.msra.mxu0 %v31801_v49  ;;  %28097 = vmatprep.mubr.f32.mxu0 %v12256_v29  ;;  %v12942_v29 = vand.u32 4294901760, %v12941_v46  ;;  %v32039_v63 = vsub.f32 %v114_v50, %v32029_v20 }
0x1851   :  { %28109 = vmatpush3.msra.mxu1 %v31837_v0  ;;  %28083 = vmatprep.subr.mxu0 %v31816_v24 }
0x1852   :  { %28110 = vmatprep.subr.mxu1 %v31848_v11  ;;  %28084 = vmatpush3.msra.mxu0 %v31816_v24  ;;  %v32046_v1 = vand.u32 4294901760, %v32039_v63 }
0x1853   :  { %28111 = vmatpush3.msra.mxu1 %v31848_v11  ;;  %28085 = vmatprep.subr.mxu0 %v31831_v9 }
0x1854   :  { %28112 = vmatprep.subr.mxu1 %v31862_v43  ;;  %28086 = vmatpush3.msra.mxu0 %v31831_v9 }
0x1855   :  { %28113 = vmatpush3.msra.mxu1 %v31862_v43  ;;  %28087 = vmatprep.subr.mxu0 %v31846_v18 }
0x1856   :  { %28114 = vmatprep.subr.mxu1 %v31878_v42  ;;  %28088 = vmatpush3.msra.mxu0 %v31846_v18 }
0x1857   :  { %28115 = vmatpush3.msra.mxu1 %v31878_v42  ;;  %28089 = vmatprep.subr.mxu0 %v31866_v16 }
0x1858   :  { %28117 = vmatmul.mubr.f32.vlgmr.msra.gmra.mxu1 %v31907_v35  ;;  %28090 = vmatpush3.msra.mxu0 %v31866_v16 }
0x1859   :  { %28091 = vmatprep.subr.mxu0 %v31873_v7  ;;  %28130 = vmatprep.subr.mxu1 %v12942_v29 }
0x185a   :  { %28092 = vmatpush3.msra.mxu0 %v31873_v7  ;;  %28131 = vmatpush3.msra.mxu1 %v12942_v29 }
0x185b   :  { %28093 = vmatprep.subr.mxu0 %v31887_v40 }
0x185c   :  { %28094 = vmatpush3.msra.mxu0 %v31887_v40 }
0x185d   :  { %28095 = vmatprep.subr.mxu0 %v31897_v2 }
0x185e   :  { %28096 = vmatpush3.msra.mxu0 %v31897_v2 }
0x185f   :  { %28098 = vmatmul.mubr.f32.vlgmr.msra.gmra.mxu0 %v31907_v35  ;;  %28119 = vmatprep.subr.mxu0 %v31993_v53  ;;  %v32024_v35 = vand.u32 4294901760, %v32012_v14 }
0x1860   :  { %28120 = vmatpush3.msra.mxu0 %v31993_v53 }
0x1861   :  { %28121 = vmatprep.subr.mxu0 %v32001_v5  ;;  %v12948_v36 = vsub.f32 %v32012_v14, %v32024_v35 }
0x1862   :  { %28122 = vmatpush3.msra.mxu0 %v32001_v5 }
0x1863   :  { %28123 = vmatprep.subr.mxu0 %v32014_v4  ;;  %v12949_v19 = vand.u32 4294901760, %v12948_v36 }
0x1864   :  { %28124 = vmatpush3.msra.mxu0 %v32014_v4 }
0x1865   :  { %28125 = vmatprep.subr.mxu0 %v32029_v20  ;;  %28132 = vmatprep.subr.mxu1 %v12949_v19 }
0x1866   :  { %28126 = vmatpush3.msra.mxu0 %v32029_v20  ;;  %28133 = vmatpush3.msra.mxu1 %v12949_v19 }
0x1867   :  { %28141 = vmatprep.subr.mxu0 %v31999_v27  ;;  %28134 = vmatprep.subr.mxu1 %v12956_v26 }
0x1868   :  { %28135 = vmatpush3.msra.mxu1 %v12956_v26 }
0x18f5   :  { %v28042_v13 = vpop.f32.mrf.mxu1 }
0x18f7   :  { %v12383_v12 = vpop.f32.mrf.mxu1 }
0x18fd   :  { %v28023_v8 = vpop.f32.mrf.mxu0 }
0x18fe   :  { %v12390_v39 = vadd.f32 %v28042_v13, %v28023_v8  ;;  %v12962_v8 = vsub.f32 %v32039_v63, %v32046_v1 }
0x18ff   :  { %v12262_v3 = vpop.f32.mrf.mxu0 }
0x1900   :  { %v12384_v41 = vadd.f32 %v12383_v12, %v12262_v3  ;;  %v12963_v13 = vand.u32 4294901760, %v12962_v8 }
0x1902   :  { %28136 = vmatprep.subr.mxu1 %v12963_v13 }
0x1903   :  { %28137 = vmatpush3.msra.mxu1 %v12963_v13 }
0x1904   :  { %28152 = vmatprep.subr.mxu1 %v31993_v53 }
0x1906   :  { %v28080_v24 = vpop.f32.mrf.mxu1 }
0x1908   :  { %v12565_v0 = vpop.f32.mrf.mxu1 }
0x190e   :  { %v28061_v49 = vpop.f32.mrf.mxu0 }
0x190f   :  { %v12485_v9 = vadd.f32 %v28061_v49, %v12390_v39 }
0x1910   :  { %v12477_v55 = vpop.f32.mrf.mxu0 }
0x1911   :  { %v12478_v25 = vadd.f32 %v12477_v55, %v12384_v41  ;;  %v12574_v18 = vadd.f32 %v28080_v24, %v12485_v9  ;;  %v25368_v9 = vld [vmem:[%s34067_s7 + $0x6] ss:$0 sm:$0xff] }
0x1913   :  { %v12566_v43 = vadd.f32 %v12565_v0, %v12478_v25  ;;  %v25369_v0 = vld [vmem:[%s34067_s7 + $0x7] ss:$0 sm:$0xff] }
0x1918   :  { %v28118_v11 = vpop.f32.mrf.mxu1 }
0x191a   :  { %v12753_v42 = vpop.f32.mrf.mxu1 }
0x191f   :  { %v28099_v6 = vpop.f32.mrf.mxu0 }
0x1920   :  { %v12675_v47 = vadd.f32 %v28099_v6, %v12574_v18 }
0x1921   :  { %v12668_v16 = vpop.f32.mrf.mxu0 }
0x1922   :  { %v12760_v7 = vadd.f32 %v28118_v11, %v12675_v47  ;;  %v12669_v58 = vadd.f32 %v12668_v16, %v12566_v43 }
0x1924   :  { %v12754_v40 = vadd.f32 %v12753_v42, %v12669_v58  ;;  %v12764_v2 = vadd.f32 %v12760_v7, %v31658_v51 }
0x1926   :  { %v12763_v30 = vadd.f32 %v12754_v40, %v31660_v57  ;;  %v31980_v56 = vadd.f32 %v12766_v45, %v12764_v2 }
0x1928   :  { %v31978_v54 = vadd.f32 %v12766_v45, %v12763_v30  ;;  %v12773_v59 = vsel %vm164_vm0, %v31980_v56, 0.0 }
0x192a   :  { %v12770_v28 = vsel %vm164_vm0, %v31978_v54, 0.0 }
0x192b   :  { %12771 = vadd.xlane.f32.xlu0 %v12770_v28 }
0x192f   :  { %12774 = vadd.xlane.f32.xlu0 %v12773_v59 }
0x19b4   :  { %v12772_v32 = vpop.xlane.xlu0 %12771 }
0x19b5   :  { %v12776_v60 = vmul.f32 0.03125, %v12772_v32 }
0x19b7   :  { %v12778_v10 = vsub.f32 %v31978_v54, %v12776_v60 }
0x19b8   :  { %v12775_v57 = vpop.xlane.xlu0 %12774 }
0x19b9   :  { %v12777_v34 = vmul.f32 0.03125, %v12775_v57  ;;  %v12780_v51 = vmul.f32 %v12778_v10, %v12778_v10 }
0x19bb   :  { %v12779_v48 = vsub.f32 %v31980_v56, %v12777_v34  ;;  %v12782_v31 = vsel %vm164_vm0, %v12780_v51, 0.0  ;;  %v25370_v34 = vld [vmem:[%s34066_s6 + $0x2] ss:$0 sm:$0xff] }
0x19bc   :  { %12783 = vadd.xlane.f32.xlu0 %v12782_v31 }
0x19bd   :  { %v12781_v61 = vmul.f32 %v12779_v48, %v12779_v48 }
0x19bf   :  { %v12785_v44 = vsel %vm164_vm0, %v12781_v61, 0.0 }
0x19c0   :  { %12786 = vadd.xlane.f32.xlu0 %v12785_v44 }
0x1a45   :  { %v12784_v3 = vpop.xlane.xlu0 %12783 }
0x1a46   :  { %v12788_v49 = vmul.f32 0.03125, %v12784_v3 }
0x1a48   :  { %v12790_v12 = vadd.f32 1e-05, %v12788_v49 }
0x1a49   :  { %v12787_v39 = vpop.xlane.xlu0 %12786 }
0x1a4a   :  { %29523 = vrsqrt.f32 %v12790_v12  ;;  %v12789_v24 = vmul.f32 0.03125, %v12787_v39 }
0x1a4c   :  { %v12791_v55 = vadd.f32 1e-05, %v12789_v24 }
0x1a4e   :  { %29525 = vrsqrt.f32 %v12791_v55 }
0x1a57   :  { %v29524_v41 = vpop.eup %29523 }
0x1a58   :  { %v12794_v25 = vmul.f32 %v29524_v41, %v12778_v10 }
0x1a5a   :  { %v12802_v18 = vmul.f32 %v25368_v9, %v12794_v25 }
0x1a5b   :  { %v29526_v11 = vpop.eup %29525 }
0x1a5c   :  { %v12795_v6 = vmul.f32 %v29526_v11, %v12779_v48  ;;  %v12810_v47 = vadd.f32 %v25369_v0, %v12802_v18 }
0x1a5e   :  { %v12803_v43 = vmul.f32 %v25368_v9, %v12795_v6  ;;  %v12819_v16 = vsel %vm164_vm0, %v12810_v47, 0 }
0x1a5f   :  { %v12893_v7 = vand.u32 4294901760, %v12819_v16 }
0x1a60   :  { %v12811_v58 = vadd.f32 %v25369_v0, %v12803_v43 }
0x1a61   :  { %28138 = vmatprep.mubr.f32.mxu1 %v12893_v7  ;;  %v12894_v42 = vsub.f32 %v12819_v16, %v12893_v7 }
0x1a62   :  { %v12822_v40 = vsel %vm164_vm0, %v12811_v58, 0 }
0x1a63   :  { %v12903_v30 = vand.u32 4294901760, %v12822_v40  ;;  %v12895_v2 = vand.u32 4294901760, %v12894_v42 }
0x1a65   :  { %v12904_v45 = vsub.f32 %v12822_v40, %v12903_v30  ;;  %28139 = vmatmul.mubr.f32.vlgmr.msra.gmra.mxu1 %v12903_v30  ;;  %v12896_v28 = vsub.f32 %v12894_v42, %v12895_v2 }
0x1a66   :  { %28153 = vmatpush3.msra.mxu1 %v31993_v53  ;;  %28160 = vmatprep.mubr.f32.mxu1 %v12895_v2 }
0x1a67   :  { %28154 = vmatprep.subr.mxu1 %v32001_v5  ;;  %v12897_v59 = vand.u32 4294901760, %v12896_v28  ;;  %v12905_v32 = vand.u32 4294901760, %v12904_v45 }
0x1a68   :  { %28155 = vmatpush3.msra.mxu1 %v32001_v5 }
0x1a69   :  { %28156 = vmatprep.subr.mxu1 %v32014_v4  ;;  %28127 = vmatprep.mubr.f32.mxu0 %v12897_v59  ;;  %v12906_v60 = vsub.f32 %v12904_v45, %v12905_v32 }
0x1a6a   :  { %28157 = vmatpush3.msra.mxu1 %v32014_v4 }
0x1a6b   :  { %28158 = vmatprep.subr.mxu1 %v32029_v20  ;;  %v12907_v10 = vand.u32 4294901760, %v12906_v60 }
0x1a6c   :  { %28159 = vmatpush3.msra.mxu1 %v32029_v20 }
0x1a6d   :  { %28161 = vmatmul.mubr.f32.vlgmr.msra.gmra.mxu1 %v12905_v32  ;;  %28174 = vmatprep.subr.mxu1 %v31993_v53 }
0x1a6e   :  { %28128 = vmatmul.mubr.f32.vlgmr.msra.gmra.mxu0 %v12907_v10  ;;  %28175 = vmatpush3.msra.mxu1 %v31993_v53 }
0x1a6f   :  { %28142 = vmatpush3.msra.mxu0 %v31999_v27  ;;  %28182 = vmatprep.mubr.f32.mxu1 %v12893_v7 }
0x1a70   :  { %28143 = vmatprep.subr.mxu0 %v32012_v14  ;;  %28149 = vmatprep.mubr.f32.mxu0 %v12894_v42 }
0x1a71   :  { %28176 = vmatprep.subr.mxu1 %v32001_v5  ;;  %28144 = vmatpush3.msra.mxu0 %v32012_v14 }
0x1a72   :  { %28177 = vmatpush3.msra.mxu1 %v32001_v5  ;;  %28145 = vmatprep.subr.mxu0 %v32027_v33 }
0x1a73   :  { %28178 = vmatprep.subr.mxu1 %v32014_v4  ;;  %28146 = vmatpush3.msra.mxu0 %v32027_v33 }
0x1a74   :  { %28179 = vmatpush3.msra.mxu1 %v32014_v4  ;;  %28147 = vmatprep.subr.mxu0 %v32039_v63 }
0x1a75   :  { %28180 = vmatprep.subr.mxu1 %v32029_v20  ;;  %28148 = vmatpush3.msra.mxu0 %v32039_v63 }
0x1a76   :  { %28181 = vmatpush3.msra.mxu1 %v32029_v20  ;;  %28150 = vmatmul.mubr.f32.vlgmr.msra.gmra.mxu0 %v12904_v45 }
0x1a77   :  { %28163 = vmatprep.subr.mxu0 %v32009_v22  ;;  %28183 = vmatmul.mubr.f32.vlgmr.msra.gmra.mxu1 %v12903_v30 }
0x1a78   :  { %28164 = vmatpush3.msra.mxu0 %v32009_v22  ;;  %28171 = vmatprep.mubr.f32.mxu0 %v12893_v7 }
0x1a79   :  { %28165 = vmatprep.subr.mxu0 %v32024_v35 }
0x1a7a   :  { %28166 = vmatpush3.msra.mxu0 %v32024_v35 }
0x1a7b   :  { %28167 = vmatprep.subr.mxu0 %v32036_v15 }
0x1a7c   :  { %28168 = vmatpush3.msra.mxu0 %v32036_v15 }
0x1a7d   :  { %28169 = vmatprep.subr.mxu0 %v32046_v1 }
0x1a7e   :  { %28170 = vmatpush3.msra.mxu0 %v32046_v1 }
0x1a7f   :  { %28172 = vmatmul.mubr.f32.vlgmr.msra.gmra.mxu0 %v12903_v30 }
0x1b25   :  { %v28140_v51 = vpop.f32.mrf.mxu1 }
0x1b27   :  { %v13000_v38 = vpop.f32.mrf.mxu1 }
0x1b2d   :  { %v28162_v52 = vpop.f32.mrf.mxu1 }
0x1b2e   :  { %v28129_v57 = vpop.f32.mrf.mxu0 }
0x1b2f   :  { %v12910_v31 = vadd.f32 %v28129_v57, %v25370_v34  ;;  %v13170_v14 = vpop.f32.mrf.mxu1 }
0x1b30   :  { %v12899_v48 = vpop.f32.mrf.mxu0 }
0x1b31   :  { %v12900_v61 = vadd.f32 %v25370_v34, %v12899_v48  ;;  %v13007_v53 = vadd.f32 %v28140_v51, %v12910_v31 }
0x1b33   :  { %v13001_v17 = vadd.f32 %v13000_v38, %v12900_v61 }
0x1b36   :  { %v28151_v44 = vpop.f32.mrf.mxu0 }
0x1b37   :  { %v13094_v5 = vadd.f32 %v28151_v44, %v13007_v53  ;;  %v28184_v50 = vpop.f32.mrf.mxu1 }
0x1b38   :  { %v13086_v27 = vpop.f32.mrf.mxu0 }
0x1b39   :  { %v13087_v22 = vadd.f32 %v13086_v27, %v13001_v17  ;;  %v13179_v4 = vadd.f32 %v28162_v52, %v13094_v5  ;;  %v13342_v15 = vpop.f32.mrf.mxu1 }
0x1b3b   :  { %v13171_v33 = vadd.f32 %v13170_v14, %v13087_v22 }
0x1b3f   :  { %v28173_v46 = vpop.f32.mrf.mxu0 }
0x1b40   :  { %v13268_v35 = vadd.f32 %v28173_v46, %v13179_v4 }
0x1b41   :  { %v13261_v20 = vpop.f32.mrf.mxu0 }
0x1b42   :  { %v32093_v29 = vadd.f32 %v28184_v50, %v13268_v35  ;;  %v13262_v36 = vadd.f32 %v13261_v20, %v13171_v33 }
0x1b44   :  { %v32095_v63 = vadd.f32 %v13342_v15, %v13262_v36  ;;  %13358 = vrot.lane.b32.xlu1 %v32093_v29, %s29643_s16  ;;  %v13353_v12 = vsel %vm749_vm1, %v32093_v29, 0.0  ;;  %v13907_v10 = vsel %vm29892_vm4, %v32093_v29, 0.0 }
0x1b45   :  { %v13364_v39 = vsel %vm164_vm0, %v13353_v12, 0  ;;  %v13912_v57 = vsel %vm164_vm0, %v13907_v10, 0 }
0x1b46   :  { %13356 = vrot.lane.b32.xlu0 %v32095_v63, %s29643_s16  ;;  %v13352_v62 = vsel %vm749_vm1, %v32095_v63, 0.0  ;;  %v32113_v24 = vand.u32 4294901760, %v13364_v39  ;;  %v13906_v42 = vsel %vm29892_vm4, %v32095_v63, 0.0  ;;  %v13991_v51 = vand.u32 4294901760, %v13912_v57 }
0x1b47   :  { %v13361_v1 = vsel %vm164_vm0, %v13352_v62, 0  ;;  %v13909_v59 = vsel %vm164_vm0, %v13906_v42, 0 }
0x1b48   :  { %v32105_v26 = vand.u32 4294901760, %v13361_v1  ;;  %v13448_v55 = vsub.f32 %v13364_v39, %v32113_v24  ;;  %v32154_v60 = vand.u32 4294901760, %v13909_v59  ;;  %v13992_v31 = vsub.f32 %v13912_v57, %v13991_v51 }
0x1b4a   :  { %28196 = vmatprep.mubr.f32.mxu1 %v32105_v26  ;;  %v13438_v8 = vsub.f32 %v13361_v1, %v32105_v26  ;;  %v13449_v18 = vand.u32 4294901760, %v13448_v55  ;;  %v13982_v34 = vsub.f32 %v13909_v59, %v32154_v60  ;;  %v13993_v44 = vand.u32 4294901760, %v13992_v31 }
0x1b4c   :  { %v13439_v13 = vand.u32 4294901760, %v13438_v8  ;;  %v13450_v7 = vsub.f32 %v13448_v55, %v13449_v18  ;;  %v13983_v48 = vand.u32 4294901760, %v13982_v34  ;;  %v13994_v53 = vsub.f32 %v13992_v31, %v13993_v44 }
0x1b4e   :  { %v13440_v3 = vsub.f32 %v13438_v8, %v13439_v13  ;;  %v13451_v2 = vand.u32 4294901760, %v13450_v7  ;;  %v13984_v61 = vsub.f32 %v13982_v34, %v13983_v48  ;;  %v13995_v52 = vand.u32 4294901760, %v13994_v53 }
0x1b50   :  { %v13441_v49 = vand.u32 4294901760, %v13440_v3  ;;  %v13985_v38 = vand.u32 4294901760, %v13984_v61 }
0x1b52   :  { %28189 = vmatprep.mubr.f32.mxu0 %v13441_v49 }
0x1bb6   :  { %v13359_v41 = vpop.permute.xlu1 %13358 }
0x1bb7   :  { %v13368_v9 = vsel %vm164_vm0, %v13359_v41, 0 }
0x1bb8   :  { %v32117_v25 = vand.u32 4294901760, %v13368_v9  ;;  %v13357_v0 = vpop.permute.xlu0 %13356 }
0x1bb9   :  { %v13366_v11 = vsel %vm164_vm0, %v13357_v0, 0 }
0x1bba   :  { %v32121_v6 = vsub.f32 %v13368_v9, %v32117_v25  ;;  %v32123_v47 = vand.u32 4294901760, %v13366_v11  ;;  %28185 = vmatprep.subr.mxu0 %v32117_v25 }
0x1bbb   :  { %28186 = vmatpush3.xpose.msra.mxu0 %v32117_v25 }
0x1bbc   :  { %v32128_v43 = vand.u32 4294901760, %v32121_v6  ;;  %v32131_v16 = vsub.f32 %v13366_v11, %v32123_v47  ;;  %28187 = vmatprep.subr.mxu0 %v32123_v47 }
0x1bbe   :  { %v32138_v40 = vand.u32 4294901760, %v32131_v16  ;;  %v13489_v30 = vsub.f32 %v32121_v6, %v32128_v43 }
0x1bbf   :  { %28188 = vmatpush3.xpose.msra.mxu0 %v32123_v47 }
0x1bc0   :  { %28199 = vmatprep.subr.mxu0 %v32121_v6  ;;  %v32144_v45 = vand.u32 4294901760, %v13489_v30  ;;  %v13496_v28 = vsub.f32 %v32131_v16, %v32138_v40 }
0x1bc2   :  { %28190 = vmatmul.mubr.f32.vlgmr.msra.gmra.mxu0 %v13451_v2  ;;  %28192 = vmatprep.subr.mxu1 %v32144_v45  ;;  %v32150_v32 = vand.u32 4294901760, %v13496_v28 }
0x1bc3   :  { %28193 = vmatpush3.xpose.msra.mxu1 %v32144_v45  ;;  %28200 = vmatpush3.xpose.msra.mxu0 %v32121_v6 }
0x1bc4   :  { %28203 = vmatprep.mubr.f32.mxu0 %v13438_v8  ;;  %28194 = vmatprep.subr.mxu1 %v32150_v32 }
0x1bc5   :  { %28201 = vmatprep.subr.mxu0 %v32131_v16 }
0x1bc7   :  { %28195 = vmatpush3.xpose.msra.mxu1 %v32150_v32  ;;  %28202 = vmatpush3.xpose.msra.mxu0 %v32131_v16 }
0x1bc8   :  { %28206 = vmatprep.subr.mxu1 %v32117_v25  ;;  %28213 = vmatprep.subr.mxu0 %v32128_v43 }
0x1bca   :  { %28197 = vmatmul.mubr.f32.vlgmr.msra.gmra.mxu1 %v32113_v24  ;;  %28204 = vmatmul.mubr.f32.vlgmr.msra.gmra.mxu0 %v13448_v55 }
0x1bcb   :  { %28207 = vmatpush3.xpose.msra.mxu1 %v32117_v25  ;;  %28210 = vmatprep.mubr.f32.mxu1 %v13439_v13 }
0x1bcc   :  { %28214 = vmatpush3.xpose.msra.mxu0 %v32128_v43  ;;  %28217 = vmatprep.mubr.f32.mxu0 %v32105_v26 }
0x1bcd   :  { %28208 = vmatprep.subr.mxu1 %v32123_v47  ;;  %28215 = vmatprep.subr.mxu0 %v32138_v40 }
0x1bcf   :  { %28209 = vmatpush3.xpose.msra.mxu1 %v32123_v47 }
0x1bd0   :  { %28216 = vmatpush3.xpose.msra.mxu0 %v32138_v40  ;;  %28220 = vmatprep.subr.mxu1 %v32117_v25 }
0x1bd1   :  { %28227 = vmatprep.subr.mxu0 %v32117_v25 }
0x1bd2   :  { %28211 = vmatmul.mubr.f32.vlgmr.msra.gmra.mxu1 %v13449_v18 }
0x1bd3   :  { %28218 = vmatmul.mubr.f32.vlgmr.msra.gmra.mxu0 %v32113_v24  ;;  %28221 = vmatpush3.xpose.msra.mxu1 %v32117_v25 }
0x1bd4   :  { %28224 = vmatprep.mubr.f32.mxu1 %v32105_v26  ;;  %28228 = vmatpush3.xpose.msra.mxu0 %v32117_v25 }
0x1bd5   :  { %28231 = vmatprep.mubr.f32.mxu0 %v13985_v38  ;;  %28222 = vmatprep.subr.mxu1 %v32123_v47 }
0x1bd6   :  { %28229 = vmatprep.subr.mxu0 %v32123_v47 }
0x1bd7   :  { %28223 = vmatpush3.xpose.msra.mxu1 %v32123_v47 }
0x1bd8   :  { %28230 = vmatpush3.xpose.msra.mxu0 %v32123_v47  ;;  %28234 = vmatprep.subr.mxu1 %v32144_v45 }
0x1bd9   :  { %28241 = vmatprep.subr.mxu0 %v32121_v6 }
0x1bda   :  { %28225 = vmatmul.mubr.f32.vlgmr.msra.gmra.mxu1 %v32113_v24 }
0x1bdb   :  { %28232 = vmatmul.mubr.f32.vlgmr.msra.gmra.mxu0 %v13995_v52  ;;  %28235 = vmatpush3.xpose.msra.mxu1 %v32144_v45 }
0x1bdc   :  { %28238 = vmatprep.mubr.f32.mxu1 %v32154_v60  ;;  %28242 = vmatpush3.xpose.msra.mxu0 %v32121_v6 }
0x1bdd   :  { %28245 = vmatprep.mubr.f32.mxu0 %v13982_v34  ;;  %28236 = vmatprep.subr.mxu1 %v32150_v32 }
0x1bde   :  { %28243 = vmatprep.subr.mxu0 %v32131_v16 }
0x1bdf   :  { %28237 = vmatpush3.xpose.msra.mxu1 %v32150_v32 }
0x1be0   :  { %28244 = vmatpush3.xpose.msra.mxu0 %v32131_v16  ;;  %28248 = vmatprep.subr.mxu1 %v32117_v25 }
0x1be1   :  { %28255 = vmatprep.subr.mxu0 %v32128_v43 }
0x1be2   :  { %28239 = vmatmul.mubr.f32.vlgmr.msra.gmra.mxu1 %v13991_v51 }
0x1be3   :  { %28246 = vmatmul.mubr.f32.vlgmr.msra.gmra.mxu0 %v13992_v31  ;;  %28249 = vmatpush3.xpose.msra.mxu1 %v32117_v25 }
0x1be4   :  { %28252 = vmatprep.mubr.f32.mxu1 %v13983_v48  ;;  %28256 = vmatpush3.xpose.msra.mxu0 %v32128_v43 }
0x1be5   :  { %28259 = vmatprep.mubr.f32.mxu0 %v32154_v60  ;;  %28250 = vmatprep.subr.mxu1 %v32123_v47 }
0x1be6   :  { %28257 = vmatprep.subr.mxu0 %v32138_v40 }
0x1be7   :  { %28251 = vmatpush3.xpose.msra.mxu1 %v32123_v47 }
0x1be8   :  { %28258 = vmatpush3.xpose.msra.mxu0 %v32138_v40  ;;  %28262 = vmatprep.subr.mxu1 %v32117_v25 }
0x1bea   :  { %28253 = vmatmul.mubr.f32.vlgmr.msra.gmra.mxu1 %v13993_v44 }
0x1beb   :  { %28260 = vmatmul.mubr.f32.vlgmr.msra.gmra.mxu0 %v13991_v51  ;;  %28263 = vmatpush3.xpose.msra.mxu1 %v32117_v25 }
0x1bec   :  { %28266 = vmatprep.mubr.f32.mxu1 %v32154_v60  ;;  %28264 = vmatprep.subr.mxu1 %v32123_v47 }
0x1bef   :  { %28265 = vmatpush3.xpose.msra.mxu1 %v32123_v47 }
0x1bf2   :  { %28267 = vmatmul.mubr.f32.vlgmr.msra.gmra.mxu1 %v13991_v51 }
0x1c82   :  { %v28191_v27 = vpop.f32.mrf.mxu0 }
0x1c84   :  { %v13443_v17 = vpop.f32.mrf.mxu0 }
0x1c8a   :  { %v28198_v5 = vpop.f32.mrf.mxu1  ;;  %v28205_v14 = vpop.f32.mrf.mxu0 }
0x1c8b   :  { %v13541_v39 = vadd.f32 %v28198_v5, %v28191_v27 }
0x1c8c   :  { %v13534_v22 = vpop.f32.mrf.mxu1  ;;  %v13616_v50 = vpop.f32.mrf.mxu0 }
0x1c8d   :  { %v13535_v8 = vadd.f32 %v13534_v22, %v13443_v17  ;;  %v13624_v42 = vadd.f32 %v28205_v14, %v13541_v39  ;;  %v29611_v22 = vld [vmem:[%s34065_s5 + $0x50] sm:$0xff] }
0x1c8f   :  { %v13617_v24 = vadd.f32 %v13616_v50, %v13535_v8 }
0x1c92   :  { %v28212_v4 = vpop.f32.mrf.mxu1 }
0x1c93   :  { %v28219_v35 = vpop.f32.mrf.mxu0  ;;  %v13707_v2 = vadd.f32 %v28212_v4, %v13624_v42 }
0x1c94   :  { %v13698_v46 = vpop.f32.mrf.mxu1 }
0x1c95   :  { %v13783_v20 = vpop.f32.mrf.mxu0  ;;  %v13699_v0 = vadd.f32 %v13698_v46, %v13617_v24  ;;  %v13790_v31 = vadd.f32 %v28219_v35, %v13707_v2 }
0x1c97   :  { %v13784_v28 = vadd.f32 %v13783_v20, %v13699_v0 }
0x1c9a   :  { %v28226_v33 = vpop.f32.mrf.mxu1 }
0x1c9b   :  { %v28233_v15 = vpop.f32.mrf.mxu0  ;;  %v13869_v38 = vadd.f32 %v28226_v33, %v13790_v31 }
0x1c9c   :  { %v13862_v36 = vpop.f32.mrf.mxu1 }
0x1c9d   :  { %v13987_v1 = vpop.f32.mrf.mxu0  ;;  %v13863_v57 = vadd.f32 %v13862_v36, %v13784_v28  ;;  %v13873_v50 = vmul.f32 0.35355338, %v13869_v38 }
0x1c9f   :  { %v13872_v53 = vmul.f32 0.35355338, %v13863_v57  ;;  %v13875_v33 = vsel %vm29995_vm7, %v13873_v50, -1e+09 }
0x1ca0   :  { %v13879_v20 = vsel %vm1277_vm9, %v13875_v33, -inf }
0x1ca1   :  { %v13874_v46 = vsel %vm29991_vm6, %v13872_v53, -1e+09 }
0x1ca2   :  { %v28240_v62 = vpop.f32.mrf.mxu1  ;;  %v13876_v35 = vsel %vm1277_vm9, %v13874_v46, -inf }
0x1ca3   :  { %v14085_v13 = vadd.f32 %v28240_v62, %v28233_v15  ;;  %v28247_v3 = vpop.f32.mrf.mxu0 }
0x1ca4   :  { %v14078_v26 = vpop.f32.mrf.mxu1 }
0x1ca5   :  { %v14079_v49 = vadd.f32 %v14078_v26, %v13987_v1  ;;  %v14168_v55 = vadd.f32 %v28247_v3, %v14085_v13  ;;  %v14160_v41 = vpop.f32.mrf.mxu0 }
0x1ca7   :  { %v14161_v18 = vadd.f32 %v14160_v41, %v14079_v49 }
0x1caa   :  { %v28254_v12 = vpop.f32.mrf.mxu1 }
0x1cab   :  { %v14251_v11 = vadd.f32 %v28254_v12, %v14168_v55  ;;  %v28261_v7 = vpop.f32.mrf.mxu0 }
0x1cac   :  { %v14242_v9 = vpop.f32.mrf.mxu1 }
0x1cad   :  { %v14243_v30 = vadd.f32 %v14242_v9, %v14161_v18  ;;  %v14334_v59 = vadd.f32 %v28261_v7, %v14251_v11  ;;  %v14327_v60 = vpop.f32.mrf.mxu0 }
0x1caf   :  { %v14328_v34 = vadd.f32 %v14327_v60, %v14243_v30 }
0x1cb2   :  { %v28268_v10 = vpop.f32.mrf.mxu1 }
0x1cb3   :  { %v14413_v51 = vadd.f32 %v28268_v10, %v14334_v59 }
0x1cb4   :  { %v14406_v48 = vpop.f32.mrf.mxu1 }
0x1cb5   :  { %v14417_v61 = vmul.f32 0.35355338, %v14413_v51  ;;  %v14407_v44 = vadd.f32 %v14406_v48, %v14328_v34 }
0x1cb7   :  { %v14416_v52 = vmul.f32 0.35355338, %v14407_v44  ;;  %v14419_v5 = vsel %vm29995_vm7, %v14417_v61, -1e+09 }
0x1cb8   :  { %v14423_v17 = vsel %vm1277_vm9, %v14419_v5, -inf }
0x1cb9   :  { %14424 = vmax.xlane.f32.xlu0 %v14423_v17  ;;  %v14418_v14 = vsel %vm29991_vm6, %v14416_v52, -1e+09 }
0x1cba   :  { %v14420_v4 = vsel %vm1277_vm9, %v14418_v14, -inf }
0x1cbb   :  { %14421 = vmax.xlane.f32.xlu1 %v14420_v4 }
0x1cbf   :  { %13877 = vmax.xlane.f32.xlu1 %v13876_v35 }
0x1cc3   :  { %13880 = vmax.xlane.f32.xlu1 %v13879_v20 }
0x1d42   :  { %v14425_v15 = vpop.xlane.xlu0 %14424 }
0x1d43   :  { %v14427_v26 = vsub.f32 %v14419_v5, %v14425_v15 }
0x1d44   :  { %v14422_v36 = vpop.xlane.xlu1 %14421 }
0x1d45   :  { %v14430_v49 = vmul.f32 1.442695, %v14427_v26  ;;  %v14426_v12 = vsub.f32 %v14418_v14, %v14422_v36 }
0x1d47   :  { %v14428_v24 = vmul.f32 1.442695, %v14426_v12 }
0x1d48   :  { %v13878_v62 = vpop.xlane.xlu1 %13877 }
0x1d49   :  { %v13882_v1 = vsub.f32 %v13874_v46, %v13878_v62 }
0x1d4b   :  { %v13884_v8 = vmul.f32 1.442695, %v13882_v1 }
0x1d4c   :  { %v13881_v13 = vpop.xlane.xlu1 %13880 }
0x1d4d   :  { %29527 = vpow2.f32 %v13884_v8  ;;  %v13883_v3 = vsub.f32 %v13875_v33, %v13881_v13 }
0x1d4f   :  { %v13886_v39 = vmul.f32 1.442695, %v13883_v3 }
0x1d51   :  { %29529 = vpow2.f32 %v13886_v39 }
0x1d52   :  { %29531 = vpow2.f32 %v14430_v49 }
0x1d53   :  { %29533 = vpow2.f32 %v14428_v24 }
0x1d5a   :  { %v32221_v55 = vpop.eup %29527 }
0x1d5b   :  { %v13888_v41 = vsel %vm1277_vm9, %v32221_v55, 0.0 }
0x1d5c   :  { %13889 = vadd.xlane.f32.xlu0 %v13888_v41 }
0x1d5e   :  { %v32225_v9 = vpop.eup %29529 }
0x1d5f   :  { %v13891_v0 = vsel %vm1277_vm9, %v32225_v9, 0.0  ;;  %v29532_v18 = vpop.eup %29531 }
0x1d60   :  { %13892 = vadd.xlane.f32.xlu1 %v13891_v0  ;;  %v14435_v11 = vsel %vm1277_vm9, %v29532_v18, 0.0  ;;  %v29534_v7 = vpop.eup %29533 }
0x1d61   :  { %v14432_v42 = vsel %vm1277_vm9, %v29534_v7, 0.0 }
0x1d64   :  { %14436 = vadd.xlane.f32.xlu1 %v14435_v11 }
0x1d68   :  { %14433 = vadd.xlane.f32.xlu1 %v14432_v42 }
0x1d72   :  { %13900 = vrot.lane.b32.xlu0 %v32093_v29, %s29646_s3 }
0x1d79   :  { %13898 = vrot.lane.b32.xlu1 %v32095_v63, %s29646_s3 }
0x1de5   :  { %v13890_v30 = vpop.xlane.xlu0 %13889 }
0x1de9   :  { %v32235_v2 = vpop.permute.xlu0 %13900  ;;  %v13893_v28 = vpop.xlane.xlu1 %13892 }
0x1dea   :  { %v14443_v59 = vsel %vm29892_vm4, %v32235_v2, 0.0  ;;  %v13905_v53 = vsel %vm749_vm1, %v32235_v2, 0.0 }
0x1deb   :  { %v32240_v60 = vand.u32 4294901760, %v14443_v59  ;;  %v32266_v14 = vand.u32 4294901760, %v13905_v53 }
0x1ded   :  { %v32243_v10 = vsub.f32 %v14443_v59, %v32240_v60  ;;  %28269 = vmatprep.subr.mxu0 %v32240_v60  ;;  %v14437_v57 = vpop.xlane.xlu1 %14436  ;;  %v32279_v62 = vsub.f32 %v13905_v53, %v32266_v14 }
0x1dee   :  { %29535 = vrcp.f32 %v14437_v57  ;;  %28270 = vmatpush3.msra.mxu0 %v32240_v60 }
0x1def   :  { %v32248_v34 = vand.u32 4294901760, %v32243_v10  ;;  %v32288_v24 = vand.u32 4294901760, %v32279_v62 }
0x1df1   :  { %v14434_v51 = vpop.xlane.xlu1 %14433  ;;  %v14569_v48 = vsub.f32 %v32243_v10, %v32248_v34  ;;  %v15077_v42 = vsub.f32 %v32279_v62, %v32288_v24 }
0x1df2   :  { %29537 = vrcp.f32 %v14434_v51 }
0x1df3   :  { %v14570_v31 = vand.u32 4294901760, %v14569_v48  ;;  %29539 = vrcp.f32 %v13890_v30  ;;  %v15078_v48 = vand.u32 4294901760, %v15077_v42 }
0x1df4   :  { %29541 = vrcp.f32 %v13893_v28 }
0x1df5   :  { %28276 = vmatprep.subr.mxu1 %v14570_v31  ;;  %v32252_v61 = vpop.permute.xlu1 %13898 }
0x1df6   :  { %v14442_v44 = vsel %vm29892_vm4, %v32252_v61, 0.0  ;;  %28277 = vmatpush3.msra.mxu1 %v14570_v31  ;;  %v13904_v50 = vsel %vm749_vm1, %v32252_v61, 0.0 }
0x1df7   :  { %v14482_v38 = vand.u32 4294901760, %v14442_v44  ;;  %v32274_v20 = vand.u32 4294901760, %v13904_v50 }
0x1df9   :  { %v32260_v52 = vsub.f32 %v14442_v44, %v14482_v38  ;;  %28271 = vmatprep.subr.mxu0 %v14482_v38  ;;  %v32284_v3 = vsub.f32 %v13904_v50, %v32274_v20 }
0x1dfa   :  { %28272 = vmatpush3.msra.mxu0 %v14482_v38 }
0x1dfb   :  { %v29536_v5 = vpop.eup %29535  ;;  %28283 = vmatprep.subr.mxu0 %v32243_v10  ;;  %v32264_v17 = vand.u32 4294901760, %v32260_v52 }
0x1dfc   :  { %v14441_v4 = vmul.f32 %v29536_v5, %v29532_v18 }
0x1dfd   :  { %v14576_v46 = vsub.f32 %v32260_v52, %v32264_v17 }
0x1dfe   :  { %v14448_v35 = vsel %vm1277_vm9, %v14441_v4, 0  ;;  %v15460_v4 = vsel %vm30113_vm13, %v32095_v63, 0.0 }
0x1dff   :  { %v29538_v33 = vpop.eup %29537  ;;  %v14577_v36 = vand.u32 4294901760, %v14576_v46  ;;  %v32276_v15 = vand.u32 4294901760, %v14448_v35  ;;  %v15463_v46 = vsel %vm164_vm0, %v15460_v4, 0 }
0x1e00   :  { %v14440_v1 = vmul.f32 %v29538_v33, %v29534_v7  ;;  %v29540_v26 = vpop.eup %29539  ;;  %v32295_v7 = vand.u32 4294901760, %v32284_v3  ;;  %v15461_v33 = vsel %vm30113_vm13, %v32093_v29, 0.0 }
0x1e01   :  { %28278 = vmatprep.subr.mxu1 %v14577_v36  ;;  %v14528_v8 = vsub.f32 %v14448_v35, %v32276_v15  ;;  %v29542_v12 = vpop.eup %29541  ;;  %v13896_v41 = vmul.f32 %v29540_v26, %v32221_v55  ;;  %v32332_v35 = vand.u32 4294901760, %v15463_v46  ;;  %v15997_v26 = vsel %vm30113_vm13, %v32235_v2, 0.0 }
0x1e02   :  { %28279 = vmatpush3.msra.mxu1 %v14577_v36  ;;  %v14445_v13 = vsel %vm1277_vm9, %v14440_v1, 0  ;;  %v13897_v18 = vmul.f32 %v29542_v12, %v32225_v9  ;;  %v15084_v59 = vsub.f32 %v32284_v3, %v32295_v7 }
0x1e03   :  { %28290 = vmatprep.subr.mxu1 %v32240_v60  ;;  %v14517_v49 = vand.u32 4294901760, %v14445_v13  ;;  %v14529_v39 = vand.u32 4294901760, %v14528_v8  ;;  %v14953_v28 = vsel %vm1277_vm9, %v13896_v41, 0  ;;  %v15536_v1 = vsub.f32 %v15463_v46, %v32332_v35 }
0x1e04   :  { %v32304_v57 = vand.u32 4294901760, %v14953_v28  ;;  %v14956_v51 = vsel %vm1277_vm9, %v13897_v18, 0 }
0x1e05   :  { %28280 = vmatprep.mubr.f32.mxu1 %v14517_v49  ;;  %v14518_v0 = vsub.f32 %v14445_v13, %v14517_v49  ;;  %v14530_v30 = vsub.f32 %v14528_v8, %v14529_v39  ;;  %v32307_v44 = vand.u32 4294901760, %v14956_v51 }
0x1e06   :  { %28281 = vmatmul.mubr.f32.vlgmr.msra.gmra.mxu1 %v32276_v15  ;;  %v15026_v53 = vsub.f32 %v14953_v28, %v32304_v57 }
0x1e07   :  { %28291 = vmatpush3.msra.mxu1 %v32240_v60  ;;  %v14519_v11 = vand.u32 4294901760, %v14518_v0  ;;  %v14531_v31 = vand.u32 4294901760, %v14530_v30 }
0x1e08   :  { %28292 = vmatprep.subr.mxu1 %v14482_v38 }
0x1e09   :  { %28293 = vmatpush3.msra.mxu1 %v14482_v38  ;;  %28294 = vmatprep.mubr.f32.mxu1 %v14519_v11  ;;  %v14520_v55 = vsub.f32 %v14518_v0, %v14519_v11 }
0x1e0a   :  { %28304 = vmatprep.subr.mxu1 %v32240_v60  ;;  %28295 = vmatmul.mubr.f32.vlgmr.msra.gmra.mxu1 %v14529_v39 }
0x1e0b   :  { %28305 = vmatpush3.msra.mxu1 %v32240_v60  ;;  %28308 = vmatprep.mubr.f32.mxu1 %v14517_v49  ;;  %v14521_v9 = vand.u32 4294901760, %v14520_v55  ;;  %v15085_v60 = vand.u32 4294901760, %v15084_v59 }
0x1e0c   :  { %28306 = vmatprep.subr.mxu1 %v14482_v38 }
0x1e0d   :  { %28307 = vmatpush3.msra.mxu1 %v14482_v38  ;;  %28273 = vmatprep.mubr.f32.mxu0 %v14521_v9  ;;  %v15036_v38 = vsub.f32 %v14956_v51, %v32307_v44 }
0x1e0e   :  { %28318 = vmatprep.subr.mxu1 %v15078_v48  ;;  %28274 = vmatmul.mubr.f32.vlgmr.msra.gmra.mxu0 %v14531_v31 }
0x1e0f   :  { %28284 = vmatpush3.msra.mxu0 %v32243_v10  ;;  %28309 = vmatmul.mubr.f32.vlgmr.msra.gmra.mxu1 %v32276_v15  ;;  %v15027_v10 = vand.u32 4294901760, %v15026_v53 }
0x1e10   :  { %28319 = vmatpush3.msra.mxu1 %v15078_v48  ;;  %28285 = vmatprep.subr.mxu0 %v32260_v52 }
0x1e11   :  { %28287 = vmatprep.mubr.f32.mxu0 %v14518_v0  ;;  %28320 = vmatprep.subr.mxu1 %v15085_v60  ;;  %v15028_v50 = vsub.f32 %v15026_v53, %v15027_v10 }
0x1e12   :  { %28322 = vmatprep.mubr.f32.mxu1 %v32304_v57  ;;  %28286 = vmatpush3.msra.mxu0 %v32260_v52  ;;  %v15037_v52 = vand.u32 4294901760, %v15036_v38 }
0x1e13   :  { %28321 = vmatpush3.msra.mxu1 %v15085_v60  ;;  %28297 = vmatprep.subr.mxu0 %v32248_v34  ;;  %v15029_v36 = vand.u32 4294901760, %v15028_v50 }
0x1e14   :  { %28332 = vmatprep.subr.mxu1 %v32266_v14  ;;  %28288 = vmatmul.mubr.f32.vlgmr.msra.gmra.mxu0 %v14528_v8  ;;  %v32361_v8 = vand.u32 4294901760, %v15997_v26 }
0x1e15   :  { %28298 = vmatpush3.msra.mxu0 %v32248_v34  ;;  %28323 = vmatmul.mubr.f32.vlgmr.msra.gmra.mxu1 %v32307_v44  ;;  %v15038_v34 = vsub.f32 %v15036_v38, %v15037_v52 }
0x1e16   :  { %28333 = vmatpush3.msra.mxu1 %v32266_v14  ;;  %28299 = vmatprep.subr.mxu0 %v32264_v17  ;;  %v32374_v12 = vsub.f32 %v15997_v26, %v32361_v8 }
0x1e17   :  { %28301 = vmatprep.mubr.f32.mxu0 %v14517_v49  ;;  %28334 = vmatprep.subr.mxu1 %v32274_v20  ;;  %v15996_v49 = vsel %vm30113_vm13, %v32252_v61, 0.0 }
0x1e18   :  { %28336 = vmatprep.mubr.f32.mxu1 %v15027_v10  ;;  %28300 = vmatpush3.msra.mxu0 %v32264_v17  ;;  %v15466_v17 = vsel %vm164_vm0, %v15461_v33, 0  ;;  %v32378_v39 = vand.u32 4294901760, %v15996_v49  ;;  %v32386_v0 = vand.u32 4294901760, %v32374_v12 }
0x1e19   :  { %28335 = vmatpush3.msra.mxu1 %v32274_v20  ;;  %28311 = vmatprep.subr.mxu0 %v32266_v14 }
0x1e1a   :  { %28346 = vmatprep.subr.mxu1 %v32266_v14  ;;  %28302 = vmatmul.mubr.f32.vlgmr.msra.gmra.mxu0 %v32276_v15  ;;  %v15039_v15 = vand.u32 4294901760, %v15038_v34  ;;  %v32389_v18 = vsub.f32 %v15996_v49, %v32378_v39 }
0x1e1b   :  { %28312 = vmatpush3.msra.mxu0 %v32266_v14  ;;  %28337 = vmatmul.mubr.f32.vlgmr.msra.gmra.mxu1 %v15037_v52 }
0x1e1c   :  { %28347 = vmatpush3.msra.mxu1 %v32266_v14  ;;  %28313 = vmatprep.subr.mxu0 %v32274_v20  ;;  %v32348_v14 = vand.u32 4294901760, %v15466_v17  ;;  %v32399_v42 = vand.u32 4294901760, %v32389_v18 }
0x1e1d   :  { %28315 = vmatprep.mubr.f32.mxu0 %v15029_v36  ;;  %28348 = vmatprep.subr.mxu1 %v32274_v20 }
0x1e1e   :  { %28350 = vmatprep.mubr.f32.mxu1 %v32304_v57  ;;  %28314 = vmatpush3.msra.mxu0 %v32274_v20  ;;  %v16130_v28 = vsub.f32 %v32389_v18, %v32399_v42 }
0x1e1f   :  { %28349 = vmatpush3.msra.mxu1 %v32274_v20  ;;  %28325 = vmatprep.subr.mxu0 %v32279_v62  ;;  %v15537_v20 = vand.u32 4294901760, %v15536_v1 }
0x1e20   :  { %28360 = vmatprep.subr.mxu1 %v32144_v45  ;;  %28316 = vmatmul.mubr.f32.vlgmr.msra.gmra.mxu0 %v15039_v15  ;;  %v16131_v55 = vand.u32 4294901760, %v16130_v28 }
0x1e21   :  { %28326 = vmatpush3.msra.mxu0 %v32279_v62  ;;  %28351 = vmatmul.mubr.f32.vlgmr.msra.gmra.mxu1 %v32307_v44  ;;  %v15546_v62 = vsub.f32 %v15466_v17, %v32348_v14  ;;  %v15538_v13 = vsub.f32 %v15536_v1, %v15537_v20 }
0x1e22   :  { %28361 = vmatpush3.xpose.msra.mxu1 %v32144_v45  ;;  %28327 = vmatprep.subr.mxu0 %v32284_v3 }
0x1e23   :  { %28329 = vmatprep.mubr.f32.mxu0 %v15026_v53  ;;  %28362 = vmatprep.subr.mxu1 %v32150_v32 }
0x1e24   :  { %28364 = vmatprep.mubr.f32.mxu1 %v32332_v35  ;;  %28328 = vmatpush3.msra.mxu0 %v32284_v3  ;;  %v15547_v3 = vand.u32 4294901760, %v15546_v62 }
0x1e25   :  { %28339 = vmatprep.subr.mxu0 %v32288_v24  ;;  %28330 = vmatmul.mubr.f32.vlgmr.msra.gmra.mxu0 %v15036_v38 }
0x1e26   :  { %28340 = vmatpush3.msra.mxu0 %v32288_v24  ;;  %28363 = vmatpush3.xpose.msra.mxu1 %v32150_v32  ;;  %v15539_v24 = vand.u32 4294901760, %v15538_v13  ;;  %v15548_v41 = vsub.f32 %v15546_v62, %v15547_v3 }
0x1e27   :  { %28341 = vmatprep.subr.mxu0 %v32295_v7  ;;  %28343 = vmatprep.mubr.f32.mxu0 %v32304_v57 }
0x1e28   :  { %28374 = vmatprep.subr.mxu1 %v32117_v25  ;;  %28342 = vmatpush3.msra.mxu0 %v32295_v7  ;;  %v15549_v11 = vand.u32 4294901760, %v15548_v41  ;;  %v16123_v7 = vsub.f32 %v32374_v12, %v32386_v0 }
0x1e29   :  { %28353 = vmatprep.subr.mxu0 %v32117_v25  ;;  %28365 = vmatmul.mubr.f32.vlgmr.msra.gmra.mxu1 %v32348_v14 }
0x1e2a   :  { %28344 = vmatmul.mubr.f32.vlgmr.msra.gmra.mxu0 %v32307_v44  ;;  %28375 = vmatpush3.xpose.msra.mxu1 %v32117_v25  ;;  %v16124_v30 = vand.u32 4294901760, %v16123_v7 }
0x1e2b   :  { %28354 = vmatpush3.xpose.msra.mxu0 %v32117_v25  ;;  %28378 = vmatprep.mubr.f32.mxu1 %v15537_v20 }
0x1e2c   :  { %28355 = vmatprep.subr.mxu0 %v32123_v47  ;;  %28357 = vmatprep.mubr.f32.mxu0 %v15539_v24 }
0x1e2d   :  { %28376 = vmatprep.subr.mxu1 %v32123_v47 }
0x1e2e   :  { %28377 = vmatpush3.xpose.msra.mxu1 %v32123_v47 }
0x1e2f   :  { %28356 = vmatpush3.xpose.msra.mxu0 %v32123_v47  ;;  %28388 = vmatprep.subr.mxu1 %v32117_v25 }
0x1e30   :  { %28367 = vmatprep.subr.mxu0 %v32121_v6 }
0x1e31   :  { %28379 = vmatmul.mubr.f32.vlgmr.msra.gmra.mxu1 %v15547_v3 }
0x1e32   :  { %28358 = vmatmul.mubr.f32.vlgmr.msra.gmra.mxu0 %v15549_v11  ;;  %28389 = vmatpush3.xpose.msra.mxu1 %v32117_v25 }
0x1e33   :  { %28368 = vmatpush3.xpose.msra.mxu0 %v32121_v6  ;;  %28371 = vmatprep.mubr.f32.mxu0 %v15536_v1 }
0x1e34   :  { %28392 = vmatprep.mubr.f32.mxu1 %v32332_v35  ;;  %28369 = vmatprep.subr.mxu0 %v32131_v16 }
0x1e35   :  { %28390 = vmatprep.subr.mxu1 %v32123_v47 }
0x1e36   :  { %28391 = vmatpush3.xpose.msra.mxu1 %v32123_v47 }
0x1e37   :  { %28370 = vmatpush3.xpose.msra.mxu0 %v32131_v16  ;;  %28402 = vmatprep.subr.mxu1 %v16124_v30 }
0x1e38   :  { %28381 = vmatprep.subr.mxu0 %v32128_v43 }
0x1e39   :  { %28393 = vmatmul.mubr.f32.vlgmr.msra.gmra.mxu1 %v32348_v14 }
0x1e3a   :  { %28372 = vmatmul.mubr.f32.vlgmr.msra.gmra.mxu0 %v15546_v62  ;;  %28403 = vmatpush3.msra.mxu1 %v16124_v30 }
0x1e3b   :  { %28382 = vmatpush3.xpose.msra.mxu0 %v32128_v43  ;;  %28385 = vmatprep.mubr.f32.mxu0 %v32332_v35 }
0x1e3c   :  { %28383 = vmatprep.subr.mxu0 %v32138_v40  ;;  %28404 = vmatprep.subr.mxu1 %v16131_v55 }
0x1e3d   :  { %28405 = vmatpush3.msra.mxu1 %v16131_v55 }
0x1e3e   :  { %28416 = vmatprep.subr.mxu1 %v32361_v8 }
0x1e3f   :  { %28384 = vmatpush3.xpose.msra.mxu0 %v32138_v40 }
0x1e40   :  { %28395 = vmatprep.subr.mxu0 %v32361_v8 }
0x1e42   :  { %28386 = vmatmul.mubr.f32.vlgmr.msra.gmra.mxu0 %v32348_v14 }
0x1e43   :  { %28396 = vmatpush3.msra.mxu0 %v32361_v8 }
0x1e44   :  { %28397 = vmatprep.subr.mxu0 %v32378_v39 }
0x1e45   :  { %28398 = vmatpush3.msra.mxu0 %v32378_v39 }
0x1e46   :  { %28409 = vmatprep.subr.mxu0 %v32374_v12 }
0x1ec6   :  { %v28282_v9 = vpop.f32.mrf.mxu1 }
0x1ec8   :  { %v32422_v59 = vpop.f32.mrf.mxu1 }
0x1eca   :  { %v28296_v57 = vpop.f32.mrf.mxu1 }
0x1ecc   :  { %v32424_v31 = vpop.f32.mrf.mxu1 }
0x1ece   :  { %v28275_v51 = vpop.f32.mrf.mxu0 }
0x1ecf   :  { %v14621_v48 = vadd.f32 %v28282_v9, %v28275_v51  ;;  %v28310_v60 = vpop.f32.mrf.mxu1 }
0x1ed0   :  { %v32426_v44 = vpop.f32.mrf.mxu0 }
0x1ed1   :  { %v32430_v52 = vpop.f32.mrf.mxu1 }
0x1ed4   :  { %v28289_v53 = vpop.f32.mrf.mxu0 }
0x1ed5   :  { %v14704_v38 = vadd.f32 %v28289_v53, %v14621_v48  ;;  %v28324_v34 = vpop.f32.mrf.mxu1 }
0x1ed6   :  { %v32428_v10 = vpop.f32.mrf.mxu0 }
0x1ed7   :  { %v14787_v4 = vadd.f32 %v28296_v57, %v14704_v38  ;;  %v32434_v36 = vpop.f32.mrf.mxu1 }
0x1eda   :  { %v28303_v50 = vpop.f32.mrf.mxu0 }
0x1edb   :  { %v14870_v46 = vadd.f32 %v28303_v50, %v14787_v4  ;;  %v28338_v26 = vpop.f32.mrf.mxu1 }
0x1edc   :  { %v32432_v35 = vpop.f32.mrf.mxu0 }
0x1edd   :  { %v14949_v33 = vadd.f32 %v28310_v60, %v14870_v46  ;;  %v32440_v49 = vpop.f32.mrf.mxu1 }
0x1ee0   :  { %v28317_v17 = vpop.f32.mrf.mxu0 }
0x1ee1   :  { %v15042_v15 = vadd.f32 %v28317_v17, %v14949_v33  ;;  %v28352_v11 = vpop.f32.mrf.mxu1 }
0x1ee2   :  { %v32436_v1 = vpop.f32.mrf.mxu0 }
0x1ee3   :  { %v15129_v14 = vadd.f32 %v28324_v34, %v15042_v15  ;;  %v32446_v28 = vpop.f32.mrf.mxu1 }
0x1ee5   :  { %v28331_v20 = vpop.f32.mrf.mxu0 }
0x1ee6   :  { %v15212_v62 = vadd.f32 %v28331_v20, %v15129_v14 }
0x1ee7   :  { %v32438_v13 = vpop.f32.mrf.mxu0 }
0x1ee8   :  { %v15295_v3 = vadd.f32 %v28338_v26, %v15212_v62 }
0x1ee9   :  { %v28366_v9 = vpop.f32.mrf.mxu1 }
0x1eea   :  { %v28345_v24 = vpop.f32.mrf.mxu0 }
0x1eeb   :  { %v15378_v41 = vadd.f32 %v28345_v24, %v15295_v3  ;;  %v15632_v51 = vpop.f32.mrf.mxu1 }
0x1eec   :  { %v32444_v30 = vpop.f32.mrf.mxu0 }
0x1eed   :  { %v32442_v7 = vadd.f32 %v28352_v11, %v15378_v41 }
0x1ef1   :  { %v28380_v53 = vpop.f32.mrf.mxu1 }
0x1ef2   :  { %v28359_v55 = vpop.f32.mrf.mxu0 }
0x1ef3   :  { %v15639_v60 = vadd.f32 %v28366_v9, %v28359_v55  ;;  %v15796_v34 = vpop.f32.mrf.mxu1 }
0x1ef4   :  { %v15541_v57 = vpop.f32.mrf.mxu0 }
0x1ef5   :  { %v15633_v4 = vadd.f32 %v15632_v51, %v15541_v57 }
0x1ef9   :  { %v28394_v17 = vpop.f32.mrf.mxu1 }
0x1efa   :  { %v28373_v48 = vpop.f32.mrf.mxu0 }
0x1efb   :  { %v15722_v50 = vadd.f32 %v28373_v48, %v15639_v60  ;;  %v15960_v24 = vpop.f32.mrf.mxu1 }
0x1efc   :  { %v15714_v38 = vpop.f32.mrf.mxu0 }
0x1efd   :  { %v15715_v46 = vadd.f32 %v15714_v38, %v15633_v4  ;;  %v15805_v33 = vadd.f32 %v28380_v53, %v15722_v50 }
0x1eff   :  { %v15797_v26 = vadd.f32 %v15796_v34, %v15715_v46 }
0x1f02   :  { %v28387_v15 = vpop.f32.mrf.mxu0 }
0x1f03   :  { %v15888_v14 = vadd.f32 %v28387_v15, %v15805_v33 }
0x1f04   :  { %v15881_v20 = vpop.f32.mrf.mxu0 }
0x1f05   :  { %v15967_v62 = vadd.f32 %v28394_v17, %v15888_v14  ;;  %v15882_v3 = vadd.f32 %v15881_v20, %v15797_v26 }
0x1f07   :  { %v15971_v41 = vmul.f32 0.35355338, %v15967_v62  ;;  %v15961_v11 = vadd.f32 %v15960_v24, %v15882_v3 }
0x1f09   :  { %v15973_v55 = vsel %vm29995_vm7, %v15971_v41, -1e+09  ;;  %v15970_v9 = vmul.f32 0.35355338, %v15961_v11 }
0x1f0a   :  { %v15977_v57 = vsel %vm1277_vm9, %v15973_v55, -inf }
0x1f0b   :  { %15978 = vmax.xlane.f32.xlu0 %v15977_v57  ;;  %v15972_v51 = vsel %vm29991_vm6, %v15970_v9, -1e+09  ;;  %v16508_v9 = vsel %vm30261_vm2, %v32095_v63, 0.0  ;;  %v16509_v63 = vsel %vm30261_vm2, %v32093_v29, 0.0 }
0x1f0c   :  { %v15974_v48 = vsel %vm1277_vm9, %v15972_v51, -inf }
0x1f0d   :  { %15975 = vmax.xlane.f32.xlu1 %v15974_v48 }
0x1f94   :  { %v15979_v60 = vpop.xlane.xlu0 %15978 }
0x1f95   :  { %v15981_v53 = vsub.f32 %v15973_v55, %v15979_v60 }
0x1f96   :  { %v15976_v38 = vpop.xlane.xlu1 %15975 }
0x1f97   :  { %v15984_v4 = vmul.f32 1.442695, %v15981_v53  ;;  %v15980_v50 = vsub.f32 %v15972_v51, %v15976_v38  ;;  %v16511_v53 = vsel %vm164_vm0, %v16508_v9, 0 }
0x1f99   :  { %29543 = vpow2.f32 %v15984_v4  ;;  %v15982_v46 = vmul.f32 1.442695, %v15980_v50  ;;  %v32464_v50 = vand.u32 4294901760, %v16511_v53 }
0x1f9b   :  { %29545 = vpow2.f32 %v15982_v46 }
0x1fa6   :  { %v29544_v34 = vpop.eup %29543 }
0x1fa7   :  { %v15989_v33 = vsel %vm1277_vm9, %v29544_v34, 0.0 }
0x1fa8   :  { %v29546_v17 = vpop.eup %29545  ;;  %15990 = vadd.xlane.f32.xlu1 %v15989_v33  ;;  %v16514_v33 = vsel %vm164_vm0, %v16509_v63, 0 }
0x1fa9   :  { %v15986_v15 = vsel %vm1277_vm9, %v29546_v17, 0.0  ;;  %v32477_v29 = vand.u32 4294901760, %v16514_v33 }
0x1faa   :  { %15987 = vadd.xlane.f32.xlu0 %v15986_v15  ;;  %v16584_v15 = vsub.f32 %v16511_v53, %v32464_v50 }
0x2031   :  { %v15991_v14 = vpop.xlane.xlu1 %15990 }
0x2032   :  { %29547 = vrcp.f32 %v15991_v14  ;;  %v16585_v14 = vand.u32 4294901760, %v16584_v15 }
0x2033   :  { %v15988_v26 = vpop.xlane.xlu0 %15987 }
0x2034   :  { %29549 = vrcp.f32 %v15988_v26 }
0x203f   :  { %v29548_v20 = vpop.eup %29547 }
0x2040   :  { %v15995_v62 = vmul.f32 %v29548_v20, %v29544_v34 }
0x2041   :  { %v29550_v3 = vpop.eup %29549 }
0x2042   :  { %v15994_v24 = vmul.f32 %v29550_v3, %v29546_v17  ;;  %v16002_v41 = vsel %vm1277_vm9, %v15995_v62, 0 }
0x2043   :  { %v16081_v11 = vand.u32 4294901760, %v16002_v41 }
0x2044   :  { %v15999_v55 = vsel %vm1277_vm9, %v15994_v24, 0 }
0x2045   :  { %v16071_v57 = vand.u32 4294901760, %v15999_v55  ;;  %v16082_v51 = vsub.f32 %v16002_v41, %v16081_v11 }
0x2047   :  { %28406 = vmatprep.mubr.f32.mxu1 %v16071_v57  ;;  %v16072_v48 = vsub.f32 %v15999_v55, %v16071_v57  ;;  %v16083_v60 = vand.u32 4294901760, %v16082_v51 }
0x2048   :  { %28407 = vmatmul.mubr.f32.vlgmr.msra.gmra.mxu1 %v16081_v11 }
0x2049   :  { %28417 = vmatpush3.msra.mxu1 %v32361_v8  ;;  %v16073_v38 = vand.u32 4294901760, %v16072_v48  ;;  %v16084_v4 = vsub.f32 %v16082_v51, %v16083_v60 }
0x204a   :  { %28418 = vmatprep.subr.mxu1 %v32378_v39 }
0x204b   :  { %28419 = vmatpush3.msra.mxu1 %v32378_v39  ;;  %28420 = vmatprep.mubr.f32.mxu1 %v16073_v38  ;;  %v16074_v46 = vsub.f32 %v16072_v48, %v16073_v38  ;;  %v16085_v17 = vand.u32 4294901760, %v16084_v4 }
0x204c   :  { %28430 = vmatprep.subr.mxu1 %v32361_v8  ;;  %28421 = vmatmul.mubr.f32.vlgmr.msra.gmra.mxu1 %v16083_v60 }
0x204d   :  { %28431 = vmatpush3.msra.mxu1 %v32361_v8  ;;  %28434 = vmatprep.mubr.f32.mxu1 %v16071_v57  ;;  %v16075_v34 = vand.u32 4294901760, %v16074_v46  ;;  %v17045_v8 = vsel %vm30261_vm2, %v32235_v2, 0.0  ;;  %v17044_v2 = vsel %vm30261_vm2, %v32252_v61, 0.0 }
0x204e   :  { %28432 = vmatprep.subr.mxu1 %v32378_v39 }
0x204f   :  { %28433 = vmatpush3.msra.mxu1 %v32378_v39  ;;  %28399 = vmatprep.mubr.f32.mxu0 %v16075_v34  ;;  %v16594_v39 = vsub.f32 %v16514_v33, %v32477_v29 }
0x2050   :  { %28444 = vmatprep.subr.mxu1 %v32144_v45  ;;  %28400 = vmatmul.mubr.f32.vlgmr.msra.gmra.mxu0 %v16085_v17 }
0x2051   :  { %28410 = vmatpush3.msra.mxu0 %v32374_v12  ;;  %28435 = vmatmul.mubr.f32.vlgmr.msra.gmra.mxu1 %v16081_v11  ;;  %v32489_v12 = vand.u32 4294901760, %v17045_v8 }
0x2052   :  { %28445 = vmatpush3.xpose.msra.mxu1 %v32144_v45  ;;  %28411 = vmatprep.subr.mxu0 %v32389_v18  ;;  %v16586_v45 = vsub.f32 %v16584_v15, %v16585_v14 }
0x2053   :  { %28413 = vmatprep.mubr.f32.mxu0 %v16072_v48  ;;  %28446 = vmatprep.subr.mxu1 %v32150_v32  ;;  %v32501_v26 = vsub.f32 %v17045_v8, %v32489_v12 }
0x2054   :  { %28448 = vmatprep.mubr.f32.mxu1 %v32464_v50  ;;  %28412 = vmatpush3.msra.mxu0 %v32389_v18  ;;  %v16595_v18 = vand.u32 4294901760, %v16594_v39  ;;  %v16587_v61 = vand.u32 4294901760, %v16586_v45 }
0x2055   :  { %28423 = vmatprep.subr.mxu0 %v32386_v0  ;;  %28414 = vmatmul.mubr.f32.vlgmr.msra.gmra.mxu0 %v16082_v51 }
0x2056   :  { %28424 = vmatpush3.msra.mxu0 %v32386_v0  ;;  %28447 = vmatpush3.xpose.msra.mxu1 %v32150_v32  ;;  %v32505_v32 = vand.u32 4294901760, %v17044_v2  ;;  %v16596_v0 = vsub.f32 %v16594_v39, %v16595_v18 }
0x2057   :  { %28425 = vmatprep.subr.mxu0 %v32399_v42  ;;  %28427 = vmatprep.mubr.f32.mxu0 %v16071_v57 }
0x2058   :  { %28458 = vmatprep.subr.mxu1 %v32117_v25  ;;  %28426 = vmatpush3.msra.mxu0 %v32399_v42  ;;  %v32512_v42 = vand.u32 4294901760, %v32501_v26  ;;  %v32515_v20 = vsub.f32 %v17044_v2, %v32505_v32  ;;  %v16597_v62 = vand.u32 4294901760, %v16596_v0 }
0x2059   :  { %28437 = vmatprep.subr.mxu0 %v32117_v25  ;;  %28449 = vmatmul.mubr.f32.vlgmr.msra.gmra.mxu1 %v32477_v29 }
0x205a   :  { %28428 = vmatmul.mubr.f32.vlgmr.msra.gmra.mxu0 %v16081_v11  ;;  %28459 = vmatpush3.xpose.msra.mxu1 %v32117_v25  ;;  %v17171_v3 = vsub.f32 %v32501_v26, %v32512_v42  ;;  %v32525_v24 = vand.u32 4294901760, %v32515_v20 }
0x205b   :  { %28438 = vmatpush3.xpose.msra.mxu0 %v32117_v25  ;;  %28462 = vmatprep.mubr.f32.mxu1 %v16585_v14 }
0x205c   :  { %28439 = vmatprep.subr.mxu0 %v32123_v47  ;;  %28441 = vmatprep.mubr.f32.mxu0 %v16587_v61  ;;  %v17172_v41 = vand.u32 4294901760, %v17171_v3  ;;  %v17178_v11 = vsub.f32 %v32515_v20, %v32525_v24 }
0x205d   :  { %28460 = vmatprep.subr.mxu1 %v32123_v47 }
0x205e   :  { %28461 = vmatpush3.xpose.msra.mxu1 %v32123_v47 }
0x205f   :  { %28440 = vmatpush3.xpose.msra.mxu0 %v32123_v47  ;;  %28472 = vmatprep.subr.mxu1 %v32117_v25 }
0x2060   :  { %28451 = vmatprep.subr.mxu0 %v32121_v6 }
0x2061   :  { %28463 = vmatmul.mubr.f32.vlgmr.msra.gmra.mxu1 %v16595_v18 }
0x2062   :  { %28442 = vmatmul.mubr.f32.vlgmr.msra.gmra.mxu0 %v16597_v62  ;;  %28473 = vmatpush3.xpose.msra.mxu1 %v32117_v25  ;;  %v17179_v25 = vand.u32 4294901760, %v17178_v11 }
0x2063   :  { %28452 = vmatpush3.xpose.msra.mxu0 %v32121_v6  ;;  %28455 = vmatprep.mubr.f32.mxu0 %v16584_v15 }
0x2064   :  { %28476 = vmatprep.mubr.f32.mxu1 %v32464_v50  ;;  %28453 = vmatprep.subr.mxu0 %v32131_v16 }
0x2065   :  { %28474 = vmatprep.subr.mxu1 %v32123_v47 }
0x2066   :  { %28475 = vmatpush3.xpose.msra.mxu1 %v32123_v47 }
0x2067   :  { %28454 = vmatpush3.xpose.msra.mxu0 %v32131_v16  ;;  %28486 = vmatprep.subr.mxu1 %v17172_v41 }
0x2068   :  { %28465 = vmatprep.subr.mxu0 %v32128_v43 }
0x2069   :  { %28477 = vmatmul.mubr.f32.vlgmr.msra.gmra.mxu1 %v32477_v29 }
0x206a   :  { %28456 = vmatmul.mubr.f32.vlgmr.msra.gmra.mxu0 %v16594_v39  ;;  %28487 = vmatpush3.msra.mxu1 %v17172_v41 }
0x206b   :  { %28466 = vmatpush3.xpose.msra.mxu0 %v32128_v43  ;;  %28469 = vmatprep.mubr.f32.mxu0 %v32464_v50 }
0x206c   :  { %28467 = vmatprep.subr.mxu0 %v32138_v40  ;;  %28488 = vmatprep.subr.mxu1 %v17179_v25 }
0x206d   :  { %28489 = vmatpush3.msra.mxu1 %v17179_v25 }
0x206e   :  { %28500 = vmatprep.subr.mxu1 %v32489_v12 }
0x206f   :  { %28468 = vmatpush3.xpose.msra.mxu0 %v32138_v40 }
0x2070   :  { %28479 = vmatprep.subr.mxu0 %v32489_v12 }
0x2072   :  { %28470 = vmatmul.mubr.f32.vlgmr.msra.gmra.mxu0 %v32477_v29 }
0x2073   :  { %28480 = vmatpush3.msra.mxu0 %v32489_v12 }
0x2074   :  { %28481 = vmatprep.subr.mxu0 %v32505_v32 }
0x2075   :  { %28482 = vmatpush3.msra.mxu0 %v32505_v32 }
0x2076   :  { %28493 = vmatprep.subr.mxu0 %v32501_v26 }
0x2108   :  { %v28408_v6 = vpop.f32.mrf.mxu1 }
0x210a   :  { %v16168_v47 = vpop.f32.mrf.mxu1 }
0x210c   :  { %v28422_v55 = vpop.f32.mrf.mxu1 }
0x210e   :  { %v16332_v40 = vpop.f32.mrf.mxu1 }
0x2110   :  { %v28401_v43 = vpop.f32.mrf.mxu0 }
0x2111   :  { %v16175_v16 = vadd.f32 %v28408_v6, %v28401_v43  ;;  %v28436_v4 = vpop.f32.mrf.mxu1 }
0x2112   :  { %v16077_v9 = vpop.f32.mrf.mxu0 }
0x2113   :  { %v16169_v51 = vadd.f32 %v16168_v47, %v16077_v9  ;;  %v16496_v15 = vpop.f32.mrf.mxu1 }
0x2115   :  { %v28415_v57 = vpop.f32.mrf.mxu0 }
0x2116   :  { %v16258_v48 = vadd.f32 %v28415_v57, %v16175_v16 }
0x2117   :  { %v16250_v60 = vpop.f32.mrf.mxu0 }
0x2118   :  { %v16251_v53 = vadd.f32 %v16250_v60, %v16169_v51  ;;  %v16341_v38 = vadd.f32 %v28422_v55, %v16258_v48 }
0x2119   :  { %v28450_v39 = vpop.f32.mrf.mxu1 }
0x211a   :  { %v28429_v50 = vpop.f32.mrf.mxu0  ;;  %v16333_v63 = vadd.f32 %v16332_v40, %v16251_v53 }
0x211b   :  { %v16424_v46 = vadd.f32 %v28429_v50, %v16341_v38  ;;  %v16680_v2 = vpop.f32.mrf.mxu1 }
0x211c   :  { %v16417_v34 = vpop.f32.mrf.mxu0 }
0x211d   :  { %v16503_v33 = vadd.f32 %v28436_v4, %v16424_v46  ;;  %v16418_v17 = vadd.f32 %v16417_v34, %v16333_v63 }
0x211f   :  { %v32549_v29 = vadd.f32 %v16503_v33, %v32442_v7  ;;  %v32551_v8 = vadd.f32 %v16496_v15, %v16418_v17 }
0x2121   :  { %v28464_v0 = vpop.f32.mrf.mxu1 }
0x2122   :  { %v28443_v14 = vpop.f32.mrf.mxu0 }
0x2123   :  { %v16687_v61 = vadd.f32 %v28450_v39, %v28443_v14  ;;  %v16844_v25 = vpop.f32.mrf.mxu1 }
0x2124   :  { %v16589_v45 = vpop.f32.mrf.mxu0 }
0x2125   :  { %v16681_v3 = vadd.f32 %v16680_v2, %v16589_v45  ;;  %v29612_v2 = vld [vmem:[%s34065_s5 + $0x48] sm:$0xff] }
0x2129   :  { %v28478_v47 = vpop.f32.mrf.mxu1 }
0x212a   :  { %v28457_v18 = vpop.f32.mrf.mxu0 }
0x212b   :  { %v16770_v41 = vadd.f32 %v28457_v18, %v16687_v61  ;;  %v17008_v40 = vpop.f32.mrf.mxu1  ;;  %v29613_v18 = vld [vmem:[%s34065_s5 + $0x58] sm:$0xff]  ;;  %v29614_v61 = vld [vmem:[%s34065_s5 + $0x40] sm:$0xff] }
0x212c   :  { %v16762_v62 = vpop.f32.mrf.mxu0 }
0x212d   :  { %v16763_v11 = vadd.f32 %v16762_v62, %v16681_v3  ;;  %v16853_v6 = vadd.f32 %v28464_v0, %v16770_v41  ;;  %v29615_v0 = vld [vmem:[%s34066_s6 + $0x2] ss:$0 sm:$0xff] }
0x212f   :  { %v16845_v7 = vadd.f32 %v16844_v25, %v16763_v11 }
0x2132   :  { %v28471_v43 = vpop.f32.mrf.mxu0 }
0x2133   :  { %v16936_v16 = vadd.f32 %v28471_v43, %v16853_v6 }
0x2134   :  { %v16929_v55 = vpop.f32.mrf.mxu0 }
0x2135   :  { %v17015_v9 = vadd.f32 %v28478_v47, %v16936_v16  ;;  %v16930_v57 = vadd.f32 %v16929_v55, %v16845_v7 }
0x2137   :  { %v17019_v51 = vmul.f32 0.35355338, %v17015_v9  ;;  %v17009_v48 = vadd.f32 %v17008_v40, %v16930_v57 }
0x2139   :  { %v17018_v60 = vmul.f32 0.35355338, %v17009_v48  ;;  %v17021_v53 = vsel %vm29995_vm7, %v17019_v51, -1e+09 }
0x213a   :  { %v17025_v38 = vsel %vm1277_vm9, %v17021_v53, -inf }
0x213b   :  { %17026 = vmax.xlane.f32.xlu1 %v17025_v38  ;;  %v17020_v4 = vsel %vm29991_vm6, %v17018_v60, -1e+09 }
0x213c   :  { %v17022_v50 = vsel %vm1277_vm9, %v17020_v4, -inf }
0x213d   :  { %17023 = vmax.xlane.f32.xlu0 %v17022_v50 }
0x21c4   :  { %v17027_v63 = vpop.xlane.xlu1 %17026 }
0x21c5   :  { %v17029_v46 = vsub.f32 %v17021_v53, %v17027_v63 }
0x21c6   :  { %v17024_v34 = vpop.xlane.xlu0 %17023 }
0x21c7   :  { %v17032_v33 = vmul.f32 1.442695, %v17029_v46  ;;  %v17028_v17 = vsub.f32 %v17020_v4, %v17024_v34 }
0x21c9   :  { %29551 = vpow2.f32 %v17032_v33  ;;  %v17030_v15 = vmul.f32 1.442695, %v17028_v17 }
0x21cb   :  { %29553 = vpow2.f32 %v17030_v15 }
0x21d6   :  { %v29552_v14 = vpop.eup %29551 }
0x21d7   :  { %v17037_v27 = vsel %vm1277_vm9, %v29552_v14, 0.0 }
0x21d8   :  { %v29554_v39 = vpop.eup %29553  ;;  %17038 = vadd.xlane.f32.xlu1 %v17037_v27 }
0x21d9   :  { %v17034_v45 = vsel %vm1277_vm9, %v29554_v39, 0.0 }
0x21da   :  { %17035 = vadd.xlane.f32.xlu0 %v17034_v45 }
0x21e9   :  { %17564 = vrot.lane.b32.xlu1 %v29611_v22, %s29647_s25 }
0x21ed   :  { %17562 = vrot.lane.b32.xlu1 %v29612_v2, %s29647_s25 }
0x21f0   :  { %17566 = vrot.lane.b32.xlu0 %v29613_v18, %s29647_s25 }
0x21f1   :  { %17560 = vrot.lane.b32.xlu1 %v29614_v61, %s29647_s25 }
0x21f4   :  { %18108 = vrot.lane.b32.xlu0 %v29615_v0, %s29647_s25 }
0x2261   :  { %v17039_v62 = vpop.xlane.xlu1 %17038 }
0x2262   :  { %29555 = vrcp.f32 %v17039_v62  ;;  %v14615_v62 = vadd.f32 %v32422_v59, %v32426_v44 }
0x2263   :  { %v17036_v3 = vpop.xlane.xlu0 %17035 }
0x2264   :  { %29557 = vrcp.f32 %v17036_v3  ;;  %v14697_v3 = vadd.f32 %v32428_v10, %v14615_v62 }
0x226f   :  { %v29556_v41 = vpop.eup %29555 }
0x2270   :  { %v17043_v11 = vmul.f32 %v29556_v41, %v29552_v14  ;;  %v14779_v41 = vadd.f32 %v32424_v31, %v14697_v3 }
0x2271   :  { %v29558_v25 = vpop.eup %29557 }
0x2272   :  { %v17042_v6 = vmul.f32 %v29558_v25, %v29554_v39  ;;  %v17050_v47 = vsel %vm1277_vm9, %v17043_v11, 0  ;;  %v14864_v11 = vadd.f32 %v32432_v35, %v14779_v41 }
0x2273   :  { %v17129_v43 = vand.u32 4294901760, %v17050_v47 }
0x2274   :  { %v17047_v16 = vsel %vm1277_vm9, %v17042_v6, 0  ;;  %v14943_v25 = vadd.f32 %v32430_v52, %v14864_v11 }
0x2275   :  { %v17119_v7 = vand.u32 4294901760, %v17047_v16  ;;  %v17130_v55 = vsub.f32 %v17050_v47, %v17129_v43 }
0x2276   :  { %v15032_v6 = vadd.f32 %v32436_v1, %v14943_v25 }
0x2277   :  { %28490 = vmatprep.mubr.f32.mxu1 %v17119_v7  ;;  %v17120_v9 = vsub.f32 %v17047_v16, %v17119_v7  ;;  %v17131_v57 = vand.u32 4294901760, %v17130_v55 }
0x2278   :  { %28491 = vmatmul.mubr.f32.vlgmr.msra.gmra.mxu1 %v17129_v43 }
0x2279   :  { %28501 = vmatpush3.msra.mxu1 %v32489_v12  ;;  %v17121_v40 = vand.u32 4294901760, %v17120_v9  ;;  %v17132_v51 = vsub.f32 %v17130_v55, %v17131_v57 }
0x227a   :  { %28502 = vmatprep.subr.mxu1 %v32505_v32 }
0x227b   :  { %28503 = vmatpush3.msra.mxu1 %v32505_v32  ;;  %28504 = vmatprep.mubr.f32.mxu1 %v17121_v40  ;;  %v17122_v48 = vsub.f32 %v17120_v9, %v17121_v40  ;;  %v17133_v53 = vand.u32 4294901760, %v17132_v51 }
0x227c   :  { %28514 = vmatprep.subr.mxu1 %v32489_v12  ;;  %28505 = vmatmul.mubr.f32.vlgmr.msra.gmra.mxu1 %v17131_v57 }
0x227d   :  { %28515 = vmatpush3.msra.mxu1 %v32489_v12  ;;  %28518 = vmatprep.mubr.f32.mxu1 %v17119_v7  ;;  %v17123_v60 = vand.u32 4294901760, %v17122_v48  ;;  %v17565_v12 = vpop.permute.xlu1 %17564 }
0x227e   :  { %28516 = vmatprep.subr.mxu1 %v32505_v32  ;;  %v32597_v38 = vand.u32 4294901760, %v17565_v12 }
0x227f   :  { %28517 = vmatpush3.msra.mxu1 %v32505_v32  ;;  %28483 = vmatprep.mubr.f32.mxu0 %v17123_v60  ;;  %v17567_v32 = vpop.permute.xlu0 %17566 }
0x2280   :  { %28484 = vmatmul.mubr.f32.vlgmr.msra.gmra.mxu0 %v17133_v53  ;;  %28519 = vmatmul.mubr.f32.vlgmr.msra.gmra.mxu1 %v17129_v43 }
0x2281   :  { %28494 = vmatpush3.msra.mxu0 %v32501_v26  ;;  %28497 = vmatprep.mubr.f32.mxu0 %v17120_v9  ;;  %v32599_v26 = vand.u32 4294901760, %v17567_v32  ;;  %v17563_v4 = vpop.permute.xlu1 %17562 }
0x2282   :  { %28495 = vmatprep.subr.mxu0 %v32515_v20  ;;  %v32604_v50 = vand.u32 4294901760, %v17563_v4 }
0x2283   :  { %28496 = vmatpush3.msra.mxu0 %v32515_v20  ;;  %v32602_v20 = vsub.f32 %v17567_v32, %v32599_v26 }
0x2284   :  { %28507 = vmatprep.subr.mxu0 %v32512_v42  ;;  %28498 = vmatmul.mubr.f32.vlgmr.msra.gmra.mxu0 %v17130_v55 }
0x2285   :  { %28508 = vmatpush3.msra.mxu0 %v32512_v42  ;;  %28511 = vmatprep.mubr.f32.mxu0 %v17119_v7  ;;  %v32609_v42 = vsub.f32 %v17565_v12, %v32597_v38  ;;  %v17561_v63 = vpop.permute.xlu1 %17560  ;;  %v32617_v46 = vand.u32 4294901760, %v32602_v20 }
0x2286   :  { %28509 = vmatprep.subr.mxu0 %v32525_v24  ;;  %v32620_v34 = vand.u32 4294901760, %v17561_v63 }
0x2287   :  { %28510 = vmatpush3.msra.mxu0 %v32525_v24  ;;  %v32614_v24 = vsub.f32 %v17563_v4, %v32604_v50  ;;  %v17695_v33 = vsub.f32 %v32602_v20, %v32617_v46  ;;  %v32626_v17 = vand.u32 4294901760, %v32609_v42 }
0x2288   :  { %28512 = vmatmul.mubr.f32.vlgmr.msra.gmra.mxu0 %v17129_v43  ;;  %28521 = vmatprep.subr.mxu0 %v32599_v26  ;;  %v32629_v15 = vsub.f32 %v17561_v63, %v32620_v34  ;;  %v15123_v43 = vadd.f32 %v32434_v36, %v15032_v6 }
0x2289   :  { %28522 = vmatpush3.msra.mxu0 %v32599_v26  ;;  %v17696_v14 = vand.u32 4294901760, %v17695_v33  ;;  %v17702_v27 = vsub.f32 %v32609_v42, %v32626_v17  ;;  %v32635_v39 = vand.u32 4294901760, %v32614_v24 }
0x228a   :  { %28523 = vmatprep.subr.mxu0 %v32597_v38  ;;  %v32642_v2 = vand.u32 4294901760, %v32629_v15  ;;  %v15205_v7 = vadd.f32 %v32438_v13, %v15123_v43 }
0x228b   :  { %28524 = vmatpush3.msra.mxu0 %v32597_v38  ;;  %28532 = vmatprep.subr.mxu1 %v17696_v14  ;;  %v17703_v45 = vand.u32 4294901760, %v17702_v27  ;;  %v17709_v22 = vsub.f32 %v32614_v24, %v32635_v39 }
0x228c   :  { %28525 = vmatprep.subr.mxu0 %v32604_v50  ;;  %28533 = vmatpush3.msra.mxu1 %v17696_v14  ;;  %v17716_v61 = vsub.f32 %v32629_v15, %v32642_v2  ;;  %v15287_v59 = vadd.f32 %v32440_v49, %v15205_v7 }
0x228d   :  { %28526 = vmatpush3.msra.mxu0 %v32604_v50  ;;  %28534 = vmatprep.subr.mxu1 %v17703_v45  ;;  %v17710_v18 = vand.u32 4294901760, %v17709_v22 }
0x228e   :  { %28527 = vmatprep.subr.mxu0 %v32620_v34  ;;  %28535 = vmatpush3.msra.mxu1 %v17703_v45  ;;  %v17717_v0 = vand.u32 4294901760, %v17716_v61  ;;  %v15372_v52 = vadd.f32 %v32444_v30, %v15287_v59  ;;  %v18109_v59 = vpop.permute.xlu0 %18108 }
0x228f   :  { %28528 = vmatpush3.msra.mxu0 %v32620_v34  ;;  %28536 = vmatprep.subr.mxu1 %v17710_v18 }
0x2290   :  { %28543 = vmatprep.subr.mxu0 %v32602_v20  ;;  %28537 = vmatpush3.msra.mxu1 %v17710_v18  ;;  %v15451_v32 = vadd.f32 %v32446_v28, %v15372_v52 }
0x2291   :  { %28538 = vmatprep.subr.mxu1 %v17717_v0 }
0x2292   :  { %28539 = vmatpush3.msra.mxu1 %v17717_v0  ;;  %v16506_v33 = vadd.f32 %v32551_v8, %v15451_v32 }
0x2293   :  { %28554 = vmatprep.subr.mxu1 %v32599_v26 }
0x2338   :  { %v28492_v47 = vpop.f32.mrf.mxu1 }
0x233a   :  { %v17216_v16 = vpop.f32.mrf.mxu1 }
0x233c   :  { %v28506_v55 = vpop.f32.mrf.mxu1 }
0x233e   :  { %v17380_v10 = vpop.f32.mrf.mxu1 }
0x2340   :  { %v28485_v9 = vpop.f32.mrf.mxu0  ;;  %v28520_v60 = vpop.f32.mrf.mxu1 }
0x2341   :  { %v17223_v44 = vadd.f32 %v28492_v47, %v28485_v9 }
0x2342   :  { %v17125_v57 = vpop.f32.mrf.mxu0  ;;  %v17544_v49 = vpop.f32.mrf.mxu1 }
0x2343   :  { %v17217_v40 = vadd.f32 %v17216_v16, %v17125_v57 }
0x2344   :  { %v28499_v31 = vpop.f32.mrf.mxu0 }
0x2345   :  { %v17306_v35 = vadd.f32 %v28499_v31, %v17223_v44 }
0x2346   :  { %v17298_v51 = vpop.f32.mrf.mxu0 }
0x2347   :  { %v17299_v1 = vadd.f32 %v17298_v51, %v17217_v40  ;;  %v17389_v48 = vadd.f32 %v28506_v55, %v17306_v35 }
0x2348   :  { %v28513_v36 = vpop.f32.mrf.mxu0 }
0x2349   :  { %v17472_v53 = vadd.f32 %v28513_v36, %v17389_v48  ;;  %v17381_v12 = vadd.f32 %v17380_v10, %v17299_v1  ;;  %v121_v1 = vld [vmem:[%s34065_s5 + $0x78] sm:$0xff] }
0x234a   :  { %v17465_v13 = vpop.f32.mrf.mxu0  ;;  %v32706_v48 = vand.u32 4294901760, %v121_v1 }
0x234b   :  { %v17551_v4 = vadd.f32 %v28520_v60, %v17472_v53  ;;  %v17466_v63 = vadd.f32 %v17465_v13, %v17381_v12  ;;  %v118_v53 = vld [vmem:[%s34065_s5 + $0x60] sm:$0xff] }
0x234c   :  { %v32729_v12 = vand.u32 4294901760, %v118_v53  ;;  %v32733_v13 = vsub.f32 %v121_v1, %v32706_v48 }
0x234d   :  { %v17555_v14 = vadd.f32 %v17551_v4, %v32549_v29  ;;  %v17545_v27 = vadd.f32 %v17544_v49, %v17466_v63 }
0x234f   :  { %v17576_v45 = vsel %vm164_vm0, %v17555_v14, 0  ;;  %v17554_v30 = vadd.f32 %v17545_v27, %v16506_v33 }
0x2350   :  { %v17657_v22 = vand.u32 4294901760, %v17576_v45 }
0x2351   :  { %v17573_v18 = vsel %vm164_vm0, %v17554_v30, 0 }
0x2352   :  { %v17658_v61 = vsub.f32 %v17576_v45, %v17657_v22  ;;  %v17647_v0 = vand.u32 4294901760, %v17573_v18 }
0x2354   :  { %v17659_v62 = vand.u32 4294901760, %v17658_v61  ;;  %v17648_v3 = vsub.f32 %v17573_v18, %v17647_v0  ;;  %28540 = vmatprep.mubr.f32.mxu1 %v17647_v0 }
0x2355   :  { %28541 = vmatmul.mubr.f32.vlgmr.msra.gmra.mxu1 %v17657_v22 }
0x2356   :  { %28555 = vmatpush3.msra.mxu1 %v32599_v26  ;;  %v17649_v28 = vand.u32 4294901760, %v17648_v3  ;;  %v17660_v8 = vsub.f32 %v17658_v61, %v17659_v62 }
0x2357   :  { %28556 = vmatprep.subr.mxu1 %v32597_v38 }
0x2358   :  { %28557 = vmatpush3.msra.mxu1 %v32597_v38  ;;  %28562 = vmatprep.mubr.f32.mxu1 %v17649_v28  ;;  %v17650_v29 = vsub.f32 %v17648_v3, %v17649_v28  ;;  %v17661_v11 = vand.u32 4294901760, %v17660_v8 }
0x2359   :  { %28558 = vmatprep.subr.mxu1 %v32604_v50 }
0x235a   :  { %28559 = vmatpush3.msra.mxu1 %v32604_v50  ;;  %v17651_v41 = vand.u32 4294901760, %v17650_v29 }
0x235b   :  { %28560 = vmatprep.subr.mxu1 %v32620_v34 }
0x235c   :  { %28561 = vmatpush3.msra.mxu1 %v32620_v34  ;;  %28529 = vmatprep.mubr.f32.mxu0 %v17651_v41 }
0x235d   :  { %28563 = vmatmul.mubr.f32.vlgmr.msra.gmra.mxu1 %v17659_v62  ;;  %28576 = vmatprep.subr.mxu1 %v32599_v26  ;;  %v32753_v62 = vsub.f32 %v118_v53, %v32729_v12 }
0x235e   :  { %28530 = vmatmul.mubr.f32.vlgmr.msra.gmra.mxu0 %v17661_v11  ;;  %28577 = vmatpush3.msra.mxu1 %v32599_v26 }
0x235f   :  { %28544 = vmatpush3.msra.mxu0 %v32602_v20  ;;  %28584 = vmatprep.mubr.f32.mxu1 %v17647_v0 }
0x2360   :  { %28545 = vmatprep.subr.mxu0 %v32609_v42  ;;  %28551 = vmatprep.mubr.f32.mxu0 %v17648_v3 }
0x2361   :  { %28578 = vmatprep.subr.mxu1 %v32597_v38  ;;  %28546 = vmatpush3.msra.mxu0 %v32609_v42 }
0x2362   :  { %28579 = vmatpush3.msra.mxu1 %v32597_v38  ;;  %28547 = vmatprep.subr.mxu0 %v32614_v24 }
0x2363   :  { %28580 = vmatprep.subr.mxu1 %v32604_v50  ;;  %28548 = vmatpush3.msra.mxu0 %v32614_v24 }
0x2364   :  { %28581 = vmatpush3.msra.mxu1 %v32604_v50  ;;  %28549 = vmatprep.subr.mxu0 %v32629_v15 }
0x2365   :  { %28582 = vmatprep.subr.mxu1 %v32620_v34  ;;  %28550 = vmatpush3.msra.mxu0 %v32629_v15 }
0x2366   :  { %28583 = vmatpush3.msra.mxu1 %v32620_v34  ;;  %28552 = vmatmul.mubr.f32.vlgmr.msra.gmra.mxu0 %v17658_v61 }
0x2367   :  { %28565 = vmatprep.subr.mxu0 %v32617_v46  ;;  %28585 = vmatmul.mubr.f32.vlgmr.msra.gmra.mxu1 %v17657_v22 }
0x2368   :  { %28566 = vmatpush3.msra.mxu0 %v32617_v46  ;;  %28573 = vmatprep.mubr.f32.mxu0 %v17647_v0  ;;  %v32750_v0 = vand.u32 4294901760, %v32733_v13 }
0x2369   :  { %28567 = vmatprep.subr.mxu0 %v32626_v17 }
0x236a   :  { %28568 = vmatpush3.msra.mxu0 %v32626_v17  ;;  %v18284_v3 = vsub.f32 %v32733_v13, %v32750_v0 }
0x236b   :  { %28569 = vmatprep.subr.mxu0 %v32635_v39 }
0x236c   :  { %28570 = vmatpush3.msra.mxu0 %v32635_v39  ;;  %v18285_v8 = vand.u32 4294901760, %v18284_v3 }
0x236d   :  { %28571 = vmatprep.subr.mxu0 %v32642_v2 }
0x236e   :  { %28572 = vmatpush3.msra.mxu0 %v32642_v2  ;;  %28598 = vmatprep.subr.mxu1 %v18285_v8 }
0x236f   :  { %28574 = vmatmul.mubr.f32.vlgmr.msra.gmra.mxu0 %v17657_v22  ;;  %28587 = vmatprep.subr.mxu0 %v32706_v48 }
0x2370   :  { %28588 = vmatpush3.msra.mxu0 %v32706_v48  ;;  %28599 = vmatpush3.msra.mxu1 %v18285_v8 }
0x2415   :  { %v28542_v26 = vpop.f32.mrf.mxu1 }
0x2417   :  { %v17754_v42 = vpop.f32.mrf.mxu1 }
0x241d   :  { %v28564_v46 = vpop.f32.mrf.mxu1 }
0x241e   :  { %v28531_v38 = vpop.f32.mrf.mxu0 }
0x241f   :  { %v17761_v24 = vadd.f32 %v28542_v26, %v28531_v38  ;;  %v17924_v6 = vpop.f32.mrf.mxu1  ;;  %v32768_v26 = vand.u32 4294901760, %v32753_v62 }
0x2420   :  { %v17653_v20 = vpop.f32.mrf.mxu0 }
0x2421   :  { %v17755_v15 = vadd.f32 %v17754_v42, %v17653_v20 }
0x2426   :  { %v28553_v50 = vpop.f32.mrf.mxu0 }
0x2427   :  { %v17848_v25 = vadd.f32 %v28553_v50, %v17761_v24  ;;  %v28586_v43 = vpop.f32.mrf.mxu1  ;;  %v18305_v50 = vsub.f32 %v32753_v62, %v32768_v26  ;;  %v32776_v24 = vld [vmem:[%s34066_s6 + $0x3] ss:$0 sm:$0xff] }
0x2428   :  { %v17840_v34 = vpop.f32.mrf.mxu0 }
0x2429   :  { %v17841_v17 = vadd.f32 %v17840_v34, %v17755_v15  ;;  %v17933_v47 = vadd.f32 %v28564_v46, %v17848_v25  ;;  %v18096_v57 = vpop.f32.mrf.mxu1  ;;  %v18306_v42 = vand.u32 4294901760, %v18305_v50 }
0x242b   :  { %v17925_v7 = vadd.f32 %v17924_v6, %v17841_v17 }
0x242f   :  { %v28575_v39 = vpop.f32.mrf.mxu0 }
0x2430   :  { %v18022_v16 = vadd.f32 %v28575_v39, %v17933_v47 }
0x2431   :  { %v18015_v55 = vpop.f32.mrf.mxu0 }
0x2432   :  { %v18103_v2 = vadd.f32 %v28586_v43, %v18022_v16  ;;  %v18016_v9 = vadd.f32 %v18015_v55, %v17925_v7  ;;  %v25371_v43 = vld [vmem:[%s34067_s7 + $0x8] ss:$0 sm:$0xff]  ;;  %v25372_v16 = vld [vmem:[%s34067_s7 + $0x9] ss:$0 sm:$0xff] }
0x2434   :  { %v18097_v44 = vadd.f32 %v18096_v57, %v18016_v9  ;;  %v18107_v10 = vadd.f32 %v18103_v2, %v31980_v56  ;;  %v120_v56 = vld [vmem:[%s34065_s5 + $0x70] sm:$0xff] }
0x2435   :  { %v32715_v60 = vand.u32 4294901760, %v120_v56 }
0x2436   :  { %v18106_v31 = vadd.f32 %v18097_v44, %v31978_v54  ;;  %v32695_v40 = vadd.f32 %v18109_v59, %v18107_v10  ;;  %v119_v54 = vld [vmem:[%s34065_s5 + $0x68] sm:$0xff] }
0x2437   :  { %v32719_v36 = vand.u32 4294901760, %v119_v54  ;;  %28589 = vmatprep.subr.mxu0 %v32715_v60  ;;  %v32743_v18 = vsub.f32 %v120_v56, %v32715_v60 }
0x2438   :  { %v32697_v35 = vadd.f32 %v18109_v59, %v18106_v31  ;;  %v18116_v51 = vsel %vm164_vm0, %v32695_v40, 0.0  ;;  %28590 = vmatpush3.msra.mxu0 %v32715_v60 }
0x2439   :  { %18117 = vadd.xlane.f32.xlu0 %v18116_v51  ;;  %28591 = vmatprep.subr.mxu0 %v32719_v36  ;;  %v32746_v61 = vsub.f32 %v119_v54, %v32719_v36  ;;  %v32758_v28 = vand.u32 4294901760, %v32743_v18 }
0x243a   :  { %v18113_v52 = vsel %vm164_vm0, %v32697_v35, 0.0  ;;  %28592 = vmatpush3.msra.mxu0 %v32719_v36 }
0x243b   :  { %18114 = vadd.xlane.f32.xlu1 %v18113_v52  ;;  %28593 = vmatprep.subr.mxu0 %v32729_v12  ;;  %v18291_v29 = vsub.f32 %v32743_v18, %v32758_v28  ;;  %v32763_v41 = vand.u32 4294901760, %v32746_v61 }
0x243c   :  { %28594 = vmatpush3.msra.mxu0 %v32729_v12 }
0x243d   :  { %28609 = vmatprep.subr.mxu0 %v32733_v13  ;;  %v18292_v11 = vand.u32 4294901760, %v18291_v29  ;;  %v18298_v38 = vsub.f32 %v32746_v61, %v32763_v41 }
0x243f   :  { %28600 = vmatprep.subr.mxu1 %v18292_v11  ;;  %v18299_v20 = vand.u32 4294901760, %v18298_v38 }
0x2440   :  { %28601 = vmatpush3.msra.mxu1 %v18292_v11 }
0x2441   :  { %28602 = vmatprep.subr.mxu1 %v18299_v20 }
0x2442   :  { %28603 = vmatpush3.msra.mxu1 %v18299_v20 }
0x2443   :  { %28604 = vmatprep.subr.mxu1 %v18306_v42 }
0x2444   :  { %28605 = vmatpush3.msra.mxu1 %v18306_v42 }
0x2445   :  { %28620 = vmatprep.subr.mxu1 %v32706_v48 }
0x244c   :  { %18705 = vrot.lane.b32.xlu1 %v121_v1, %s29643_s16 }
0x2450   :  { %18701 = vrot.lane.b32.xlu1 %v119_v54, %s29643_s16 }
0x2454   :  { %18699 = vrot.lane.b32.xlu1 %v118_v53, %s29643_s16 }
0x2458   :  { %18711 = vrot.lane.b32.xlu1 %v32776_v24, %s29643_s16 }
0x24c2   :  { %v18118_v32 = vpop.xlane.xlu0 %18117 }
0x24c3   :  { %v18120_v4 = vmul.f32 0.03125, %v18118_v32 }
0x24c4   :  { %v18115_v63 = vpop.xlane.xlu1 %18114 }
0x24c5   :  { %v18119_v49 = vmul.f32 0.03125, %v18115_v63  ;;  %v18122_v33 = vsub.f32 %v32695_v40, %v18120_v4 }
0x24c7   :  { %v18121_v14 = vsub.f32 %v32697_v35, %v18119_v49  ;;  %v18124_v30 = vmul.f32 %v18122_v33, %v18122_v33 }
0x24c8   :  { %v18706_v57 = vpop.permute.xlu1 %18705 }
0x24c9   :  { %v18123_v27 = vmul.f32 %v18121_v14, %v18121_v14  ;;  %v18128_v22 = vsel %vm164_vm0, %v18124_v30, 0.0  ;;  %v32796_v4 = vand.u32 4294901760, %v18706_v57 }
0x24cb   :  { %v18125_v45 = vsel %vm164_vm0, %v18123_v27, 0.0 }
0x24cc   :  { %18126 = vadd.xlane.f32.xlu0 %v18125_v45  ;;  %v18702_v1 = vpop.permute.xlu1 %18701  ;;  %v32805_v45 = vsub.f32 %v18706_v57, %v32796_v4 }
0x24cd   :  { %v32807_v30 = vand.u32 4294901760, %v18702_v1 }
0x24ce   :  { %v18840_v11 = vand.u32 4294901760, %v32805_v45 }
0x24cf   :  { %v32820_v38 = vsub.f32 %v18702_v1, %v32807_v30 }
0x24d0   :  { %18129 = vadd.xlane.f32.xlu0 %v18128_v22  ;;  %v18700_v27 = vpop.permute.xlu1 %18699  ;;  %v18841_v42 = vsub.f32 %v32805_v45, %v18840_v11 }
0x24d1   :  { %v32814_v29 = vand.u32 4294901760, %v18700_v27 }
0x24d3   :  { %v32827_v50 = vsub.f32 %v18700_v27, %v32814_v29 }
0x24e6   :  { %18703 = vrot.lane.b32.xlu0 %v120_v56, %s29643_s16 }
0x2555   :  { %v18127_v46 = vpop.xlane.xlu0 %18126 }
0x2556   :  { %v18131_v34 = vmul.f32 0.03125, %v18127_v46  ;;  %v18854_v46 = vand.u32 4294901760, %v32820_v38 }
0x2558   :  { %v18133_v15 = vadd.f32 1e-05, %v18131_v34  ;;  %v18842_v34 = vand.u32 4294901760, %v18841_v42 }
0x2559   :  { %v18130_v25 = vpop.xlane.xlu0 %18129 }
0x255a   :  { %29559 = vrsqrt.f32 %v18133_v15  ;;  %v18132_v17 = vmul.f32 0.03125, %v18130_v25  ;;  %v34149_v25 = vld [vmem:[#allocation15_spill] sm:$0xff] }
0x255c   :  { %v18134_v6 = vadd.f32 1e-05, %v18132_v17  ;;  %v34150_v17 = vld [vmem:[#allocation23_spill] sm:$0xff] }
0x255d   :  { %v18704_v53 = vpop.permute.xlu0 %18703 }
0x255e   :  { %29561 = vrsqrt.f32 %v18134_v6  ;;  %v34151_v6 = vld [vmem:[#allocation13_spill] sm:$0xff] }
0x2567   :  { %v29560_v47 = vpop.eup %29559 }
0x2568   :  { %v18137_v39 = vmul.f32 %v29560_v47, %v18121_v14  ;;  %v32800_v14 = vand.u32 4294901760, %v18704_v53  ;;  %v34152_v47 = vld [vmem:[#allocation18_spill] sm:$0xff] }
0x256a   :  { %v18145_v7 = vmul.f32 %v25371_v43, %v18137_v39  ;;  %v32812_v3 = vsub.f32 %v18704_v53, %v32800_v14  ;;  %v34154_v39 = vld [vmem:[#allocation21_spill] sm:$0xff] }
0x256b   :  { %v29562_v55 = vpop.eup %29561 }
0x256c   :  { %v18138_v2 = vmul.f32 %v29562_v55, %v18122_v33  ;;  %v18153_v9 = vadd.f32 %v25372_v16, %v18145_v7  ;;  %v18847_v20 = vand.u32 4294901760, %v32812_v3 }
0x256e   :  { %v18146_v59 = vmul.f32 %v25371_v43, %v18138_v2  ;;  %v18162_v44 = vsel %vm164_vm0, %v18153_v9, 0  ;;  %v34153_v43 = vld [vmem:[#allocation16_spill] sm:$0xff] }
0x256f   :  { %v32787_v10 = vand.u32 4294901760, %v18162_v44 }
0x2570   :  { %v18154_v31 = vadd.f32 %v25372_v16, %v18146_v59  ;;  %v34155_v16 = vld [vmem:[#allocation19_spill] sm:$0xff] }
0x2571   :  { %28606 = vmatprep.mubr.f32.mxu1 %v32787_v10  ;;  %v18237_v51 = vsub.f32 %v18162_v44, %v32787_v10 }
0x2572   :  { %v18165_v52 = vsel %vm164_vm0, %v18154_v31, 0 }
0x2573   :  { %v32792_v54 = vand.u32 4294901760, %v18165_v52  ;;  %v18238_v56 = vand.u32 4294901760, %v18237_v51 }
0x2575   :  { %v18247_v32 = vsub.f32 %v18165_v52, %v32792_v54  ;;  %28607 = vmatmul.mubr.f32.vlgmr.msra.gmra.mxu1 %v32792_v54  ;;  %v18239_v63 = vsub.f32 %v18237_v51, %v18238_v56 }
0x2576   :  { %28621 = vmatpush3.msra.mxu1 %v32706_v48  ;;  %28628 = vmatprep.mubr.f32.mxu1 %v18238_v56 }
0x2577   :  { %28622 = vmatprep.subr.mxu1 %v32715_v60  ;;  %v18240_v49 = vand.u32 4294901760, %v18239_v63  ;;  %v18248_v33 = vand.u32 4294901760, %v18247_v32 }
0x2578   :  { %28623 = vmatpush3.msra.mxu1 %v32715_v60 }
0x2579   :  { %28624 = vmatprep.subr.mxu1 %v32719_v36  ;;  %28595 = vmatprep.mubr.f32.mxu0 %v18240_v49  ;;  %v18249_v22 = vsub.f32 %v18247_v32, %v18248_v33 }
0x257a   :  { %28625 = vmatpush3.msra.mxu1 %v32719_v36 }
0x257b   :  { %28626 = vmatprep.subr.mxu1 %v32729_v12  ;;  %v18250_v8 = vand.u32 4294901760, %v18249_v22 }
0x257c   :  { %28627 = vmatpush3.msra.mxu1 %v32729_v12 }
0x257d   :  { %28629 = vmatmul.mubr.f32.vlgmr.msra.gmra.mxu1 %v18248_v33  ;;  %28642 = vmatprep.subr.mxu1 %v32706_v48 }
0x257e   :  { %28596 = vmatmul.mubr.f32.vlgmr.msra.gmra.mxu0 %v18250_v8  ;;  %28643 = vmatpush3.msra.mxu1 %v32706_v48  ;;  %v18848_v48 = vsub.f32 %v32812_v3, %v18847_v20 }
0x257f   :  { %28610 = vmatpush3.msra.mxu0 %v32733_v13  ;;  %28650 = vmatprep.mubr.f32.mxu1 %v32787_v10  ;;  %v18861_v13 = vand.u32 4294901760, %v32827_v50 }
0x2580   :  { %28611 = vmatprep.subr.mxu0 %v32743_v18  ;;  %28617 = vmatprep.mubr.f32.mxu0 %v18237_v51 }
0x2581   :  { %28644 = vmatprep.subr.mxu1 %v32715_v60  ;;  %28612 = vmatpush3.msra.mxu0 %v32743_v18  ;;  %v18849_v18 = vand.u32 4294901760, %v18848_v48 }
0x2582   :  { %28645 = vmatpush3.msra.mxu1 %v32715_v60  ;;  %28613 = vmatprep.subr.mxu0 %v32746_v61  ;;  %v18855_v60 = vsub.f32 %v32820_v38, %v18854_v46 }
0x2583   :  { %28646 = vmatprep.subr.mxu1 %v32719_v36  ;;  %28614 = vmatpush3.msra.mxu0 %v32746_v61  ;;  %v18862_v61 = vsub.f32 %v32827_v50, %v18861_v13 }
0x2584   :  { %28647 = vmatpush3.msra.mxu1 %v32719_v36  ;;  %28615 = vmatprep.subr.mxu0 %v32753_v62  ;;  %v34143_v36 = vmov 0.0   ;;  %v18856_v15 = vand.u32 4294901760, %v18855_v60 }
0x2585   :  { %28648 = vmatprep.subr.mxu1 %v32729_v12  ;;  %28616 = vmatpush3.msra.mxu0 %v32753_v62  ;;  %v34145_v62 = vld [vmem:[#allocation14_spill] sm:$0xff] }
0x2586   :  { %28649 = vmatpush3.msra.mxu1 %v32729_v12  ;;  %28618 = vmatmul.mubr.f32.vlgmr.msra.gmra.mxu0 %v18247_v32  ;;  %v18863_v12 = vand.u32 4294901760, %v18862_v61  ;;  %v18712_v61 = vpop.permute.xlu1 %18711 }
0x2587   :  { %28631 = vmatprep.subr.mxu0 %v32750_v0  ;;  %28651 = vmatmul.mubr.f32.vlgmr.msra.gmra.mxu1 %v32792_v54 }
0x2588   :  { %28670 = vmatprep.subr.mxu1 %v34143_v36  ;;  %28632 = vmatpush3.msra.mxu0 %v32750_v0  ;;  %v34144_v0 = vld [vmem:[#allocation12_spill] sm:$0xff] }
0x2589   :  { %28639 = vmatprep.mubr.f32.mxu0 %v32787_v10  ;;  %28671 = vmatpush3.msra.mxu1 %v18842_v34 }
0x258a   :  { %28633 = vmatprep.subr.mxu0 %v32758_v28  ;;  %28672 = vmatprep.subr.mxu1 %v34143_v36 }
0x258b   :  { %28634 = vmatpush3.msra.mxu0 %v32758_v28  ;;  %28673 = vmatpush3.msra.mxu1 %v18849_v18  ;;  %v34146_v28 = vld [vmem:[#allocation20_spill] sm:$0xff] }
0x258c   :  { %28635 = vmatprep.subr.mxu0 %v32763_v41  ;;  %28674 = vmatprep.subr.mxu1 %v34143_v36 }
0x258d   :  { %28636 = vmatpush3.msra.mxu0 %v32763_v41  ;;  %28675 = vmatpush3.msra.mxu1 %v18856_v15  ;;  %v34147_v41 = vld [vmem:[#allocation17_spill] sm:$0xff] }
0x258e   :  { %28637 = vmatprep.subr.mxu0 %v32768_v26  ;;  %28676 = vmatprep.subr.mxu1 %v34143_v36 }
0x258f   :  { %28638 = vmatpush3.msra.mxu0 %v32768_v26  ;;  %28677 = vmatpush3.msra.mxu1 %v18863_v12  ;;  %v34148_v26 = vld [vmem:[#allocation22_spill] sm:$0xff] }
0x2590   :  { %28678 = vmatprep.mubr.msk.f32.mxu1 %vm29649_vm3, %v34143_v36  ;;  %28640 = vmatmul.mubr.f32.vlgmr.msra.gmra.mxu0 %v32792_v54 }
0x2591   :  { %28653 = vmatprep.subr.mxu0 %v34143_v36  ;;  %28679 = vmatmul.mubr.f32.vlgmr.msra.gmra.mxu1 %v34144_v0 }
0x2592   :  { %28704 = vmatprep.subr.mxu1 %v34143_v36  ;;  %28654 = vmatpush3.msra.mxu0 %v32796_v4 }
0x2593   :  { %28705 = vmatpush3.msra.mxu1 %v32796_v4  ;;  %28655 = vmatprep.subr.mxu0 %v34143_v36 }
0x2594   :  { %28706 = vmatprep.subr.mxu1 %v34143_v36  ;;  %28656 = vmatpush3.msra.mxu0 %v32800_v14 }
0x2595   :  { %28681 = vmatprep.mubr.msk.f32.mxu1 %vm29649_vm3, %v34143_v36  ;;  %28707 = vmatpush3.msra.mxu1 %v32800_v14 }
0x2596   :  { %28657 = vmatprep.subr.mxu0 %v34143_v36  ;;  %28682 = vmatmul.mubr.f32.gmra.mxu1 %v34145_v62 }
0x2597   :  { %28708 = vmatprep.subr.mxu1 %v34143_v36  ;;  %28658 = vmatpush3.msra.mxu0 %v32807_v30 }
0x2598   :  { %28709 = vmatpush3.msra.mxu1 %v32807_v30  ;;  %28659 = vmatprep.subr.mxu0 %v34143_v36 }
0x2599   :  { %28710 = vmatprep.subr.mxu1 %v34143_v36  ;;  %28660 = vmatpush3.msra.mxu0 %v32814_v29 }
0x259a   :  { %28661 = vmatprep.mubr.msk.f32.mxu0 %vm29649_vm3, %v34143_v36  ;;  %28684 = vmatprep.mubr.msk.f32.mxu1 %vm29649_vm3, %v34143_v36 }
0x259b   :  { %28711 = vmatpush3.msra.mxu1 %v32814_v29  ;;  %28662 = vmatmul.mubr.f32.vlgmr.msra.gmra.mxu0 %v34146_v28 }
0x259c   :  { %28685 = vmatmul.mubr.f32.gmra.mxu1 %v34147_v41  ;;  %28687 = vmatprep.subr.mxu0 %v34143_v36 }
0x259d   :  { %28688 = vmatpush3.msra.mxu0 %v32805_v45  ;;  %28664 = vmatprep.mubr.msk.f32.mxu0 %vm29649_vm3, %v34143_v36 }
0x259e   :  { %28689 = vmatprep.subr.mxu0 %v34143_v36  ;;  %28712 = vmatprep.mubr.msk.f32.mxu1 %vm29649_vm3, %v34143_v36 }
0x259f   :  { %28690 = vmatpush3.msra.mxu0 %v32812_v3  ;;  %28738 = vmatprep.subr.mxu1 %v34143_v36 }
0x25a0   :  { %28665 = vmatmul.mubr.f32.gmra.mxu0 %v34148_v26  ;;  %28691 = vmatprep.subr.mxu0 %v34143_v36 }
0x25a1   :  { %28713 = vmatmul.mubr.f32.vlgmr.msra.gmra.mxu1 %v34149_v25  ;;  %28692 = vmatpush3.msra.mxu0 %v32820_v38 }
0x25a2   :  { %28739 = vmatpush3.msra.mxu1 %v32796_v4  ;;  %28693 = vmatprep.subr.mxu0 %v34143_v36 }
0x25a3   :  { %28740 = vmatprep.subr.mxu1 %v34143_v36  ;;  %28667 = vmatprep.mubr.msk.f32.mxu0 %vm29649_vm3, %v34143_v36 }
0x25a4   :  { %28741 = vmatpush3.msra.mxu1 %v32800_v14  ;;  %28694 = vmatpush3.msra.mxu0 %v32827_v50 }
0x25a5   :  { %28742 = vmatprep.subr.mxu1 %v34143_v36  ;;  %28668 = vmatmul.mubr.f32.gmra.mxu0 %v34150_v17 }
0x25a6   :  { %28743 = vmatpush3.msra.mxu1 %v32807_v30  ;;  %28695 = vmatprep.mubr.msk.f32.mxu0 %vm29649_vm3, %v34143_v36 }
0x25a7   :  { %28744 = vmatprep.subr.mxu1 %v34143_v36  ;;  %28721 = vmatprep.subr.mxu0 %v34143_v36 }
0x25a8   :  { %28745 = vmatpush3.msra.mxu1 %v32814_v29  ;;  %28715 = vmatprep.mubr.msk.f32.mxu1 %vm29649_vm3, %v34143_v36 }
0x25a9   :  { %28696 = vmatmul.mubr.f32.vlgmr.msra.gmra.mxu0 %v34151_v6  ;;  %28716 = vmatmul.mubr.f32.gmra.mxu1 %v34152_v47 }
0x25aa   :  { %28722 = vmatpush3.msra.mxu0 %v18840_v11  ;;  %28698 = vmatprep.mubr.msk.f32.mxu0 %vm29649_vm3, %v34143_v36 }
0x25ab   :  { %28723 = vmatprep.subr.mxu0 %v34143_v36  ;;  %28718 = vmatprep.mubr.msk.f32.mxu1 %vm29649_vm3, %v34143_v36 }
0x25ac   :  { %28724 = vmatpush3.msra.mxu0 %v18847_v20 }
0x25ad   :  { %28725 = vmatprep.subr.mxu0 %v34143_v36  ;;  %28699 = vmatmul.mubr.f32.gmra.mxu0 %v34153_v43 }
0x25ae   :  { %28726 = vmatpush3.msra.mxu0 %v18854_v46  ;;  %28701 = vmatprep.mubr.msk.f32.mxu0 %vm29649_vm3, %v34143_v36 }
0x25af   :  { %28727 = vmatprep.subr.mxu0 %v34143_v36  ;;  %28719 = vmatmul.mubr.f32.gmra.mxu1 %v34154_v39 }
0x25b0   :  { %28728 = vmatpush3.msra.mxu0 %v18861_v13  ;;  %28746 = vmatprep.mubr.msk.f32.mxu1 %vm29649_vm3, %v34143_v36 }
0x25b1   :  { %28702 = vmatmul.mubr.f32.gmra.mxu0 %v34155_v16 }
0x25b2   :  { %28729 = vmatprep.mubr.msk.f32.mxu0 %vm29649_vm3, %v34143_v36 }
0x25b3   :  { %28747 = vmatmul.mubr.f32.vlgmr.msra.gmra.mxu1 %v34144_v0 }
0x25b4   :  { %28749 = vmatprep.mubr.msk.f32.mxu1 %vm29649_vm3, %v34143_v36 }
0x25b5   :  { %28730 = vmatmul.mubr.f32.vlgmr.msra.gmra.mxu0 %v34144_v0 }
0x25b6   :  { %28732 = vmatprep.mubr.msk.f32.mxu0 %vm29649_vm3, %v34143_v36 }
0x25b7   :  { %28750 = vmatmul.mubr.f32.gmra.mxu1 %v34145_v62 }
0x25b8   :  { %28752 = vmatprep.mubr.msk.f32.mxu1 %vm29649_vm3, %v34143_v36 }
0x25b9   :  { %28733 = vmatmul.mubr.f32.gmra.mxu0 %v34145_v62 }
0x25ba   :  { %28735 = vmatprep.mubr.msk.f32.mxu0 %vm29649_vm3, %v34143_v36 }
0x25bb   :  { %28753 = vmatmul.mubr.f32.gmra.mxu1 %v34147_v41 }
0x25bd   :  { %28736 = vmatmul.mubr.f32.gmra.mxu0 %v34147_v41 }
0x2635   :  { %v28608_v7 = vpop.f32.mrf.mxu1 }
0x2637   :  { %v18343_v2 = vpop.f32.mrf.mxu1 }
0x263d   :  { %v28630_v57 = vpop.f32.mrf.mxu1 }
0x263e   :  { %v28597_v55 = vpop.f32.mrf.mxu0 }
0x263f   :  { %v18513_v10 = vpop.f32.mrf.mxu1  ;;  %v18253_v60 = vadd.f32 %v28597_v55, %v32776_v24 }
0x2640   :  { %v18242_v9 = vpop.f32.mrf.mxu0 }
0x2641   :  { %v18243_v44 = vadd.f32 %v32776_v24, %v18242_v9  ;;  %v18350_v15 = vadd.f32 %v28608_v7, %v18253_v60 }
0x2643   :  { %v18344_v52 = vadd.f32 %v18343_v2, %v18243_v44 }
0x2646   :  { %v28619_v59 = vpop.f32.mrf.mxu0 }
0x2647   :  { %v28652_v51 = vpop.f32.mrf.mxu1  ;;  %v18437_v28 = vadd.f32 %v28619_v59, %v18350_v15 }
0x2648   :  { %v18429_v31 = vpop.f32.mrf.mxu0 }
0x2649   :  { %v18430_v1 = vadd.f32 %v18429_v31, %v18344_v52  ;;  %v18685_v54 = vpop.f32.mrf.mxu1  ;;  %v18522_v47 = vadd.f32 %v28630_v57, %v18437_v28 }
0x264b   :  { %v18514_v53 = vadd.f32 %v18513_v10, %v18430_v1 }
0x2650   :  { %v28641_v56 = vpop.f32.mrf.mxu0 }
0x2651   :  { %v18900_v32 = vpop.f32.mrf.mxu1  ;;  %v18611_v2 = vadd.f32 %v28641_v56, %v18522_v47 }
0x2652   :  { %v18604_v4 = vpop.f32.mrf.mxu0 }
0x2653   :  { %v18605_v63 = vadd.f32 %v18604_v4, %v18514_v53  ;;  %v28680_v49 = vpop.f32.mrf.mxu1  ;;  %v32986_v1 = vadd.f32 %v28652_v51, %v18611_v2 }
0x2655   :  { %v32969_v14 = vadd.f32 %v18685_v54, %v18605_v63  ;;  %v19286_v56 = vsel %vm749_vm1, %v32986_v1, 0.0 }
0x2656   :  { %v18906_v33 = vpop.f32.mrf.mxu1 }
0x2657   :  { %v19285_v45 = vsel %vm749_vm1, %v32969_v14, 0.0 }
0x2658   :  { %v28683_v27 = vpop.f32.mrf.mxu1  ;;  %v19288_v30 = vsel %vm164_vm0, %v19285_v45, 0 }
0x2659   :  { %v32975_v3 = vand.u32 4294901760, %v19288_v30 }
0x265b   :  { %v18789_v22 = vpop.f32.mrf.mxu0  ;;  %28770 = vmatprep.mubr.f32.mxu1 %v32975_v3  ;;  %v32979_v11 = vsub.f32 %v19288_v30, %v32975_v3 }
0x265c   :  { %v18912_v8 = vpop.f32.mrf.mxu1  ;;  %v18790_v62 = vadd.f32 %v18789_v22, %v18712_v61 }
0x265d   :  { %v28663_v29 = vpop.f32.mrf.mxu0  ;;  %v19372_v20 = vand.u32 4294901760, %v32979_v11 }
0x265e   :  { %v28686_v38 = vpop.f32.mrf.mxu1  ;;  %v18901_v6 = vadd.f32 %v18900_v32, %v18790_v62  ;;  %v19291_v29 = vsel %vm164_vm0, %v19286_v56, 0 }
0x265f   :  { %v19373_v42 = vsub.f32 %v32979_v11, %v19372_v20 }
0x2660   :  { %v18799_v50 = vpop.f32.mrf.mxu0 }
0x2661   :  { %v19083_v46 = vpop.f32.mrf.mxu1  ;;  %v19374_v13 = vand.u32 4294901760, %v19373_v42  ;;  %v18800_v17 = vadd.f32 %v18799_v50, %v18712_v61 }
0x2662   :  { %v28666_v48 = vpop.f32.mrf.mxu0 }
0x2663   :  { %v28714_v34 = vpop.f32.mrf.mxu1  ;;  %28761 = vmatprep.mubr.f32.mxu0 %v19374_v13  ;;  %v18907_v9 = vadd.f32 %v18906_v33, %v18800_v17 }
0x2664   :  { %v33000_v34 = vand.u32 4294901760, %v19291_v29 }
0x2665   :  { %v18809_v18 = vpop.f32.mrf.mxu0 }
0x2666   :  { %v18810_v44 = vadd.f32 %v18809_v18, %v18712_v61 }
0x2667   :  { %v28669_v36 = vpop.f32.mrf.mxu0 }
0x2668   :  { %v18913_v53 = vadd.f32 %v18912_v8, %v18810_v44  ;;  %v19855_v44 = vsel %vm29892_vm4, %v32969_v14, 0.0 }
0x2669   :  { %v18992_v12 = vpop.f32.mrf.mxu0  ;;  %v19091_v0 = vpop.f32.mrf.mxu1 }
0x266a   :  { %v18993_v16 = vadd.f32 %v18992_v12, %v18901_v6 }
0x266b   :  { %v28697_v41 = vpop.f32.mrf.mxu0  ;;  %v28717_v26 = vpop.f32.mrf.mxu1 }
0x266c   :  { %v19084_v31 = vadd.f32 %v19083_v46, %v18993_v16 }
0x266d   :  { %v18999_v25 = vpop.f32.mrf.mxu0 }
0x266e   :  { %v19000_v52 = vadd.f32 %v18999_v25, %v18907_v9 }
0x266f   :  { %v28700_v43 = vpop.f32.mrf.mxu0  ;;  %v19099_v39 = vpop.f32.mrf.mxu1 }
0x2670   :  { %v19092_v63 = vadd.f32 %v19091_v0, %v19000_v52  ;;  %v19381_v0 = vsub.f32 %v19291_v29, %v33000_v34 }
0x2671   :  { %v19006_v24 = vpop.f32.mrf.mxu0  ;;  %v28720_v55 = vpop.f32.mrf.mxu1 }
0x2672   :  { %v19007_v49 = vadd.f32 %v19006_v24, %v18913_v53  ;;  %v19382_v25 = vand.u32 4294901760, %v19381_v0 }
0x2673   :  { %v28703_v10 = vpop.f32.mrf.mxu0  ;;  %v19269_v7 = vpop.f32.mrf.mxu1 }
0x2674   :  { %v19100_v38 = vadd.f32 %v19099_v39, %v19007_v49  ;;  %v19383_v39 = vsub.f32 %v19381_v0, %v19382_v25  ;;  %v19858_v10 = vsel %vm164_vm0, %v19855_v44, 0 }
0x2675   :  { %v19182_v59 = vpop.f32.mrf.mxu0  ;;  %v28748_v54 = vpop.f32.mrf.mxu1 }
0x2676   :  { %v19183_v4 = vadd.f32 %v19182_v59, %v19084_v31  ;;  %v19384_v55 = vand.u32 4294901760, %v19383_v39  ;;  %v19856_v31 = vsel %vm29892_vm4, %v32986_v1, 0.0 }
0x2677   :  { %v28731_v32 = vpop.f32.mrf.mxu0  ;;  %v19275_v57 = vpop.f32.mrf.mxu1 }
0x2678   :  { %v32991_v45 = vadd.f32 %v19269_v7, %v19183_v4  ;;  %v33067_v7 = vand.u32 4294901760, %v19858_v10 }
0x2679   :  { %v19188_v33 = vpop.f32.mrf.mxu0  ;;  %v28751_v27 = vpop.f32.mrf.mxu1 }
0x267a   :  { %v19189_v30 = vadd.f32 %v19188_v33, %v19092_v63  ;;  %v19294_v46 = vsel %vm164_vm0, %v32991_v45, 0  ;;  %v19932_v52 = vsub.f32 %v19858_v10, %v33067_v7 }
0x267b   :  { %v28734_v22 = vpop.f32.mrf.mxu0  ;;  %v19281_v51 = vpop.f32.mrf.mxu1  ;;  %v33006_v36 = vand.u32 4294901760, %v19294_v46 }
0x267c   :  { %v32994_v8 = vadd.f32 %v19275_v57, %v19189_v30 }
0x267d   :  { %v19194_v50 = vpop.f32.mrf.mxu0  ;;  %v28754_v42 = vpop.f32.mrf.mxu1  ;;  %v33017_v28 = vsub.f32 %v19294_v46, %v33006_v36 }
0x267e   :  { %v19297_v48 = vsel %vm164_vm0, %v32994_v8, 0  ;;  %v19195_v13 = vadd.f32 %v19194_v50, %v19100_v38 }
0x267f   :  { %v33002_v60 = vand.u32 4294901760, %v19297_v48  ;;  %v28737_v18 = vpop.f32.mrf.mxu0  ;;  %v33032_v6 = vand.u32 4294901760, %v33017_v28 }
0x2680   :  { %v33004_v61 = vadd.f32 %v19281_v51, %v19195_v13 }
0x2681   :  { %v33009_v15 = vsub.f32 %v19297_v48, %v33002_v60  ;;  %v19434_v24 = vsub.f32 %v33017_v28, %v33032_v6 }
0x2682   :  { %v19300_v12 = vsel %vm164_vm0, %v33004_v61, 0 }
0x2683   :  { %v33014_v62 = vand.u32 4294901760, %v19300_v12  ;;  %v33020_v41 = vand.u32 4294901760, %v33009_v15  ;;  %v33051_v9 = vand.u32 4294901760, %v19434_v24 }
0x2685   :  { %v33023_v26 = vsub.f32 %v19300_v12, %v33014_v62  ;;  %28755 = vmatprep.subr.mxu0 %v33014_v62  ;;  %v19427_v43 = vsub.f32 %v33009_v15, %v33020_v41 }
0x2686   :  { %28756 = vmatpush3.xpose.msra.mxu0 %v33014_v62 }
0x2687   :  { %v33028_v17 = vand.u32 4294901760, %v33023_v26  ;;  %28757 = vmatprep.subr.mxu0 %v33002_v60  ;;  %v33043_v2 = vand.u32 4294901760, %v19427_v43 }
0x2689   :  { %v19420_v47 = vsub.f32 %v33023_v26, %v33028_v17 }
0x268a   :  { %28758 = vmatpush3.xpose.msra.mxu0 %v33002_v60 }
0x268b   :  { %28759 = vmatprep.subr.mxu0 %v33006_v36  ;;  %v33040_v16 = vand.u32 4294901760, %v19420_v47 }
0x268d   :  { %28764 = vmatprep.subr.mxu1 %v33040_v16 }
0x268e   :  { %28760 = vmatpush3.xpose.msra.mxu0 %v33006_v36  ;;  %28765 = vmatpush3.xpose.msra.mxu1 %v33040_v16 }
0x268f   :  { %28766 = vmatprep.subr.mxu1 %v33043_v2  ;;  %28773 = vmatprep.subr.mxu0 %v33023_v26 }
0x2691   :  { %28762 = vmatmul.mubr.f32.vlgmr.msra.gmra.mxu0 %v19384_v55 }
0x2692   :  { %28767 = vmatpush3.xpose.msra.mxu1 %v33043_v2  ;;  %28774 = vmatpush3.xpose.msra.mxu0 %v33023_v26 }
0x2693   :  { %28779 = vmatprep.mubr.f32.mxu0 %v32979_v11  ;;  %28768 = vmatprep.subr.mxu1 %v33051_v9  ;;  %v19861_v11 = vsel %vm164_vm0, %v19856_v31, 0 }
0x2694   :  { %28775 = vmatprep.subr.mxu0 %v33009_v15  ;;  %v33087_v59 = vand.u32 4294901760, %v19861_v11 }
0x2696   :  { %28769 = vmatpush3.xpose.msra.mxu1 %v33051_v9  ;;  %28776 = vmatpush3.xpose.msra.mxu0 %v33009_v15  ;;  %v19942_v53 = vsub.f32 %v19861_v11, %v33087_v59 }
0x2697   :  { %28777 = vmatprep.subr.mxu0 %v33017_v28  ;;  %28782 = vmatprep.subr.mxu1 %v33014_v62 }
0x2698   :  { %v19943_v32 = vand.u32 4294901760, %v19942_v53 }
0x2699   :  { %28771 = vmatmul.mubr.f32.vlgmr.msra.gmra.mxu1 %v33000_v34 }
0x269a   :  { %28778 = vmatpush3.xpose.msra.mxu0 %v33017_v28  ;;  %28783 = vmatpush3.xpose.msra.mxu1 %v33014_v62 }
0x269b   :  { %28788 = vmatprep.mubr.f32.mxu1 %v19372_v20  ;;  %28784 = vmatprep.subr.mxu1 %v33002_v60  ;;  %v19933_v20 = vand.u32 4294901760, %v19932_v52 }
0x269c   :  { %28791 = vmatprep.subr.mxu0 %v33028_v17 }
0x269d   :  { %28780 = vmatmul.mubr.f32.vlgmr.msra.gmra.mxu0 %v19381_v0  ;;  %v19934_v54 = vsub.f32 %v19932_v52, %v19933_v20 }
0x269e   :  { %28785 = vmatpush3.xpose.msra.mxu1 %v33002_v60  ;;  %28792 = vmatpush3.xpose.msra.mxu0 %v33028_v17 }
0x269f   :  { %28797 = vmatprep.mubr.f32.mxu0 %v32975_v3  ;;  %28786 = vmatprep.subr.mxu1 %v33006_v36  ;;  %v19935_v4 = vand.u32 4294901760, %v19934_v54 }
0x26a0   :  { %28793 = vmatprep.subr.mxu0 %v33020_v41 }
0x26a2   :  { %28787 = vmatpush3.xpose.msra.mxu1 %v33006_v36  ;;  %28794 = vmatpush3.xpose.msra.mxu0 %v33020_v41 }
0x26a3   :  { %28795 = vmatprep.subr.mxu0 %v33032_v6  ;;  %28800 = vmatprep.subr.mxu1 %v33014_v62 }
0x26a5   :  { %28789 = vmatmul.mubr.f32.vlgmr.msra.gmra.mxu1 %v19382_v25 }
0x26a6   :  { %28796 = vmatpush3.xpose.msra.mxu0 %v33032_v6  ;;  %28801 = vmatpush3.xpose.msra.mxu1 %v33014_v62 }
0x26a7   :  { %28806 = vmatprep.mubr.f32.mxu1 %v32975_v3  ;;  %28802 = vmatprep.subr.mxu1 %v33002_v60  ;;  %v19944_v3 = vsub.f32 %v19942_v53, %v19943_v32 }
0x26a8   :  { %28809 = vmatprep.subr.mxu0 %v33014_v62 }
0x26a9   :  { %28798 = vmatmul.mubr.f32.vlgmr.msra.gmra.mxu0 %v33000_v34  ;;  %v19945_v57 = vand.u32 4294901760, %v19944_v3 }
0x26aa   :  { %28803 = vmatpush3.xpose.msra.mxu1 %v33002_v60  ;;  %28810 = vmatpush3.xpose.msra.mxu0 %v33014_v62 }
0x26ab   :  { %28815 = vmatprep.mubr.f32.mxu0 %v19935_v4  ;;  %28804 = vmatprep.subr.mxu1 %v33006_v36 }
0x26ac   :  { %28811 = vmatprep.subr.mxu0 %v33002_v60 }
0x26ae   :  { %28805 = vmatpush3.xpose.msra.mxu1 %v33006_v36  ;;  %28812 = vmatpush3.xpose.msra.mxu0 %v33002_v60 }
0x26af   :  { %28813 = vmatprep.subr.mxu0 %v33006_v36  ;;  %28818 = vmatprep.subr.mxu1 %v33040_v16 }
0x26b1   :  { %28807 = vmatmul.mubr.f32.vlgmr.msra.gmra.mxu1 %v33000_v34 }
0x26b2   :  { %28814 = vmatpush3.xpose.msra.mxu0 %v33006_v36  ;;  %28819 = vmatpush3.xpose.msra.mxu1 %v33040_v16 }
0x26b3   :  { %28824 = vmatprep.mubr.f32.mxu1 %v33067_v7  ;;  %28820 = vmatprep.subr.mxu1 %v33043_v2 }
0x26b4   :  { %28827 = vmatprep.subr.mxu0 %v33023_v26 }
0x26b5   :  { %28816 = vmatmul.mubr.f32.vlgmr.msra.gmra.mxu0 %v19945_v57 }
0x26b6   :  { %28821 = vmatpush3.xpose.msra.mxu1 %v33043_v2  ;;  %28828 = vmatpush3.xpose.msra.mxu0 %v33023_v26 }
0x26b7   :  { %28833 = vmatprep.mubr.f32.mxu0 %v19932_v52  ;;  %28822 = vmatprep.subr.mxu1 %v33051_v9 }
0x26b8   :  { %28829 = vmatprep.subr.mxu0 %v33009_v15 }
0x26ba   :  { %28823 = vmatpush3.xpose.msra.mxu1 %v33051_v9  ;;  %28830 = vmatpush3.xpose.msra.mxu0 %v33009_v15 }
0x26bb   :  { %28831 = vmatprep.subr.mxu0 %v33017_v28  ;;  %28836 = vmatprep.subr.mxu1 %v33014_v62 }
0x26bd   :  { %28825 = vmatmul.mubr.f32.vlgmr.msra.gmra.mxu1 %v33087_v59 }
0x26be   :  { %28832 = vmatpush3.xpose.msra.mxu0 %v33017_v28  ;;  %28837 = vmatpush3.xpose.msra.mxu1 %v33014_v62 }
0x26bf   :  { %28842 = vmatprep.mubr.f32.mxu1 %v19933_v20  ;;  %28838 = vmatprep.subr.mxu1 %v33002_v60 }
0x26c0   :  { %28845 = vmatprep.subr.mxu0 %v33028_v17 }
0x26c1   :  { %28834 = vmatmul.mubr.f32.vlgmr.msra.gmra.mxu0 %v19942_v53 }
0x26c2   :  { %28839 = vmatpush3.xpose.msra.mxu1 %v33002_v60  ;;  %28846 = vmatpush3.xpose.msra.mxu0 %v33028_v17 }
0x26c3   :  { %28851 = vmatprep.mubr.f32.mxu0 %v33067_v7  ;;  %28840 = vmatprep.subr.mxu1 %v33006_v36 }
0x26c4   :  { %28847 = vmatprep.subr.mxu0 %v33020_v41 }
0x26c6   :  { %28841 = vmatpush3.xpose.msra.mxu1 %v33006_v36  ;;  %28848 = vmatpush3.xpose.msra.mxu0 %v33020_v41 }
0x26c7   :  { %28849 = vmatprep.subr.mxu0 %v33032_v6  ;;  %28854 = vmatprep.subr.mxu1 %v33014_v62 }
0x26c9   :  { %28843 = vmatmul.mubr.f32.vlgmr.msra.gmra.mxu1 %v19943_v32 }
0x26ca   :  { %28850 = vmatpush3.xpose.msra.mxu0 %v33032_v6  ;;  %28855 = vmatpush3.xpose.msra.mxu1 %v33014_v62 }
0x26cb   :  { %28860 = vmatprep.mubr.f32.mxu1 %v33067_v7  ;;  %28856 = vmatprep.subr.mxu1 %v33002_v60 }
0x26cd   :  { %28852 = vmatmul.mubr.f32.vlgmr.msra.gmra.mxu0 %v33087_v59 }
0x26ce   :  { %28857 = vmatpush3.xpose.msra.mxu1 %v33002_v60 }
0x26cf   :  { %28858 = vmatprep.subr.mxu1 %v33006_v36 }
0x26d2   :  { %28859 = vmatpush3.xpose.msra.mxu1 %v33006_v36 }
0x26d5   :  { %28861 = vmatmul.mubr.f32.vlgmr.msra.gmra.mxu1 %v33087_v59 }
0x2751   :  { %v28763_v63 = vpop.f32.mrf.mxu0 }
0x2753   :  { %v19376_v49 = vpop.f32.mrf.mxu0 }
0x2759   :  { %v28772_v56 = vpop.f32.mrf.mxu1 }
0x275a   :  { %v19479_v10 = vadd.f32 %v28772_v56, %v28763_v63 }
0x275b   :  { %v19472_v27 = vpop.f32.mrf.mxu1 }
0x275c   :  { %v19473_v25 = vadd.f32 %v19472_v27, %v19376_v49 }
0x275d   :  { %v28781_v33 = vpop.f32.mrf.mxu0 }
0x275e   :  { %v19564_v20 = vadd.f32 %v28781_v33, %v19479_v10 }
0x275f   :  { %v19556_v30 = vpop.f32.mrf.mxu0 }
0x2760   :  { %v19557_v39 = vadd.f32 %v19556_v30, %v19473_v25 }
0x2765   :  { %v28790_v22 = vpop.f32.mrf.mxu1 }
0x2766   :  { %v19648_v32 = vadd.f32 %v28790_v22, %v19564_v20 }
0x2767   :  { %v19639_v29 = vpop.f32.mrf.mxu1 }
0x2768   :  { %v19640_v7 = vadd.f32 %v19639_v29, %v19557_v39 }
0x2769   :  { %v28799_v51 = vpop.f32.mrf.mxu0 }
0x276b   :  { %v19727_v38 = vpop.f32.mrf.mxu0 }
0x276c   :  { %v19728_v59 = vadd.f32 %v19727_v38, %v19640_v7 }
0x2771   :  { %v28808_v50 = vpop.f32.mrf.mxu1 }
0x2773   :  { %v19807_v46 = vpop.f32.mrf.mxu1 }
0x2774   :  { %v19808_v3 = vadd.f32 %v19807_v46, %v19728_v59 }
0x2775   :  { %v28817_v42 = vpop.f32.mrf.mxu0 }
0x2777   :  { %v19937_v48 = vpop.f32.mrf.mxu0 }
0x277d   :  { %v28826_v13 = vpop.f32.mrf.mxu1 }
0x277e   :  { %v20040_v47 = vadd.f32 %v28826_v13, %v28817_v42  ;;  %v19734_v42 = vadd.f32 %v28799_v51, %v19648_v32 }
0x277f   :  { %v20033_v18 = vpop.f32.mrf.mxu1 }
0x2780   :  { %v20034_v24 = vadd.f32 %v20033_v18, %v19937_v48  ;;  %v19814_v13 = vadd.f32 %v28808_v50, %v19734_v42 }
0x2781   :  { %v28835_v34 = vpop.f32.mrf.mxu0 }
0x2782   :  { %v20125_v55 = vadd.f32 %v28835_v34, %v20040_v47  ;;  %v19817_v34 = vmul.f32 0.35355338, %v19808_v3  ;;  %v19818_v38 = vmul.f32 0.35355338, %v19814_v13 }
0x2783   :  { %v20117_v12 = vpop.f32.mrf.mxu0 }
0x2784   :  { %v20118_v31 = vadd.f32 %v20117_v12, %v20034_v24  ;;  %v19819_v51 = vsel %vm29979_vm8, %v19817_v34, -1e+09  ;;  %v19820_v46 = vsel %vm29983_vm10, %v19818_v38, -1e+09 }
0x2785   :  { %v19821_v50 = vsel %vm7247_vm5, %v19819_v51, -inf  ;;  %v19824_v18 = vsel %vm7247_vm5, %v19820_v46, -inf }
0x2789   :  { %v28844_v0 = vpop.f32.mrf.mxu1 }
0x278a   :  { %v20209_v52 = vadd.f32 %v28844_v0, %v20125_v55 }
0x278b   :  { %v20200_v44 = vpop.f32.mrf.mxu1 }
0x278c   :  { %v20201_v54 = vadd.f32 %v20200_v44, %v20118_v31 }
0x278d   :  { %v28853_v43 = vpop.f32.mrf.mxu0 }
0x278e   :  { %v20295_v53 = vadd.f32 %v28853_v43, %v20209_v52 }
0x278f   :  { %v20288_v11 = vpop.f32.mrf.mxu0 }
0x2790   :  { %v20289_v57 = vadd.f32 %v20288_v11, %v20201_v54 }
0x2795   :  { %v28862_v4 = vpop.f32.mrf.mxu1 }
0x2796   :  { %v20375_v49 = vadd.f32 %v28862_v4, %v20295_v53 }
0x2797   :  { %v20368_v27 = vpop.f32.mrf.mxu1 }
0x2798   :  { %v20379_v30 = vmul.f32 0.35355338, %v20375_v49  ;;  %v20369_v48 = vadd.f32 %v20368_v27, %v20289_v57 }
0x279a   :  { %v20378_v63 = vmul.f32 0.35355338, %v20369_v48  ;;  %v20381_v56 = vsel %vm29983_vm10, %v20379_v30, -1e+09 }
0x279b   :  { %v20385_v33 = vsel %vm7247_vm5, %v20381_v56, -inf }
0x279c   :  { %20386 = vmax.xlane.f32.xlu1 %v20385_v33  ;;  %v20380_v29 = vsel %vm29979_vm8, %v20378_v63, -1e+09 }
0x279d   :  { %v20382_v22 = vsel %vm7247_vm5, %v20380_v29, -inf }
0x279e   :  { %20383 = vmax.xlane.f32.xlu0 %v20382_v22 }
0x27a2   :  { %19822 = vmax.xlane.f32.xlu0 %v19821_v50 }
0x27a6   :  { %19825 = vmax.xlane.f32.xlu0 %v19824_v18 }
0x2825   :  { %v20387_v25 = vpop.xlane.xlu1 %20386 }
0x2826   :  { %v20389_v39 = vsub.f32 %v20381_v56, %v20387_v25 }
0x2827   :  { %v20384_v12 = vpop.xlane.xlu0 %20383 }
0x2828   :  { %v20388_v0 = vsub.f32 %v20380_v29, %v20384_v12  ;;  %v20392_v7 = vmul.f32 1.442695, %v20389_v39 }
0x282a   :  { %v20390_v24 = vmul.f32 1.442695, %v20388_v0 }
0x282b   :  { %v19823_v47 = vpop.xlane.xlu0 %19822 }
0x282c   :  { %v19827_v43 = vsub.f32 %v19819_v51, %v19823_v47 }
0x282e   :  { %v19829_v55 = vmul.f32 1.442695, %v19827_v43 }
0x282f   :  { %v19826_v44 = vpop.xlane.xlu0 %19825 }
0x2830   :  { %29563 = vpow2.f32 %v19829_v55  ;;  %v19828_v10 = vsub.f32 %v19820_v46, %v19826_v44 }
0x2831   :  { %29565 = vpow2.f32 %v20390_v24 }
0x2832   :  { %v19831_v31 = vmul.f32 1.442695, %v19828_v10 }
0x2834   :  { %29567 = vpow2.f32 %v19831_v31 }
0x2835   :  { %29569 = vpow2.f32 %v20392_v7 }
0x283d   :  { %v33155_v52 = vpop.eup %29563 }
0x283e   :  { %v19833_v11 = vsel %vm7247_vm5, %v33155_v52, 0.0  ;;  %v29566_v20 = vpop.eup %29565 }
0x283f   :  { %19834 = vadd.xlane.f32.xlu0 %v19833_v11  ;;  %v20394_v54 = vsel %vm7247_vm5, %v29566_v20, 0.0 }
0x2841   :  { %v33159_v59 = vpop.eup %29567 }
0x2842   :  { %v19836_v53 = vsel %vm7247_vm5, %v33159_v59, 0.0  ;;  %v29570_v4 = vpop.eup %29569 }
0x2843   :  { %20395 = vadd.xlane.f32.xlu0 %v20394_v54  ;;  %19837 = vadd.xlane.f32.xlu1 %v19836_v53  ;;  %v20397_v32 = vsel %vm7247_vm5, %v29570_v4, 0.0 }
0x2847   :  { %20398 = vadd.xlane.f32.xlu1 %v20397_v32 }
0x2858   :  { %19845 = vrot.lane.b32.xlu1 %v32994_v8, %s29643_s16 }
0x2859   :  { %19847 = vrot.lane.b32.xlu0 %v33004_v61, %s29643_s16 }
0x285c   :  { %19843 = vrot.lane.b32.xlu1 %v32991_v45, %s29643_s16 }
0x28c8   :  { %v19835_v3 = vpop.xlane.xlu0 %19834 }
0x28cc   :  { %v19838_v57 = vpop.xlane.xlu1 %19837  ;;  %v20396_v49 = vpop.xlane.xlu0 %20395 }
0x28cd   :  { %29571 = vrcp.f32 %v20396_v49 }
0x28d0   :  { %v20399_v27 = vpop.xlane.xlu1 %20398  ;;  %v33171_v42 = vpop.permute.xlu0 %19847 }
0x28d1   :  { %29573 = vrcp.f32 %v20399_v27  ;;  %v20406_v30 = vsel %vm29892_vm4, %v33171_v42, 0.0  ;;  %v19854_v58 = vsel %vm749_vm1, %v33171_v42, 0.0 }
0x28d2   :  { %v20414_v8 = vsel %vm7840_vm11, %v20406_v30, 0  ;;  %29575 = vrcp.f32 %v19835_v3  ;;  %v20938_v24 = vsel %vm7840_vm11, %v19854_v58, 0 }
0x28d3   :  { %v33177_v48 = vand.u32 4294901760, %v20414_v8  ;;  %29577 = vrcp.f32 %v19838_v57  ;;  %v33236_v53 = vand.u32 4294901760, %v20938_v24 }
0x28d4   :  { %v33179_v61 = vpop.permute.xlu1 %19845 }
0x28d5   :  { %v33182_v45 = vsub.f32 %v20414_v8, %v33177_v48  ;;  %28863 = vmatprep.subr.mxu0 %v33177_v48  ;;  %v20405_v13 = vsel %vm29892_vm4, %v33179_v61, 0.0 }
0x28d6   :  { %28864 = vmatpush3.msra.mxu0 %v33177_v48  ;;  %v33189_v34 = vand.u32 4294901760, %v20405_v13 }
0x28d7   :  { %v33192_v63 = vand.u32 4294901760, %v33182_v45 }
0x28d8   :  { %v33194_v56 = vpop.permute.xlu1 %19843  ;;  %v33197_v33 = vsub.f32 %v20405_v13, %v33189_v34  ;;  %28865 = vmatprep.subr.mxu0 %v33189_v34 }
0x28d9   :  { %v20404_v29 = vsel %vm29892_vm4, %v33194_v56, 0.0  ;;  %28866 = vmatpush3.msra.mxu0 %v33189_v34  ;;  %v20534_v51 = vsub.f32 %v33182_v45, %v33192_v63  ;;  %v19852_v49 = vsel %vm749_vm1, %v33194_v56, 0.0 }
0x28da   :  { %v33203_v22 = vand.u32 4294901760, %v20404_v29  ;;  %v29572_v38 = vpop.eup %29571  ;;  %v33213_v46 = vand.u32 4294901760, %v33197_v33 }
0x28db   :  { %v20535_v18 = vand.u32 4294901760, %v20534_v51  ;;  %v20402_v12 = vmul.f32 %v29572_v38, %v29566_v20 }
0x28dc   :  { %v33209_v50 = vsub.f32 %v20404_v29, %v33203_v22  ;;  %28867 = vmatprep.subr.mxu0 %v33203_v22  ;;  %v20541_v25 = vsub.f32 %v33197_v33, %v33213_v46  ;;  %v33251_v29 = vsub.f32 %v20938_v24, %v33236_v53 }
0x28dd   :  { %28868 = vmatpush3.msra.mxu0 %v33203_v22  ;;  %28872 = vmatprep.subr.mxu1 %v20535_v18  ;;  %v20408_v39 = vsel %vm7247_vm5, %v20402_v12, 0 }
0x28de   :  { %v29574_v0 = vpop.eup %29573  ;;  %28881 = vmatprep.subr.mxu0 %v33182_v45  ;;  %v33223_v47 = vand.u32 4294901760, %v33209_v50  ;;  %28873 = vmatpush3.msra.mxu1 %v20535_v18  ;;  %v20542_v55 = vand.u32 4294901760, %v20541_v25  ;;  %v33227_v44 = vand.u32 4294901760, %v20408_v39 }
0x28df   :  { %v20403_v43 = vmul.f32 %v29574_v0, %v29570_v4  ;;  %v29576_v7 = vpop.eup %29575  ;;  %v19853_v4 = vsel %vm749_vm1, %v33179_v61, 0.0 }
0x28e0   :  { %v20548_v10 = vsub.f32 %v33209_v50, %v33223_v47  ;;  %28874 = vmatprep.subr.mxu1 %v20542_v55  ;;  %28878 = vmatprep.mubr.f32.mxu1 %v33227_v44  ;;  %v20485_v54 = vsub.f32 %v20408_v39, %v33227_v44  ;;  %v19841_v57 = vmul.f32 %v29576_v7, %v33155_v52  ;;  %v33246_v27 = vand.u32 4294901760, %v19853_v4  ;;  %v29578_v13 = vpop.eup %29577 }
0x28e1   :  { %v20411_v31 = vsel %vm7247_vm5, %v20403_v43, 0  ;;  %28875 = vmatpush3.msra.mxu1 %v20542_v55  ;;  %v33254_v52 = vand.u32 4294901760, %v19852_v49  ;;  %v19842_v58 = vmul.f32 %v29578_v13, %v33159_v59  ;;  %v33271_v43 = vand.u32 4294901760, %v33251_v29 }
0x28e2   :  { %v20549_v11 = vand.u32 4294901760, %v20548_v10  ;;  %v33233_v20 = vand.u32 4294901760, %v20411_v31  ;;  %v20486_v3 = vand.u32 4294901760, %v20485_v54  ;;  %v20932_v51 = vsel %vm7247_vm5, %v19841_v57, 0 }
0x28e3   :  { %v33261_v18 = vsub.f32 %v19853_v4, %v33246_v27  ;;  %v33265_v0 = vand.u32 4294901760, %v20932_v51  ;;  %v33268_v25 = vsub.f32 %v19852_v49, %v33254_v52  ;;  %v20935_v39 = vsel %vm7247_vm5, %v19842_v58, 0 }
0x28e4   :  { %28876 = vmatprep.subr.mxu1 %v20549_v11  ;;  %v20495_v32 = vsub.f32 %v20411_v31, %v33233_v20  ;;  %v20487_v30 = vsub.f32 %v20485_v54, %v20486_v3  ;;  %v33292_v10 = vand.u32 4294901760, %v20935_v39  ;;  %v22005_v58 = vsel %vm30113_vm13, %v33179_v61, 0.0 }
0x28e5   :  { %28877 = vmatpush3.msra.mxu1 %v20549_v11  ;;  %v33277_v59 = vand.u32 4294901760, %v33261_v18  ;;  %v21009_v24 = vsub.f32 %v20932_v51, %v33265_v0  ;;  %v33288_v55 = vand.u32 4294901760, %v33268_v25 }
0x28e6   :  { %28879 = vmatmul.mubr.f32.vlgmr.msra.gmra.mxu1 %v33233_v20  ;;  %28890 = vmatprep.subr.mxu1 %v33177_v48  ;;  %v20496_v8 = vand.u32 4294901760, %v20495_v32  ;;  %v20488_v19 = vand.u32 4294901760, %v20487_v30 }
0x28e7   :  { %28891 = vmatpush3.msra.mxu1 %v33177_v48  ;;  %28896 = vmatprep.mubr.f32.mxu1 %v20486_v3  ;;  %v21456_v3 = vsel %vm30113_vm13, %v32986_v1, 0.0 }
0x28e8   :  { %28892 = vmatprep.subr.mxu1 %v33189_v34  ;;  %v20497_v38 = vsub.f32 %v20495_v32, %v20496_v8  ;;  %28869 = vmatprep.mubr.f32.mxu0 %v20488_v19 }
0x28e9   :  { %28893 = vmatpush3.msra.mxu1 %v33189_v34 }
0x28ea   :  { %28894 = vmatprep.subr.mxu1 %v33203_v22  ;;  %v20498_v12 = vand.u32 4294901760, %v20497_v38 }
0x28eb   :  { %28895 = vmatpush3.msra.mxu1 %v33203_v22 }
0x28ec   :  { %28870 = vmatmul.mubr.f32.vlgmr.msra.gmra.mxu0 %v20498_v12  ;;  %28897 = vmatmul.mubr.f32.vlgmr.msra.gmra.mxu1 %v20496_v8 }
0x28ed   :  { %28882 = vmatpush3.msra.mxu0 %v33182_v45  ;;  %28908 = vmatprep.subr.mxu1 %v33177_v48  ;;  %v21058_v45 = vsub.f32 %v33251_v29, %v33271_v43 }
0x28ee   :  { %28883 = vmatprep.subr.mxu0 %v33197_v33  ;;  %28887 = vmatprep.mubr.f32.mxu0 %v20485_v54  ;;  %v21455_v54 = vsel %vm30113_vm13, %v32969_v14, 0.0 }
0x28ef   :  { %28909 = vmatpush3.msra.mxu1 %v33177_v48  ;;  %28914 = vmatprep.mubr.f32.mxu1 %v33227_v44  ;;  %v21065_v48 = vsub.f32 %v33261_v18, %v33277_v59  ;;  %v21059_v7 = vand.u32 4294901760, %v21058_v45 }
0x28f0   :  { %28884 = vmatpush3.msra.mxu0 %v33197_v33  ;;  %28910 = vmatprep.subr.mxu1 %v33189_v34  ;;  %v21010_v33 = vand.u32 4294901760, %v21009_v24 }
0x28f1   :  { %28885 = vmatprep.subr.mxu0 %v33209_v50  ;;  %28911 = vmatpush3.msra.mxu1 %v33189_v34  ;;  %v21072_v34 = vsub.f32 %v33268_v25, %v33288_v55  ;;  %v21066_v31 = vand.u32 4294901760, %v21065_v48 }
0x28f2   :  { %28886 = vmatpush3.msra.mxu0 %v33209_v50  ;;  %28912 = vmatprep.subr.mxu1 %v33203_v22  ;;  %v21019_v50 = vsub.f32 %v20935_v39, %v33292_v10 }
0x28f3   :  { %28888 = vmatmul.mubr.f32.vlgmr.msra.gmra.mxu0 %v20495_v32  ;;  %28899 = vmatprep.subr.mxu0 %v33192_v63 }
0x28f4   :  { %28913 = vmatpush3.msra.mxu1 %v33203_v22  ;;  %28900 = vmatpush3.msra.mxu0 %v33192_v63  ;;  %v21011_v22 = vsub.f32 %v21009_v24, %v21010_v33  ;;  %v21073_v63 = vand.u32 4294901760, %v21072_v34 }
0x28f5   :  { %28905 = vmatprep.mubr.f32.mxu0 %v33227_v44  ;;  %28915 = vmatmul.mubr.f32.vlgmr.msra.gmra.mxu1 %v33233_v20  ;;  %v21020_v44 = vand.u32 4294901760, %v21019_v50 }
0x28f6   :  { %28926 = vmatprep.subr.mxu1 %v21059_v7  ;;  %28901 = vmatprep.subr.mxu0 %v33213_v46  ;;  %v21012_v11 = vand.u32 4294901760, %v21011_v22 }
0x28f7   :  { %28927 = vmatpush3.msra.mxu1 %v21059_v7  ;;  %28932 = vmatprep.mubr.f32.mxu1 %v33265_v0 }
0x28f8   :  { %28902 = vmatpush3.msra.mxu0 %v33213_v46  ;;  %28928 = vmatprep.subr.mxu1 %v21066_v31  ;;  %v21021_v46 = vsub.f32 %v21019_v50, %v21020_v44 }
0x28f9   :  { %28903 = vmatprep.subr.mxu0 %v33223_v47  ;;  %28929 = vmatpush3.msra.mxu1 %v21066_v31 }
0x28fa   :  { %28904 = vmatpush3.msra.mxu0 %v33223_v47  ;;  %28930 = vmatprep.subr.mxu1 %v21073_v63  ;;  %v21458_v47 = vsel %vm164_vm0, %v21455_v54, 0 }
0x28fb   :  { %28906 = vmatmul.mubr.f32.vlgmr.msra.gmra.mxu0 %v33233_v20  ;;  %28917 = vmatprep.subr.mxu0 %v33236_v53  ;;  %v21022_v20 = vand.u32 4294901760, %v21021_v46  ;;  %v33329_v4 = vand.u32 4294901760, %v21458_v47 }
0x28fc   :  { %28931 = vmatpush3.msra.mxu1 %v21073_v63  ;;  %28918 = vmatpush3.msra.mxu0 %v33236_v53 }
0x28fd   :  { %28923 = vmatprep.mubr.f32.mxu0 %v21012_v11  ;;  %28933 = vmatmul.mubr.f32.vlgmr.msra.gmra.mxu1 %v33292_v10  ;;  %v21532_v32 = vsub.f32 %v21458_v47, %v33329_v4 }
0x28fe   :  { %28944 = vmatprep.subr.mxu1 %v33236_v53  ;;  %28919 = vmatprep.subr.mxu0 %v33246_v27 }
0x28ff   :  { %28945 = vmatpush3.msra.mxu1 %v33236_v53  ;;  %28950 = vmatprep.mubr.f32.mxu1 %v21010_v33  ;;  %v21533_v57 = vand.u32 4294901760, %v21532_v32 }
0x2900   :  { %28920 = vmatpush3.msra.mxu0 %v33246_v27  ;;  %28946 = vmatprep.subr.mxu1 %v33246_v27 }
0x2901   :  { %28921 = vmatprep.subr.mxu0 %v33254_v52  ;;  %28947 = vmatpush3.msra.mxu1 %v33246_v27 }
0x2902   :  { %28922 = vmatpush3.msra.mxu0 %v33254_v52  ;;  %28948 = vmatprep.subr.mxu1 %v33254_v52 }
0x2903   :  { %28924 = vmatmul.mubr.f32.vlgmr.msra.gmra.mxu0 %v21022_v20  ;;  %28935 = vmatprep.subr.mxu0 %v33251_v29 }
0x2904   :  { %28949 = vmatpush3.msra.mxu1 %v33254_v52  ;;  %28936 = vmatpush3.msra.mxu0 %v33251_v29  ;;  %v22006_v29 = vsel %vm30113_vm13, %v33171_v42, 0.0 }
0x2905   :  { %28941 = vmatprep.mubr.f32.mxu0 %v21009_v24  ;;  %28951 = vmatmul.mubr.f32.vlgmr.msra.gmra.mxu1 %v21020_v44  ;;  %v22014_v19 = vsel %vm7840_vm11, %v22006_v29, 0 }
0x2906   :  { %28962 = vmatprep.subr.mxu1 %v33236_v53  ;;  %28937 = vmatprep.subr.mxu0 %v33261_v18  ;;  %v33383_v51 = vand.u32 4294901760, %v22014_v19 }
0x2907   :  { %28963 = vmatpush3.msra.mxu1 %v33236_v53  ;;  %28968 = vmatprep.mubr.f32.mxu1 %v33265_v0  ;;  %v21461_v53 = vsel %vm164_vm0, %v21456_v3, 0 }
0x2908   :  { %28938 = vmatpush3.msra.mxu0 %v33261_v18  ;;  %28964 = vmatprep.subr.mxu1 %v33246_v27  ;;  %v33355_v49 = vand.u32 4294901760, %v21461_v53  ;;  %v22004_v18 = vsel %vm30113_vm13, %v33194_v56, 0.0  ;;  %v33396_v12 = vsub.f32 %v22014_v19, %v33383_v51 }
0x2909   :  { %28939 = vmatprep.subr.mxu0 %v33268_v25  ;;  %28965 = vmatpush3.msra.mxu1 %v33246_v27  ;;  %v21534_v27 = vsub.f32 %v21532_v32, %v21533_v57 }
0x290a   :  { %28940 = vmatpush3.msra.mxu0 %v33268_v25  ;;  %28966 = vmatprep.subr.mxu1 %v33254_v52  ;;  %v21542_v30 = vsub.f32 %v21461_v53, %v33355_v49  ;;  %v33401_v25 = vand.u32 4294901760, %v22004_v18 }
0x290b   :  { %28942 = vmatmul.mubr.f32.vlgmr.msra.gmra.mxu0 %v21019_v50  ;;  %28953 = vmatprep.subr.mxu0 %v33271_v43  ;;  %v21535_v8 = vand.u32 4294901760, %v21534_v27 }
0x290c   :  { %28967 = vmatpush3.msra.mxu1 %v33254_v52  ;;  %28954 = vmatpush3.msra.mxu0 %v33271_v43  ;;  %v21543_v13 = vand.u32 4294901760, %v21542_v30  ;;  %v33410_v43 = vand.u32 4294901760, %v33396_v12 }
0x290d   :  { %28959 = vmatprep.mubr.f32.mxu0 %v33265_v0  ;;  %28969 = vmatmul.mubr.f32.vlgmr.msra.gmra.mxu1 %v33292_v10  ;;  %v33398_v0 = vand.u32 4294901760, %v22005_v58 }
0x290e   :  { %28980 = vmatprep.subr.mxu1 %v33040_v16  ;;  %28955 = vmatprep.subr.mxu0 %v33277_v59  ;;  %v21544_v52 = vsub.f32 %v21542_v30, %v21543_v13  ;;  %v22134_v39 = vsub.f32 %v33396_v12, %v33410_v43 }
0x290f   :  { %28981 = vmatpush3.xpose.msra.mxu1 %v33040_v16  ;;  %28986 = vmatprep.mubr.f32.mxu1 %v33329_v4  ;;  %v33407_v5 = vsub.f32 %v22005_v58, %v33398_v0 }
0x2910   :  { %28956 = vmatpush3.msra.mxu0 %v33277_v59  ;;  %28982 = vmatprep.subr.mxu1 %v33043_v2  ;;  %v21545_v38 = vand.u32 4294901760, %v21544_v52  ;;  %v33415_v59 = vsub.f32 %v22004_v18, %v33401_v25 }
0x2911   :  { %28957 = vmatprep.subr.mxu0 %v33288_v55  ;;  %v33423_v24 = vand.u32 4294901760, %v33407_v5 }
0x2912   :  { %28958 = vmatpush3.msra.mxu0 %v33288_v55  ;;  %v33429_v45 = vand.u32 4294901760, %v33415_v59  ;;  %v22135_v55 = vand.u32 4294901760, %v22134_v39 }
0x2913   :  { %28960 = vmatmul.mubr.f32.vlgmr.msra.gmra.mxu0 %v33292_v10  ;;  %28971 = vmatprep.subr.mxu0 %v33014_v62  ;;  %v22141_v10 = vsub.f32 %v33407_v5, %v33423_v24 }
0x2914   :  { %28983 = vmatpush3.xpose.msra.mxu1 %v33043_v2  ;;  %28972 = vmatpush3.xpose.msra.mxu0 %v33014_v62  ;;  %v22148_v48 = vsub.f32 %v33415_v59, %v33429_v45 }
0x2915   :  { %28977 = vmatprep.mubr.f32.mxu0 %v21535_v8  ;;  %28984 = vmatprep.subr.mxu1 %v33051_v9  ;;  %v22142_v33 = vand.u32 4294901760, %v22141_v10 }
0x2916   :  { %28973 = vmatprep.subr.mxu0 %v33002_v60  ;;  %v22149_v7 = vand.u32 4294901760, %v22148_v48 }
0x2918   :  { %28985 = vmatpush3.xpose.msra.mxu1 %v33051_v9  ;;  %28974 = vmatpush3.xpose.msra.mxu0 %v33002_v60 }
0x2919   :  { %28998 = vmatprep.subr.mxu1 %v33014_v62  ;;  %28975 = vmatprep.subr.mxu0 %v33006_v36 }
0x291b   :  { %28987 = vmatmul.mubr.f32.vlgmr.msra.gmra.mxu1 %v33355_v49 }
0x291c   :  { %28999 = vmatpush3.xpose.msra.mxu1 %v33014_v62  ;;  %29004 = vmatprep.mubr.f32.mxu1 %v21533_v57 }
0x291d   :  { %28976 = vmatpush3.xpose.msra.mxu0 %v33006_v36  ;;  %29000 = vmatprep.subr.mxu1 %v33002_v60 }
0x291e   :  { %28989 = vmatprep.subr.mxu0 %v33023_v26 }
0x2920   :  { %28978 = vmatmul.mubr.f32.vlgmr.msra.gmra.mxu0 %v21545_v38  ;;  %29001 = vmatpush3.xpose.msra.mxu1 %v33002_v60 }
0x2921   :  { %28990 = vmatpush3.xpose.msra.mxu0 %v33023_v26  ;;  %28995 = vmatprep.mubr.f32.mxu0 %v21532_v32 }
0x2922   :  { %29002 = vmatprep.subr.mxu1 %v33006_v36  ;;  %28991 = vmatprep.subr.mxu0 %v33009_v15 }
0x2924   :  { %29003 = vmatpush3.xpose.msra.mxu1 %v33006_v36 }
0x2925   :  { %28992 = vmatpush3.xpose.msra.mxu0 %v33009_v15  ;;  %29016 = vmatprep.subr.mxu1 %v33014_v62 }
0x2926   :  { %28993 = vmatprep.subr.mxu0 %v33017_v28 }
0x2927   :  { %29005 = vmatmul.mubr.f32.vlgmr.msra.gmra.mxu1 %v21543_v13 }
0x2928   :  { %29017 = vmatpush3.xpose.msra.mxu1 %v33014_v62  ;;  %29022 = vmatprep.mubr.f32.mxu1 %v33329_v4 }
0x2929   :  { %28994 = vmatpush3.xpose.msra.mxu0 %v33017_v28  ;;  %29018 = vmatprep.subr.mxu1 %v33002_v60 }
0x292a   :  { %29007 = vmatprep.subr.mxu0 %v33028_v17 }
0x292c   :  { %28996 = vmatmul.mubr.f32.vlgmr.msra.gmra.mxu0 %v21542_v30  ;;  %29019 = vmatpush3.xpose.msra.mxu1 %v33002_v60 }
0x292d   :  { %29008 = vmatpush3.xpose.msra.mxu0 %v33028_v17  ;;  %29013 = vmatprep.mubr.f32.mxu0 %v33329_v4 }
0x292e   :  { %29020 = vmatprep.subr.mxu1 %v33006_v36  ;;  %29009 = vmatprep.subr.mxu0 %v33020_v41 }
0x2930   :  { %29021 = vmatpush3.xpose.msra.mxu1 %v33006_v36 }
0x2931   :  { %29010 = vmatpush3.xpose.msra.mxu0 %v33020_v41  ;;  %29034 = vmatprep.subr.mxu1 %v22135_v55 }
0x2932   :  { %29011 = vmatprep.subr.mxu0 %v33032_v6 }
0x2933   :  { %29023 = vmatmul.mubr.f32.vlgmr.msra.gmra.mxu1 %v33355_v49 }
0x2934   :  { %29035 = vmatpush3.msra.mxu1 %v22135_v55 }
0x2935   :  { %29012 = vmatpush3.xpose.msra.mxu0 %v33032_v6  ;;  %29036 = vmatprep.subr.mxu1 %v22142_v33 }
0x2936   :  { %29025 = vmatprep.subr.mxu0 %v33383_v51  ;;  %29037 = vmatpush3.msra.mxu1 %v22142_v33 }
0x2937   :  { %29038 = vmatprep.subr.mxu1 %v22149_v7 }
0x2938   :  { %29014 = vmatmul.mubr.f32.vlgmr.msra.gmra.mxu0 %v33355_v49  ;;  %29039 = vmatpush3.msra.mxu1 %v22149_v7 }
0x2939   :  { %29026 = vmatpush3.msra.mxu0 %v33383_v51  ;;  %29052 = vmatprep.subr.mxu1 %v33383_v51 }
0x293a   :  { %29027 = vmatprep.subr.mxu0 %v33398_v0 }
0x293b   :  { %29028 = vmatpush3.msra.mxu0 %v33398_v0 }
0x293c   :  { %29029 = vmatprep.subr.mxu0 %v33401_v25 }
0x293d   :  { %29030 = vmatpush3.msra.mxu0 %v33401_v25 }
0x293e   :  { %29043 = vmatprep.subr.mxu0 %v33396_v12 }
0x29a6   :  { %v28880_v34 = vpop.f32.mrf.mxu1 }
0x29a8   :  { %v20586_v22 = vpop.f32.mrf.mxu1 }
0x29ac   :  { %v28871_v50 = vpop.f32.mrf.mxu0  ;;  %v28898_v11 = vpop.f32.mrf.mxu1 }
0x29ad   :  { %v20593_v31 = vadd.f32 %v28880_v34, %v28871_v50 }
0x29ae   :  { %v20490_v63 = vpop.f32.mrf.mxu0  ;;  %v20753_v32 = vpop.f32.mrf.mxu1 }
0x29af   :  { %v20587_v44 = vadd.f32 %v20586_v22, %v20490_v63 }
0x29b3   :  { %v28889_v46 = vpop.f32.mrf.mxu0 }
0x29b4   :  { %v20678_v54 = vadd.f32 %v28889_v46, %v20593_v31 }
0x29b5   :  { %v20670_v47 = vpop.f32.mrf.mxu0  ;;  %v28916_v53 = vpop.f32.mrf.mxu1 }
0x29b6   :  { %v20671_v20 = vadd.f32 %v20670_v47, %v20587_v44  ;;  %v20762_v4 = vadd.f32 %v28898_v11, %v20678_v54 }
0x29b7   :  { %v20921_v13 = vpop.f32.mrf.mxu1 }
0x29b8   :  { %v20754_v3 = vadd.f32 %v20753_v32, %v20671_v20 }
0x29bb   :  { %v28907_v57 = vpop.f32.mrf.mxu0 }
0x29bc   :  { %v20848_v49 = vadd.f32 %v28907_v57, %v20762_v4 }
0x29bd   :  { %v20841_v27 = vpop.f32.mrf.mxu0  ;;  %v28934_v52 = vpop.f32.mrf.mxu1 }
0x29be   :  { %v20842_v30 = vadd.f32 %v20841_v27, %v20754_v3  ;;  %v20928_v8 = vadd.f32 %v28916_v53, %v20848_v49 }
0x29bf   :  { %v21110_v55 = vpop.f32.mrf.mxu1 }
0x29c0   :  { %v20922_v29 = vadd.f32 %v20921_v13, %v20842_v30 }
0x29c3   :  { %v28925_v19 = vpop.f32.mrf.mxu0 }
0x29c4   :  { %v21025_v38 = vadd.f32 %v28925_v19, %v20928_v8 }
0x29c5   :  { %v21014_v58 = vpop.f32.mrf.mxu0  ;;  %v28952_v48 = vpop.f32.mrf.mxu1 }
0x29c6   :  { %v21015_v18 = vadd.f32 %v21014_v58, %v20922_v29  ;;  %v21117_v39 = vadd.f32 %v28934_v52, %v21025_v38 }
0x29c7   :  { %v21277_v22 = vpop.f32.mrf.mxu1 }
0x29c8   :  { %v21111_v10 = vadd.f32 %v21110_v55, %v21015_v18 }
0x29cb   :  { %v28943_v33 = vpop.f32.mrf.mxu0 }
0x29cc   :  { %v21202_v7 = vadd.f32 %v28943_v33, %v21117_v39 }
0x29cd   :  { %v21194_v34 = vpop.f32.mrf.mxu0  ;;  %v28970_v44 = vpop.f32.mrf.mxu1 }
0x29ce   :  { %v21195_v50 = vadd.f32 %v21194_v34, %v21111_v10  ;;  %v21286_v31 = vadd.f32 %v28952_v48, %v21202_v7 }
0x29cf   :  { %v21445_v4 = vpop.f32.mrf.mxu1 }
0x29d0   :  { %v21278_v63 = vadd.f32 %v21277_v22, %v21195_v50 }
0x29d3   :  { %v28961_v11 = vpop.f32.mrf.mxu0 }
0x29d4   :  { %v21372_v46 = vadd.f32 %v28961_v11, %v21286_v31 }
0x29d5   :  { %v21365_v54 = vpop.f32.mrf.mxu0 }
0x29d6   :  { %v33451_v47 = vadd.f32 %v28970_v44, %v21372_v46  ;;  %v21366_v20 = vadd.f32 %v21365_v54, %v21278_v63 }
0x29d8   :  { %v33453_v32 = vadd.f32 %v21445_v4, %v21366_v20 }
0x29db   :  { %v28988_v53 = vpop.f32.mrf.mxu1 }
0x29dd   :  { %v21633_v27 = vpop.f32.mrf.mxu1 }
0x29e0   :  { %v28979_v3 = vpop.f32.mrf.mxu0 }
0x29e1   :  { %v21640_v30 = vadd.f32 %v28988_v53, %v28979_v3 }
0x29e2   :  { %v21537_v57 = vpop.f32.mrf.mxu0 }
0x29e3   :  { %v21634_v29 = vadd.f32 %v21633_v27, %v21537_v57 }
0x29e7   :  { %v29006_v8 = vpop.f32.mrf.mxu1 }
0x29e9   :  { %v21800_v38 = vpop.f32.mrf.mxu1 }
0x29ec   :  { %v28997_v49 = vpop.f32.mrf.mxu0 }
0x29ed   :  { %v21725_v52 = vadd.f32 %v28997_v49, %v21640_v30 }
0x29ee   :  { %v21717_v13 = vpop.f32.mrf.mxu0 }
0x29ef   :  { %v21718_v19 = vadd.f32 %v21717_v13, %v21634_v29  ;;  %v21809_v58 = vadd.f32 %v29006_v8, %v21725_v52 }
0x29f1   :  { %v21801_v10 = vadd.f32 %v21800_v38, %v21718_v19 }
0x29f3   :  { %v29024_v18 = vpop.f32.mrf.mxu1 }
0x29f5   :  { %v21968_v34 = vpop.f32.mrf.mxu1 }
0x29f8   :  { %v29015_v39 = vpop.f32.mrf.mxu0 }
0x29f9   :  { %v21895_v55 = vadd.f32 %v29015_v39, %v21809_v58 }
0x29fa   :  { %v21888_v48 = vpop.f32.mrf.mxu0 }
0x29fb   :  { %v21975_v33 = vadd.f32 %v29024_v18, %v21895_v55  ;;  %v21889_v7 = vadd.f32 %v21888_v48, %v21801_v10 }
0x29fd   :  { %v21979_v50 = vmul.f32 0.35355338, %v21975_v33  ;;  %v21969_v31 = vadd.f32 %v21968_v34, %v21889_v7  ;;  %v22533_v7 = vsel %vm30261_vm2, %v32969_v14, 0.0 }
0x29ff   :  { %v21978_v22 = vmul.f32 0.35355338, %v21969_v31  ;;  %v21981_v63 = vsel %vm29983_vm10, %v21979_v50, -1e+09 }
0x2a00   :  { %v21985_v44 = vsel %vm7247_vm5, %v21981_v63, -inf }
0x2a01   :  { %21986 = vmax.xlane.f32.xlu0 %v21985_v44  ;;  %v21980_v11 = vsel %vm29979_vm8, %v21978_v22, -1e+09 }
0x2a02   :  { %v21982_v46 = vsel %vm7247_vm5, %v21980_v11, -inf }
0x2a03   :  { %21983 = vmax.xlane.f32.xlu1 %v21982_v46 }
0x2a8a   :  { %v21987_v54 = vpop.xlane.xlu0 %21986 }
0x2a8b   :  { %v21989_v20 = vsub.f32 %v21981_v63, %v21987_v54  ;;  %v22536_v63 = vsel %vm164_vm0, %v22533_v7, 0  ;;  %v22534_v54 = vsel %vm30261_vm2, %v32986_v1, 0.0 }
0x2a8c   :  { %v21984_v4 = vpop.xlane.xlu1 %21983  ;;  %v33474_v14 = vand.u32 4294901760, %v22536_v63 }
0x2a8d   :  { %v21988_v3 = vsub.f32 %v21980_v11, %v21984_v4  ;;  %v21992_v53 = vmul.f32 1.442695, %v21989_v20 }
0x2a8e   :  { %v22610_v46 = vsub.f32 %v22536_v63, %v33474_v14 }
0x2a8f   :  { %v21990_v57 = vmul.f32 1.442695, %v21988_v3 }
0x2a91   :  { %29579 = vpow2.f32 %v21990_v57 }
0x2a92   :  { %29581 = vpow2.f32 %v21992_v53 }
0x2a9e   :  { %v29580_v49 = vpop.eup %29579 }
0x2a9f   :  { %v21994_v27 = vsel %vm7247_vm5, %v29580_v49, 0.0  ;;  %v29582_v30 = vpop.eup %29581 }
0x2aa0   :  { %21995 = vadd.xlane.f32.xlu0 %v21994_v27  ;;  %v21997_v8 = vsel %vm7247_vm5, %v29582_v30, 0.0 }
0x2aa4   :  { %21998 = vadd.xlane.f32.xlu0 %v21997_v8 }
0x2b29   :  { %v21996_v13 = vpop.xlane.xlu0 %21995 }
0x2b2a   :  { %29583 = vrcp.f32 %v21996_v13 }
0x2b2d   :  { %v21999_v29 = vpop.xlane.xlu0 %21998 }
0x2b2e   :  { %29585 = vrcp.f32 %v21999_v29 }
0x2b37   :  { %v29584_v52 = vpop.eup %29583 }
0x2b38   :  { %v22002_v19 = vmul.f32 %v29584_v52, %v29580_v49 }
0x2b3a   :  { %v22008_v38 = vsel %vm7247_vm5, %v22002_v19, 0 }
0x2b3b   :  { %v29586_v58 = vpop.eup %29585  ;;  %v22084_v18 = vand.u32 4294901760, %v22008_v38 }
0x2b3c   :  { %v22003_v39 = vmul.f32 %v29586_v58, %v29582_v30 }
0x2b3d   :  { %29040 = vmatprep.mubr.f32.mxu1 %v22084_v18  ;;  %v22085_v55 = vsub.f32 %v22008_v38, %v22084_v18 }
0x2b3e   :  { %v22011_v10 = vsel %vm7247_vm5, %v22003_v39, 0 }
0x2b3f   :  { %v22094_v48 = vand.u32 4294901760, %v22011_v10  ;;  %v22086_v33 = vand.u32 4294901760, %v22085_v55 }
0x2b41   :  { %v22095_v34 = vsub.f32 %v22011_v10, %v22094_v48  ;;  %29041 = vmatmul.mubr.f32.vlgmr.msra.gmra.mxu1 %v22094_v48  ;;  %v22087_v50 = vsub.f32 %v22085_v55, %v22086_v33 }
0x2b42   :  { %29053 = vmatpush3.msra.mxu1 %v33383_v51  ;;  %29058 = vmatprep.mubr.f32.mxu1 %v22086_v33 }
0x2b43   :  { %29054 = vmatprep.subr.mxu1 %v33398_v0  ;;  %v22088_v31 = vand.u32 4294901760, %v22087_v50  ;;  %v22096_v22 = vand.u32 4294901760, %v22095_v34 }
0x2b44   :  { %29055 = vmatpush3.msra.mxu1 %v33398_v0 }
0x2b45   :  { %29056 = vmatprep.subr.mxu1 %v33401_v25  ;;  %29031 = vmatprep.mubr.f32.mxu0 %v22088_v31  ;;  %v22097_v44 = vsub.f32 %v22095_v34, %v22096_v22 }
0x2b46   :  { %29057 = vmatpush3.msra.mxu1 %v33401_v25 }
0x2b47   :  { %29059 = vmatmul.mubr.f32.vlgmr.msra.gmra.mxu1 %v22096_v22  ;;  %29070 = vmatprep.subr.mxu1 %v33383_v51  ;;  %v22098_v11 = vand.u32 4294901760, %v22097_v44 }
0x2b48   :  { %29071 = vmatpush3.msra.mxu1 %v33383_v51  ;;  %29076 = vmatprep.mubr.f32.mxu1 %v22084_v18  ;;  %v22539_v51 = vsel %vm164_vm0, %v22534_v54, 0 }
0x2b49   :  { %29072 = vmatprep.subr.mxu1 %v33398_v0  ;;  %29032 = vmatmul.mubr.f32.vlgmr.msra.gmra.mxu0 %v22098_v11  ;;  %v33497_v1 = vand.u32 4294901760, %v22539_v51 }
0x2b4a   :  { %29044 = vmatpush3.msra.mxu0 %v33396_v12  ;;  %29073 = vmatpush3.msra.mxu1 %v33398_v0  ;;  %v22611_v12 = vand.u32 4294901760, %v22610_v46 }
0x2b4b   :  { %29045 = vmatprep.subr.mxu0 %v33407_v5  ;;  %29049 = vmatprep.mubr.f32.mxu0 %v22085_v55 }
0x2b4c   :  { %29074 = vmatprep.subr.mxu1 %v33401_v25  ;;  %29046 = vmatpush3.msra.mxu0 %v33407_v5  ;;  %v22612_v0 = vsub.f32 %v22610_v46, %v22611_v12  ;;  %v23084_v5 = vsel %vm30261_vm2, %v33171_v42, 0.0  ;;  %v23083_v42 = vsel %vm30261_vm2, %v33179_v61, 0.0 }
0x2b4d   :  { %29075 = vmatpush3.msra.mxu1 %v33401_v25  ;;  %29047 = vmatprep.subr.mxu0 %v33415_v59  ;;  %v33536_v4 = vand.u32 4294901760, %v23083_v42 }
0x2b4e   :  { %29077 = vmatmul.mubr.f32.vlgmr.msra.gmra.mxu1 %v22094_v48  ;;  %29088 = vmatprep.subr.mxu1 %v33040_v16  ;;  %v22613_v25 = vand.u32 4294901760, %v22612_v0 }
0x2b4f   :  { %29048 = vmatpush3.msra.mxu0 %v33415_v59  ;;  %29089 = vmatpush3.xpose.msra.mxu1 %v33040_v16  ;;  %v22620_v16 = vsub.f32 %v22539_v51, %v33497_v1  ;;  %v33545_v37 = vsub.f32 %v23083_v42, %v33536_v4 }
0x2b50   :  { %29094 = vmatprep.mubr.f32.mxu1 %v33474_v14  ;;  %29050 = vmatmul.mubr.f32.vlgmr.msra.gmra.mxu0 %v22095_v34 }
0x2b51   :  { %29061 = vmatprep.subr.mxu0 %v33410_v43  ;;  %29090 = vmatprep.subr.mxu1 %v33043_v2 }
0x2b52   :  { %29062 = vmatpush3.msra.mxu0 %v33410_v43  ;;  %29067 = vmatprep.mubr.f32.mxu0 %v22084_v18  ;;  %v23092_v43 = vsel %vm7840_vm11, %v23084_v5, 0 }
0x2b53   :  { %29063 = vmatprep.subr.mxu0 %v33423_v24  ;;  %29091 = vmatpush3.xpose.msra.mxu1 %v33043_v2  ;;  %v22621_v2 = vand.u32 4294901760, %v22620_v16 }
0x2b54   :  { %29064 = vmatpush3.msra.mxu0 %v33423_v24  ;;  %29092 = vmatprep.subr.mxu1 %v33051_v9 }
0x2b55   :  { %29065 = vmatprep.subr.mxu0 %v33429_v45  ;;  %v22622_v59 = vsub.f32 %v22620_v16, %v22621_v2 }
0x2b56   :  { %29066 = vmatpush3.msra.mxu0 %v33429_v45  ;;  %v23082_v45 = vsel %vm30261_vm2, %v33194_v56, 0.0 }
0x2b57   :  { %29068 = vmatmul.mubr.f32.vlgmr.msra.gmra.mxu0 %v22094_v48  ;;  %29079 = vmatprep.subr.mxu0 %v33014_v62  ;;  %v22623_v24 = vand.u32 4294901760, %v22622_v59  ;;  %v33541_v61 = vand.u32 4294901760, %v23082_v45 }
0x2b58   :  { %29080 = vmatpush3.xpose.msra.mxu0 %v33014_v62  ;;  %29085 = vmatprep.mubr.f32.mxu0 %v22613_v25 }
0x2b59   :  { %29093 = vmatpush3.xpose.msra.mxu1 %v33051_v9  ;;  %29081 = vmatprep.subr.mxu0 %v33002_v60  ;;  %v33521_v9 = vand.u32 4294901760, %v23092_v43 }
0x2b5a   :  { %29106 = vmatprep.subr.mxu1 %v33014_v62 }
0x2b5b   :  { %v33534_v20 = vsub.f32 %v23092_v43, %v33521_v9 }
0x2b5c   :  { %29095 = vmatmul.mubr.f32.vlgmr.msra.gmra.mxu1 %v33497_v1  ;;  %29082 = vmatpush3.xpose.msra.mxu0 %v33002_v60 }
0x2b5d   :  { %29107 = vmatpush3.xpose.msra.mxu1 %v33014_v62  ;;  %29112 = vmatprep.mubr.f32.mxu1 %v22611_v12  ;;  %v33549_v56 = vand.u32 4294901760, %v33534_v20 }
0x2b5e   :  { %29083 = vmatprep.subr.mxu0 %v33006_v36  ;;  %29108 = vmatprep.subr.mxu1 %v33002_v60 }
0x2b5f   :  { %v23212_v3 = vsub.f32 %v33534_v20, %v33549_v56 }
0x2b60   :  { %29084 = vmatpush3.xpose.msra.mxu0 %v33006_v36 }
0x2b61   :  { %29109 = vmatpush3.xpose.msra.mxu1 %v33002_v60  ;;  %29097 = vmatprep.subr.mxu0 %v33023_v26 }
0x2b62   :  { %29110 = vmatprep.subr.mxu1 %v33006_v36 }
0x2b63   :  { %29086 = vmatmul.mubr.f32.vlgmr.msra.gmra.mxu0 %v22623_v24 }
0x2b64   :  { %29098 = vmatpush3.xpose.msra.mxu0 %v33023_v26  ;;  %29103 = vmatprep.mubr.f32.mxu0 %v22610_v46  ;;  %v33554_v26 = vsub.f32 %v23082_v45, %v33541_v61 }
0x2b65   :  { %29111 = vmatpush3.xpose.msra.mxu1 %v33006_v36  ;;  %29099 = vmatprep.subr.mxu0 %v33009_v15 }
0x2b66   :  { %29124 = vmatprep.subr.mxu1 %v33014_v62 }
0x2b68   :  { %29113 = vmatmul.mubr.f32.vlgmr.msra.gmra.mxu1 %v22621_v2  ;;  %29100 = vmatpush3.xpose.msra.mxu0 %v33009_v15  ;;  %v33562_v15 = vand.u32 4294901760, %v33545_v37 }
0x2b69   :  { %29125 = vmatpush3.xpose.msra.mxu1 %v33014_v62  ;;  %29130 = vmatprep.mubr.f32.mxu1 %v33474_v14  ;;  %v33568_v62 = vand.u32 4294901760, %v33554_v26 }
0x2b6a   :  { %29101 = vmatprep.subr.mxu0 %v33017_v28  ;;  %29126 = vmatprep.subr.mxu1 %v33002_v60  ;;  %v23219_v53 = vsub.f32 %v33545_v37, %v33562_v15 }
0x2b6c   :  { %29102 = vmatpush3.xpose.msra.mxu0 %v33017_v28  ;;  %v23213_v28 = vand.u32 4294901760, %v23212_v3  ;;  %v23220_v57 = vand.u32 4294901760, %v23219_v53 }
0x2b6d   :  { %29127 = vmatpush3.xpose.msra.mxu1 %v33002_v60  ;;  %29115 = vmatprep.subr.mxu0 %v33028_v17  ;;  %v23226_v60 = vsub.f32 %v33554_v26, %v33568_v62 }
0x2b6e   :  { %29128 = vmatprep.subr.mxu1 %v33006_v36 }
0x2b6f   :  { %29104 = vmatmul.mubr.f32.vlgmr.msra.gmra.mxu0 %v22620_v16 }
0x2b70   :  { %29116 = vmatpush3.xpose.msra.mxu0 %v33028_v17  ;;  %29121 = vmatprep.mubr.f32.mxu0 %v33474_v14  ;;  %v23227_v17 = vand.u32 4294901760, %v23226_v60 }
0x2b71   :  { %29129 = vmatpush3.xpose.msra.mxu1 %v33006_v36  ;;  %29117 = vmatprep.subr.mxu0 %v33020_v41 }
0x2b72   :  { %29142 = vmatprep.subr.mxu1 %v23213_v28 }
0x2b74   :  { %29131 = vmatmul.mubr.f32.vlgmr.msra.gmra.mxu1 %v33497_v1  ;;  %29118 = vmatpush3.xpose.msra.mxu0 %v33020_v41 }
0x2b75   :  { %29143 = vmatpush3.msra.mxu1 %v23213_v28  ;;  %29119 = vmatprep.subr.mxu0 %v33032_v6 }
0x2b76   :  { %29144 = vmatprep.subr.mxu1 %v23220_v57 }
0x2b77   :  { %29145 = vmatpush3.msra.mxu1 %v23220_v57 }
0x2b78   :  { %29146 = vmatprep.subr.mxu1 %v23227_v17  ;;  %29120 = vmatpush3.xpose.msra.mxu0 %v33032_v6 }
0x2b79   :  { %29147 = vmatpush3.msra.mxu1 %v23227_v17  ;;  %29133 = vmatprep.subr.mxu0 %v33521_v9 }
0x2b7a   :  { %29160 = vmatprep.subr.mxu1 %v33521_v9 }
0x2b7b   :  { %29122 = vmatmul.mubr.f32.vlgmr.msra.gmra.mxu0 %v33497_v1 }
0x2b7c   :  { %29134 = vmatpush3.msra.mxu0 %v33521_v9 }
0x2b7d   :  { %29135 = vmatprep.subr.mxu0 %v33536_v4 }
0x2b7e   :  { %29136 = vmatpush3.msra.mxu0 %v33536_v4 }
0x2b7f   :  { %29137 = vmatprep.subr.mxu0 %v33541_v61 }
0x2b80   :  { %29138 = vmatpush3.msra.mxu0 %v33541_v61 }
0x2b81   :  { %29151 = vmatprep.subr.mxu0 %v33534_v20 }
0x2c01   :  { %v29042_v36 = vpop.f32.mrf.mxu1 }
0x2c03   :  { %v22186_v49 = vpop.f32.mrf.mxu1 }
0x2c07   :  { %v29060_v8 = vpop.f32.mrf.mxu1 }
0x2c09   :  { %v29033_v41 = vpop.f32.mrf.mxu0  ;;  %v22353_v58 = vpop.f32.mrf.mxu1 }
0x2c0a   :  { %v22193_v6 = vadd.f32 %v29042_v36, %v29033_v41 }
0x2c0b   :  { %v22090_v27 = vpop.f32.mrf.mxu0 }
0x2c0c   :  { %v22187_v30 = vadd.f32 %v22186_v49, %v22090_v27 }
0x2c0e   :  { %v29078_v39 = vpop.f32.mrf.mxu1 }
0x2c10   :  { %v29051_v13 = vpop.f32.mrf.mxu0  ;;  %v22521_v34 = vpop.f32.mrf.mxu1 }
0x2c11   :  { %v22278_v29 = vadd.f32 %v29051_v13, %v22193_v6 }
0x2c12   :  { %v22270_v52 = vpop.f32.mrf.mxu0 }
0x2c13   :  { %v22271_v19 = vadd.f32 %v22270_v52, %v22187_v30  ;;  %v22362_v38 = vadd.f32 %v29060_v8, %v22278_v29 }
0x2c15   :  { %v22354_v18 = vadd.f32 %v22353_v58, %v22271_v19  ;;  %v29617_v19 = vld [vmem:[%s34065_s5 + $0x70] sm:$0xff]  ;;  %v29619_v58 = vld [vmem:[%s34065_s5 + $0x60] sm:$0xff] }
0x2c17   :  { %v29069_v55 = vpop.f32.mrf.mxu0 }
0x2c18   :  { %v22448_v10 = vadd.f32 %v29069_v55, %v22362_v38  ;;  %v29618_v38 = vld [vmem:[%s34065_s5 + $0x68] sm:$0xff] }
0x2c19   :  { %v22441_v48 = vpop.f32.mrf.mxu0 }
0x2c1a   :  { %v22528_v33 = vadd.f32 %v29078_v39, %v22448_v10  ;;  %v22442_v7 = vadd.f32 %v22441_v48, %v22354_v18  ;;  %v29620_v18 = vld [vmem:[%s34066_s6 + $0x3] ss:$0 sm:$0xff] }
0x2c1c   :  { %v33592_v50 = vadd.f32 %v22528_v33, %v33451_v47  ;;  %v22522_v31 = vadd.f32 %v22521_v34, %v22442_v7  ;;  %v29096_v44 = vpop.f32.mrf.mxu1 }
0x2c1e   :  { %v33595_v22 = vadd.f32 %v22522_v31, %v33453_v32  ;;  %v22711_v46 = vpop.f32.mrf.mxu1 }
0x2c23   :  { %v29087_v63 = vpop.f32.mrf.mxu0 }
0x2c24   :  { %v22718_v54 = vadd.f32 %v29096_v44, %v29087_v63 }
0x2c25   :  { %v22615_v14 = vpop.f32.mrf.mxu0 }
0x2c26   :  { %v22712_v1 = vadd.f32 %v22711_v46, %v22615_v14 }
0x2c28   :  { %v29114_v51 = vpop.f32.mrf.mxu1 }
0x2c2a   :  { %v22878_v25 = vpop.f32.mrf.mxu1 }
0x2c2f   :  { %v29105_v11 = vpop.f32.mrf.mxu0 }
0x2c30   :  { %v22803_v0 = vadd.f32 %v29105_v11, %v22718_v54 }
0x2c31   :  { %v22795_v12 = vpop.f32.mrf.mxu0 }
0x2c32   :  { %v22796_v16 = vadd.f32 %v22795_v12, %v22712_v1  ;;  %v22887_v2 = vadd.f32 %v29114_v51, %v22803_v0 }
0x2c34   :  { %v29132_v5 = vpop.f32.mrf.mxu1  ;;  %v22879_v59 = vadd.f32 %v22878_v25, %v22796_v16 }
0x2c36   :  { %v23046_v45 = vpop.f32.mrf.mxu1 }
0x2c3b   :  { %v29123_v47 = vpop.f32.mrf.mxu0 }
0x2c3c   :  { %v22973_v43 = vadd.f32 %v29123_v47, %v22887_v2 }
0x2c3d   :  { %v22966_v42 = vpop.f32.mrf.mxu0 }
0x2c3e   :  { %v23053_v32 = vadd.f32 %v29132_v5, %v22973_v43  ;;  %v22967_v24 = vadd.f32 %v22966_v42, %v22879_v59 }
0x2c40   :  { %v23057_v3 = vmul.f32 0.35355338, %v23053_v32  ;;  %v23047_v28 = vadd.f32 %v23046_v45, %v22967_v24 }
0x2c42   :  { %v23056_v53 = vmul.f32 0.35355338, %v23047_v28  ;;  %v23059_v60 = vsel %vm29983_vm10, %v23057_v3, -1e+09 }
0x2c43   :  { %v23063_v57 = vsel %vm7247_vm5, %v23059_v60, -inf }
0x2c44   :  { %23064 = vmax.xlane.f32.xlu0 %v23063_v57  ;;  %v23058_v17 = vsel %vm29979_vm8, %v23056_v53, -1e+09 }
0x2c45   :  { %v23060_v36 = vsel %vm7247_vm5, %v23058_v17, -inf }
0x2c46   :  { %23061 = vmax.xlane.f32.xlu1 %v23060_v36 }
0x2ccd   :  { %v23065_v41 = vpop.xlane.xlu0 %23064 }
0x2cce   :  { %v23067_v6 = vsub.f32 %v23059_v60, %v23065_v41 }
0x2ccf   :  { %v23062_v49 = vpop.xlane.xlu1 %23061 }
0x2cd0   :  { %v23070_v27 = vmul.f32 1.442695, %v23067_v6  ;;  %v23066_v30 = vsub.f32 %v23058_v17, %v23062_v49 }
0x2cd2   :  { %29587 = vpow2.f32 %v23070_v27  ;;  %v23068_v8 = vmul.f32 1.442695, %v23066_v30 }
0x2cd4   :  { %29589 = vpow2.f32 %v23068_v8 }
0x2cdf   :  { %v29588_v13 = vpop.eup %29587 }
0x2ce0   :  { %v23075_v23 = vsel %vm7247_vm5, %v29588_v13, 0.0 }
0x2ce1   :  { %v29590_v29 = vpop.eup %29589  ;;  %23076 = vadd.xlane.f32.xlu0 %v23075_v23 }
0x2ce2   :  { %v23072_v52 = vsel %vm7247_vm5, %v29590_v29, 0.0 }
0x2ce3   :  { %23073 = vadd.xlane.f32.xlu1 %v23072_v52 }
0x2cf4   :  { %23617 = vrot.lane.b32.xlu1 %v29616_v21, %s29647_s25 }
0x2cf7   :  { %23615 = vrot.lane.b32.xlu0 %v29617_v19, %s29647_s25 }
0x2cf8   :  { %23613 = vrot.lane.b32.xlu1 %v29618_v38, %s29647_s25 }
0x2cfc   :  { %23611 = vrot.lane.b32.xlu1 %v29619_v58, %s29647_s25 }
0x2d00   :  { %24159 = vrot.lane.b32.xlu1 %v29620_v18, %s29647_s25 }
0x2d6a   :  { %v23077_v39 = vpop.xlane.xlu0 %23076 }
0x2d6b   :  { %29591 = vrcp.f32 %v23077_v39 }
0x2d6c   :  { %v23074_v55 = vpop.xlane.xlu1 %23073 }
0x2d6d   :  { %29593 = vrcp.f32 %v23074_v55 }
0x2d78   :  { %v29592_v10 = vpop.eup %29591 }
0x2d79   :  { %v23081_v48 = vmul.f32 %v29592_v10, %v29588_v13 }
0x2d7a   :  { %v29594_v33 = vpop.eup %29593 }
0x2d7b   :  { %v23080_v7 = vmul.f32 %v29594_v33, %v29590_v29  ;;  %v23089_v34 = vsel %vm7247_vm5, %v23081_v48, 0 }
0x2d7c   :  { %v23172_v31 = vand.u32 4294901760, %v23089_v34 }
0x2d7d   :  { %v23086_v63 = vsel %vm7247_vm5, %v23080_v7, 0 }
0x2d7e   :  { %v23162_v44 = vand.u32 4294901760, %v23086_v63  ;;  %v23173_v14 = vsub.f32 %v23089_v34, %v23172_v31 }
0x2d80   :  { %29148 = vmatprep.mubr.f32.mxu1 %v23162_v44  ;;  %v23163_v11 = vsub.f32 %v23086_v63, %v23162_v44  ;;  %v23174_v46 = vand.u32 4294901760, %v23173_v14 }
0x2d81   :  { %29149 = vmatmul.mubr.f32.vlgmr.msra.gmra.mxu1 %v23172_v31 }
0x2d82   :  { %29161 = vmatpush3.msra.mxu1 %v33521_v9  ;;  %v23164_v54 = vand.u32 4294901760, %v23163_v11  ;;  %v23175_v12 = vsub.f32 %v23173_v14, %v23174_v46 }
0x2d83   :  { %29162 = vmatprep.subr.mxu1 %v33536_v4 }
0x2d84   :  { %29163 = vmatpush3.msra.mxu1 %v33536_v4  ;;  %29166 = vmatprep.mubr.f32.mxu1 %v23164_v54  ;;  %v23165_v51 = vsub.f32 %v23163_v11, %v23164_v54  ;;  %v23176_v0 = vand.u32 4294901760, %v23175_v12 }
0x2d85   :  { %29164 = vmatprep.subr.mxu1 %v33541_v61 }
0x2d86   :  { %29165 = vmatpush3.msra.mxu1 %v33541_v61  ;;  %v23166_v1 = vand.u32 4294901760, %v23165_v51 }
0x2d87   :  { %29167 = vmatmul.mubr.f32.vlgmr.msra.gmra.mxu1 %v23174_v46  ;;  %29178 = vmatprep.subr.mxu1 %v33521_v9 }
0x2d88   :  { %29179 = vmatpush3.msra.mxu1 %v33521_v9  ;;  %29184 = vmatprep.mubr.f32.mxu1 %v23162_v44  ;;  %v23618_v9 = vpop.permute.xlu1 %23617 }
0x2d89   :  { %29139 = vmatprep.mubr.f32.mxu0 %v23166_v1  ;;  %29180 = vmatprep.subr.mxu1 %v33536_v4 }
0x2d8a   :  { %29140 = vmatmul.mubr.f32.vlgmr.msra.gmra.mxu0 %v23176_v0  ;;  %29181 = vmatpush3.msra.mxu1 %v33536_v4  ;;  %v23616_v4 = vpop.permute.xlu0 %23615 }
0x2d8b   :  { %29152 = vmatpush3.msra.mxu0 %v33534_v20  ;;  %29157 = vmatprep.mubr.f32.mxu0 %v23163_v11  ;;  %v33649_v20 = vand.u32 4294901760, %v23618_v9 }
0x2d8c   :  { %29153 = vmatprep.subr.mxu0 %v33545_v37  ;;  %29182 = vmatprep.subr.mxu1 %v33541_v61 }
0x2d8d   :  { %29154 = vmatpush3.msra.mxu0 %v33545_v37  ;;  %29183 = vmatpush3.msra.mxu1 %v33541_v61  ;;  %v33654_v61 = vsub.f32 %v23618_v9, %v33649_v20  ;;  %v33656_v37 = vand.u32 4294901760, %v23616_v4 }
0x2d8e   :  { %29155 = vmatprep.subr.mxu0 %v33554_v26  ;;  %29185 = vmatmul.mubr.f32.vlgmr.msra.gmra.mxu1 %v23172_v31 }
0x2d8f   :  { %29156 = vmatpush3.msra.mxu0 %v33554_v26  ;;  %v33659_v26 = vsub.f32 %v23616_v4, %v33656_v37  ;;  %v33669_v16 = vand.u32 4294901760, %v33654_v61 }
0x2d90   :  { %29158 = vmatmul.mubr.f32.vlgmr.msra.gmra.mxu0 %v23173_v14  ;;  %29169 = vmatprep.subr.mxu0 %v33549_v56 }
0x2d91   :  { %29170 = vmatpush3.msra.mxu0 %v33549_v56  ;;  %29175 = vmatprep.mubr.f32.mxu0 %v23162_v44  ;;  %v23614_v56 = vpop.permute.xlu1 %23613  ;;  %v23746_v5 = vsub.f32 %v33654_v61, %v33669_v16  ;;  %v33678_v47 = vand.u32 4294901760, %v33659_v26 }
0x2d92   :  { %29171 = vmatprep.subr.mxu0 %v33562_v15 }
0x2d93   :  { %29172 = vmatpush3.msra.mxu0 %v33562_v15  ;;  %v33661_v15 = vand.u32 4294901760, %v23614_v56  ;;  %v23747_v59 = vand.u32 4294901760, %v23746_v5  ;;  %v23753_v42 = vsub.f32 %v33659_v26, %v33678_v47 }
0x2d94   :  { %29173 = vmatprep.subr.mxu0 %v33568_v62 }
0x2d95   :  { %29174 = vmatpush3.msra.mxu0 %v33568_v62  ;;  %v33666_v62 = vsub.f32 %v23614_v56, %v33661_v15  ;;  %v23612_v25 = vpop.permute.xlu1 %23611  ;;  %29198 = vmatprep.subr.mxu1 %v23747_v59  ;;  %v23754_v24 = vand.u32 4294901760, %v23753_v42 }
0x2d96   :  { %29176 = vmatmul.mubr.f32.vlgmr.msra.gmra.mxu0 %v23172_v31  ;;  %29187 = vmatprep.subr.mxu0 %v33649_v20  ;;  %v33673_v2 = vand.u32 4294901760, %v23612_v25 }
0x2d97   :  { %29188 = vmatpush3.msra.mxu0 %v33649_v20  ;;  %v33686_v32 = vand.u32 4294901760, %v33666_v62  ;;  %29199 = vmatpush3.msra.mxu1 %v23747_v59 }
0x2d98   :  { %29189 = vmatprep.subr.mxu0 %v33656_v37  ;;  %v33681_v43 = vsub.f32 %v23612_v25, %v33673_v2  ;;  %29200 = vmatprep.subr.mxu1 %v23754_v24 }
0x2d99   :  { %29190 = vmatpush3.msra.mxu0 %v33656_v37  ;;  %v23760_v45 = vsub.f32 %v33666_v62, %v33686_v32  ;;  %29201 = vmatpush3.msra.mxu1 %v23754_v24 }
0x2d9a   :  { %29191 = vmatprep.subr.mxu0 %v33661_v15  ;;  %v33693_v3 = vand.u32 4294901760, %v33681_v43 }
0x2d9b   :  { %29192 = vmatpush3.msra.mxu0 %v33661_v15  ;;  %v23761_v28 = vand.u32 4294901760, %v23760_v45  ;;  %v24160_v45 = vpop.permute.xlu1 %24159 }
0x2d9c   :  { %29193 = vmatprep.subr.mxu0 %v33673_v2  ;;  %v23767_v53 = vsub.f32 %v33681_v43, %v33693_v3 }
0x2d9d   :  { %29194 = vmatpush3.msra.mxu0 %v33673_v2  ;;  %29202 = vmatprep.subr.mxu1 %v23761_v28 }
0x2d9e   :  { %29209 = vmatprep.subr.mxu0 %v33654_v61  ;;  %v23768_v60 = vand.u32 4294901760, %v23767_v53  ;;  %29203 = vmatpush3.msra.mxu1 %v23761_v28 }
0x2da0   :  { %29204 = vmatprep.subr.mxu1 %v23768_v60 }
0x2da1   :  { %29205 = vmatpush3.msra.mxu1 %v23768_v60 }
0x2da2   :  { %29220 = vmatprep.subr.mxu1 %v33649_v20 }
0x2e41   :  { %v29150_v57 = vpop.f32.mrf.mxu1 }
0x2e43   :  { %v23264_v36 = vpop.f32.mrf.mxu1 }
0x2e47   :  { %v29168_v49 = vpop.f32.mrf.mxu1 }
0x2e49   :  { %v23431_v29 = vpop.f32.mrf.mxu1 }
0x2e4a   :  { %v29141_v17 = vpop.f32.mrf.mxu0 }
0x2e4b   :  { %v23271_v6 = vadd.f32 %v29150_v57, %v29141_v17 }
0x2e4c   :  { %v23168_v41 = vpop.f32.mrf.mxu0 }
0x2e4d   :  { %v23265_v30 = vadd.f32 %v23264_v36, %v23168_v41 }
0x2e4e   :  { %v29186_v21 = vpop.f32.mrf.mxu1 }
0x2e50   :  { %v29159_v27 = vpop.f32.mrf.mxu0  ;;  %v23599_v10 = vpop.f32.mrf.mxu1 }
0x2e51   :  { %v23356_v8 = vadd.f32 %v29159_v27, %v23271_v6 }
0x2e52   :  { %v23348_v13 = vpop.f32.mrf.mxu0 }
0x2e53   :  { %v23349_v23 = vadd.f32 %v23348_v13, %v23265_v30  ;;  %v23440_v52 = vadd.f32 %v29168_v49, %v23356_v8 }
0x2e55   :  { %v23432_v58 = vadd.f32 %v23431_v29, %v23349_v23  ;;  %v145_v29 = vld [vmem:[%s34068_s8 + $0x38] sm:$0xff] }
0x2e56   :  { %v29177_v19 = vpop.f32.mrf.mxu0 }
0x2e57   :  { %v23526_v38 = vadd.f32 %v29177_v19, %v23440_v52  ;;  %v33754_v52 = vand.u32 4294901760, %v145_v29 }
0x2e58   :  { %v23519_v18 = vpop.f32.mrf.mxu0 }
0x2e59   :  { %v23606_v39 = vadd.f32 %v29186_v21, %v23526_v38  ;;  %v23520_v55 = vadd.f32 %v23519_v18, %v23432_v58  ;;  %v144_v21 = vld [vmem:[%s34068_s8 + $0x30] sm:$0xff]  ;;  %v33760_v19 = vsub.f32 %v145_v29, %v33754_v52  ;;  %v143_v58 = vld [vmem:[%s34068_s8 + $0x28] sm:$0xff]  ;;  %v158_v29 = vld [vmem:[%s34069_s9 + $0x60] sm:$0xff] }
0x2e5a   :  { %v33762_v38 = vand.u32 4294901760, %v144_v21 }
0x2e5b   :  { %v23610_v48 = vadd.f32 %v23606_v39, %v33592_v50  ;;  %v23600_v33 = vadd.f32 %v23599_v10, %v23520_v55  ;;  %v33770_v18 = vand.u32 4294901760, %v33760_v19  ;;  %v33775_v55 = vand.u32 4294901760, %v143_v58  ;;  %v142_v10 = vld [vmem:[%s34068_s8 + $0x20] sm:$0xff] }
0x2e5c   :  { %v33773_v39 = vsub.f32 %v144_v21, %v33762_v38 }
0x2e5d   :  { %v23627_v7 = vsel %vm164_vm0, %v23610_v48, 0  ;;  %v23609_v34 = vadd.f32 %v23600_v33, %v33595_v22  ;;  %v24335_v48 = vsub.f32 %v33760_v19, %v33770_v18 }
0x2e5e   :  { %v23708_v31 = vand.u32 4294901760, %v23627_v7  ;;  %v33785_v33 = vand.u32 4294901760, %v33773_v39 }
0x2e5f   :  { %v23624_v63 = vsel %vm164_vm0, %v23609_v34, 0  ;;  %v33790_v34 = vand.u32 4294901760, %v142_v10 }
0x2e60   :  { %v23709_v44 = vsub.f32 %v23627_v7, %v23708_v31  ;;  %v23698_v14 = vand.u32 4294901760, %v23624_v63  ;;  %v33788_v7 = vsub.f32 %v143_v58, %v33775_v55  ;;  %v157_v58 = vld [vmem:[%s34069_s9 + $0x58] sm:$0xff] }
0x2e62   :  { %v23710_v11 = vand.u32 4294901760, %v23709_v44  ;;  %v23699_v46 = vsub.f32 %v23624_v63, %v23698_v14  ;;  %29206 = vmatprep.mubr.f32.mxu1 %v23698_v14  ;;  %v24342_v63 = vsub.f32 %v33773_v39, %v33785_v33 }
0x2e63   :  { %29207 = vmatmul.mubr.f32.vlgmr.msra.gmra.mxu1 %v23708_v31 }
0x2e64   :  { %29221 = vmatpush3.msra.mxu1 %v33649_v20  ;;  %v23700_v54 = vand.u32 4294901760, %v23699_v46  ;;  %v23711_v50 = vsub.f32 %v23709_v44, %v23710_v11 }
0x2e65   :  { %29222 = vmatprep.subr.mxu1 %v33656_v37 }
0x2e66   :  { %29223 = vmatpush3.msra.mxu1 %v33656_v37  ;;  %29228 = vmatprep.mubr.f32.mxu1 %v23700_v54  ;;  %v23701_v51 = vsub.f32 %v23699_v46, %v23700_v54  ;;  %v23712_v12 = vand.u32 4294901760, %v23711_v50 }
0x2e67   :  { %29224 = vmatprep.subr.mxu1 %v33661_v15 }
0x2e68   :  { %29225 = vmatpush3.msra.mxu1 %v33661_v15  ;;  %v23702_v22 = vand.u32 4294901760, %v23701_v51 }
0x2e69   :  { %29226 = vmatprep.subr.mxu1 %v33673_v2 }
0x2e6a   :  { %29227 = vmatpush3.msra.mxu1 %v33673_v2  ;;  %29195 = vmatprep.mubr.f32.mxu0 %v23702_v22 }
0x2e6b   :  { %29229 = vmatmul.mubr.f32.vlgmr.msra.gmra.mxu1 %v23710_v11  ;;  %29242 = vmatprep.subr.mxu1 %v33649_v20  ;;  %v24343_v11 = vand.u32 4294901760, %v24342_v63 }
0x2e6c   :  { %29196 = vmatmul.mubr.f32.vlgmr.msra.gmra.mxu0 %v23712_v12  ;;  %29243 = vmatpush3.msra.mxu1 %v33649_v20 }
0x2e6d   :  { %29210 = vmatpush3.msra.mxu0 %v33654_v61  ;;  %29250 = vmatprep.mubr.f32.mxu1 %v23698_v14 }
0x2e6e   :  { %29211 = vmatprep.subr.mxu0 %v33659_v26  ;;  %29217 = vmatprep.mubr.f32.mxu0 %v23699_v46 }
0x2e6f   :  { %29244 = vmatprep.subr.mxu1 %v33656_v37  ;;  %29212 = vmatpush3.msra.mxu0 %v33659_v26 }
0x2e70   :  { %29245 = vmatpush3.msra.mxu1 %v33656_v37  ;;  %29213 = vmatprep.subr.mxu0 %v33666_v62 }
0x2e71   :  { %29246 = vmatprep.subr.mxu1 %v33661_v15  ;;  %29214 = vmatpush3.msra.mxu0 %v33666_v62 }
0x2e72   :  { %29247 = vmatpush3.msra.mxu1 %v33661_v15  ;;  %29215 = vmatprep.subr.mxu0 %v33681_v43 }
0x2e73   :  { %29248 = vmatprep.subr.mxu1 %v33673_v2  ;;  %29216 = vmatpush3.msra.mxu0 %v33681_v43 }
0x2e74   :  { %29249 = vmatpush3.msra.mxu1 %v33673_v2  ;;  %29218 = vmatmul.mubr.f32.vlgmr.msra.gmra.mxu0 %v23709_v44  ;;  %v33797_v44 = vand.u32 4294901760, %v33788_v7 }
0x2e75   :  { %29231 = vmatprep.subr.mxu0 %v33669_v16  ;;  %29251 = vmatmul.mubr.f32.vlgmr.msra.gmra.mxu1 %v23708_v31 }
0x2e76   :  { %29232 = vmatpush3.msra.mxu0 %v33669_v16  ;;  %29239 = vmatprep.mubr.f32.mxu0 %v23698_v14  ;;  %v33800_v14 = vsub.f32 %v142_v10, %v33790_v34  ;;  %v24349_v46 = vsub.f32 %v33788_v7, %v33797_v44 }
0x2e77   :  { %29233 = vmatprep.subr.mxu0 %v33678_v47 }
0x2e78   :  { %29234 = vmatpush3.msra.mxu0 %v33678_v47  ;;  %v33807_v54 = vand.u32 4294901760, %v33800_v14  ;;  %v24350_v50 = vand.u32 4294901760, %v24349_v46 }
0x2e79   :  { %29235 = vmatprep.subr.mxu0 %v33686_v32 }
0x2e7a   :  { %29236 = vmatpush3.msra.mxu0 %v33686_v32  ;;  %v24356_v51 = vsub.f32 %v33800_v14, %v33807_v54 }
0x2e7b   :  { %29237 = vmatprep.subr.mxu0 %v33693_v3 }
0x2e7c   :  { %29238 = vmatpush3.msra.mxu0 %v33693_v3  ;;  %v24357_v22 = vand.u32 4294901760, %v24356_v51 }
0x2e7d   :  { %29240 = vmatmul.mubr.f32.vlgmr.msra.gmra.mxu0 %v23708_v31  ;;  %29253 = vmatprep.subr.mxu0 %v33754_v52  ;;  %v24336_v31 = vand.u32 4294901760, %v24335_v48  ;;  %v33914_v48 = vand.u32 4294901760, %v157_v58 }
0x2e7e   :  { %29254 = vmatpush3.msra.mxu0 %v33754_v52 }
0x2e7f   :  { %29255 = vmatprep.subr.mxu0 %v33762_v38  ;;  %29264 = vmatprep.subr.mxu1 %v24336_v31 }
0x2e80   :  { %29256 = vmatpush3.msra.mxu0 %v33762_v38  ;;  %29265 = vmatpush3.msra.mxu1 %v24336_v31 }
0x2e81   :  { %29257 = vmatprep.subr.mxu0 %v33775_v55  ;;  %29266 = vmatprep.subr.mxu1 %v24343_v11 }
0x2e82   :  { %29258 = vmatpush3.msra.mxu0 %v33775_v55  ;;  %29267 = vmatpush3.msra.mxu1 %v24343_v11 }
0x2e83   :  { %29259 = vmatprep.subr.mxu0 %v33790_v34  ;;  %29268 = vmatprep.subr.mxu1 %v24350_v50 }
0x2e84   :  { %29260 = vmatpush3.msra.mxu0 %v33790_v34  ;;  %29269 = vmatpush3.msra.mxu1 %v24350_v50 }
0x2e85   :  { %29275 = vmatprep.subr.mxu0 %v33760_v19  ;;  %29270 = vmatprep.subr.mxu1 %v24357_v22 }
0x2e86   :  { %29271 = vmatpush3.msra.mxu1 %v24357_v22  ;;  %v154_v22 = vld [vmem:[%s34069_s9 + $0x40] sm:$0xff] }
0x2e87   :  { %29286 = vmatprep.subr.mxu1 %v33754_v52 }
0x2f23   :  { %v29208_v0 = vpop.f32.mrf.mxu1 }
0x2f25   :  { %v23805_v4 = vpop.f32.mrf.mxu1 }
0x2f2b   :  { %v29230_v37 = vpop.f32.mrf.mxu1 }
0x2f2c   :  { %v29197_v1 = vpop.f32.mrf.mxu0 }
0x2f2d   :  { %v23812_v61 = vadd.f32 %v29208_v0, %v29197_v1  ;;  %v23975_v16 = vpop.f32.mrf.mxu1 }
0x2f2e   :  { %v23704_v9 = vpop.f32.mrf.mxu0 }
0x2f2f   :  { %v23806_v26 = vadd.f32 %v23805_v4, %v23704_v9 }
0x2f34   :  { %v29219_v20 = vpop.f32.mrf.mxu0 }
0x2f35   :  { %v23899_v15 = vadd.f32 %v29219_v20, %v23812_v61  ;;  %v29252_v2 = vpop.f32.mrf.mxu1 }
0x2f36   :  { %v23891_v56 = vpop.f32.mrf.mxu0 }
0x2f37   :  { %v23892_v62 = vadd.f32 %v23891_v56, %v23806_v26  ;;  %v23984_v25 = vadd.f32 %v29230_v37, %v23899_v15  ;;  %v24147_v24 = vpop.f32.mrf.mxu1  ;;  %v25374_v37 = vld [vmem:[%s34067_s7 + $0xa] ss:$0 sm:$0xff]  ;;  %v25375_v26 = vld [vmem:[%s34067_s7 + $0xb] ss:$0 sm:$0xff] }
0x2f39   :  { %v23976_v43 = vadd.f32 %v23975_v16, %v23892_v62 }
0x2f3d   :  { %v29241_v5 = vpop.f32.mrf.mxu0 }
0x2f3e   :  { %v24073_v47 = vadd.f32 %v29241_v5, %v23984_v25 }
0x2f3f   :  { %v24066_v59 = vpop.f32.mrf.mxu0 }
0x2f40   :  { %v24154_v42 = vadd.f32 %v29252_v2, %v24073_v47  ;;  %v24067_v32 = vadd.f32 %v24066_v59, %v23976_v43 }
0x2f42   :  { %v24148_v3 = vadd.f32 %v24147_v24, %v24067_v32  ;;  %v24158_v28 = vadd.f32 %v24154_v42, %v32695_v40 }
0x2f44   :  { %v24157_v53 = vadd.f32 %v24148_v3, %v32697_v35  ;;  %v33735_v60 = vadd.f32 %v24160_v45, %v24158_v28 }
0x2f46   :  { %v33737_v57 = vadd.f32 %v24160_v45, %v24157_v53  ;;  %v24167_v17 = vsel %vm164_vm0, %v33735_v60, 0.0 }
0x2f47   :  { %24168 = vadd.xlane.f32.xlu1 %v24167_v17 }
0x2f48   :  { %v24164_v36 = vsel %vm164_vm0, %v33737_v57, 0.0 }
0x2f49   :  { %24165 = vadd.xlane.f32.xlu0 %v24164_v36 }
0x2fd0   :  { %v24169_v41 = vpop.xlane.xlu1 %24168 }
0x2fd1   :  { %v24171_v6 = vmul.f32 0.03125, %v24169_v41  ;;  %v33855_v41 = vld [vmem:[%s34070_s10 + $0x1] ss:$0 sm:$0xff] }
0x2fd2   :  { %v24166_v49 = vpop.xlane.xlu0 %24165 }
0x2fd3   :  { %v24170_v27 = vmul.f32 0.03125, %v24166_v49  ;;  %v33744_v40 = vsub.f32 %v33735_v60, %v24171_v6  ;;  %v161_v6 = vld [vmem:[%s34069_s9 + $0x78] sm:$0xff] }
0x2fd4   :  { %v33862_v49 = vand.u32 4294901760, %v161_v6 }
0x2fd5   :  { %v24172_v35 = vsub.f32 %v33737_v57, %v24170_v27  ;;  %v24175_v13 = vmul.f32 %v33744_v40, %v33744_v40  ;;  %v160_v27 = vld [vmem:[%s34069_s9 + $0x70] sm:$0xff] }
0x2fd7   :  { %v24174_v30 = vmul.f32 %v24172_v35, %v24172_v35  ;;  %v24179_v23 = vsel %vm164_vm0, %v24175_v13, 0.0 }
0x2fd9   :  { %v24176_v8 = vsel %vm164_vm0, %v24174_v30, 0.0  ;;  %v159_v30 = vld [vmem:[%s34069_s9 + $0x68] sm:$0xff] }
0x2fda   :  { %24177 = vadd.xlane.f32.xlu0 %v24176_v8 }
0x2fde   :  { %24180 = vadd.xlane.f32.xlu0 %v24179_v23  ;;  %v33883_v23 = vand.u32 4294901760, %v159_v30 }
0x2ff4   :  { %25336 = vrot.lane.b32.xlu0 %v33855_v41, %s29646_s3 }
0x3063   :  { %v24178_v12 = vpop.xlane.xlu0 %24177 }
0x3064   :  { %v24182_v1 = vmul.f32 0.03125, %v24178_v12 }
0x3066   :  { %v24184_v0 = vadd.f32 1e-05, %v24182_v1 }
0x3067   :  { %v24181_v9 = vpop.xlane.xlu0 %24180 }
0x3068   :  { %29595 = vrsqrt.f32 %v24184_v0  ;;  %v24183_v20 = vmul.f32 0.03125, %v24181_v9  ;;  %v33955_v9 = vand.u32 4294901760, %v154_v22 }
0x306a   :  { %v24185_v4 = vadd.f32 1e-05, %v24183_v20 }
0x306c   :  { %29597 = vrsqrt.f32 %v24185_v4 }
0x3075   :  { %v29596_v61 = vpop.eup %29595 }
0x3076   :  { %v24188_v56 = vmul.f32 %v29596_v61, %v24172_v35  ;;  %v33870_v35 = vand.u32 4294901760, %v160_v27 }
0x3078   :  { %v24196_v15 = vmul.f32 %v25374_v37, %v24188_v56  ;;  %v33881_v13 = vsub.f32 %v160_v27, %v33870_v35 }
0x3079   :  { %v29598_v62 = vpop.eup %29597 }
0x307a   :  { %v24189_v16 = vmul.f32 %v29598_v62, %v33744_v40  ;;  %v24204_v25 = vadd.f32 %v25375_v26, %v24196_v15  ;;  %v33868_v40 = vsub.f32 %v161_v6, %v33862_v49  ;;  %v33893_v21 = vand.u32 4294901760, %v33881_v13 }
0x307c   :  { %v24197_v2 = vmul.f32 %v25374_v37, %v24189_v16  ;;  %v24213_v5 = vsel %vm164_vm0, %v24204_v25, 0  ;;  %v33878_v8 = vand.u32 4294901760, %v33868_v40  ;;  %v33967_v37 = vsub.f32 %v154_v22, %v33955_v9 }
0x307d   :  { %v24287_v47 = vand.u32 4294901760, %v24213_v5 }
0x307e   :  { %v24205_v43 = vadd.f32 %v25375_v26, %v24197_v2  ;;  %v33974_v62 = vand.u32 4294901760, %v33967_v37 }
0x307f   :  { %29272 = vmatprep.mubr.f32.mxu1 %v24287_v47  ;;  %v24288_v59 = vsub.f32 %v24213_v5, %v24287_v47 }
0x3080   :  { %v24216_v42 = vsel %vm164_vm0, %v24205_v43, 0  ;;  %v24916_v25 = vsub.f32 %v33967_v37, %v33974_v62 }
0x3081   :  { %v24297_v32 = vand.u32 4294901760, %v24216_v42  ;;  %v24289_v24 = vand.u32 4294901760, %v24288_v59 }
0x3082   :  { %v24917_v2 = vand.u32 4294901760, %v24916_v25 }
0x3083   :  { %v24298_v45 = vsub.f32 %v24216_v42, %v24297_v32  ;;  %29273 = vmatmul.mubr.f32.vlgmr.msra.gmra.mxu1 %v24297_v32  ;;  %v24290_v3 = vsub.f32 %v24288_v59, %v24289_v24 }
0x3084   :  { %29287 = vmatpush3.msra.mxu1 %v33754_v52  ;;  %29294 = vmatprep.mubr.f32.mxu1 %v24289_v24 }
0x3085   :  { %29288 = vmatprep.subr.mxu1 %v33762_v38  ;;  %v24291_v28 = vand.u32 4294901760, %v24290_v3  ;;  %v24299_v53 = vand.u32 4294901760, %v24298_v45 }
0x3086   :  { %29289 = vmatpush3.msra.mxu1 %v33762_v38 }
0x3087   :  { %29290 = vmatprep.subr.mxu1 %v33775_v55  ;;  %29261 = vmatprep.mubr.f32.mxu0 %v24291_v28  ;;  %v24300_v17 = vsub.f32 %v24298_v45, %v24299_v53 }
0x3088   :  { %29291 = vmatpush3.msra.mxu1 %v33775_v55 }
0x3089   :  { %29292 = vmatprep.subr.mxu1 %v33790_v34  ;;  %v24301_v36 = vand.u32 4294901760, %v24300_v17 }
0x308a   :  { %29293 = vmatpush3.msra.mxu1 %v33790_v34 }
0x308b   :  { %29295 = vmatmul.mubr.f32.vlgmr.msra.gmra.mxu1 %v24299_v53  ;;  %29308 = vmatprep.subr.mxu1 %v33754_v52 }
0x308c   :  { %29262 = vmatmul.mubr.f32.vlgmr.msra.gmra.mxu0 %v24301_v36  ;;  %29309 = vmatpush3.msra.mxu1 %v33754_v52  ;;  %v24867_v52 = vsub.f32 %v33868_v40, %v33878_v8 }
0x308d   :  { %29276 = vmatpush3.msra.mxu0 %v33760_v19  ;;  %29316 = vmatprep.mubr.f32.mxu1 %v24287_v47  ;;  %v33896_v19 = vsub.f32 %v159_v30, %v33883_v23 }
0x308e   :  { %29277 = vmatprep.subr.mxu0 %v33773_v39  ;;  %29283 = vmatprep.mubr.f32.mxu0 %v24288_v59 }
0x308f   :  { %29310 = vmatprep.subr.mxu1 %v33762_v38  ;;  %29278 = vmatpush3.msra.mxu0 %v33773_v39  ;;  %v24874_v39 = vsub.f32 %v33881_v13, %v33893_v21 }
0x3090   :  { %29311 = vmatpush3.msra.mxu1 %v33762_v38  ;;  %29279 = vmatprep.subr.mxu0 %v33788_v7  ;;  %v33898_v38 = vand.u32 4294901760, %v158_v29 }
0x3091   :  { %29312 = vmatprep.subr.mxu1 %v33775_v55  ;;  %29280 = vmatpush3.msra.mxu0 %v33788_v7  ;;  %v24875_v7 = vand.u32 4294901760, %v24874_v39 }
0x3092   :  { %29313 = vmatpush3.msra.mxu1 %v33775_v55  ;;  %29281 = vmatprep.subr.mxu0 %v33800_v14  ;;  %v33908_v55 = vand.u32 4294901760, %v33896_v19  ;;  %v33911_v10 = vsub.f32 %v158_v29, %v33898_v38 }
0x3093   :  { %29314 = vmatprep.subr.mxu1 %v33790_v34  ;;  %29282 = vmatpush3.msra.mxu0 %v33800_v14  ;;  %v155_v14 = vld [vmem:[%s34069_s9 + $0x48] sm:$0xff] }
0x3094   :  { %29315 = vmatpush3.msra.mxu1 %v33790_v34  ;;  %29284 = vmatmul.mubr.f32.vlgmr.msra.gmra.mxu0 %v24298_v45  ;;  %v24881_v34 = vsub.f32 %v33896_v19, %v33908_v55  ;;  %v33923_v31 = vand.u32 4294901760, %v33911_v10  ;;  %v33939_v50 = vand.u32 4294901760, %v155_v14 }
0x3095   :  { %29297 = vmatprep.subr.mxu0 %v33770_v18  ;;  %29317 = vmatmul.mubr.f32.vlgmr.msra.gmra.mxu1 %v24297_v32 }
0x3096   :  { %29298 = vmatpush3.msra.mxu0 %v33770_v18  ;;  %29305 = vmatprep.mubr.f32.mxu0 %v24287_v47  ;;  %v24868_v18 = vand.u32 4294901760, %v24867_v52  ;;  %v24882_v11 = vand.u32 4294901760, %v24881_v34  ;;  %v24888_v46 = vsub.f32 %v33911_v10, %v33923_v31  ;;  %v33953_v0 = vsub.f32 %v155_v14, %v33939_v50 }
0x3097   :  { %29299 = vmatprep.subr.mxu0 %v33785_v33 }
0x3098   :  { %29300 = vmatpush3.msra.mxu0 %v33785_v33  ;;  %v156_v33 = vld [vmem:[%s34069_s9 + $0x50] sm:$0xff]  ;;  %29338 = vmatprep.subr.mxu1 %v24868_v18  ;;  %v24889_v12 = vand.u32 4294901760, %v24888_v46  ;;  %v33964_v61 = vand.u32 4294901760, %v33953_v0  ;;  %s29650_s9 = smov [#allocation2]  }
0x3099   :  { %29301 = vmatprep.subr.mxu0 %v33797_v44  ;;  %v33925_v63 = vand.u32 4294901760, %v156_v33  ;;  %29339 = vmatpush3.msra.mxu1 %v24868_v18  ;;  %s25348_s6 = sshll.u32 %s29650_s9, 4  ;;  %s25349_s6 = int_to_ptr.vmem [resolvable:$true] %s25348_s6 }
0x309a   :  { %29302 = vmatpush3.msra.mxu0 %v33797_v44  ;;  %v33928_v44 = vsub.f32 %v157_v58, %v33914_v48  ;;  %29340 = vmatprep.subr.mxu1 %v24875_v7  ;;  %v24909_v15 = vsub.f32 %v33953_v0, %v33964_v61  ;;  %s29621_s25 = scalar_lea.vmem %s25349_s6, 256  ;;  %p29626_p1 = scmp.lt.s32.totalorder %s25349_s6, %s25349_s6 }
0x309b   :  { %29303 = vmatprep.subr.mxu0 %v33807_v54  ;;  %29341 = vmatpush3.msra.mxu1 %v24875_v7  ;;  %p29622_p0 = scmp.ne.s32.totalorder %s25349_s6, %s29621_s25  ;;  %p29627_p2 = scmp.lt.s32.totalorder %s29621_s25, %s29621_s25 }
0x309c   :  { %29304 = vmatpush3.msra.mxu0 %v33807_v54  ;;  %v33937_v54 = vsub.f32 %v156_v33, %v33925_v63  ;;  %v33943_v51 = vand.u32 4294901760, %v33928_v44  ;;  %29342 = vmatprep.subr.mxu1 %v24882_v11  ;;  %v24910_v16 = vand.u32 4294901760, %v24909_v15 }
0x309d   :  { %29306 = vmatmul.mubr.f32.vlgmr.msra.gmra.mxu0 %v24297_v32  ;;  %29319 = vmatprep.subr.mxu0 %v33862_v49  ;;  %p29628_p3 = por %p29627_p2, %p29626_p1 }
0x309e   :  { %29320 = vmatpush3.msra.mxu0 %v33862_v49  ;;  %v33950_v1 = vand.u32 4294901760, %v33937_v54  ;;  %29343 = vmatpush3.msra.mxu1 %v24882_v11  ;;  %v24895_v20 = vsub.f32 %v33928_v44, %v33943_v51 }
0x309f   :  { %29321 = vmatprep.subr.mxu0 %v33870_v35  ;;  %29344 = vmatprep.subr.mxu1 %v24889_v12  ;;  %p29629_p4 = pnand %p29628_p3, %p29622_p0 }
0x30a0   :  { %29322 = vmatpush3.msra.mxu0 %v33870_v35  ;;  %v24902_v4 = vsub.f32 %v33937_v54, %v33950_v1  ;;  %29345 = vmatpush3.msra.mxu1 %v24889_v12  ;;  %v24896_v56 = vand.u32 4294901760, %v24895_v20 }
0x30a1   :  { %29323 = vmatprep.subr.mxu0 %v33883_v23 }
0x30a2   :  { %29324 = vmatpush3.msra.mxu0 %v33883_v23  ;;  %v24903_v26 = vand.u32 4294901760, %v24902_v4  ;;  %29346 = vmatprep.subr.mxu1 %v24896_v56 }
0x30a3   :  { %29325 = vmatprep.subr.mxu0 %v33898_v38  ;;  %29347 = vmatpush3.msra.mxu1 %v24896_v56 }
0x30a4   :  { %29326 = vmatpush3.msra.mxu0 %v33898_v38  ;;  %29348 = vmatprep.subr.mxu1 %v24903_v26 }
0x30a5   :  { %29327 = vmatprep.subr.mxu0 %v33914_v48  ;;  %29349 = vmatpush3.msra.mxu1 %v24903_v26 }
0x30a6   :  { %29328 = vmatpush3.msra.mxu0 %v33914_v48  ;;  %29350 = vmatprep.subr.mxu1 %v24910_v16 }
0x30a7   :  { %29329 = vmatprep.subr.mxu0 %v33925_v63  ;;  %29351 = vmatpush3.msra.mxu1 %v24910_v16 }
0x30a8   :  { %29330 = vmatpush3.msra.mxu0 %v33925_v63  ;;  %29352 = vmatprep.subr.mxu1 %v24917_v2 }
0x30a9   :  { %29331 = vmatprep.subr.mxu0 %v33939_v50  ;;  %29353 = vmatpush3.msra.mxu1 %v24917_v2 }
0x30aa   :  { %29332 = vmatpush3.msra.mxu0 %v33939_v50  ;;  %29376 = vmatprep.subr.mxu1 %v33862_v49 }
0x30ab   :  { %29333 = vmatprep.subr.mxu0 %v33955_v9 }
0x30ac   :  { %29334 = vmatpush3.msra.mxu0 %v33955_v9 }
0x30ad   :  { %29357 = vmatprep.subr.mxu0 %v33868_v40 }
0x3143   :  { %v29274_v47 = vpop.f32.mrf.mxu1 }
0x3145   :  { %v24394_v24 = vpop.f32.mrf.mxu1 }
0x314b   :  { %v29296_v3 = vpop.f32.mrf.mxu1 }
0x314c   :  { %v29263_v5 = vpop.f32.mrf.mxu0 }
0x314d   :  { %v24304_v59 = vadd.f32 %v29263_v5, %v33855_v41  ;;  %v24564_v6 = vpop.f32.mrf.mxu1 }
0x314e   :  { %v24293_v43 = vpop.f32.mrf.mxu0 }
0x314f   :  { %v24294_v42 = vadd.f32 %v33855_v41, %v24293_v43  ;;  %v24401_v45 = vadd.f32 %v29274_v47, %v24304_v59 }
0x3151   :  { %v24395_v17 = vadd.f32 %v24394_v24, %v24294_v42 }
0x3154   :  { %v29285_v32 = vpop.f32.mrf.mxu0 }
0x3155   :  { %v24488_v53 = vadd.f32 %v29285_v32, %v24401_v45  ;;  %v29318_v30 = vpop.f32.mrf.mxu1 }
0x3156   :  { %v24480_v28 = vpop.f32.mrf.mxu0 }
0x3157   :  { %v24481_v36 = vadd.f32 %v24480_v28, %v24395_v17  ;;  %v24573_v27 = vadd.f32 %v29296_v3, %v24488_v53  ;;  %v24736_v7 = vpop.f32.mrf.mxu1 }
0x3159   :  { %v24565_v58 = vadd.f32 %v24564_v6, %v24481_v36 }
0x315d   :  { %v29307_v29 = vpop.f32.mrf.mxu0 }
0x315e   :  { %v24662_v52 = vadd.f32 %v29307_v29, %v24573_v27 }
0x315f   :  { %v24655_v18 = vpop.f32.mrf.mxu0 }
0x3160   :  { %v24743_v39 = vadd.f32 %v29318_v30, %v24662_v52  ;;  %v24656_v33 = vadd.f32 %v24655_v18, %v24565_v58 }
0x3162   :  { %v24747_v34 = vmax.f32 %v24743_v39, 0.0  ;;  %v24737_v41 = vadd.f32 %v24736_v7, %v24656_v33 }
0x3164   :  { %v24752_v14 = vsel %vm12176_vm12, %v24747_v34, 0  ;;  %v24746_v11 = vmax.f32 %v24737_v41, 0.0 }
0x3165   :  { %v33984_v46 = vand.u32 4294901760, %v24752_v14 }
0x3166   :  { %v24749_v22 = vsel %vm12176_vm12, %v24746_v11, 0 }
0x3167   :  { %v24838_v12 = vsub.f32 %v24752_v14, %v33984_v46  ;;  %v24827_v20 = vand.u32 4294901760, %v24749_v22 }
0x3169   :  { %v24839_v4 = vand.u32 4294901760, %v24838_v12  ;;  %v24828_v56 = vsub.f32 %v24749_v22, %v24827_v20  ;;  %29354 = vmatprep.mubr.f32.mxu1 %v24827_v20 }
0x316a   :  { %29355 = vmatmul.mubr.f32.vlgmr.msra.gmra.mxu1 %v33984_v46 }
0x316b   :  { %29377 = vmatpush3.msra.mxu1 %v33862_v49  ;;  %v24829_v26 = vand.u32 4294901760, %v24828_v56  ;;  %v24840_v15 = vsub.f32 %v24838_v12, %v24839_v4 }
0x316c   :  { %29378 = vmatprep.subr.mxu1 %v33870_v35 }
0x316d   :  { %29379 = vmatpush3.msra.mxu1 %v33870_v35  ;;  %29392 = vmatprep.mubr.f32.mxu1 %v24829_v26  ;;  %v24830_v16 = vsub.f32 %v24828_v56, %v24829_v26  ;;  %v24841_v2 = vand.u32 4294901760, %v24840_v15 }
0x316e   :  { %29380 = vmatprep.subr.mxu1 %v33883_v23 }
0x316f   :  { %29381 = vmatpush3.msra.mxu1 %v33883_v23  ;;  %v24831_v25 = vand.u32 4294901760, %v24830_v16 }
0x3170   :  { %29382 = vmatprep.subr.mxu1 %v33898_v38 }
0x3171   :  { %29383 = vmatpush3.msra.mxu1 %v33898_v38  ;;  %29335 = vmatprep.mubr.f32.mxu0 %v24831_v25 }
0x3172   :  { %29384 = vmatprep.subr.mxu1 %v33914_v48  ;;  %29336 = vmatmul.mubr.f32.vlgmr.msra.gmra.mxu0 %v24841_v2 }
0x3173   :  { %29358 = vmatpush3.msra.mxu0 %v33868_v40  ;;  %29385 = vmatpush3.msra.mxu1 %v33914_v48 }
0x3174   :  { %29359 = vmatprep.subr.mxu0 %v33881_v13  ;;  %29373 = vmatprep.mubr.f32.mxu0 %v24828_v56 }
0x3175   :  { %29386 = vmatprep.subr.mxu1 %v33925_v63  ;;  %29360 = vmatpush3.msra.mxu0 %v33881_v13 }
0x3176   :  { %29387 = vmatpush3.msra.mxu1 %v33925_v63  ;;  %29361 = vmatprep.subr.mxu0 %v33896_v19 }
0x3177   :  { %29388 = vmatprep.subr.mxu1 %v33939_v50  ;;  %29362 = vmatpush3.msra.mxu0 %v33896_v19 }
0x3178   :  { %29389 = vmatpush3.msra.mxu1 %v33939_v50  ;;  %29363 = vmatprep.subr.mxu0 %v33911_v10 }
0x3179   :  { %29390 = vmatprep.subr.mxu1 %v33955_v9  ;;  %29364 = vmatpush3.msra.mxu0 %v33911_v10 }
0x317a   :  { %29391 = vmatpush3.msra.mxu1 %v33955_v9  ;;  %29365 = vmatprep.subr.mxu0 %v33928_v44 }
0x317b   :  { %29393 = vmatmul.mubr.f32.vlgmr.msra.gmra.mxu1 %v24839_v4  ;;  %29414 = vmatprep.subr.mxu1 %v33862_v49 }
0x317c   :  { %29366 = vmatpush3.msra.mxu0 %v33928_v44  ;;  %29415 = vmatpush3.msra.mxu1 %v33862_v49 }
0x317d   :  { %29430 = vmatprep.mubr.f32.mxu1 %v24827_v20  ;;  %29367 = vmatprep.subr.mxu0 %v33937_v54 }
0x317e   :  { %29416 = vmatprep.subr.mxu1 %v33870_v35  ;;  %29368 = vmatpush3.msra.mxu0 %v33937_v54 }
0x317f   :  { %29417 = vmatpush3.msra.mxu1 %v33870_v35  ;;  %29369 = vmatprep.subr.mxu0 %v33953_v0 }
0x3180   :  { %29418 = vmatprep.subr.mxu1 %v33883_v23  ;;  %29370 = vmatpush3.msra.mxu0 %v33953_v0 }
0x3181   :  { %29419 = vmatpush3.msra.mxu1 %v33883_v23  ;;  %29371 = vmatprep.subr.mxu0 %v33967_v37 }
0x3182   :  { %29420 = vmatprep.subr.mxu1 %v33898_v38  ;;  %29372 = vmatpush3.msra.mxu0 %v33967_v37 }
0x3183   :  { %29421 = vmatpush3.msra.mxu1 %v33898_v38  ;;  %29374 = vmatmul.mubr.f32.vlgmr.msra.gmra.mxu0 %v24838_v12 }
0x3184   :  { %29395 = vmatprep.subr.mxu0 %v33878_v8  ;;  %29422 = vmatprep.subr.mxu1 %v33914_v48 }
0x3185   :  { %29396 = vmatpush3.msra.mxu0 %v33878_v8  ;;  %29411 = vmatprep.mubr.f32.mxu0 %v24827_v20 }
0x3186   :  { %29423 = vmatpush3.msra.mxu1 %v33914_v48  ;;  %29397 = vmatprep.subr.mxu0 %v33893_v21 }
0x3187   :  { %29424 = vmatprep.subr.mxu1 %v33925_v63  ;;  %29398 = vmatpush3.msra.mxu0 %v33893_v21 }
0x3188   :  { %29425 = vmatpush3.msra.mxu1 %v33925_v63  ;;  %29399 = vmatprep.subr.mxu0 %v33908_v55 }
0x3189   :  { %29426 = vmatprep.subr.mxu1 %v33939_v50  ;;  %29400 = vmatpush3.msra.mxu0 %v33908_v55 }
0x318a   :  { %29427 = vmatpush3.msra.mxu1 %v33939_v50  ;;  %29401 = vmatprep.subr.mxu0 %v33923_v31 }
0x318b   :  { %29428 = vmatprep.subr.mxu1 %v33955_v9  ;;  %29402 = vmatpush3.msra.mxu0 %v33923_v31 }
0x318c   :  { %29429 = vmatpush3.msra.mxu1 %v33955_v9  ;;  %29403 = vmatprep.subr.mxu0 %v33943_v51 }
0x318d   :  { %29431 = vmatmul.mubr.f32.vlgmr.msra.gmra.mxu1 %v33984_v46  ;;  %29404 = vmatpush3.msra.mxu0 %v33943_v51 }
0x318e   :  { %29405 = vmatprep.subr.mxu0 %v33950_v1 }
0x318f   :  { %29406 = vmatpush3.msra.mxu0 %v33950_v1 }
0x3190   :  { %29407 = vmatprep.subr.mxu0 %v33964_v61 }
0x3191   :  { %29408 = vmatpush3.msra.mxu0 %v33964_v61  ;;  %v25337_v61 = vpop.permute.xlu0 %25336 }
0x3192   :  { %29409 = vmatprep.subr.mxu0 %v33974_v62 }
0x3193   :  { %29410 = vmatpush3.msra.mxu0 %v33974_v62 }
0x3194   :  { %29412 = vmatmul.mubr.f32.vlgmr.msra.gmra.mxu0 %v33984_v46 }
0x322a   :  { %v29356_v40 = vpop.f32.mrf.mxu1 }
0x322c   :  { %v24954_v13 = vpop.f32.mrf.mxu1 }
0x3232   :  { %v29337_v49 = vpop.f32.mrf.mxu0 }
0x3233   :  { %v24961_v23 = vadd.f32 %v29356_v40, %v29337_v49 }
0x3234   :  { %v24833_v35 = vpop.f32.mrf.mxu0 }
0x3235   :  { %v24955_v38 = vadd.f32 %v24954_v13, %v24833_v35 }
0x323b   :  { %v29394_v21 = vpop.f32.mrf.mxu1 }
0x323d   :  { %v25136_v48 = vpop.f32.mrf.mxu1 }
0x3243   :  { %v29375_v8 = vpop.f32.mrf.mxu0 }
0x3244   :  { %v25056_v55 = vadd.f32 %v29375_v8, %v24961_v23 }
0x3245   :  { %v25048_v19 = vpop.f32.mrf.mxu0 }
0x3246   :  { %v25049_v10 = vadd.f32 %v25048_v19, %v24955_v38  ;;  %v25145_v31 = vadd.f32 %v29394_v21, %v25056_v55 }
0x3248   :  { %v25137_v50 = vadd.f32 %v25136_v48, %v25049_v10 }
0x324d   :  { %v29432_v63 = vpop.f32.mrf.mxu1 }
0x324f   :  { %v25324_v9 = vpop.f32.mrf.mxu1 }
0x3254   :  { %v29413_v44 = vpop.f32.mrf.mxu0 }
0x3255   :  { %v25246_v54 = vadd.f32 %v29413_v44, %v25145_v31 }
0x3256   :  { %v25239_v51 = vpop.f32.mrf.mxu0 }
0x3257   :  { %v25331_v1 = vadd.f32 %v29432_v63, %v25246_v54  ;;  %v25240_v0 = vadd.f32 %v25239_v51, %v25137_v50 }
0x3259   :  { %v25325_v37 = vadd.f32 %v25324_v9, %v25240_v0  ;;  %v25335_v62 = vadd.f32 %v25331_v1, %v33735_v60 }
0x325b   :  { %v25334_v5 = vadd.f32 %v25325_v37, %v33737_v57  ;;  %v25340_v47 = vadd.f32 %v25337_v61, %v25335_v62 }
0x325d   :  { %v25339_v43 = vadd.f32 %v25337_v61, %v25334_v5  ;;  %25342 = vst.msk [vmem:[#allocation2 + $0x8] sm:$0xff] %vm164_vm0, %v25340_v47 }
0x325f   :  { %25341 = vst.msk [vmem:[#allocation2] sm:$0xff] %vm164_vm0, %v25339_v43 }
0x3260   :  { %29632 = shalt.err (!%p29629_p4)
}
0x3261   :  { %s29651_s21 = smov 128   ;;  %s29652_s4 = smov 8  }
0x3262   :  { %25354 = dma.vmem_to_hbm [thread:$0]  %s25349_s6, 256, %s34071_s11, [#allocation3], %s29651_s21, %s29651_s21, %s29652_s4  }
0x3263   :  { %29641 = dma.done.wait [#allocation3], 256  }
0x3264   :  { %29642 = vsyncadd [#allocation3], 4294967040 }
0x3265   :  { %25358 = vsyncpa [#allocation3], 1 }

</bundles_post_ra>
